<compile_context>
chip_gen: v7x
topology: tpu7x:2x2x1
jax: 0.10.0
libtpu: 0.0.40
codegen_flags: <defaults>
</compile_context>

<pallas_src>
import jax
import jax.numpy as jnp
import numpy as np
from jax import lax
from jax.experimental import pallas as pl
from jax.experimental.pallas import tpu as pltpu


# --------------------------------------------------------------------------------
# kernel A: conv1 -> ReLU -> pool -> conv2 -> ReLU -> pool   (one batch tile / step)
# --------------------------------------------------------------------------------

def _conv_stage_kernel(x_ref, a1_ref, b1_ref, w2_ref, b2_ref, o_ref, xcol_ref, p1_ref):
    # x_ref : (tb, 28, 28) f32            a1_ref: (140, 480) f32   b1_ref: (1, 480) f32
    # w2_ref: (5, 460, 400) bf16          b2_ref: (1, 400) f32
    # o_ref : (tb, 800) bf16              xcol_ref: (tb,24,140) f32   p1_ref: (tb,12,460) bf16
    tb = x_ref.shape[0]
    x = x_ref[...]                                            # (tb, 28, 28) f32

    # ---- conv1 (5x5, 1->20) as ONE banded MXU matmul -------------------------------
    # xcol[b, h, i*28 + win] = x[b, h+i, win]
    for i in range(5):
        xcol_ref[:, :, i * 28:(i + 1) * 28] = x[:, i:i + 24, :]
    xall = xcol_ref[...].reshape(tb * 24, 140)
    y = jnp.dot(xall, a1_ref[...], preferred_element_type=jnp.float32)   # (tb*24, 480)
    y = jnp.maximum(y + b1_ref[...], 0.0)                      # bias + ReLU (lane-dense)
    y = y.reshape(tb, 24, 480)                                 # rows = h, cols = w*20 + c

    # ---- 2x2 max-pool in the lane-dense layout -------------------------------------
    mw = jnp.maximum(y[:, :, 0:460], y[:, :, 20:480])          # W-pairs (valid at even w)
    mh = jnp.maximum(mw[:, 0:23, :], mw[:, 1:24, :])           # H-pairs (valid at even h)
    for hp in range(12):                                       # compact rows: keep even h
        p1_ref[:, hp, :] = mh[:, 2 * hp, :].astype(jnp.bfloat16)
    # p1_ref[b, hp, wp*40 + c] = pooled conv1 activation (odd-w lane groups are junk,
    # they get zero weight rows in w2_ref below).

    # ---- conv2 (5x5, 20->50) as a banded im2col matmul: 5 K-chunks of K=460, N=400 --
    acc2 = jnp.zeros((tb * 8, 400), jnp.float32)
    for i in range(5):
        pi = p1_ref[:, i:i + 8, :].reshape(tb * 8, 460)        # rows = (b, ho)
        acc2 = acc2 + jnp.dot(pi, w2_ref[i], preferred_element_type=jnp.float32)
    y2 = jnp.maximum(acc2 + b2_ref[...], 0.0)                  # cols = wo*50 + oc
    y2 = y2.reshape(tb, 8, 400)

    # ---- 2x2 max-pool + lane-dense (tb, 800) store in (h, w, c) order ----------------
    mw2 = jnp.maximum(y2[:, :, 0:350], y2[:, :, 50:400])       # W-pairs (valid at even wo)
    mh2 = jnp.maximum(mw2[:, 0:7, :], mw2[:, 1:8, :])          # H-pairs (valid at even ho)
    for hp in range(4):
        row = mh2[:, 2 * hp, :]                                # (tb, 350)
        for wp in range(4):
            o_ref[:, (hp * 4 + wp) * 50:(hp * 4 + wp) * 50 + 50] = (
                row[:, wp * 100:wp * 100 + 50].astype(o_ref.dtype))


def conv_stage(x, a1m, b1t, w2m, b2t, *, tb):
    B = x.shape[0]
    flops = 2 * B * (24 * 140 * 480 + 5 * 8 * 460 * 400)
    bytes_accessed = (4 * (x.size + a1m.size + b1t.size + b2t.size)
                      + 2 * (w2m.size + B * 800))
    return pl.pallas_call(
        _conv_stage_kernel,
        out_shape=jax.ShapeDtypeStruct((B, 800), jnp.bfloat16),
        grid=(B // tb,),
        in_specs=[
            pl.BlockSpec((tb, 28, 28), lambda b: (b, 0, 0)),
            pl.BlockSpec((140, 480), lambda b: (0, 0)),        # weights: VMEM-resident
            pl.BlockSpec((1, 480), lambda b: (0, 0)),
            pl.BlockSpec((5, 460, 400), lambda b: (0, 0, 0)),
            pl.BlockSpec((1, 400), lambda b: (0, 0)),
        ],
        out_specs=pl.BlockSpec((tb, 800), lambda b: (b, 0)),
        scratch_shapes=[
            pltpu.VMEM((tb, 24, 140), jnp.float32),
            pltpu.VMEM((tb, 12, 460), jnp.bfloat16),
        ],
        compiler_params=pltpu.CompilerParams(
            dimension_semantics=("parallel",),
            vmem_limit_bytes=32 * 1024 * 1024),
        cost_estimate=pl.CostEstimate(flops=flops, transcendentals=0,
                                      bytes_accessed=bytes_accessed),
    )(x, a1m, b1t, w2m, b2t)


# --------------------------------------------------------------------------------
# kernel B: fc1 -> ReLU -> fc2 (padded to 128) -> log_softmax (per row tile)
# --------------------------------------------------------------------------------

def _fc_head_kernel(a_ref, w1_ref, b1_ref, w2_ref, b2_ref, o_ref):
    h = jnp.dot(a_ref[...], w1_ref[...], preferred_element_type=jnp.float32)  # (tm,500)
    h = jnp.maximum(h + b1_ref[...], 0.0)
    z = jnp.dot(h.astype(jnp.bfloat16), w2_ref[...],
                preferred_element_type=jnp.float32) + b2_ref[...]             # (tm,128)
    m = jnp.max(z, axis=-1, keepdims=True)
    e = jnp.exp(z - m)
    lse = jnp.log(jnp.sum(e, axis=-1, keepdims=True)) + m
    o_ref[...] = z - lse


def fc_stage(a, w1, b1, w2, b2, *, tm):
    B = a.shape[0]
    flops = 2 * B * (800 * 500 + 500 * 128)
    bytes_accessed = 2 * (a.size + w1.size + w2.size) + 4 * (B * 128 + b1.size + b2.size)
    return pl.pallas_call(
        _fc_head_kernel,
        out_shape=jax.ShapeDtypeStruct((B, 128), jnp.float32),
        grid=(B // tm,),
        in_specs=[
            pl.BlockSpec((tm, 800), lambda i: (i, 0)),
            pl.BlockSpec((800, 500), lambda i: (0, 0)),        # weights: VMEM-resident
            pl.BlockSpec((1, 500), lambda i: (0, 0)),
            pl.BlockSpec((500, 128), lambda i: (0, 0)),
            pl.BlockSpec((1, 128), lambda i: (0, 0)),
        ],
        out_specs=pl.BlockSpec((tm, 128), lambda i: (i, 0)),
        compiler_params=pltpu.CompilerParams(
            dimension_semantics=("parallel",),
            vmem_limit_bytes=32 * 1024 * 1024),
        cost_estimate=pl.CostEstimate(flops=flops, transcendentals=B * 129,
                                      bytes_accessed=bytes_accessed),
    )(a, w1, b1, w2, b2)


# --------------------------------------------------------------------------------
# parameters (PyTorch-native layouts) + one-time layout preparation
# --------------------------------------------------------------------------------

def init_params(key):
    ks = jax.random.split(key, 8)

    def u(k, shape, fan_in):
        bound = 1.0 / jnp.sqrt(float(fan_in))
        return jax.random.uniform(k, shape, jnp.float32, -bound, bound)

    return {
        "conv1_w": u(ks[0], (20, 1, 5, 5), 25),
        "conv1_b": u(ks[1], (20,), 25),
        "conv2_w": u(ks[2], (50, 20, 5, 5), 500),
        "conv2_b": u(ks[3], (50,), 500),
        "fc1_w":   u(ks[4], (500, 800), 800),
        "fc1_b":   u(ks[5], (500,), 800),
        "fc2_w":   u(ks[6], (10, 500), 500),
        "fc2_b":   u(ks[7], (10,), 500),
    }


def prepare_params(p):
    """One-time weight-layout prep: all runtime permutations are folded in here."""
    # conv1 banded matrix: A1[i*28 + win, w*20 + oc] = conv1_w[oc, 0, i, win - w], 0<=win-w<5
    w1 = np.asarray(p["conv1_w"], np.float32)                  # (20,1,5,5)
    A1 = np.zeros((5, 28, 24, 20), np.float32)
    for i in range(5):
        for j in range(5):
            A1[i, np.arange(24) + j, np.arange(24), :] = w1[:, 0, i, j]
    a1m = jnp.asarray(A1.reshape(140, 480))
    b1t = jnp.asarray(np.tile(np.asarray(p["conv1_b"], np.float32), 24).reshape(1, 480))

    # conv2 banded matrix over 460-wide pooled rows (cols wp*40+c valid, rest zero rows):
    # B2[i, wp*40 + c, wo*50 + oc] = conv2_w[oc, c, i, wp - wo], 0 <= wp - wo < 5
    w2 = np.asarray(p["conv2_w"], np.float32)                  # (50,20,5,5)
    B2 = np.zeros((5, 460, 400), np.float32)
    for i in range(5):
        for j in range(5):
            for wo in range(8):
                wp = wo + j
                B2[i, wp * 40:wp * 40 + 20, wo * 50:wo * 50 + 50] = w2[:, :, i, j].T
    w2m = jnp.asarray(B2).astype(jnp.bfloat16)
    b2t = jnp.asarray(np.tile(np.asarray(p["conv2_b"], np.float32), 8).reshape(1, 400))

    # fc1: PyTorch flattens NCHW -> input row c*16 + h*4 + w; kernel A emits rows ordered
    # h*200 + w*50 + c.  Permute fc1's input rows once to match.
    fc1 = p["fc1_w"].T.reshape(50, 4, 4, 500).transpose(1, 2, 0, 3).reshape(800, 500)
    fc1_wm = fc1.astype(jnp.bfloat16)
    fc1_bm = p["fc1_b"].reshape(1, 500)
    # fc2 padded N=10 -> 128: zero weights + -1e30 bias so pad lanes vanish in softmax.
    fc2_wm = jnp.zeros((500, 128), jnp.float32).at[:, :10].set(p["fc2_w"].T).astype(jnp.bfloat16)
    fc2_bm = jnp.full((1, 128), -1e30, jnp.float32).at[0, :10].set(p["fc2_b"])
    return {"a1m": a1m, "b1t": b1t, "w2m": w2m, "b2t": b2t,
            "fc1_wm": fc1_wm, "fc1_bm": fc1_bm, "fc2_wm": fc2_wm, "fc2_bm": fc2_bm}


# --------------------------------------------------------------------------------
# forward pass
# --------------------------------------------------------------------------------

def _fc_tile(b_pad):
    for c in (512, 256, 128, 64, 32, 16, 8):
        if b_pad % c == 0:
            return c
    return b_pad


@jax.jit
def net_forward(x_nchw, kp):
    B = x_nchw.shape[0]
    x = x_nchw.reshape(B, 28, 28)                 # drop the singleton channel
    tb = 16 if B >= 128 else 8                    # conv batch tile
    b_pad = ((B + tb - 1) // tb) * tb             # pad batch to a tile multiple
    if b_pad != B:
        x = jnp.pad(x, ((0, b_pad - B), (0, 0), (0, 0)))
    feat = conv_stage(x, kp["a1m"], kp["b1t"], kp["w2m"], kp["b2t"], tb=tb)  # (b_pad,800) bf16
    logp = fc_stage(feat, kp["fc1_wm"], kp["fc1_bm"], kp["fc2_wm"], kp["fc2_bm"],
                    tm=_fc_tile(b_pad))                                       # (b_pad,128)
    return logp[:B, :10]


def reference_forward(x_nchw, p):
    """Pure-JAX f32 reference with the exact PyTorch semantics."""
    dn = ("NCHW", "OIHW", "NCHW")
    y = lax.conv_general_dilated(x_nchw, p["conv1_w"], (1, 1), "VALID", dimension_numbers=dn)
    y = jax.nn.relu(y + p["conv1_b"].reshape(1, -1, 1, 1))
    y = lax.reduce_window(y, -jnp.inf, lax.max, (1, 1, 2, 2), (1, 1, 2, 2), "VALID")
    y = lax.conv_general_dilated(y, p["conv2_w"], (1, 1), "VALID", dimension_numbers=dn)
    y = jax.nn.relu(y + p["conv2_b"].reshape(1, -1, 1, 1))
    y = lax.reduce_window(y, -jnp.inf, lax.max, (1, 1, 2, 2), (1, 1, 2, 2), "VALID")
    y = y.reshape(y.shape[0], 4 * 4 * 50)
    y = jax.nn.relu(y @ p["fc1_w"].T + p["fc1_b"])
    y = y @ p["fc2_w"].T + p["fc2_b"]
    return jax.nn.log_softmax(y, axis=-1)


if __name__ == "__main__":
    key = jax.random.PRNGKey(0)
    k_x, k_p = jax.random.split(key)
    # MNIST geometry is fixed by fc1 = Linear(4*4*50, 500): inputs are 1x28x28.
    x = jax.random.normal(k_x, (2, 1, 28, 28), dtype=jnp.float32)
    params = init_params(k_p)
    kparams = prepare_params(params)

    out = jax.block_until_ready(net_forward(x, kparams))

    assert out.shape == (2, 10)
    # log_softmax rows must normalize in probability space
    assert bool(jnp.all(jnp.abs(jnp.sum(jnp.exp(out), axis=1) - 1.0) < 1e-4))
    # match the pure-JAX f32 reference (bf16 MXU operands => loose tolerance)
    ref = reference_forward(x, params)
    assert bool(jnp.all(jnp.abs(out - ref) < 5e-2)), "mismatch vs f32 reference"
    print("KERNEL_OK")
</pallas_src>

<mosaic_0001>
module attributes {stable_mosaic.version = 11 : i64} {
  func.func @_fc_head_kernel(%arg0: i32, %arg1: memref<8x800xbf16, #tpu.memory_space<vmem>>, %arg2: memref<800x500xbf16, #tpu.memory_space<vmem>>, %arg3: memref<1x500xf32, #tpu.memory_space<vmem>>, %arg4: memref<500x128xbf16, #tpu.memory_space<vmem>>, %arg5: memref<1x128xf32, #tpu.memory_space<vmem>>, %arg6: memref<8x128xf32, #tpu.memory_space<vmem>>) attributes {dimension_semantics = [#tpu.dimension_semantics<parallel>], iteration_bounds = array<i64: 1>, scalar_prefetch = 0 : i64, scratch_operands = 0 : i64, tpu.core_type = #tpu.core_type<tc>, window_params = [{transform_indices = @transform_0, window_bounds = array<i64: 8, 800>}, {pipeline_mode = #tpu.pipeline_mode<synchronous>, transform_indices = @transform_1, window_bounds = array<i64: 800, 500>}, {pipeline_mode = #tpu.pipeline_mode<synchronous>, transform_indices = @transform_2, window_bounds = array<i64: 1, 500>}, {pipeline_mode = #tpu.pipeline_mode<synchronous>, transform_indices = @transform_3, window_bounds = array<i64: 500, 128>}, {pipeline_mode = #tpu.pipeline_mode<synchronous>, transform_indices = @transform_4, window_bounds = array<i64: 1, 128>}, {transform_indices = @transform_5, window_bounds = array<i64: 8, 128>}]} {
    %c0 = arith.constant 0 : index
    %c0_0 = arith.constant 0 : index
    %0 = vector.load %arg1[%c0, %c0_0] : memref<8x800xbf16, #tpu.memory_space<vmem>>, vector<8x800xbf16>
    %c0_1 = arith.constant 0 : index
    %c0_2 = arith.constant 0 : index
    %1 = vector.load %arg2[%c0_1, %c0_2] : memref<800x500xbf16, #tpu.memory_space<vmem>>, vector<800x500xbf16>
    %cst = arith.constant dense<0.000000e+00> : vector<8x500xf32>
    %2 = tpu.matmul %0, %1, %cst {dimension_numbers = #tpu.dot_dimension_numbers<[1], [0], [0], [1], [0, 0, 1, 1], [], []>} : vector<8x800xbf16>, vector<800x500xbf16>, vector<8x500xf32> -> vector<8x500xf32>
    %c0_3 = arith.constant 0 : index
    %c0_4 = arith.constant 0 : index
    %3 = vector.load %arg3[%c0_3, %c0_4] : memref<1x500xf32, #tpu.memory_space<vmem>>, vector<1x500xf32>
    %4 = vector.broadcast %3 : vector<1x500xf32> to vector<8x500xf32>
    %5 = arith.addf %2, %4 : vector<8x500xf32>
    %cst_5 = arith.constant 0.000000e+00 : f32
    %6 = vector.broadcast %cst_5 : f32 to vector<8x500xf32>
    %7 = arith.maximumf %5, %6 : vector<8x500xf32>
    %8 = arith.truncf %7 : vector<8x500xf32> to vector<8x500xbf16>
    %c0_6 = arith.constant 0 : index
    %c0_7 = arith.constant 0 : index
    %9 = vector.load %arg4[%c0_6, %c0_7] : memref<500x128xbf16, #tpu.memory_space<vmem>>, vector<500x128xbf16>
    %cst_8 = arith.constant dense<0.000000e+00> : vector<8x128xf32>
    %10 = tpu.matmul %8, %9, %cst_8 {dimension_numbers = #tpu.dot_dimension_numbers<[1], [0], [0], [1], [0, 0, 1, 1], [], []>} : vector<8x500xbf16>, vector<500x128xbf16>, vector<8x128xf32> -> vector<8x128xf32>
    %c0_9 = arith.constant 0 : index
    %c0_10 = arith.constant 0 : index
    %11 = vector.load %arg5[%c0_9, %c0_10] : memref<1x128xf32, #tpu.memory_space<vmem>>, vector<1x128xf32>
    %12 = vector.broadcast %11 : vector<1x128xf32> to vector<8x128xf32>
    %13 = arith.addf %10, %12 : vector<8x128xf32>
    %cst_11 = arith.constant dense<0xFF800000> : vector<8xf32>
    %14 = vector.multi_reduction <maximumf>, %13, %cst_11 [1] : vector<8x128xf32> to vector<8xf32>
    %15 = vector.shape_cast %14 : vector<8xf32> to vector<8x1xf32>
    %16 = vector.broadcast %15 : vector<8x1xf32> to vector<8x128xf32>
    %17 = arith.subf %13, %16 : vector<8x128xf32>
    %18 = math.exp %17 : vector<8x128xf32>
    %cst_12 = arith.constant dense<0.000000e+00> : vector<8xf32>
    %19 = vector.multi_reduction <add>, %18, %cst_12 [1] : vector<8x128xf32> to vector<8xf32>
    %20 = vector.shape_cast %19 : vector<8xf32> to vector<8x1xf32>
    %21 = math.log %20 : vector<8x1xf32>
    %22 = arith.addf %21, %15 : vector<8x1xf32>
    %23 = vector.broadcast %22 : vector<8x1xf32> to vector<8x128xf32>
    %24 = arith.subf %13, %23 : vector<8x128xf32>
    %c0_13 = arith.constant 0 : index
    %c0_14 = arith.constant 0 : index
    %25 = vector.load %arg6[%c0_13, %c0_14] : memref<8x128xf32, #tpu.memory_space<vmem>>, vector<8x128xf32>
    tpu.vector_store %arg6[%c0_13, %c0_14], %24 {strides = array<i32>} : memref<8x128xf32, #tpu.memory_space<vmem>>, vector<8x128xf32>,
    return
  }
  func.func @transform_0(%arg0: i32) -> (i32, i32) {
    %c0_i32 = arith.constant 0 : i32
    %c0_i32_0 = arith.constant 0 : i32
    return %arg0, %c0_i32 : i32, i32
  }
  func.func @transform_1(%arg0: i32) -> (i32, i32) {
    %c0_i32 = arith.constant 0 : i32
    %c0_i32_0 = arith.constant 0 : i32
    %c0_i32_1 = arith.constant 0 : i32
    return %c0_i32, %c0_i32_0 : i32, i32
  }
  func.func @transform_2(%arg0: i32) -> (i32, i32) {
    %c0_i32 = arith.constant 0 : i32
    %c0_i32_0 = arith.constant 0 : i32
    %c0_i32_1 = arith.constant 0 : i32
    return %c0_i32, %c0_i32_0 : i32, i32
  }
  func.func @transform_3(%arg0: i32) -> (i32, i32) {
    %c0_i32 = arith.constant 0 : i32
    %c0_i32_0 = arith.constant 0 : i32
    %c0_i32_1 = arith.constant 0 : i32
    return %c0_i32, %c0_i32_0 : i32, i32
  }
  func.func @transform_4(%arg0: i32) -> (i32, i32) {
    %c0_i32 = arith.constant 0 : i32
    %c0_i32_0 = arith.constant 0 : i32
    %c0_i32_1 = arith.constant 0 : i32
    return %c0_i32, %c0_i32_0 : i32, i32
  }
  func.func @transform_5(%arg0: i32) -> (i32, i32) {
    %c0_i32 = arith.constant 0 : i32
    %c0_i32_0 = arith.constant 0 : i32
    return %arg0, %c0_i32 : i32, i32
  }
}

module attributes {stable_mosaic.version = 11 : i64} {
  func.func @_conv_stage_kernel(%arg0: i32, %arg1: memref<8x28x28xf32, #tpu.memory_space<vmem>>, %arg2: memref<140x480xf32, #tpu.memory_space<vmem>>, %arg3: memref<1x480xf32, #tpu.memory_space<vmem>>, %arg4: memref<5x460x400xbf16, #tpu.memory_space<vmem>>, %arg5: memref<1x400xf32, #tpu.memory_space<vmem>>, %arg6: memref<8x800xbf16, #tpu.memory_space<vmem>>, %arg7: memref<8x24x140xf32, #tpu.memory_space<vmem>>, %arg8: memref<8x12x460xbf16, #tpu.memory_space<vmem>>) attributes {dimension_semantics = [#tpu.dimension_semantics<parallel>], iteration_bounds = array<i64: 1>, scalar_prefetch = 0 : i64, scratch_operands = 2 : i64, tpu.core_type = #tpu.core_type<tc>, window_params = [{transform_indices = @transform_0, window_bounds = array<i64: 8, 28, 28>}, {pipeline_mode = #tpu.pipeline_mode<synchronous>, transform_indices = @transform_1, window_bounds = array<i64: 140, 480>}, {pipeline_mode = #tpu.pipeline_mode<synchronous>, transform_indices = @transform_2, window_bounds = array<i64: 1, 480>}, {pipeline_mode = #tpu.pipeline_mode<synchronous>, transform_indices = @transform_3, window_bounds = array<i64: 5, 460, 400>}, {pipeline_mode = #tpu.pipeline_mode<synchronous>, transform_indices = @transform_4, window_bounds = array<i64: 1, 400>}, {transform_indices = @transform_5, window_bounds = array<i64: 8, 800>}]} {
    %c0 = arith.constant 0 : index
    %c0_0 = arith.constant 0 : index
    %c0_1 = arith.constant 0 : index
    %0 = vector.load %arg1[%c0, %c0_0, %c0_1] : memref<8x28x28xf32, #tpu.memory_space<vmem>>, vector<8x28x28xf32>
    %1 = vector.extract_strided_slice %0 {offsets = [0, 0, 0], sizes = [8, 24, 28], strides = [1, 1, 1]} : vector<8x28x28xf32> to vector<8x24x28xf32>
    %c0_2 = arith.constant 0 : index
    %c0_3 = arith.constant 0 : index
    %c0_4 = arith.constant 0 : index
    %2 = vector.load %arg7[%c0_2, %c0_3, %c0_4] : memref<8x24x140xf32, #tpu.memory_space<vmem>>, vector<8x24x28xf32>
    tpu.vector_store %arg7[%c0_2, %c0_3, %c0_4], %1 {strides = array<i32>} : memref<8x24x140xf32, #tpu.memory_space<vmem>>, vector<8x24x28xf32>,
    %3 = vector.extract_strided_slice %0 {offsets = [0, 1, 0], sizes = [8, 24, 28], strides = [1, 1, 1]} : vector<8x28x28xf32> to vector<8x24x28xf32>
    %c0_5 = arith.constant 0 : index
    %c0_6 = arith.constant 0 : index
    %c28 = arith.constant 28 : index
    %4 = vector.load %arg7[%c0_5, %c0_6, %c28] : memref<8x24x140xf32, #tpu.memory_space<vmem>>, vector<8x24x28xf32>
    tpu.vector_store %arg7[%c0_5, %c0_6, %c28], %3 {strides = array<i32>} : memref<8x24x140xf32, #tpu.memory_space<vmem>>, vector<8x24x28xf32>,
    %5 = vector.extract_strided_slice %0 {offsets = [0, 2, 0], sizes = [8, 24, 28], strides = [1, 1, 1]} : vector<8x28x28xf32> to vector<8x24x28xf32>
    %c0_7 = arith.constant 0 : index
    %c0_8 = arith.constant 0 : index
    %c56 = arith.constant 56 : index
    %6 = vector.load %arg7[%c0_7, %c0_8, %c56] : memref<8x24x140xf32, #tpu.memory_space<vmem>>, vector<8x24x28xf32>
    tpu.vector_store %arg7[%c0_7, %c0_8, %c56], %5 {strides = array<i32>} : memref<8x24x140xf32, #tpu.memory_space<vmem>>, vector<8x24x28xf32>,
    %7 = vector.extract_strided_slice %0 {offsets = [0, 3, 0], sizes = [8, 24, 28], strides = [1, 1, 1]} : vector<8x28x28xf32> to vector<8x24x28xf32>
    %c0_9 = arith.constant 0 : index
    %c0_10 = arith.constant 0 : index
    %c84 = arith.constant 84 : index
    %8 = vector.load %arg7[%c0_9, %c0_10, %c84] : memref<8x24x140xf32, #tpu.memory_space<vmem>>, vector<8x24x28xf32>
    tpu.vector_store %arg7[%c0_9, %c0_10, %c84], %7 {strides = array<i32>} : memref<8x24x140xf32, #tpu.memory_space<vmem>>, vector<8x24x28xf32>,
    %9 = vector.extract_strided_slice %0 {offsets = [0, 4, 0], sizes = [8, 24, 28], strides = [1, 1, 1]} : vector<8x28x28xf32> to vector<8x24x28xf32>
    %c0_11 = arith.constant 0 : index
    %c0_12 = arith.constant 0 : index
    %c112 = arith.constant 112 : index
    %10 = vector.load %arg7[%c0_11, %c0_12, %c112] : memref<8x24x140xf32, #tpu.memory_space<vmem>>, vector<8x24x28xf32>
    tpu.vector_store %arg7[%c0_11, %c0_12, %c112], %9 {strides = array<i32>} : memref<8x24x140xf32, #tpu.memory_space<vmem>>, vector<8x24x28xf32>,
    %c0_13 = arith.constant 0 : index
    %c0_14 = arith.constant 0 : index
    %c0_15 = arith.constant 0 : index
    %11 = vector.load %arg7[%c0_13, %c0_14, %c0_15] : memref<8x24x140xf32, #tpu.memory_space<vmem>>, vector<8x24x140xf32>
    %12 = vector.shape_cast %11 : vector<8x24x140xf32> to vector<192x140xf32>
    %c0_16 = arith.constant 0 : index
    %c0_17 = arith.constant 0 : index
    %13 = vector.load %arg2[%c0_16, %c0_17] : memref<140x480xf32, #tpu.memory_space<vmem>>, vector<140x480xf32>
    %cst = arith.constant dense<0.000000e+00> : vector<192x480xf32>
    %14 = tpu.matmul %12, %13, %cst {dimension_numbers = #tpu.dot_dimension_numbers<[1], [0], [0], [1], [0, 0, 1, 1], [], []>} : vector<192x140xf32>, vector<140x480xf32>, vector<192x480xf32> -> vector<192x480xf32>
    %c0_18 = arith.constant 0 : index
    %c0_19 = arith.constant 0 : index
    %15 = vector.load %arg3[%c0_18, %c0_19] : memref<1x480xf32, #tpu.memory_space<vmem>>, vector<1x480xf32>
    %16 = vector.broadcast %15 : vector<1x480xf32> to vector<192x480xf32>
    %17 = arith.addf %14, %16 : vector<192x480xf32>
    %cst_20 = arith.constant 0.000000e+00 : f32
    %18 = vector.broadcast %cst_20 : f32 to vector<192x480xf32>
    %19 = arith.maximumf %17, %18 : vector<192x480xf32>
    %20 = vector.shape_cast %19 : vector<192x480xf32> to vector<8x24x480xf32>
    %21 = vector.extract_strided_slice %20 {offsets = [0, 0, 0], sizes = [8, 24, 460], strides = [1, 1, 1]} : vector<8x24x480xf32> to vector<8x24x460xf32>
    %22 = vector.extract_strided_slice %20 {offsets = [0, 0, 20], sizes = [8, 24, 460], strides = [1, 1, 1]} : vector<8x24x480xf32> to vector<8x24x460xf32>
    %23 = arith.maximumf %21, %22 : vector<8x24x460xf32>
    %24 = vector.extract_strided_slice %23 {offsets = [0, 0, 0], sizes = [8, 23, 460], strides = [1, 1, 1]} : vector<8x24x460xf32> to vector<8x23x460xf32>
    %25 = vector.extract_strided_slice %23 {offsets = [0, 1, 0], sizes = [8, 23, 460], strides = [1, 1, 1]} : vector<8x24x460xf32> to vector<8x23x460xf32>
    %26 = arith.maximumf %24, %25 : vector<8x23x460xf32>
    %27 = vector.extract_strided_slice %26 {offsets = [0, 0, 0], sizes = [8, 1, 460], strides = [1, 1, 1]} : vector<8x23x460xf32> to vector<8x1x460xf32>
    %28 = vector.shape_cast %27 : vector<8x1x460xf32> to vector<8x460xf32>
    %29 = arith.truncf %28 : vector<8x460xf32> to vector<8x460xbf16>
    %c0_21 = arith.constant 0 : index
    %c0_22 = arith.constant 0 : index
    %c0_23 = arith.constant 0 : index
    %30 = vector.load %arg8[%c0_21, %c0_22, %c0_23] : memref<8x12x460xbf16, #tpu.memory_space<vmem>>, vector<8x1x460xbf16>
    %31 = vector.shape_cast %30 : vector<8x1x460xbf16> to vector<8x460xbf16>
    %32 = vector.shape_cast %29 : vector<8x460xbf16> to vector<8x1x460xbf16>
    tpu.vector_store %arg8[%c0_21, %c0_22, %c0_23], %32 {strides = array<i32>} : memref<8x12x460xbf16, #tpu.memory_space<vmem>>, vector<8x1x460xbf16>,
    %33 = vector.extract_strided_slice %26 {offsets = [0, 2, 0], sizes = [8, 1, 460], strides = [1, 1, 1]} : vector<8x23x460xf32> to vector<8x1x460xf32>
    %34 = vector.shape_cast %33 : vector<8x1x460xf32> to vector<8x460xf32>
    %35 = arith.truncf %34 : vector<8x460xf32> to vector<8x460xbf16>
    %c0_24 = arith.constant 0 : index
    %c1 = arith.constant 1 : index
    %c0_25 = arith.constant 0 : index
    %36 = vector.load %arg8[%c0_24, %c1, %c0_25] : memref<8x12x460xbf16, #tpu.memory_space<vmem>>, vector<8x1x460xbf16>
    %37 = vector.shape_cast %36 : vector<8x1x460xbf16> to vector<8x460xbf16>
    %38 = vector.shape_cast %35 : vector<8x460xbf16> to vector<8x1x460xbf16>
    tpu.vector_store %arg8[%c0_24, %c1, %c0_25], %38 {strides = array<i32>} : memref<8x12x460xbf16, #tpu.memory_space<vmem>>, vector<8x1x460xbf16>,
    %39 = vector.extract_strided_slice %26 {offsets = [0, 4, 0], sizes = [8, 1, 460], strides = [1, 1, 1]} : vector<8x23x460xf32> to vector<8x1x460xf32>
    %40 = vector.shape_cast %39 : vector<8x1x460xf32> to vector<8x460xf32>
    %41 = arith.truncf %40 : vector<8x460xf32> to vector<8x460xbf16>
    %c0_26 = arith.constant 0 : index
    %c2 = arith.constant 2 : index
    %c0_27 = arith.constant 0 : index
    %42 = vector.load %arg8[%c0_26, %c2, %c0_27] : memref<8x12x460xbf16, #tpu.memory_space<vmem>>, vector<8x1x460xbf16>
    %43 = vector.shape_cast %42 : vector<8x1x460xbf16> to vector<8x460xbf16>
    %44 = vector.shape_cast %41 : vector<8x460xbf16> to vector<8x1x460xbf16>
    tpu.vector_store %arg8[%c0_26, %c2, %c0_27], %44 {strides = array<i32>} : memref<8x12x460xbf16, #tpu.memory_space<vmem>>, vector<8x1x460xbf16>,
    %45 = vector.extract_strided_slice %26 {offsets = [0, 6, 0], sizes = [8, 1, 460], strides = [1, 1, 1]} : vector<8x23x460xf32> to vector<8x1x460xf32>
    %46 = vector.shape_cast %45 : vector<8x1x460xf32> to vector<8x460xf32>
    %47 = arith.truncf %46 : vector<8x460xf32> to vector<8x460xbf16>
    %c0_28 = arith.constant 0 : index
    %c3 = arith.constant 3 : index
    %c0_29 = arith.constant 0 : index
    %48 = vector.load %arg8[%c0_28, %c3, %c0_29] : memref<8x12x460xbf16, #tpu.memory_space<vmem>>, vector<8x1x460xbf16>
    %49 = vector.shape_cast %48 : vector<8x1x460xbf16> to vector<8x460xbf16>
    %50 = vector.shape_cast %47 : vector<8x460xbf16> to vector<8x1x460xbf16>
    tpu.vector_store %arg8[%c0_28, %c3, %c0_29], %50 {strides = array<i32>} : memref<8x12x460xbf16, #tpu.memory_space<vmem>>, vector<8x1x460xbf16>,
    %51 = vector.extract_strided_slice %26 {offsets = [0, 8, 0], sizes = [8, 1, 460], strides = [1, 1, 1]} : vector<8x23x460xf32> to vector<8x1x460xf32>
    %52 = vector.shape_cast %51 : vector<8x1x460xf32> to vector<8x460xf32>
    %53 = arith.truncf %52 : vector<8x460xf32> to vector<8x460xbf16>
    %c0_30 = arith.constant 0 : index
    %c4 = arith.constant 4 : index
    %c0_31 = arith.constant 0 : index
    %54 = vector.load %arg8[%c0_30, %c4, %c0_31] : memref<8x12x460xbf16, #tpu.memory_space<vmem>>, vector<8x1x460xbf16>
    %55 = vector.shape_cast %54 : vector<8x1x460xbf16> to vector<8x460xbf16>
    %56 = vector.shape_cast %53 : vector<8x460xbf16> to vector<8x1x460xbf16>
    tpu.vector_store %arg8[%c0_30, %c4, %c0_31], %56 {strides = array<i32>} : memref<8x12x460xbf16, #tpu.memory_space<vmem>>, vector<8x1x460xbf16>,
    %57 = vector.extract_strided_slice %26 {offsets = [0, 10, 0], sizes = [8, 1, 460], strides = [1, 1, 1]} : vector<8x23x460xf32> to vector<8x1x460xf32>
    %58 = vector.shape_cast %57 : vector<8x1x460xf32> to vector<8x460xf32>
    %59 = arith.truncf %58 : vector<8x460xf32> to vector<8x460xbf16>
    %c0_32 = arith.constant 0 : index
    %c5 = arith.constant 5 : index
    %c0_33 = arith.constant 0 : index
    %60 = vector.load %arg8[%c0_32, %c5, %c0_33] : memref<8x12x460xbf16, #tpu.memory_space<vmem>>, vector<8x1x460xbf16>
    %61 = vector.shape_cast %60 : vector<8x1x460xbf16> to vector<8x460xbf16>
    %62 = vector.shape_cast %59 : vector<8x460xbf16> to vector<8x1x460xbf16>
    tpu.vector_store %arg8[%c0_32, %c5, %c0_33], %62 {strides = array<i32>} : memref<8x12x460xbf16, #tpu.memory_space<vmem>>, vector<8x1x460xbf16>,
    %63 = vector.extract_strided_slice %26 {offsets = [0, 12, 0], sizes = [8, 1, 460], strides = [1, 1, 1]} : vector<8x23x460xf32> to vector<8x1x460xf32>
    %64 = vector.shape_cast %63 : vector<8x1x460xf32> to vector<8x460xf32>
    %65 = arith.truncf %64 : vector<8x460xf32> to vector<8x460xbf16>
    %c0_34 = arith.constant 0 : index
    %c6 = arith.constant 6 : index
    %c0_35 = arith.constant 0 : index
    %66 = vector.load %arg8[%c0_34, %c6, %c0_35] : memref<8x12x460xbf16, #tpu.memory_space<vmem>>, vector<8x1x460xbf16>
    %67 = vector.shape_cast %66 : vector<8x1x460xbf16> to vector<8x460xbf16>
    %68 = vector.shape_cast %65 : vector<8x460xbf16> to vector<8x1x460xbf16>
    tpu.vector_store %arg8[%c0_34, %c6, %c0_35], %68 {strides = array<i32>} : memref<8x12x460xbf16, #tpu.memory_space<vmem>>, vector<8x1x460xbf16>,
    %69 = vector.extract_strided_slice %26 {offsets = [0, 14, 0], sizes = [8, 1, 460], strides = [1, 1, 1]} : vector<8x23x460xf32> to vector<8x1x460xf32>
    %70 = vector.shape_cast %69 : vector<8x1x460xf32> to vector<8x460xf32>
    %71 = arith.truncf %70 : vector<8x460xf32> to vector<8x460xbf16>
    %c0_36 = arith.constant 0 : index
    %c7 = arith.constant 7 : index
    %c0_37 = arith.constant 0 : index
    %72 = vector.load %arg8[%c0_36, %c7, %c0_37] : memref<8x12x460xbf16, #tpu.memory_space<vmem>>, vector<8x1x460xbf16>
    %73 = vector.shape_cast %72 : vector<8x1x460xbf16> to vector<8x460xbf16>
    %74 = vector.shape_cast %71 : vector<8x460xbf16> to vector<8x1x460xbf16>
    tpu.vector_store %arg8[%c0_36, %c7, %c0_37], %74 {strides = array<i32>} : memref<8x12x460xbf16, #tpu.memory_space<vmem>>, vector<8x1x460xbf16>,
    %75 = vector.extract_strided_slice %26 {offsets = [0, 16, 0], sizes = [8, 1, 460], strides = [1, 1, 1]} : vector<8x23x460xf32> to vector<8x1x460xf32>
    %76 = vector.shape_cast %75 : vector<8x1x460xf32> to vector<8x460xf32>
    %77 = arith.truncf %76 : vector<8x460xf32> to vector<8x460xbf16>
    %c0_38 = arith.constant 0 : index
    %c8 = arith.constant 8 : index
    %c0_39 = arith.constant 0 : index
    %78 = vector.load %arg8[%c0_38, %c8, %c0_39] : memref<8x12x460xbf16, #tpu.memory_space<vmem>>, vector<8x1x460xbf16>
    %79 = vector.shape_cast %78 : vector<8x1x460xbf16> to vector<8x460xbf16>
    %80 = vector.shape_cast %77 : vector<8x460xbf16> to vector<8x1x460xbf16>
    tpu.vector_store %arg8[%c0_38, %c8, %c0_39], %80 {strides = array<i32>} : memref<8x12x460xbf16, #tpu.memory_space<vmem>>, vector<8x1x460xbf16>,
    %81 = vector.extract_strided_slice %26 {offsets = [0, 18, 0], sizes = [8, 1, 460], strides = [1, 1, 1]} : vector<8x23x460xf32> to vector<8x1x460xf32>
    %82 = vector.shape_cast %81 : vector<8x1x460xf32> to vector<8x460xf32>
    %83 = arith.truncf %82 : vector<8x460xf32> to vector<8x460xbf16>
    %c0_40 = arith.constant 0 : index
    %c9 = arith.constant 9 : index
    %c0_41 = arith.constant 0 : index
    %84 = vector.load %arg8[%c0_40, %c9, %c0_41] : memref<8x12x460xbf16, #tpu.memory_space<vmem>>, vector<8x1x460xbf16>
    %85 = vector.shape_cast %84 : vector<8x1x460xbf16> to vector<8x460xbf16>
    %86 = vector.shape_cast %83 : vector<8x460xbf16> to vector<8x1x460xbf16>
    tpu.vector_store %arg8[%c0_40, %c9, %c0_41], %86 {strides = array<i32>} : memref<8x12x460xbf16, #tpu.memory_space<vmem>>, vector<8x1x460xbf16>,
    %87 = vector.extract_strided_slice %26 {offsets = [0, 20, 0], sizes = [8, 1, 460], strides = [1, 1, 1]} : vector<8x23x460xf32> to vector<8x1x460xf32>
    %88 = vector.shape_cast %87 : vector<8x1x460xf32> to vector<8x460xf32>
    %89 = arith.truncf %88 : vector<8x460xf32> to vector<8x460xbf16>
    %c0_42 = arith.constant 0 : index
    %c10 = arith.constant 10 : index
    %c0_43 = arith.constant 0 : index
    %90 = vector.load %arg8[%c0_42, %c10, %c0_43] : memref<8x12x460xbf16, #tpu.memory_space<vmem>>, vector<8x1x460xbf16>
    %91 = vector.shape_cast %90 : vector<8x1x460xbf16> to vector<8x460xbf16>
    %92 = vector.shape_cast %89 : vector<8x460xbf16> to vector<8x1x460xbf16>
    tpu.vector_store %arg8[%c0_42, %c10, %c0_43], %92 {strides = array<i32>} : memref<8x12x460xbf16, #tpu.memory_space<vmem>>, vector<8x1x460xbf16>,
    %93 = vector.extract_strided_slice %26 {offsets = [0, 22, 0], sizes = [8, 1, 460], strides = [1, 1, 1]} : vector<8x23x460xf32> to vector<8x1x460xf32>
    %94 = vector.shape_cast %93 : vector<8x1x460xf32> to vector<8x460xf32>
    %95 = arith.truncf %94 : vector<8x460xf32> to vector<8x460xbf16>
    %c0_44 = arith.constant 0 : index
    %c11 = arith.constant 11 : index
    %c0_45 = arith.constant 0 : index
    %96 = vector.load %arg8[%c0_44, %c11, %c0_45] : memref<8x12x460xbf16, #tpu.memory_space<vmem>>, vector<8x1x460xbf16>
    %97 = vector.shape_cast %96 : vector<8x1x460xbf16> to vector<8x460xbf16>
    %98 = vector.shape_cast %95 : vector<8x460xbf16> to vector<8x1x460xbf16>
    tpu.vector_store %arg8[%c0_44, %c11, %c0_45], %98 {strides = array<i32>} : memref<8x12x460xbf16, #tpu.memory_space<vmem>>, vector<8x1x460xbf16>,
    %cst_46 = arith.constant 0.000000e+00 : f32
    %99 = vector.broadcast %cst_46 : f32 to vector<64x400xf32>
    %c0_47 = arith.constant 0 : index
    %c0_48 = arith.constant 0 : index
    %c0_49 = arith.constant 0 : index
    %100 = vector.load %arg8[%c0_47, %c0_48, %c0_49] : memref<8x12x460xbf16, #tpu.memory_space<vmem>>, vector<8x8x460xbf16>
    %101 = vector.shape_cast %100 : vector<8x8x460xbf16> to vector<64x460xbf16>
    %c0_50 = arith.constant 0 : index
    %c0_51 = arith.constant 0 : index
    %c0_52 = arith.constant 0 : index
    %102 = vector.load %arg4[%c0_50, %c0_51, %c0_52] : memref<5x460x400xbf16, #tpu.memory_space<vmem>>, vector<1x460x400xbf16>
    %103 = vector.shape_cast %102 : vector<1x460x400xbf16> to vector<460x400xbf16>
    %cst_53 = arith.constant dense<0.000000e+00> : vector<64x400xf32>
    %104 = tpu.matmul %101, %103, %cst_53 {dimension_numbers = #tpu.dot_dimension_numbers<[1], [0], [0], [1], [0, 0, 1, 1], [], []>} : vector<64x460xbf16>, vector<460x400xbf16>, vector<64x400xf32> -> vector<64x400xf32>
    %105 = arith.addf %99, %104 : vector<64x400xf32>
    %c0_54 = arith.constant 0 : index
    %c1_55 = arith.constant 1 : index
    %c0_56 = arith.constant 0 : index
    %106 = vector.load %arg8[%c0_54, %c1_55, %c0_56] : memref<8x12x460xbf16, #tpu.memory_space<vmem>>, vector<8x8x460xbf16>
    %107 = vector.shape_cast %106 : vector<8x8x460xbf16> to vector<64x460xbf16>
    %c1_57 = arith.constant 1 : index
    %c0_58 = arith.constant 0 : index
    %c0_59 = arith.constant 0 : index
    %108 = vector.load %arg4[%c1_57, %c0_58, %c0_59] : memref<5x460x400xbf16, #tpu.memory_space<vmem>>, vector<1x460x400xbf16>
    %109 = vector.shape_cast %108 : vector<1x460x400xbf16> to vector<460x400xbf16>
    %cst_60 = arith.constant dense<0.000000e+00> : vector<64x400xf32>
    %110 = tpu.matmul %107, %109, %cst_60 {dimension_numbers = #tpu.dot_dimension_numbers<[1], [0], [0], [1], [0, 0, 1, 1], [], []>} : vector<64x460xbf16>, vector<460x400xbf16>, vector<64x400xf32> -> vector<64x400xf32>
    %111 = arith.addf %105, %110 : vector<64x400xf32>
    %c0_61 = arith.constant 0 : index
    %c2_62 = arith.constant 2 : index
    %c0_63 = arith.constant 0 : index
    %112 = vector.load %arg8[%c0_61, %c2_62, %c0_63] : memref<8x12x460xbf16, #tpu.memory_space<vmem>>, vector<8x8x460xbf16>
    %113 = vector.shape_cast %112 : vector<8x8x460xbf16> to vector<64x460xbf16>
    %c2_64 = arith.constant 2 : index
    %c0_65 = arith.constant 0 : index
    %c0_66 = arith.constant 0 : index
    %114 = vector.load %arg4[%c2_64, %c0_65, %c0_66] : memref<5x460x400xbf16, #tpu.memory_space<vmem>>, vector<1x460x400xbf16>
    %115 = vector.shape_cast %114 : vector<1x460x400xbf16> to vector<460x400xbf16>
    %cst_67 = arith.constant dense<0.000000e+00> : vector<64x400xf32>
    %116 = tpu.matmul %113, %115, %cst_67 {dimension_numbers = #tpu.dot_dimension_numbers<[1], [0], [0], [1], [0, 0, 1, 1], [], []>} : vector<64x460xbf16>, vector<460x400xbf16>, vector<64x400xf32> -> vector<64x400xf32>
    %117 = arith.addf %111, %116 : vector<64x400xf32>
    %c0_68 = arith.constant 0 : index
    %c3_69 = arith.constant 3 : index
    %c0_70 = arith.constant 0 : index
    %118 = vector.load %arg8[%c0_68, %c3_69, %c0_70] : memref<8x12x460xbf16, #tpu.memory_space<vmem>>, vector<8x8x460xbf16>
    %119 = vector.shape_cast %118 : vector<8x8x460xbf16> to vector<64x460xbf16>
    %c3_71 = arith.constant 3 : index
    %c0_72 = arith.constant 0 : index
    %c0_73 = arith.constant 0 : index
    %120 = vector.load %arg4[%c3_71, %c0_72, %c0_73] : memref<5x460x400xbf16, #tpu.memory_space<vmem>>, vector<1x460x400xbf16>
    %121 = vector.shape_cast %120 : vector<1x460x400xbf16> to vector<460x400xbf16>
    %cst_74 = arith.constant dense<0.000000e+00> : vector<64x400xf32>
    %122 = tpu.matmul %119, %121, %cst_74 {dimension_numbers = #tpu.dot_dimension_numbers<[1], [0], [0], [1], [0, 0, 1, 1], [], []>} : vector<64x460xbf16>, vector<460x400xbf16>, vector<64x400xf32> -> vector<64x400xf32>
    %123 = arith.addf %117, %122 : vector<64x400xf32>
    %c0_75 = arith.constant 0 : index
    %c4_76 = arith.constant 4 : index
    %c0_77 = arith.constant 0 : index
    %124 = vector.load %arg8[%c0_75, %c4_76, %c0_77] : memref<8x12x460xbf16, #tpu.memory_space<vmem>>, vector<8x8x460xbf16>
    %125 = vector.shape_cast %124 : vector<8x8x460xbf16> to vector<64x460xbf16>
    %c4_78 = arith.constant 4 : index
    %c0_79 = arith.constant 0 : index
    %c0_80 = arith.constant 0 : index
    %126 = vector.load %arg4[%c4_78, %c0_79, %c0_80] : memref<5x460x400xbf16, #tpu.memory_space<vmem>>, vector<1x460x400xbf16>
    %127 = vector.shape_cast %126 : vector<1x460x400xbf16> to vector<460x400xbf16>
    %cst_81 = arith.constant dense<0.000000e+00> : vector<64x400xf32>
    %128 = tpu.matmul %125, %127, %cst_81 {dimension_numbers = #tpu.dot_dimension_numbers<[1], [0], [0], [1], [0, 0, 1, 1], [], []>} : vector<64x460xbf16>, vector<460x400xbf16>, vector<64x400xf32> -> vector<64x400xf32>
    %129 = arith.addf %123, %128 : vector<64x400xf32>
    %c0_82 = arith.constant 0 : index
    %c0_83 = arith.constant 0 : index
    %130 = vector.load %arg5[%c0_82, %c0_83] : memref<1x400xf32, #tpu.memory_space<vmem>>, vector<1x400xf32>
    %131 = vector.broadcast %130 : vector<1x400xf32> to vector<64x400xf32>
    %132 = arith.addf %129, %131 : vector<64x400xf32>
    %cst_84 = arith.constant 0.000000e+00 : f32
    %133 = vector.broadcast %cst_84 : f32 to vector<64x400xf32>
    %134 = arith.maximumf %132, %133 : vector<64x400xf32>
    %135 = vector.shape_cast %134 : vector<64x400xf32> to vector<8x8x400xf32>
    %136 = vector.extract_strided_slice %135 {offsets = [0, 0, 0], sizes = [8, 8, 350], strides = [1, 1, 1]} : vector<8x8x400xf32> to vector<8x8x350xf32>
    %137 = vector.extract_strided_slice %135 {offsets = [0, 0, 50], sizes = [8, 8, 350], strides = [1, 1, 1]} : vector<8x8x400xf32> to vector<8x8x350xf32>
    %138 = arith.maximumf %136, %137 : vector<8x8x350xf32>
    %139 = vector.extract_strided_slice %138 {offsets = [0, 0, 0], sizes = [8, 7, 350], strides = [1, 1, 1]} : vector<8x8x350xf32> to vector<8x7x350xf32>
    %140 = vector.extract_strided_slice %138 {offsets = [0, 1, 0], sizes = [8, 7, 350], strides = [1, 1, 1]} : vector<8x8x350xf32> to vector<8x7x350xf32>
    %141 = arith.maximumf %139, %140 : vector<8x7x350xf32>
    %142 = vector.extract_strided_slice %141 {offsets = [0, 0, 0], sizes = [8, 1, 350], strides = [1, 1, 1]} : vector<8x7x350xf32> to vector<8x1x350xf32>
    %143 = vector.shape_cast %142 : vector<8x1x350xf32> to vector<8x350xf32>
    %144 = vector.extract_strided_slice %143 {offsets = [0, 0], sizes = [8, 50], strides = [1, 1]} : vector<8x350xf32> to vector<8x50xf32>
    %145 = arith.truncf %144 : vector<8x50xf32> to vector<8x50xbf16>
    %c0_85 = arith.constant 0 : index
    %c0_86 = arith.constant 0 : index
    %146 = vector.load %arg6[%c0_85, %c0_86] : memref<8x800xbf16, #tpu.memory_space<vmem>>, vector<8x50xbf16>
    tpu.vector_store %arg6[%c0_85, %c0_86], %145 {strides = array<i32>} : memref<8x800xbf16, #tpu.memory_space<vmem>>, vector<8x50xbf16>,
    %147 = vector.extract_strided_slice %143 {offsets = [0, 100], sizes = [8, 50], strides = [1, 1]} : vector<8x350xf32> to vector<8x50xf32>
    %148 = arith.truncf %147 : vector<8x50xf32> to vector<8x50xbf16>
    %c0_87 = arith.constant 0 : index
    %c50 = arith.constant 50 : index
    %149 = vector.load %arg6[%c0_87, %c50] : memref<8x800xbf16, #tpu.memory_space<vmem>>, vector<8x50xbf16>
    tpu.vector_store %arg6[%c0_87, %c50], %148 {strides = array<i32>} : memref<8x800xbf16, #tpu.memory_space<vmem>>, vector<8x50xbf16>,
    %150 = vector.extract_strided_slice %143 {offsets = [0, 200], sizes = [8, 50], strides = [1, 1]} : vector<8x350xf32> to vector<8x50xf32>
    %151 = arith.truncf %150 : vector<8x50xf32> to vector<8x50xbf16>
    %c0_88 = arith.constant 0 : index
    %c100 = arith.constant 100 : index
    %152 = vector.load %arg6[%c0_88, %c100] : memref<8x800xbf16, #tpu.memory_space<vmem>>, vector<8x50xbf16>
    tpu.vector_store %arg6[%c0_88, %c100], %151 {strides = array<i32>} : memref<8x800xbf16, #tpu.memory_space<vmem>>, vector<8x50xbf16>,
    %153 = vector.extract_strided_slice %143 {offsets = [0, 300], sizes = [8, 50], strides = [1, 1]} : vector<8x350xf32> to vector<8x50xf32>
    %154 = arith.truncf %153 : vector<8x50xf32> to vector<8x50xbf16>
    %c0_89 = arith.constant 0 : index
    %c150 = arith.constant 150 : index
    %155 = vector.load %arg6[%c0_89, %c150] : memref<8x800xbf16, #tpu.memory_space<vmem>>, vector<8x50xbf16>
    tpu.vector_store %arg6[%c0_89, %c150], %154 {strides = array<i32>} : memref<8x800xbf16, #tpu.memory_space<vmem>>, vector<8x50xbf16>,
    %156 = vector.extract_strided_slice %141 {offsets = [0, 2, 0], sizes = [8, 1, 350], strides = [1, 1, 1]} : vector<8x7x350xf32> to vector<8x1x350xf32>
    %157 = vector.shape_cast %156 : vector<8x1x350xf32> to vector<8x350xf32>
    %158 = vector.extract_strided_slice %157 {offsets = [0, 0], sizes = [8, 50], strides = [1, 1]} : vector<8x350xf32> to vector<8x50xf32>
    %159 = arith.truncf %158 : vector<8x50xf32> to vector<8x50xbf16>
    %c0_90 = arith.constant 0 : index
    %c200 = arith.constant 200 : index
    %160 = vector.load %arg6[%c0_90, %c200] : memref<8x800xbf16, #tpu.memory_space<vmem>>, vector<8x50xbf16>
    tpu.vector_store %arg6[%c0_90, %c200], %159 {strides = array<i32>} : memref<8x800xbf16, #tpu.memory_space<vmem>>, vector<8x50xbf16>,
    %161 = vector.extract_strided_slice %157 {offsets = [0, 100], sizes = [8, 50], strides = [1, 1]} : vector<8x350xf32> to vector<8x50xf32>
    %162 = arith.truncf %161 : vector<8x50xf32> to vector<8x50xbf16>
    %c0_91 = arith.constant 0 : index
    %c250 = arith.constant 250 : index
    %163 = vector.load %arg6[%c0_91, %c250] : memref<8x800xbf16, #tpu.memory_space<vmem>>, vector<8x50xbf16>
    tpu.vector_store %arg6[%c0_91, %c250], %162 {strides = array<i32>} : memref<8x800xbf16, #tpu.memory_space<vmem>>, vector<8x50xbf16>,
    %164 = vector.extract_strided_slice %157 {offsets = [0, 200], sizes = [8, 50], strides = [1, 1]} : vector<8x350xf32> to vector<8x50xf32>
    %165 = arith.truncf %164 : vector<8x50xf32> to vector<8x50xbf16>
    %c0_92 = arith.constant 0 : index
    %c300 = arith.constant 300 : index
    %166 = vector.load %arg6[%c0_92, %c300] : memref<8x800xbf16, #tpu.memory_space<vmem>>, vector<8x50xbf16>
    tpu.vector_store %arg6[%c0_92, %c300], %165 {strides = array<i32>} : memref<8x800xbf16, #tpu.memory_space<vmem>>, vector<8x50xbf16>,
    %167 = vector.extract_strided_slice %157 {offsets = [0, 300], sizes = [8, 50], strides = [1, 1]} : vector<8x350xf32> to vector<8x50xf32>
    %168 = arith.truncf %167 : vector<8x50xf32> to vector<8x50xbf16>
    %c0_93 = arith.constant 0 : index
    %c350 = arith.constant 350 : index
    %169 = vector.load %arg6[%c0_93, %c350] : memref<8x800xbf16, #tpu.memory_space<vmem>>, vector<8x50xbf16>
    tpu.vector_store %arg6[%c0_93, %c350], %168 {strides = array<i32>} : memref<8x800xbf16, #tpu.memory_space<vmem>>, vector<8x50xbf16>,
    %170 = vector.extract_strided_slice %141 {offsets = [0, 4, 0], sizes = [8, 1, 350], strides = [1, 1, 1]} : vector<8x7x350xf32> to vector<8x1x350xf32>
    %171 = vector.shape_cast %170 : vector<8x1x350xf32> to vector<8x350xf32>
    %172 = vector.extract_strided_slice %171 {offsets = [0, 0], sizes = [8, 50], strides = [1, 1]} : vector<8x350xf32> to vector<8x50xf32>
    %173 = arith.truncf %172 : vector<8x50xf32> to vector<8x50xbf16>
    %c0_94 = arith.constant 0 : index
    %c400 = arith.constant 400 : index
    %174 = vector.load %arg6[%c0_94, %c400] : memref<8x800xbf16, #tpu.memory_space<vmem>>, vector<8x50xbf16>
    tpu.vector_store %arg6[%c0_94, %c400], %173 {strides = array<i32>} : memref<8x800xbf16, #tpu.memory_space<vmem>>, vector<8x50xbf16>,
    %175 = vector.extract_strided_slice %171 {offsets = [0, 100], sizes = [8, 50], strides = [1, 1]} : vector<8x350xf32> to vector<8x50xf32>
    %176 = arith.truncf %175 : vector<8x50xf32> to vector<8x50xbf16>
    %c0_95 = arith.constant 0 : index
    %c450 = arith.constant 450 : index
    %177 = vector.load %arg6[%c0_95, %c450] : memref<8x800xbf16, #tpu.memory_space<vmem>>, vector<8x50xbf16>
    tpu.vector_store %arg6[%c0_95, %c450], %176 {strides = array<i32>} : memref<8x800xbf16, #tpu.memory_space<vmem>>, vector<8x50xbf16>,
    %178 = vector.extract_strided_slice %171 {offsets = [0, 200], sizes = [8, 50], strides = [1, 1]} : vector<8x350xf32> to vector<8x50xf32>
    %179 = arith.truncf %178 : vector<8x50xf32> to vector<8x50xbf16>
    %c0_96 = arith.constant 0 : index
    %c500 = arith.constant 500 : index
    %180 = vector.load %arg6[%c0_96, %c500] : memref<8x800xbf16, #tpu.memory_space<vmem>>, vector<8x50xbf16>
    tpu.vector_store %arg6[%c0_96, %c500], %179 {strides = array<i32>} : memref<8x800xbf16, #tpu.memory_space<vmem>>, vector<8x50xbf16>,
    %181 = vector.extract_strided_slice %171 {offsets = [0, 300], sizes = [8, 50], strides = [1, 1]} : vector<8x350xf32> to vector<8x50xf32>
    %182 = arith.truncf %181 : vector<8x50xf32> to vector<8x50xbf16>
    %c0_97 = arith.constant 0 : index
    %c550 = arith.constant 550 : index
    %183 = vector.load %arg6[%c0_97, %c550] : memref<8x800xbf16, #tpu.memory_space<vmem>>, vector<8x50xbf16>
    tpu.vector_store %arg6[%c0_97, %c550], %182 {strides = array<i32>} : memref<8x800xbf16, #tpu.memory_space<vmem>>, vector<8x50xbf16>,
    %184 = vector.extract_strided_slice %141 {offsets = [0, 6, 0], sizes = [8, 1, 350], strides = [1, 1, 1]} : vector<8x7x350xf32> to vector<8x1x350xf32>
    %185 = vector.shape_cast %184 : vector<8x1x350xf32> to vector<8x350xf32>
    %186 = vector.extract_strided_slice %185 {offsets = [0, 0], sizes = [8, 50], strides = [1, 1]} : vector<8x350xf32> to vector<8x50xf32>
    %187 = arith.truncf %186 : vector<8x50xf32> to vector<8x50xbf16>
    %c0_98 = arith.constant 0 : index
    %c600 = arith.constant 600 : index
    %188 = vector.load %arg6[%c0_98, %c600] : memref<8x800xbf16, #tpu.memory_space<vmem>>, vector<8x50xbf16>
    tpu.vector_store %arg6[%c0_98, %c600], %187 {strides = array<i32>} : memref<8x800xbf16, #tpu.memory_space<vmem>>, vector<8x50xbf16>,
    %189 = vector.extract_strided_slice %185 {offsets = [0, 100], sizes = [8, 50], strides = [1, 1]} : vector<8x350xf32> to vector<8x50xf32>
    %190 = arith.truncf %189 : vector<8x50xf32> to vector<8x50xbf16>
    %c0_99 = arith.constant 0 : index
    %c650 = arith.constant 650 : index
    %191 = vector.load %arg6[%c0_99, %c650] : memref<8x800xbf16, #tpu.memory_space<vmem>>, vector<8x50xbf16>
    tpu.vector_store %arg6[%c0_99, %c650], %190 {strides = array<i32>} : memref<8x800xbf16, #tpu.memory_space<vmem>>, vector<8x50xbf16>,
    %192 = vector.extract_strided_slice %185 {offsets = [0, 200], sizes = [8, 50], strides = [1, 1]} : vector<8x350xf32> to vector<8x50xf32>
    %193 = arith.truncf %192 : vector<8x50xf32> to vector<8x50xbf16>
    %c0_100 = arith.constant 0 : index
    %c700 = arith.constant 700 : index
    %194 = vector.load %arg6[%c0_100, %c700] : memref<8x800xbf16, #tpu.memory_space<vmem>>, vector<8x50xbf16>
    tpu.vector_store %arg6[%c0_100, %c700], %193 {strides = array<i32>} : memref<8x800xbf16, #tpu.memory_space<vmem>>, vector<8x50xbf16>,
    %195 = vector.extract_strided_slice %185 {offsets = [0, 300], sizes = [8, 50], strides = [1, 1]} : vector<8x350xf32> to vector<8x50xf32>
    %196 = arith.truncf %195 : vector<8x50xf32> to vector<8x50xbf16>
    %c0_101 = arith.constant 0 : index
    %c750 = arith.constant 750 : index
    %197 = vector.load %arg6[%c0_101, %c750] : memref<8x800xbf16, #tpu.memory_space<vmem>>, vector<8x50xbf16>
    tpu.vector_store %arg6[%c0_101, %c750], %196 {strides = array<i32>} : memref<8x800xbf16, #tpu.memory_space<vmem>>, vector<8x50xbf16>,
    return
  }
  func.func @transform_0(%arg0: i32) -> (i32, i32, i32) {
    %c0_i32 = arith.constant 0 : i32
    %c0_i32_0 = arith.constant 0 : i32
    %c0_i32_1 = arith.constant 0 : i32
    return %arg0, %c0_i32, %c0_i32_0 : i32, i32, i32
  }
  func.func @transform_1(%arg0: i32) -> (i32, i32) {
    %c0_i32 = arith.constant 0 : i32
    %c0_i32_0 = arith.constant 0 : i32
    %c0_i32_1 = arith.constant 0 : i32
    return %c0_i32, %c0_i32_0 : i32, i32
  }
  func.func @transform_2(%arg0: i32) -> (i32, i32) {
    %c0_i32 = arith.constant 0 : i32
    %c0_i32_0 = arith.constant 0 : i32
    %c0_i32_1 = arith.constant 0 : i32
    return %c0_i32, %c0_i32_0 : i32, i32
  }
  func.func @transform_3(%arg0: i32) -> (i32, i32, i32) {
    %c0_i32 = arith.constant 0 : i32
    %c0_i32_0 = arith.constant 0 : i32
    %c0_i32_1 = arith.constant 0 : i32
    %c0_i32_2 = arith.constant 0 : i32
    return %c0_i32, %c0_i32_0, %c0_i32_1 : i32, i32, i32
  }
  func.func @transform_4(%arg0: i32) -> (i32, i32) {
    %c0_i32 = arith.constant 0 : i32
    %c0_i32_0 = arith.constant 0 : i32
    %c0_i32_1 = arith.constant 0 : i32
    return %c0_i32, %c0_i32_0 : i32, i32
  }
  func.func @transform_5(%arg0: i32) -> (i32, i32) {
    %c0_i32 = arith.constant 0 : i32
    %c0_i32_0 = arith.constant 0 : i32
    return %arg0, %c0_i32 : i32, i32
  }
}

</mosaic_0001>

<bundles_post_ra>
// kernel: net_forward.3
= control target key start
LH: loop header
LB: loop body
LE: loop exit
PB: predicated region body
PF: predicated region fallthrough
CT: control target
= control target key end

     0   :  { %vm1271_vm0 = vcmask 261120   ;;  %vm1874_vm1 = vcmask 1041408   ;;  %vm1870_vm2 = vcmask 949248   ;;  %s3394_s1 = inlined_call_operand.vmem [shape: bf16[800,500], index: 1, kind: input, shape index: {}]   ;;  %s3395_s0 = inlined_call_operand.vmem [shape: bf16[8,800], index: 0, kind: input, shape index: {}]   ;;  %s3396_s3 = inlined_call_operand.vmem [shape: bf16[500,128], index: 3, kind: input, shape index: {}]   ;;  %s3397_s2 = inlined_call_operand.vmem [shape: f32[1,500], index: 2, kind: input, shape index: {}]   ;;  %s3398_s4 = inlined_call_operand.vmem [shape: f32[1,128], index: 4, kind: input, shape index: {}]   ;;  %s3399_s5 = inlined_call_operand.vmem [shape: f32[8,128], index: 5, kind: output, shape index: {}]  }
   0x1   :  { %v2291_v0 = vld [vmem:[%s3394_s1 + $0x4] ss:$16 sps:$4 sm:$0xff]   ;;  %v2293_v1 = vld [vmem:[%s3394_s1 + $0xc] ss:$16 sps:$4 sm:$0xff]   ;;  %v2295_v2 = vld [vmem:[%s3394_s1] ss:$16 sps:$4 sm:$0xff]  }
   0x2   :  { %1275 = vmatprep.subr.bf16.mxu0 %v2291_v0  ;;  %v2296_v3 = vld [vmem:[%s3394_s1 + $0x8] ss:$16 sps:$4 sm:$0xff]   ;;  %1439 = vmatprep.subr.bf16.mxu1 %v2293_v1  ;;  %v2297_v4 = vld [vmem:[%s3394_s1 + $0x24] ss:$16 sps:$4 sm:$0xff]   ;;  %v2299_v5 = vld [vmem:[%s3394_s1 + $0x2c] ss:$16 sps:$4 sm:$0xff]  }
   0x3   :  { %1276 = vmatpush1.bf16.msra.mxu0 %v2295_v2  ;;  %1440 = vmatpush1.bf16.msra.mxu1 %v2296_v3  ;;  %v2301_v6 = vld [vmem:[%s3394_s1 + $0x20] ss:$16 sps:$4 sm:$0xff]   ;;  %v2302_v7 = vld [vmem:[%s3394_s1 + $0x28] ss:$16 sps:$4 sm:$0xff]   ;;  %v2303_v8 = vld [vmem:[%s3394_s1 + $0x44] ss:$16 sps:$4 sm:$0xff]  }
   0x4   :  { %1277 = vmatprep.subr.bf16.mxu0 %v2297_v4  ;;  %1441 = vmatprep.subr.bf16.mxu1 %v2299_v5  ;;  %v2305_v9 = vld [vmem:[%s3394_s1 + $0x4c] ss:$16 sps:$4 sm:$0xff]   ;;  %v2307_v10 = vld [vmem:[%s3394_s1 + $0x40] ss:$16 sps:$4 sm:$0xff]   ;;  %v2308_v11 = vld [vmem:[%s3394_s1 + $0x48] ss:$16 sps:$4 sm:$0xff]  }
   0x5   :  { %v2309_v12 = vld [vmem:[%s3394_s1 + $0x64] ss:$16 sps:$4 sm:$0xff]   ;;  %v2311_v13 = vld [vmem:[%s3394_s1 + $0x6c] ss:$16 sps:$4 sm:$0xff]   ;;  %v2313_v14 = vld [vmem:[%s3394_s1 + $0x60] ss:$16 sps:$4 sm:$0xff]  }
   0x6   :  { %v2314_v15 = vld [vmem:[%s3394_s1 + $0x68] ss:$16 sps:$4 sm:$0xff]   ;;  %v2315_v16 = vld [vmem:[%s3394_s1 + $0x84] ss:$16 sps:$4 sm:$0xff]   ;;  %v2317_v17 = vld [vmem:[%s3394_s1 + $0x8c] ss:$16 sps:$4 sm:$0xff]  }
   0x7   :  { %1278 = vmatpush1.bf16.msra.mxu0 %v2301_v6  ;;  %1442 = vmatpush1.bf16.msra.mxu1 %v2302_v7  ;;  %v2319_v18 = vld [vmem:[%s3394_s1 + $0x80] ss:$16 sps:$4 sm:$0xff]   ;;  %v2320_v19 = vld [vmem:[%s3394_s1 + $0x88] ss:$16 sps:$4 sm:$0xff]   ;;  %v2321_v20 = vld [vmem:[%s3394_s1 + $0xa4] ss:$16 sps:$4 sm:$0xff]  }
   0x8   :  { %1279 = vmatprep.subr.bf16.mxu0 %v2303_v8  ;;  %1443 = vmatprep.subr.bf16.mxu1 %v2305_v9  ;;  %v2323_v21 = vld [vmem:[%s3394_s1 + $0xac] ss:$16 sps:$4 sm:$0xff]   ;;  %v2325_v22 = vld [vmem:[%s3394_s1 + $0xa0] ss:$16 sps:$4 sm:$0xff]   ;;  %v2326_v23 = vld [vmem:[%s3394_s1 + $0xa8] ss:$16 sps:$4 sm:$0xff]  }
   0x9   :  { %v2327_v24 = vld [vmem:[%s3394_s1 + $0xc4] ss:$16 sps:$4 sm:$0xff]   ;;  %v2329_v25 = vld [vmem:[%s3394_s1 + $0xcc] ss:$16 sps:$4 sm:$0xff]   ;;  %v2331_v26 = vld [vmem:[%s3394_s1 + $0xc0] ss:$16 sps:$4 sm:$0xff]  }
   0xa   :  { %v2332_v27 = vld [vmem:[%s3394_s1 + $0xc8] ss:$16 sps:$4 sm:$0xff]   ;;  %v2333_v28 = vld [vmem:[%s3394_s1 + $0xe4] ss:$16 sps:$4 sm:$0xff]   ;;  %v2335_v29 = vld [vmem:[%s3394_s1 + $0xec] ss:$16 sps:$4 sm:$0xff]  }
   0xb   :  { %1280 = vmatpush1.bf16.msra.mxu0 %v2307_v10  ;;  %1444 = vmatpush1.bf16.msra.mxu1 %v2308_v11  ;;  %v2337_v30 = vld [vmem:[%s3394_s1 + $0xe0] ss:$16 sps:$4 sm:$0xff]   ;;  %v2338_v31 = vld [vmem:[%s3394_s1 + $0xe8] ss:$16 sps:$4 sm:$0xff]   ;;  %v2339_v32 = vld [vmem:[%s3394_s1 + $0x104] ss:$16 sps:$4 sm:$0xff]  }
   0xc   :  { %1281 = vmatprep.subr.bf16.mxu0 %v2309_v12  ;;  %1445 = vmatprep.subr.bf16.mxu1 %v2311_v13  ;;  %v2341_v33 = vld [vmem:[%s3394_s1 + $0x10c] ss:$16 sps:$4 sm:$0xff]   ;;  %v2343_v34 = vld [vmem:[%s3394_s1 + $0x100] ss:$16 sps:$4 sm:$0xff]   ;;  %v2344_v35 = vld [vmem:[%s3394_s1 + $0x108] ss:$16 sps:$4 sm:$0xff]  }
   0xd   :  { %v2345_v36 = vld [vmem:[%s3394_s1 + $0x124] ss:$16 sps:$4 sm:$0xff]   ;;  %v2347_v37 = vld [vmem:[%s3394_s1 + $0x12c] ss:$16 sps:$4 sm:$0xff]   ;;  %v2349_v38 = vld [vmem:[%s3394_s1 + $0x120] ss:$16 sps:$4 sm:$0xff]  }
   0xe   :  { %v2350_v39 = vld [vmem:[%s3394_s1 + $0x128] ss:$16 sps:$4 sm:$0xff]   ;;  %v2351_v40 = vld [vmem:[%s3394_s1 + $0x144] ss:$16 sps:$4 sm:$0xff]   ;;  %v2353_v41 = vld [vmem:[%s3394_s1 + $0x14c] ss:$16 sps:$4 sm:$0xff]  }
   0xf   :  { %1282 = vmatpush1.bf16.msra.mxu0 %v2313_v14  ;;  %1446 = vmatpush1.bf16.msra.mxu1 %v2314_v15  ;;  %v2355_v42 = vld [vmem:[%s3394_s1 + $0x140] ss:$16 sps:$4 sm:$0xff]   ;;  %v2356_v43 = vld [vmem:[%s3394_s1 + $0x148] ss:$16 sps:$4 sm:$0xff]   ;;  %v2357_v44 = vld [vmem:[%s3394_s1 + $0x164] ss:$16 sps:$4 sm:$0xff]  }
  0x10   :  { %1283 = vmatprep.subr.bf16.mxu0 %v2315_v16  ;;  %1447 = vmatprep.subr.bf16.mxu1 %v2317_v17  ;;  %v2359_v45 = vld [vmem:[%s3394_s1 + $0x16c] ss:$16 sps:$4 sm:$0xff]   ;;  %v21_v46 = vld [vmem:[%s3395_s0] sm:$0xff]  ;;  %v2362_v49 = vld [vmem:[%s3394_s1 + $0x168] ss:$16 sps:$4 sm:$0xff]  }
  0x11   :  { %v2361_v47 = vld [vmem:[%s3394_s1 + $0x160] ss:$16 sps:$4 sm:$0xff]   ;;  %v1975_v48 = vcombine.high %v21_v46, %v21_v46  ;;  %v2363_v50 = vld [vmem:[%s3394_s1 + $0x184] ss:$16 sps:$4 sm:$0xff]   ;;  %v2365_v51 = vld [vmem:[%s3394_s1 + $0x18c] ss:$16 sps:$4 sm:$0xff]   ;;  %v1974_v4 = vcombine.low %v21_v46, %v21_v46 }
  0x12   :  { %v2367_v52 = vld [vmem:[%s3394_s1 + $0x180] ss:$16 sps:$4 sm:$0xff]   ;;  %v2368_v53 = vld [vmem:[%s3394_s1 + $0x188] ss:$16 sps:$4 sm:$0xff]   ;;  %v2369_v54 = vld [vmem:[%s3394_s1 + $0x1a4] ss:$16 sps:$4 sm:$0xff]  }
  0x13   :  { %1284 = vmatpush1.bf16.msra.mxu0 %v2319_v18  ;;  %1448 = vmatpush1.bf16.msra.mxu1 %v2320_v19  ;;  %v2371_v55 = vld [vmem:[%s3394_s1 + $0x1ac] ss:$16 sps:$4 sm:$0xff]   ;;  %v2373_v56 = vld [vmem:[%s3394_s1 + $0x1a0] ss:$16 sps:$4 sm:$0xff]   ;;  %v2374_v57 = vld [vmem:[%s3394_s1 + $0x1a8] ss:$16 sps:$4 sm:$0xff]  }
  0x14   :  { %1285 = vmatprep.subr.bf16.mxu0 %v2321_v20  ;;  %1449 = vmatprep.subr.bf16.mxu1 %v2323_v21  ;;  %v2375_v58 = vld [vmem:[%s3394_s1 + $0x1c4] ss:$16 sps:$4 sm:$0xff]   ;;  %v2377_v59 = vld [vmem:[%s3394_s1 + $0x1cc] ss:$16 sps:$4 sm:$0xff]   ;;  %v2379_v60 = vld [vmem:[%s3394_s1 + $0x1c0] ss:$16 sps:$4 sm:$0xff]  }
  0x15   :  { %1307 = vmatprep.mubr.bf16.mxu0 %v1975_v48  ;;  %1471 = vmatprep.mubr.bf16.mxu1 %v1975_v48  ;;  %v2380_v61 = vld [vmem:[%s3394_s1 + $0x1c8] ss:$16 sps:$4 sm:$0xff]   ;;  %v2381_v62 = vld [vmem:[%s3394_s1 + $0x1e4] ss:$16 sps:$4 sm:$0xff]   ;;  %v2383_v63 = vld [vmem:[%s3394_s1 + $0x1ec] ss:$16 sps:$4 sm:$0xff]  }
  0x16   :  { %v2385_v0 = vld [vmem:[%s3394_s1 + $0x1e0] ss:$16 sps:$4 sm:$0xff]   ;;  %v2386_v1 = vld [vmem:[%s3394_s1 + $0x1e8] ss:$16 sps:$4 sm:$0xff]   ;;  %v2392_v2 = vld [vmem:[%s3394_s1 + $0x204] ss:$16 sps:$4 sm:$0xff]  }
  0x17   :  { %1286 = vmatpush1.bf16.msra.mxu0 %v2325_v22  ;;  %1450 = vmatpush1.bf16.msra.mxu1 %v2326_v23  ;;  %v2395_v3 = vld [vmem:[%s3394_s1 + $0x20c] ss:$16 sps:$4 sm:$0xff]   ;;  %v2390_v5 = vld [vmem:[%s3394_s1 + $0x200] ss:$16 sps:$4 sm:$0xff]   ;;  %v2393_v6 = vld [vmem:[%s3394_s1 + $0x208] ss:$16 sps:$4 sm:$0xff]  }
  0x18   :  { %1287 = vmatprep.subr.bf16.mxu0 %v2327_v24  ;;  %1451 = vmatprep.subr.bf16.mxu1 %v2329_v25  ;;  %v2398_v7 = vld [vmem:[%s3394_s1 + $0x224] ss:$16 sps:$4 sm:$0xff]   ;;  %v2401_v8 = vld [vmem:[%s3394_s1 + $0x22c] ss:$16 sps:$4 sm:$0xff]   ;;  %v2396_v9 = vld [vmem:[%s3394_s1 + $0x220] ss:$16 sps:$4 sm:$0xff]  }
  0x19   :  { %v2399_v10 = vld [vmem:[%s3394_s1 + $0x228] ss:$16 sps:$4 sm:$0xff]   ;;  %v2404_v11 = vld [vmem:[%s3394_s1 + $0x244] ss:$16 sps:$4 sm:$0xff]   ;;  %v2407_v12 = vld [vmem:[%s3394_s1 + $0x24c] ss:$16 sps:$4 sm:$0xff]  }
  0x1a   :  { %v2402_v13 = vld [vmem:[%s3394_s1 + $0x240] ss:$16 sps:$4 sm:$0xff]   ;;  %v2405_v14 = vld [vmem:[%s3394_s1 + $0x248] ss:$16 sps:$4 sm:$0xff]   ;;  %v2410_v15 = vld [vmem:[%s3394_s1 + $0x264] ss:$16 sps:$4 sm:$0xff]  }
  0x1b   :  { %1288 = vmatpush1.bf16.msra.mxu0 %v2331_v26  ;;  %1452 = vmatpush1.bf16.msra.mxu1 %v2332_v27  ;;  %v2413_v16 = vld [vmem:[%s3394_s1 + $0x26c] ss:$16 sps:$4 sm:$0xff]   ;;  %v2408_v17 = vld [vmem:[%s3394_s1 + $0x260] ss:$16 sps:$4 sm:$0xff]   ;;  %v2411_v18 = vld [vmem:[%s3394_s1 + $0x268] ss:$16 sps:$4 sm:$0xff]  }
  0x1c   :  { %1289 = vmatprep.subr.bf16.mxu0 %v2333_v28  ;;  %1453 = vmatprep.subr.bf16.mxu1 %v2335_v29  ;;  %v2416_v19 = vld [vmem:[%s3394_s1 + $0x284] ss:$16 sps:$4 sm:$0xff]   ;;  %v2419_v20 = vld [vmem:[%s3394_s1 + $0x28c] ss:$16 sps:$4 sm:$0xff]   ;;  %v2414_v21 = vld [vmem:[%s3394_s1 + $0x280] ss:$16 sps:$4 sm:$0xff]  }
  0x1d   :  { %v2417_v22 = vld [vmem:[%s3394_s1 + $0x288] ss:$16 sps:$4 sm:$0xff]   ;;  %v2422_v23 = vld [vmem:[%s3394_s1 + $0x2a4] ss:$16 sps:$4 sm:$0xff]   ;;  %v2425_v24 = vld [vmem:[%s3394_s1 + $0x2ac] ss:$16 sps:$4 sm:$0xff]  }
  0x1e   :  { %v2420_v25 = vld [vmem:[%s3394_s1 + $0x2a0] ss:$16 sps:$4 sm:$0xff]   ;;  %v2423_v26 = vld [vmem:[%s3394_s1 + $0x2a8] ss:$16 sps:$4 sm:$0xff]   ;;  %v2428_v27 = vld [vmem:[%s3394_s1 + $0x2c4] ss:$16 sps:$4 sm:$0xff]  }
  0x1f   :  { %1290 = vmatpush1.bf16.msra.mxu0 %v2337_v30  ;;  %1454 = vmatpush1.bf16.msra.mxu1 %v2338_v31  ;;  %v2431_v28 = vld [vmem:[%s3394_s1 + $0x2cc] ss:$16 sps:$4 sm:$0xff]   ;;  %v2426_v30 = vld [vmem:[%s3394_s1 + $0x2c0] ss:$16 sps:$4 sm:$0xff]   ;;  %v2429_v31 = vld [vmem:[%s3394_s1 + $0x2c8] ss:$16 sps:$4 sm:$0xff]  }
  0x20   :  { %1291 = vmatprep.subr.bf16.mxu0 %v2339_v32  ;;  %1455 = vmatprep.subr.bf16.mxu1 %v2341_v33  ;;  %v2941_v29 = vld [vmem:[%s3395_s0 + $0x8] sm:$0xff]  ;;  %v2434_v33 = vld [vmem:[%s3394_s1 + $0x2e4] ss:$16 sps:$4 sm:$0xff]  }
  0x21   :  { %v1977_v32 = vcombine.high %v2941_v29, %v2941_v29  ;;  %v2455_v46 = vld [vmem:[%s3394_s1 + $0x34c] ss:$16 sps:$4 sm:$0xff]   ;;  %v2453_v48 = vld [vmem:[%s3394_s1 + $0x348] ss:$16 sps:$4 sm:$0xff]  }
  0x23   :  { %1292 = vmatpush1.bf16.msra.mxu0 %v2343_v34  ;;  %1456 = vmatpush1.bf16.msra.mxu1 %v2344_v35  ;;  %v2437_v34 = vld [vmem:[%s3394_s1 + $0x2ec] ss:$16 sps:$4 sm:$0xff]   ;;  %v2432_v35 = vld [vmem:[%s3394_s1 + $0x2e0] ss:$16 sps:$4 sm:$0xff]  }
  0x24   :  { %1293 = vmatprep.subr.bf16.mxu0 %v2345_v36  ;;  %1457 = vmatprep.subr.bf16.mxu1 %v2347_v37  ;;  %v2435_v36 = vld [vmem:[%s3394_s1 + $0x2e8] ss:$16 sps:$4 sm:$0xff]   ;;  %v2440_v37 = vld [vmem:[%s3394_s1 + $0x304] ss:$16 sps:$4 sm:$0xff]  }
  0x27   :  { %1294 = vmatpush1.bf16.msra.mxu0 %v2349_v38  ;;  %1458 = vmatpush1.bf16.msra.mxu1 %v2350_v39  ;;  %v2443_v38 = vld [vmem:[%s3394_s1 + $0x30c] ss:$16 sps:$4 sm:$0xff]   ;;  %v2438_v39 = vld [vmem:[%s3394_s1 + $0x300] ss:$16 sps:$4 sm:$0xff]  }
  0x28   :  { %1295 = vmatprep.subr.bf16.mxu0 %v2351_v40  ;;  %1459 = vmatprep.subr.bf16.mxu1 %v2353_v41  ;;  %v2441_v40 = vld [vmem:[%s3394_s1 + $0x308] ss:$16 sps:$4 sm:$0xff]   ;;  %v2446_v41 = vld [vmem:[%s3394_s1 + $0x324] ss:$16 sps:$4 sm:$0xff]  }
  0x2b   :  { %1296 = vmatpush1.bf16.msra.mxu0 %v2355_v42  ;;  %1460 = vmatpush1.bf16.msra.mxu1 %v2356_v43  ;;  %v2449_v42 = vld [vmem:[%s3394_s1 + $0x32c] ss:$16 sps:$4 sm:$0xff]   ;;  %v2444_v43 = vld [vmem:[%s3394_s1 + $0x320] ss:$16 sps:$4 sm:$0xff]  }
  0x2c   :  { %1297 = vmatprep.subr.bf16.mxu0 %v2357_v44  ;;  %1461 = vmatprep.subr.bf16.mxu1 %v2359_v45  ;;  %v2447_v44 = vld [vmem:[%s3394_s1 + $0x328] ss:$16 sps:$4 sm:$0xff]   ;;  %v2452_v45 = vld [vmem:[%s3394_s1 + $0x344] ss:$16 sps:$4 sm:$0xff]  }
  0x2f   :  { %1298 = vmatpush1.bf16.msra.mxu0 %v2361_v47  ;;  %1462 = vmatpush1.bf16.msra.mxu1 %v2362_v49  ;;  %v2450_v47 = vld [vmem:[%s3394_s1 + $0x340] ss:$16 sps:$4 sm:$0xff]   ;;  %v2458_v49 = vld [vmem:[%s3394_s1 + $0x364] ss:$16 sps:$4 sm:$0xff]  }
  0x30   :  { %1299 = vmatprep.subr.bf16.mxu0 %v2363_v50  ;;  %1463 = vmatprep.subr.bf16.mxu1 %v2365_v51  ;;  %v2461_v50 = vld [vmem:[%s3394_s1 + $0x36c] ss:$16 sps:$4 sm:$0xff]   ;;  %v2456_v51 = vld [vmem:[%s3394_s1 + $0x360] ss:$16 sps:$4 sm:$0xff]  }
  0x33   :  { %1300 = vmatpush1.bf16.msra.mxu0 %v2367_v52  ;;  %1464 = vmatpush1.bf16.msra.mxu1 %v2368_v53  ;;  %v2459_v52 = vld [vmem:[%s3394_s1 + $0x368] ss:$16 sps:$4 sm:$0xff]   ;;  %v2464_v53 = vld [vmem:[%s3394_s1 + $0x384] ss:$16 sps:$4 sm:$0xff]  }
  0x34   :  { %1301 = vmatprep.subr.bf16.mxu0 %v2369_v54  ;;  %1465 = vmatprep.subr.bf16.mxu1 %v2371_v55  ;;  %v2467_v54 = vld [vmem:[%s3394_s1 + $0x38c] ss:$16 sps:$4 sm:$0xff]   ;;  %v2462_v55 = vld [vmem:[%s3394_s1 + $0x380] ss:$16 sps:$4 sm:$0xff]  }
  0x37   :  { %1302 = vmatpush1.bf16.msra.mxu0 %v2373_v56  ;;  %1466 = vmatpush1.bf16.msra.mxu1 %v2374_v57  ;;  %v2465_v56 = vld [vmem:[%s3394_s1 + $0x388] ss:$16 sps:$4 sm:$0xff]   ;;  %v2470_v57 = vld [vmem:[%s3394_s1 + $0x3a4] ss:$16 sps:$4 sm:$0xff]  }
  0x38   :  { %1303 = vmatprep.subr.bf16.mxu0 %v2375_v58  ;;  %1467 = vmatprep.subr.bf16.mxu1 %v2377_v59  ;;  %v2473_v58 = vld [vmem:[%s3394_s1 + $0x3ac] ss:$16 sps:$4 sm:$0xff]   ;;  %v2468_v59 = vld [vmem:[%s3394_s1 + $0x3a0] ss:$16 sps:$4 sm:$0xff]  }
  0x3b   :  { %1304 = vmatpush1.bf16.msra.mxu0 %v2379_v60  ;;  %1468 = vmatpush1.bf16.msra.mxu1 %v2380_v61  ;;  %v2471_v60 = vld [vmem:[%s3394_s1 + $0x3a8] ss:$16 sps:$4 sm:$0xff]   ;;  %v2476_v61 = vld [vmem:[%s3394_s1 + $0x3c4] ss:$16 sps:$4 sm:$0xff]  }
  0x3c   :  { %1305 = vmatprep.subr.bf16.mxu0 %v2381_v62  ;;  %1469 = vmatprep.subr.bf16.mxu1 %v2383_v63  ;;  %v2479_v62 = vld [vmem:[%s3394_s1 + $0x3cc] ss:$16 sps:$4 sm:$0xff]   ;;  %v2474_v63 = vld [vmem:[%s3394_s1 + $0x3c0] ss:$16 sps:$4 sm:$0xff]  }
  0x3f   :  { %1306 = vmatpush1.bf16.msra.mxu0 %v2385_v0  ;;  %1470 = vmatpush1.bf16.msra.mxu1 %v2386_v1  ;;  %v2477_v0 = vld [vmem:[%s3394_s1 + $0x3c8] ss:$16 sps:$4 sm:$0xff]   ;;  %v2482_v1 = vld [vmem:[%s3394_s1 + $0x3e4] ss:$16 sps:$4 sm:$0xff]  }
  0x40   :  { %1316 = vmatprep.subr.bf16.mxu0 %v2392_v2  ;;  %1480 = vmatprep.subr.bf16.mxu1 %v2395_v3  ;;  %v2485_v2 = vld [vmem:[%s3394_s1 + $0x3ec] ss:$16 sps:$4 sm:$0xff]   ;;  %v2480_v3 = vld [vmem:[%s3394_s1 + $0x3e0] ss:$16 sps:$4 sm:$0xff]  }
  0x42   :  { %1308 = vmatmul.mubr.bf16.vlgmr.msra.gmra.mrb[0].mxu0 %v1974_v4  ;;  %1472 = vmatmul.mubr.bf16.vlgmr.msra.gmra.mrb[0].mxu1 %v1974_v4  ;;  %v2483_v4 = vld [vmem:[%s3394_s1 + $0x3e8] ss:$16 sps:$4 sm:$0xff]  }
  0x43   :  { %1317 = vmatpush1.bf16.msra.mxu0 %v2390_v5  ;;  %1481 = vmatpush1.bf16.msra.mxu1 %v2393_v6  ;;  %v2490_v5 = vld [vmem:[%s3394_s1 + $0x404] ss:$16 sps:$4 sm:$0xff]   ;;  %v2493_v6 = vld [vmem:[%s3394_s1 + $0x40c] ss:$16 sps:$4 sm:$0xff]  }
  0x44   :  { %1318 = vmatprep.subr.bf16.mxu0 %v2398_v7  ;;  %1482 = vmatprep.subr.bf16.mxu1 %v2401_v8  ;;  %v1976_v7 = vcombine.low %v2941_v29, %v2941_v29  ;;  %v2488_v8 = vld [vmem:[%s3394_s1 + $0x400] ss:$16 sps:$4 sm:$0xff]   ;;  %v2523_v29 = vld [vmem:[%s3394_s1 + $0x4ac] ss:$16 sps:$4 sm:$0xff]  }
  0x45   :  { %1348 = vmatprep.mubr.bf16.mxu0 %v1977_v32  ;;  %1512 = vmatprep.mubr.bf16.mxu1 %v1977_v32  ;;  %v2526_v32 = vld [vmem:[%s3394_s1 + $0x4c4] ss:$16 sps:$4 sm:$0xff]  }
  0x47   :  { %1319 = vmatpush1.bf16.msra.mxu0 %v2396_v9  ;;  %1483 = vmatpush1.bf16.msra.mxu1 %v2399_v10  ;;  %v2491_v9 = vld [vmem:[%s3394_s1 + $0x408] ss:$16 sps:$4 sm:$0xff]   ;;  %v2496_v10 = vld [vmem:[%s3394_s1 + $0x424] ss:$16 sps:$4 sm:$0xff]  }
  0x48   :  { %1320 = vmatprep.subr.bf16.mxu0 %v2404_v11  ;;  %1484 = vmatprep.subr.bf16.mxu1 %v2407_v12  ;;  %v2499_v11 = vld [vmem:[%s3394_s1 + $0x42c] ss:$16 sps:$4 sm:$0xff]   ;;  %v3082_v12 = vld [vmem:[%s3395_s0 + $0x10] sm:$0xff] }
  0x4b   :  { %1321 = vmatpush1.bf16.msra.mxu0 %v2402_v13  ;;  %1485 = vmatpush1.bf16.msra.mxu1 %v2405_v14  ;;  %v1979_v13 = vcombine.high %v3082_v12, %v3082_v12  ;;  %v2494_v14 = vld [vmem:[%s3394_s1 + $0x420] ss:$16 sps:$4 sm:$0xff]  }
  0x4c   :  { %1322 = vmatprep.subr.bf16.mxu0 %v2410_v15  ;;  %1486 = vmatprep.subr.bf16.mxu1 %v2413_v16  ;;  %v2497_v15 = vld [vmem:[%s3394_s1 + $0x428] ss:$16 sps:$4 sm:$0xff]   ;;  %v2502_v16 = vld [vmem:[%s3394_s1 + $0x444] ss:$16 sps:$4 sm:$0xff]  }
  0x4f   :  { %1323 = vmatpush1.bf16.msra.mxu0 %v2408_v17  ;;  %1487 = vmatpush1.bf16.msra.mxu1 %v2411_v18  ;;  %v2505_v17 = vld [vmem:[%s3394_s1 + $0x44c] ss:$16 sps:$4 sm:$0xff]   ;;  %v2500_v18 = vld [vmem:[%s3394_s1 + $0x440] ss:$16 sps:$4 sm:$0xff]  }
  0x50   :  { %1324 = vmatprep.subr.bf16.mxu0 %v2416_v19  ;;  %1488 = vmatprep.subr.bf16.mxu1 %v2419_v20  ;;  %v2503_v19 = vld [vmem:[%s3394_s1 + $0x448] ss:$16 sps:$4 sm:$0xff]   ;;  %v2508_v20 = vld [vmem:[%s3394_s1 + $0x464] ss:$16 sps:$4 sm:$0xff]  }
  0x53   :  { %1325 = vmatpush1.bf16.msra.mxu0 %v2414_v21  ;;  %1489 = vmatpush1.bf16.msra.mxu1 %v2417_v22  ;;  %v2511_v21 = vld [vmem:[%s3394_s1 + $0x46c] ss:$16 sps:$4 sm:$0xff]   ;;  %v2506_v22 = vld [vmem:[%s3394_s1 + $0x460] ss:$16 sps:$4 sm:$0xff]  }
  0x54   :  { %1326 = vmatprep.subr.bf16.mxu0 %v2422_v23  ;;  %1490 = vmatprep.subr.bf16.mxu1 %v2425_v24  ;;  %v2509_v23 = vld [vmem:[%s3394_s1 + $0x468] ss:$16 sps:$4 sm:$0xff]   ;;  %v2514_v24 = vld [vmem:[%s3394_s1 + $0x484] ss:$16 sps:$4 sm:$0xff]  }
  0x57   :  { %1327 = vmatpush1.bf16.msra.mxu0 %v2420_v25  ;;  %1491 = vmatpush1.bf16.msra.mxu1 %v2423_v26  ;;  %v2517_v25 = vld [vmem:[%s3394_s1 + $0x48c] ss:$16 sps:$4 sm:$0xff]   ;;  %v2512_v26 = vld [vmem:[%s3394_s1 + $0x480] ss:$16 sps:$4 sm:$0xff]  }
  0x58   :  { %1328 = vmatprep.subr.bf16.mxu0 %v2428_v27  ;;  %1492 = vmatprep.subr.bf16.mxu1 %v2431_v28  ;;  %v2515_v27 = vld [vmem:[%s3394_s1 + $0x488] ss:$16 sps:$4 sm:$0xff]   ;;  %v2520_v28 = vld [vmem:[%s3394_s1 + $0x4a4] ss:$16 sps:$4 sm:$0xff]  }
  0x5b   :  { %1329 = vmatpush1.bf16.msra.mxu0 %v2426_v30  ;;  %1493 = vmatpush1.bf16.msra.mxu1 %v2429_v31  ;;  %v2518_v30 = vld [vmem:[%s3394_s1 + $0x4a0] ss:$16 sps:$4 sm:$0xff]   ;;  %v2521_v31 = vld [vmem:[%s3394_s1 + $0x4a8] ss:$16 sps:$4 sm:$0xff]  }
  0x5c   :  { %1330 = vmatprep.subr.bf16.mxu0 %v2434_v33  ;;  %1494 = vmatprep.subr.bf16.mxu1 %v2437_v34  ;;  %v2529_v33 = vld [vmem:[%s3394_s1 + $0x4cc] ss:$16 sps:$4 sm:$0xff]   ;;  %v2524_v34 = vld [vmem:[%s3394_s1 + $0x4c0] ss:$16 sps:$4 sm:$0xff]  }
  0x5f   :  { %1331 = vmatpush1.bf16.msra.mxu0 %v2432_v35  ;;  %1495 = vmatpush1.bf16.msra.mxu1 %v2435_v36  ;;  %v2527_v35 = vld [vmem:[%s3394_s1 + $0x4c8] ss:$16 sps:$4 sm:$0xff]   ;;  %v2532_v36 = vld [vmem:[%s3394_s1 + $0x4e4] ss:$16 sps:$4 sm:$0xff]  }
  0x60   :  { %1332 = vmatprep.subr.bf16.mxu0 %v2440_v37  ;;  %1496 = vmatprep.subr.bf16.mxu1 %v2443_v38  ;;  %v2535_v37 = vld [vmem:[%s3394_s1 + $0x4ec] ss:$16 sps:$4 sm:$0xff]   ;;  %v2530_v38 = vld [vmem:[%s3394_s1 + $0x4e0] ss:$16 sps:$4 sm:$0xff]  }
  0x63   :  { %1333 = vmatpush1.bf16.msra.mxu0 %v2438_v39  ;;  %1497 = vmatpush1.bf16.msra.mxu1 %v2441_v40  ;;  %v2533_v39 = vld [vmem:[%s3394_s1 + $0x4e8] ss:$16 sps:$4 sm:$0xff]   ;;  %v2538_v40 = vld [vmem:[%s3394_s1 + $0x504] ss:$16 sps:$4 sm:$0xff]  }
  0x64   :  { %1334 = vmatprep.subr.bf16.mxu0 %v2446_v41  ;;  %1498 = vmatprep.subr.bf16.mxu1 %v2449_v42  ;;  %v2541_v41 = vld [vmem:[%s3394_s1 + $0x50c] ss:$16 sps:$4 sm:$0xff]   ;;  %v2536_v42 = vld [vmem:[%s3394_s1 + $0x500] ss:$16 sps:$4 sm:$0xff]  }
  0x67   :  { %1335 = vmatpush1.bf16.msra.mxu0 %v2444_v43  ;;  %1499 = vmatpush1.bf16.msra.mxu1 %v2447_v44  ;;  %v2539_v43 = vld [vmem:[%s3394_s1 + $0x508] ss:$16 sps:$4 sm:$0xff]   ;;  %v2544_v44 = vld [vmem:[%s3394_s1 + $0x524] ss:$16 sps:$4 sm:$0xff]  }
  0x68   :  { %1336 = vmatprep.subr.bf16.mxu0 %v2452_v45  ;;  %1500 = vmatprep.subr.bf16.mxu1 %v2455_v46  ;;  %v2547_v45 = vld [vmem:[%s3394_s1 + $0x52c] ss:$16 sps:$4 sm:$0xff]   ;;  %v2542_v46 = vld [vmem:[%s3394_s1 + $0x520] ss:$16 sps:$4 sm:$0xff]  }
  0x6b   :  { %1337 = vmatpush1.bf16.msra.mxu0 %v2450_v47  ;;  %1501 = vmatpush1.bf16.msra.mxu1 %v2453_v48  ;;  %v2545_v47 = vld [vmem:[%s3394_s1 + $0x528] ss:$16 sps:$4 sm:$0xff]   ;;  %v2550_v48 = vld [vmem:[%s3394_s1 + $0x544] ss:$16 sps:$4 sm:$0xff]  }
  0x6c   :  { %1338 = vmatprep.subr.bf16.mxu0 %v2458_v49  ;;  %1502 = vmatprep.subr.bf16.mxu1 %v2461_v50  ;;  %v2553_v49 = vld [vmem:[%s3394_s1 + $0x54c] ss:$16 sps:$4 sm:$0xff]   ;;  %v2548_v50 = vld [vmem:[%s3394_s1 + $0x540] ss:$16 sps:$4 sm:$0xff]  }
  0x6f   :  { %1339 = vmatpush1.bf16.msra.mxu0 %v2456_v51  ;;  %1503 = vmatpush1.bf16.msra.mxu1 %v2459_v52  ;;  %v2551_v51 = vld [vmem:[%s3394_s1 + $0x548] ss:$16 sps:$4 sm:$0xff]   ;;  %v2556_v52 = vld [vmem:[%s3394_s1 + $0x564] ss:$16 sps:$4 sm:$0xff]  }
  0x70   :  { %1340 = vmatprep.subr.bf16.mxu0 %v2464_v53  ;;  %1504 = vmatprep.subr.bf16.mxu1 %v2467_v54  ;;  %v2559_v53 = vld [vmem:[%s3394_s1 + $0x56c] ss:$16 sps:$4 sm:$0xff]   ;;  %v2554_v54 = vld [vmem:[%s3394_s1 + $0x560] ss:$16 sps:$4 sm:$0xff]  }
  0x73   :  { %1341 = vmatpush1.bf16.msra.mxu0 %v2462_v55  ;;  %1505 = vmatpush1.bf16.msra.mxu1 %v2465_v56  ;;  %v2557_v55 = vld [vmem:[%s3394_s1 + $0x568] ss:$16 sps:$4 sm:$0xff]   ;;  %v2562_v56 = vld [vmem:[%s3394_s1 + $0x584] ss:$16 sps:$4 sm:$0xff]  }
  0x74   :  { %1342 = vmatprep.subr.bf16.mxu0 %v2470_v57  ;;  %1506 = vmatprep.subr.bf16.mxu1 %v2473_v58  ;;  %v2565_v57 = vld [vmem:[%s3394_s1 + $0x58c] ss:$16 sps:$4 sm:$0xff]   ;;  %v2560_v58 = vld [vmem:[%s3394_s1 + $0x580] ss:$16 sps:$4 sm:$0xff]  }
  0x77   :  { %1343 = vmatpush1.bf16.msra.mxu0 %v2468_v59  ;;  %1507 = vmatpush1.bf16.msra.mxu1 %v2471_v60  ;;  %v2563_v59 = vld [vmem:[%s3394_s1 + $0x588] ss:$16 sps:$4 sm:$0xff]   ;;  %v2568_v60 = vld [vmem:[%s3394_s1 + $0x5a4] ss:$16 sps:$4 sm:$0xff]  }
  0x78   :  { %1344 = vmatprep.subr.bf16.mxu0 %v2476_v61  ;;  %1508 = vmatprep.subr.bf16.mxu1 %v2479_v62  ;;  %v2571_v61 = vld [vmem:[%s3394_s1 + $0x5ac] ss:$16 sps:$4 sm:$0xff]   ;;  %v2566_v62 = vld [vmem:[%s3394_s1 + $0x5a0] ss:$16 sps:$4 sm:$0xff]  }
  0x7b   :  { %1345 = vmatpush1.bf16.msra.mxu0 %v2474_v63  ;;  %1509 = vmatpush1.bf16.msra.mxu1 %v2477_v0  ;;  %v2569_v63 = vld [vmem:[%s3394_s1 + $0x5a8] ss:$16 sps:$4 sm:$0xff]   ;;  %v2574_v0 = vld [vmem:[%s3394_s1 + $0x5c4] ss:$16 sps:$4 sm:$0xff]  }
  0x7c   :  { %1346 = vmatprep.subr.bf16.mxu0 %v2482_v1  ;;  %1510 = vmatprep.subr.bf16.mxu1 %v2485_v2  ;;  %v2577_v1 = vld [vmem:[%s3394_s1 + $0x5cc] ss:$16 sps:$4 sm:$0xff]   ;;  %v2572_v2 = vld [vmem:[%s3394_s1 + $0x5c0] ss:$16 sps:$4 sm:$0xff]  }
  0x7f   :  { %1347 = vmatpush1.bf16.msra.mxu0 %v2480_v3  ;;  %1511 = vmatpush1.bf16.msra.mxu1 %v2483_v4  ;;  %v2575_v3 = vld [vmem:[%s3394_s1 + $0x5c8] ss:$16 sps:$4 sm:$0xff]   ;;  %v2580_v4 = vld [vmem:[%s3394_s1 + $0x5e4] ss:$16 sps:$4 sm:$0xff]  }
  0x80   :  { %1357 = vmatprep.subr.bf16.mxu0 %v2490_v5  ;;  %1521 = vmatprep.subr.bf16.mxu1 %v2493_v6  ;;  %v2583_v5 = vld [vmem:[%s3394_s1 + $0x5ec] ss:$16 sps:$4 sm:$0xff]   ;;  %v2578_v6 = vld [vmem:[%s3394_s1 + $0x5e0] ss:$16 sps:$4 sm:$0xff]  }
  0x82   :  { %1349 = vmatmul.mubr.bf16.vlgmr.msra.gmra.mrb[0].mxu0 %v1976_v7  ;;  %1513 = vmatmul.mubr.bf16.vlgmr.msra.gmra.mrb[0].mxu1 %v1976_v7  ;;  %v2581_v7 = vld [vmem:[%s3394_s1 + $0x5e8] ss:$16 sps:$4 sm:$0xff]  }
  0x83   :  { %1358 = vmatpush1.bf16.msra.mxu0 %v2488_v8  ;;  %1522 = vmatpush1.bf16.msra.mxu1 %v2491_v9  ;;  %v2588_v8 = vld [vmem:[%s3394_s1 + $0x604] ss:$16 sps:$4 sm:$0xff]   ;;  %v2591_v9 = vld [vmem:[%s3394_s1 + $0x60c] ss:$16 sps:$4 sm:$0xff]  }
  0x84   :  { %1359 = vmatprep.subr.bf16.mxu0 %v2496_v10  ;;  %1523 = vmatprep.subr.bf16.mxu1 %v2499_v11  ;;  %v1978_v10 = vcombine.low %v3082_v12, %v3082_v12  ;;  %v2586_v11 = vld [vmem:[%s3394_s1 + $0x600] ss:$16 sps:$4 sm:$0xff]   ;;  %v2597_v12 = vld [vmem:[%s3394_s1 + $0x62c] ss:$16 sps:$4 sm:$0xff]  }
  0x85   :  { %1389 = vmatprep.mubr.bf16.mxu0 %v1979_v13  ;;  %1553 = vmatprep.mubr.bf16.mxu1 %v1979_v13  ;;  %v2589_v13 = vld [vmem:[%s3394_s1 + $0x608] ss:$16 sps:$4 sm:$0xff]  }
  0x87   :  { %1360 = vmatpush1.bf16.msra.mxu0 %v2494_v14  ;;  %1524 = vmatpush1.bf16.msra.mxu1 %v2497_v15  ;;  %v2594_v14 = vld [vmem:[%s3394_s1 + $0x624] ss:$16 sps:$4 sm:$0xff]   ;;  %v2592_v15 = vld [vmem:[%s3394_s1 + $0x620] ss:$16 sps:$4 sm:$0xff]  }
  0x88   :  { %1361 = vmatprep.subr.bf16.mxu0 %v2502_v16  ;;  %1525 = vmatprep.subr.bf16.mxu1 %v2505_v17  ;;  %v2595_v16 = vld [vmem:[%s3394_s1 + $0x628] ss:$16 sps:$4 sm:$0xff]   ;;  %v2598_v17 = vld [vmem:[%s3396_s3 + $0x40] sm:$0xff]  }
  0x8b   :  { %1362 = vmatpush1.bf16.msra.mxu0 %v2500_v18  ;;  %1526 = vmatpush1.bf16.msra.mxu1 %v2503_v19  ;;  %v2599_v18 = vld [vmem:[%s3396_s3 + $0xc0] sm:$0xff]   ;;  %v2634_v19 = vmov 0  }
  0x8c   :  { %1363 = vmatprep.subr.bf16.mxu0 %v2508_v20  ;;  %1527 = vmatprep.subr.bf16.mxu1 %v2511_v21  ;;  %v2389_v20 = vld [vmem:[%s3395_s0 + $0x18] ss:$0 sps:$4 sm:$0xff]   ;;  %v2600_v21 = vld [vmem:[%s3396_s3] sm:$0xff]  }
  0x8f   :  { %1364 = vmatpush1.bf16.msra.mxu0 %v2506_v22  ;;  %1528 = vmatpush1.bf16.msra.mxu1 %v2509_v23  ;;  %v2601_v22 = vld [vmem:[%s3396_s3 + $0x80] sm:$0xff]   ;;  %v2602_v23 = vld [vmem:[%s3396_s3 + $0x48] sm:$0xff]  }
  0x90   :  { %1365 = vmatprep.subr.bf16.mxu0 %v2514_v24  ;;  %1529 = vmatprep.subr.bf16.mxu1 %v2517_v25  ;;  %v2603_v24 = vld [vmem:[%s3396_s3 + $0xc8] sm:$0xff]  }
  0x91   :  { %v2604_v25 = vld [vmem:[%s3396_s3 + $0x8] sm:$0xff]  }
  0x93   :  { %1366 = vmatpush1.bf16.msra.mxu0 %v2512_v26  ;;  %1530 = vmatpush1.bf16.msra.mxu1 %v2515_v27  ;;  %v2605_v26 = vld [vmem:[%s3396_s3 + $0x88] sm:$0xff]   ;;  %v2606_v27 = vld [vmem:[%s3396_s3 + $0x50] sm:$0xff]  }
  0x94   :  { %1367 = vmatprep.subr.bf16.mxu0 %v2520_v28  ;;  %1531 = vmatprep.subr.bf16.mxu1 %v2523_v29  ;;  %v2607_v28 = vld [vmem:[%s3396_s3 + $0xd0] sm:$0xff]  }
  0x95   :  { %v2608_v29 = vld [vmem:[%s3396_s3 + $0x10] sm:$0xff]  }
  0x97   :  { %1368 = vmatpush1.bf16.msra.mxu0 %v2518_v30  ;;  %1532 = vmatpush1.bf16.msra.mxu1 %v2521_v31  ;;  %v2609_v30 = vld [vmem:[%s3396_s3 + $0x90] sm:$0xff]   ;;  %v2610_v31 = vld [vmem:[%s3396_s3 + $0x58] sm:$0xff]  }
  0x98   :  { %1369 = vmatprep.subr.bf16.mxu0 %v2526_v32  ;;  %1533 = vmatprep.subr.bf16.mxu1 %v2529_v33  ;;  %v2611_v32 = vld [vmem:[%s3396_s3 + $0xd8] sm:$0xff]  }
  0x99   :  { %v2612_v33 = vld [vmem:[%s3396_s3 + $0x18] sm:$0xff]  }
  0x9b   :  { %1370 = vmatpush1.bf16.msra.mxu0 %v2524_v34  ;;  %1534 = vmatpush1.bf16.msra.mxu1 %v2527_v35  ;;  %v2613_v34 = vld [vmem:[%s3396_s3 + $0x98] sm:$0xff]   ;;  %v2614_v35 = vld [vmem:[%s3396_s3 + $0x60] sm:$0xff]  }
  0x9c   :  { %1371 = vmatprep.subr.bf16.mxu0 %v2532_v36  ;;  %1535 = vmatprep.subr.bf16.mxu1 %v2535_v37  ;;  %v2615_v36 = vld [vmem:[%s3396_s3 + $0xe0] sm:$0xff]  }
  0x9d   :  { %v2616_v37 = vld [vmem:[%s3396_s3 + $0x20] sm:$0xff]  }
  0x9f   :  { %1372 = vmatpush1.bf16.msra.mxu0 %v2530_v38  ;;  %1536 = vmatpush1.bf16.msra.mxu1 %v2533_v39  ;;  %v2617_v38 = vld [vmem:[%s3396_s3 + $0xa0] sm:$0xff]   ;;  %v2618_v39 = vld [vmem:[%s3396_s3 + $0x68] sm:$0xff]  }
  0xa0   :  { %1373 = vmatprep.subr.bf16.mxu0 %v2538_v40  ;;  %1537 = vmatprep.subr.bf16.mxu1 %v2541_v41  ;;  %v2619_v40 = vld [vmem:[%s3396_s3 + $0xe8] sm:$0xff]  }
  0xa1   :  { %v2620_v41 = vld [vmem:[%s3396_s3 + $0x28] sm:$0xff]  }
  0xa3   :  { %1374 = vmatpush1.bf16.msra.mxu0 %v2536_v42  ;;  %1538 = vmatpush1.bf16.msra.mxu1 %v2539_v43  ;;  %v2621_v42 = vld [vmem:[%s3396_s3 + $0xa8] sm:$0xff]   ;;  %v2622_v43 = vld [vmem:[%s3396_s3 + $0x70] sm:$0xff]  }
  0xa4   :  { %1375 = vmatprep.subr.bf16.mxu0 %v2544_v44  ;;  %1539 = vmatprep.subr.bf16.mxu1 %v2547_v45  ;;  %v2623_v44 = vld [vmem:[%s3396_s3 + $0xf0] sm:$0xff]  }
  0xa5   :  { %v2624_v45 = vld [vmem:[%s3396_s3 + $0x30] sm:$0xff]  }
  0xa7   :  { %1376 = vmatpush1.bf16.msra.mxu0 %v2542_v46  ;;  %1540 = vmatpush1.bf16.msra.mxu1 %v2545_v47  ;;  %v2625_v46 = vld [vmem:[%s3396_s3 + $0xb0] sm:$0xff]   ;;  %v2626_v47 = vld [vmem:[%s3396_s3 + $0x78] sm:$0xff]  }
  0xa8   :  { %1377 = vmatprep.subr.bf16.mxu0 %v2550_v48  ;;  %1541 = vmatprep.subr.bf16.mxu1 %v2553_v49  ;;  %v2627_v48 = vld [vmem:[%s3396_s3 + $0xf8] ss:$0 sps:$4 sm:$0x33]  }
  0xa9   :  { %v2628_v49 = vld [vmem:[%s3396_s3 + $0x38] sm:$0xff]  }
  0xab   :  { %1378 = vmatpush1.bf16.msra.mxu0 %v2548_v50  ;;  %1542 = vmatpush1.bf16.msra.mxu1 %v2551_v51  ;;  %v2629_v50 = vld [vmem:[%s3396_s3 + $0xb8] sm:$0xff]   ;;  %v227_v51 = vlaneseq }
  0xac   :  { %1379 = vmatprep.subr.bf16.mxu0 %v2556_v52  ;;  %1543 = vmatprep.subr.bf16.mxu1 %v2559_v53 }
  0xad   :  { %v228_v52 = vshrl.u32 %v227_v51, 7 }
  0xaf   :  { %1380 = vmatpush1.bf16.msra.mxu0 %v2554_v54  ;;  %1544 = vmatpush1.bf16.msra.mxu1 %v2557_v55  ;;  %v229_v53 = vsub.s32 0, %v228_v52  ;;  %v237_v54 = vsub.s32 2, %v228_v52  ;;  %v225_v55 = vld [vmem:[%s3397_s2] sm:$0xf] }
  0xb0   :  { %1381 = vmatprep.subr.bf16.mxu0 %v2562_v56  ;;  %1545 = vmatprep.subr.bf16.mxu1 %v2565_v57  ;;  %v233_v56 = vsub.s32 1, %v228_v52  ;;  %v241_v57 = vsub.s32 3, %v228_v52 }
  0xb3   :  { %1382 = vmatpush1.bf16.msra.mxu0 %v2560_v58  ;;  %1546 = vmatpush1.bf16.msra.mxu1 %v2563_v59  ;;  %v230_v58 = vrot.slane %v225_v55, %v229_v53  ;;  %v238_v59 = vrot.slane %v225_v55, %v237_v54 }
  0xb4   :  { %1383 = vmatprep.subr.bf16.mxu0 %v2568_v60  ;;  %1547 = vmatprep.subr.bf16.mxu1 %v2571_v61  ;;  %v234_v60 = vrot.slane %v225_v55, %v233_v56  ;;  %v242_v61 = vrot.slane %v225_v55, %v241_v57 }
  0xb7   :  { %1384 = vmatpush1.bf16.msra.mxu0 %v2566_v62  ;;  %1548 = vmatpush1.bf16.msra.mxu1 %v2569_v63 }
  0xb8   :  { %1385 = vmatprep.subr.bf16.mxu0 %v2574_v0  ;;  %1549 = vmatprep.subr.bf16.mxu1 %v2577_v1 }
  0xbb   :  { %1386 = vmatpush1.bf16.msra.mxu0 %v2572_v2  ;;  %1550 = vmatpush1.bf16.msra.mxu1 %v2575_v3 }
  0xbc   :  { %1387 = vmatprep.subr.bf16.mxu0 %v2580_v4  ;;  %1551 = vmatprep.subr.bf16.mxu1 %v2583_v5 }
  0xbf   :  { %1388 = vmatpush1.bf16.msra.mxu0 %v2578_v6  ;;  %1552 = vmatpush1.bf16.msra.mxu1 %v2581_v7 }
  0xc0   :  { %1398 = vmatprep.subr.bf16.mxu0 %v2588_v8  ;;  %1562 = vmatprep.subr.bf16.mxu1 %v2591_v9 }
  0xc2   :  { %1390 = vmatmul.mubr.bf16.vlgmr.msra.gmra.mrb[0].mxu0 %v1978_v10  ;;  %1554 = vmatmul.mubr.bf16.vlgmr.msra.gmra.mrb[0].mxu1 %v1978_v10 }
  0xc3   :  { %1399 = vmatpush1.bf16.msra.mxu0 %v2586_v11  ;;  %1563 = vmatpush1.bf16.msra.mxu1 %v2589_v13 }
  0xc4   :  { %1400 = vmatprep.subr.bf16.mxu0 %v2594_v14  ;;  %1564 = vmatprep.subr.bf16.mxu1 %v2597_v12 }
  0xc5   :  { %1430 = vmatprep.mubr.bf16.mxu0 %v2634_v19  ;;  %1594 = vmatprep.mubr.bf16.mxu1 %v2634_v19 }
  0xc7   :  { %1401 = vmatpush1.bf16.msra.mxu0 %v2592_v15  ;;  %1565 = vmatpush1.bf16.msra.mxu1 %v2595_v16 }
  0xc8   :  { %2217 = vmatprep.subr.bf16.mxu0 %v2598_v17  ;;  %2239 = vmatprep.subr.bf16.mxu1 %v2599_v18 }
  0xce   :  { %2181 = vmatmul.mubr.msk.bf16.vlgmr.msra.gmra.mrb[0].mxu0 %vm1271_vm0, %v2389_v20  ;;  %2182 = vmatmul.mubr.msk.bf16.vlgmr.msra.gmra.mrb[0].mxu1 %vm1271_vm0, %v2389_v20  ;;  %v2183_v20 = vld [vmem:[%s3398_s4] ss:$0 sm:$0xff] }
  0xcf   :  { %2218 = vmatpush3.bf16.msra.mxu0 %v2600_v21  ;;  %2240 = vmatpush3.bf16.msra.mxu1 %v2601_v22 }
  0xd0   :  { %2219 = vmatprep.subr.bf16.mxu0 %v2602_v23  ;;  %2241 = vmatprep.subr.bf16.mxu1 %v2603_v24 }
  0xd3   :  { %2220 = vmatpush3.bf16.msra.mxu0 %v2604_v25  ;;  %2242 = vmatpush3.bf16.msra.mxu1 %v2605_v26 }
  0xd4   :  { %2221 = vmatprep.subr.bf16.mxu0 %v2606_v27  ;;  %2243 = vmatprep.subr.bf16.mxu1 %v2607_v28 }
  0xd7   :  { %2222 = vmatpush3.bf16.msra.mxu0 %v2608_v29  ;;  %2244 = vmatpush3.bf16.msra.mxu1 %v2609_v30 }
  0xd8   :  { %2223 = vmatprep.subr.bf16.mxu0 %v2610_v31  ;;  %2245 = vmatprep.subr.bf16.mxu1 %v2611_v32 }
  0xdb   :  { %2224 = vmatpush3.bf16.msra.mxu0 %v2612_v33  ;;  %2246 = vmatpush3.bf16.msra.mxu1 %v2613_v34 }
  0xdc   :  { %2225 = vmatprep.subr.bf16.mxu0 %v2614_v35  ;;  %2247 = vmatprep.subr.bf16.mxu1 %v2615_v36 }
  0xdf   :  { %2226 = vmatpush3.bf16.msra.mxu0 %v2616_v37  ;;  %2248 = vmatpush3.bf16.msra.mxu1 %v2617_v38 }
  0xe0   :  { %2227 = vmatprep.subr.bf16.mxu0 %v2618_v39  ;;  %2249 = vmatprep.subr.bf16.mxu1 %v2619_v40 }
  0xe3   :  { %2228 = vmatpush3.bf16.msra.mxu0 %v2620_v41  ;;  %2250 = vmatpush3.bf16.msra.mxu1 %v2621_v42 }
  0xe4   :  { %2229 = vmatprep.subr.bf16.mxu0 %v2622_v43  ;;  %2251 = vmatprep.subr.bf16.mxu1 %v2623_v44 }
  0xe7   :  { %2230 = vmatpush3.bf16.msra.mxu0 %v2624_v45  ;;  %2252 = vmatpush3.bf16.msra.mxu1 %v2625_v46 }
  0xe8   :  { %2231 = vmatprep.subr.bf16.mxu0 %v2626_v47  ;;  %2289 = vmatprep.subr.msk.bf16.mxu1 %vm1874_vm1, %v2627_v48 }
  0xeb   :  { %2232 = vmatpush3.bf16.msra.mxu0 %v2628_v49  ;;  %2254 = vmatpush3.bf16.msra.mxu1 %v2629_v50 }
 0x1a1   :  { %v1432_v62 = vpop.f32.mrb[0].mxu0  ;;  %v1596_v63 = vpop.f32.mrb[0].mxu1 }
 0x1a2   :  { %v2261_v0 = vadd.f32 %v1432_v62, %v230_v58  ;;  %v2263_v1 = vadd.f32 %v1596_v63, %v238_v59  ;;  %v1434_v2 = vpop.f32.mrb[1].mxu0  ;;  %v1598_v3 = vpop.f32.mrb[1].mxu1 }
 0x1a3   :  { %v2262_v4 = vadd.f32 %v1434_v2, %v234_v60  ;;  %v2264_v5 = vadd.f32 %v1598_v3, %v242_v61  ;;  %v1436_v6 = vpop.f32.mrb[2].mxu0  ;;  %v1600_v7 = vpop.f32.mrb[2].mxu1 }
 0x1a4   :  { %v1603_v8 = vmax.f32 %v2261_v0, 0.0  ;;  %v1605_v9 = vmax.f32 %v2263_v1, 0.0  ;;  %v1437_v10 = vpop.f32.mrb[3].mxu0  ;;  %v1601_v11 = vpop.f32.mrb[3].mxu1 }
 0x1a5   :  { %v1604_v13 = vmax.f32 %v2262_v4, 0.0  ;;  %v1606_v14 = vmax.f32 %v2264_v5, 0.0 }
 0x1a6   :  { %v1607_v16 = vpack.c.bf16 %v1603_v8, %v1603_v8  ;;  %v1609_v17 = vpack.c.bf16 %v1605_v9, %v1605_v9 }
 0x1a7   :  { %v1608_v12 = vpack.c.bf16 %v1604_v13, %v1604_v13  ;;  %v1610_v15 = vpack.c.bf16 %v1606_v14, %v1606_v14 }
 0x1a9   :  { %1910 = vmatprep.mubr.bf16.mxu0 %v1608_v12  ;;  %2216 = vmatprep.mubr.msk.bf16.mxu1 %vm1870_vm2, %v1610_v15 }
 0x1aa   :  { %1911 = vmatmul.mubr.bf16.vlgmr.msra.gmra.mrb[4].mxu0 %v1607_v16  ;;  %1951 = vmatmul.mubr.bf16.vlgmr.msra.gmra.mrb[4].mxu1 %v1609_v17 }
 0x27d   :  { %v2233_v18 = vpop.f32.mrb[4].mxu0  ;;  %v2255_v19 = vpop.f32.mrb[4].mxu1 }
 0x27e   :  { %v2234_v21 = vpop.f32.mrb[5].mxu0  ;;  %v2256_v22 = vpop.f32.mrb[5].mxu1 }
 0x27f   :  { %v2235_v23 = vadd.f32 %v2234_v21, %v2233_v18  ;;  %v2257_v24 = vadd.f32 %v2256_v22, %v2255_v19  ;;  %v2236_v25 = vpop.f32.mrb[6].mxu0  ;;  %v2258_v26 = vpop.f32.mrb[6].mxu1 }
 0x280   :  { %v2237_v27 = vpop.f32.mrb[7].mxu0  ;;  %v2259_v28 = vpop.f32.mrb[7].mxu1 }
 0x281   :  { %v1913_v29 = vadd.f32 %v2235_v23, %v2183_v20 }
 0x283   :  { %v1953_v30 = vadd.f32 %v2257_v24, %v1913_v29 }
 0x285   :  { %1958 = vmax.xlane.f32.xlu0 %v1953_v30 }
 0x312   :  { %v1959_v31 = vpop.xlane.xlu0 %1958 }
 0x313   :  { %v1960_v32 = vsub.f32 %v1953_v30, %v1959_v31 }
 0x315   :  { %v1961_v33 = vmul.f32 1.442695, %v1960_v32 }
 0x317   :  { %2630 = vpow2.f32 %v1961_v33 }
 0x321   :  { %v2631_v34 = vpop.eup %2630 }
 0x322   :  { %1963 = vadd.xlane.f32.xlu0 %v2631_v34 }
 0x3af   :  { %v1964_v35 = vpop.xlane.xlu0 %1963 }
 0x3b0   :  { %2632 = vlog2.f32 %v1964_v35 }
 0x3ba   :  { %v2633_v36 = vpop.eup %2632 }
 0x3bb   :  { %v1966_v37 = vmul.f32 0.6931472, %v2633_v36 }
 0x3bd   :  { %v1967_v38 = vadd.f32 %v1966_v37, %v1959_v31 }
 0x3bf   :  { %v1968_v39 = vsub.f32 %v1953_v30, %v1967_v38 }
 0x3c1   :  { %1969 = vst [vmem:[%s3399_s5] sm:$0xff] %v1968_v39 }

// kernel: net_forward.2
= control target key start
LH: loop header
LB: loop body
LE: loop exit
PB: predicated region body
PF: predicated region fallthrough
CT: control target
= control target key end

     0   :  { %vm418_vm0 = vcmask 1044480   ;;  %vm21671_vm1 = vcmask 1046528   ;;  %vm572_vm2 = vcmask 1043456   ;;  %vm21667_vm3 = vcmask 1045504   ;;  %s14314_s9 = smov 84   ;;  %s14315_s10 = smov 28   ;;  %s21581_s0 = inlined_call_operand.vmem [shape: f32[8,28,28], index: 0, kind: input, shape index: {}]   ;;  %s21582_s1 = inlined_call_operand.vmem [shape: f32[140,480], index: 1, kind: input, shape index: {}]   ;;  %s21583_s2 = inlined_call_operand.vmem [shape: f32[1,480], index: 2, kind: input, shape index: {}]   ;;  %s21584_s3 = inlined_call_operand.vmem [shape: bf16[5,460,400], index: 3, kind: input, shape index: {}]   ;;  %s21585_s4 = inlined_call_operand.vmem [shape: f32[1,400], index: 4, kind: input, shape index: {}]   ;;  %s21586_s5 = inlined_call_operand.vmem [shape: bf16[8,800], index: 5, kind: output, shape index: {}]  }
   0x1   :  { %v21_v0 = vld [vmem:[%s21581_s0] sm:$0xff]  ;;  %v14370_v1 = vld [vmem:[%s21581_s0 + $0x8] sm:$0xff]  ;;  %v14375_v2 = vld [vmem:[%s21581_s0 + $0x10] sm:$0xff]  ;;  %vm21657_vm4 = vcmask 228352   ;;  %s14316_s21 = smov 112   ;;  %s14317_s22 = smov 56  }
   0x2   :  { %v419_v3 = vrot.slane %v21_v0, 3  ;;  %v420_v4 = vrot.slane %v14370_v1, 3  ;;  %v111_v5 = vrot.slane %v21_v0, 1  ;;  %v112_v6 = vrot.slane %v14370_v1, 1  ;;  %54 = vst.msk [vmem:[#allocation2] sm:$0xff] %vm21657_vm4, %v21_v0  ;;  %55 = vst.msk [vmem:[#allocation2 + $0x10] sm:$0xff] %vm21657_vm4, %v14370_v1 }
   0x3   :  { %56 = vst.msk [vmem:[#allocation2 + $0x20] sm:$0xff] %vm21657_vm4, %v14375_v2  ;;  %v573_v7 = vrot.slane %v21_v0, 4  ;;  %v574_v8 = vrot.slane %v14370_v1, 4  ;;  %v265_v9 = vrot.slane %v21_v0, 2  ;;  %v266_v10 = vrot.slane %v14370_v1, 2  ;;  %v14389_v11 = vld [vmem:[%s21581_s0 + $0x20] sm:$0xff] }
   0x4   :  { %v14394_v12 = vld [vmem:[%s21581_s0 + $0x28] sm:$0xff]  ;;  %v421_v13 = vsel %vm418_vm0, %v419_v3, %v420_v4  ;;  %v113_v14 = vsel %vm21671_vm1, %v111_v5, %v112_v6  ;;  %v268_v15 = vrot.slane %v14375_v2, 2  ;;  %v24_v16 = vld [vmem:[%s21581_s0 + $0x18] sm:$0xf]  ;;  %v14405_v17 = vld [vmem:[%s21581_s0 + $0x30] sm:$0xff]  ;;  %57 = vst.msk [vmem:[#allocation2 + $0x30] sm:$0xff] %vm21657_vm4, %v14389_v11 }
   0x5   :  { %v14410_v18 = vld [vmem:[%s21581_s0 + $0x40] sm:$0xff]  ;;  %58 = vst.msk [vmem:[#allocation2 + $0x40] sm:$0xff] %vm21657_vm4, %v14394_v12  ;;  %475 = vrot.lane.b32.xlu1 %v421_v13, %s14314_s9  ;;  %167 = vrot.lane.b32.xlu0 %v113_v14, %s14315_s10  ;;  %v114_v19 = vrot.slane %v14375_v2, 1  ;;  %v576_v20 = vrot.slane %v14375_v2, 4  ;;  %v14423_v21 = vld [vmem:[%s21581_s0 + $0x48] sm:$0xff]  ;;  %59 = vst.msk [vmem:[#allocation2 + $0x50] sm:$0xff] %vm21657_vm4, %v14405_v17  ;;  %v575_v23 = vsel %vm572_vm2, %v573_v7, %v574_v8 }
   0x6   :  { %v14428_v22 = vld [vmem:[%s21581_s0 + $0x50] sm:$0xff]  ;;  %60 = vst.msk [vmem:[#allocation2 + $0x60] sm:$0xff] %vm21657_vm4, %v14410_v18  ;;  %v267_v24 = vsel %vm21667_vm3, %v265_v9, %v266_v10  ;;  %v422_v25 = vrot.slane %v14375_v2, 3  ;;  %v14440_v26 = vld [vmem:[%s21581_s0 + $0x60] sm:$0xff]  ;;  %v14445_v27 = vld [vmem:[%s21581_s0 + $0x68] sm:$0xff]  ;;  %v269_v28 = vsel %vm21667_vm3, %v266_v10, %v268_v15  ;;  %v270_v29 = vrot.slane %v24_v16, 2 }
   0x7   :  { %21824 = vst [vmem:[#allocation4_spill] sm:$0xff] %v14428_v22  ;;  %61 = vst.msk [vmem:[#allocation2 + $0x70] sm:$0xff] %vm21657_vm4, %v14423_v21  ;;  %v116_v30 = vrot.slane %v24_v16, 1  ;;  %v14455_v31 = vld [vmem:[%s21581_s0 + $0x70] sm:$0xff]  ;;  %v578_v32 = vrot.slane %v24_v16, 4  ;;  %v424_v33 = vrot.slane %v24_v16, 3  ;;  %v115_v36 = vsel %vm21671_vm1, %v112_v6, %v114_v19 }
   0x8   :  { %62 = vst.msk [vmem:[#allocation2 + $0x80] sm:$0xff] %vm21657_vm4, %v14428_v22  ;;  %63 = vst.msk [vmem:[#allocation2 + $0x90] sm:$0xff] %vm21657_vm4, %v14440_v26  ;;  %v272_v34 = vrot.slane %v14389_v11, 2  ;;  %v273_v35 = vrot.slane %v14394_v12, 2  ;;  %v577_v37 = vsel %vm572_vm2, %v574_v8, %v576_v20  ;;  %v118_v38 = vrot.slane %v14389_v11, 1  ;;  %v14478_v44 = vld [vmem:[%s21581_s0 + $0x80] sm:$0xff] }
   0x9   :  { %64 = vst.msk [vmem:[#allocation2 + $0xa0] sm:$0xff] %vm21657_vm4, %v14445_v27  ;;  %65 = vst.msk [vmem:[#allocation2 + $0xb0] sm:$0xff] %vm21657_vm4, %v14455_v31  ;;  %629 = vrot.lane.b32.xlu1 %v575_v23, %s14316_s21  ;;  %321 = vrot.lane.b32.xlu0 %v267_v24, %s14317_s22  ;;  %v119_v39 = vrot.slane %v14394_v12, 1  ;;  %v423_v40 = vsel %vm418_vm0, %v420_v4, %v422_v25  ;;  %v580_v41 = vrot.slane %v14389_v11, 4  ;;  %v581_v42 = vrot.slane %v14394_v12, 4  ;;  %v14490_v50 = vld [vmem:[%s21581_s0 + $0x88] sm:$0xff] }
   0xa   :  { %v426_v43 = vrot.slane %v14389_v11, 3  ;;  %v271_v45 = vsel %vm21667_vm3, %v268_v15, %v270_v29  ;;  %v117_v46 = vsel %vm21671_vm1, %v114_v19, %v116_v30  ;;  %v427_v47 = vrot.slane %v14394_v12, 3  ;;  %v28_v49 = vld [vmem:[%s21581_s0 + $0x38] sm:$0xf]  ;;  %66 = vst.msk [vmem:[#allocation2 + $0xc0] sm:$0xff] %vm21657_vm4, %v14478_v44  ;;  %67 = vst.msk [vmem:[#allocation2 + $0xd0] sm:$0xff] %vm21657_vm4, %v14490_v50 }
   0xb   :  { %v275_v48 = vrot.slane %v14405_v17, 2  ;;  %v14495_v51 = vsel %vm572_vm2, %v576_v20, %v578_v32  ;;  %v14498_v52 = vsel %vm418_vm0, %v422_v25, %v424_v33  ;;  %v14501_v53 = vsel %vm21667_vm3, %v272_v34, %v273_v35  ;;  %v14543_v11 = vld [vmem:[%s21581_s0 + $0x90] sm:$0xff]  ;;  %v14554_v16 = vld [vmem:[%s21581_s0 + $0x58] sm:$0xf]  ;;  %v14716_v32 = vld [vmem:[%s21582_s1 + $0x88] sm:$0xff]  ;;  %s14322_s16 = smov 106  }
   0xc   :  { %v121_v54 = vrot.slane %v14405_v17, 1  ;;  %v14509_v55 = vsel %vm21671_vm1, %v118_v38, %v119_v39  ;;  %v14512_v56 = vsel %vm572_vm2, %v580_v41, %v581_v42  ;;  %v583_v57 = vrot.slane %v14405_v17, 4  ;;  %68 = vst.msk [vmem:[#allocation2 + $0xe0] sm:$0xff] %vm21657_vm4, %v14543_v11  ;;  %s14323_s17 = smov 72   ;;  %s14324_s18 = smov 50  }
   0xd   :  { %323 = vrot.lane.b32.xlu1 %v269_v28, %s14317_s22  ;;  %169 = vrot.lane.b32.xlu0 %v115_v36, %s14315_s10  ;;  %v429_v58 = vrot.slane %v14405_v17, 3  ;;  %v14517_v59 = vsel %vm418_vm0, %v426_v43, %v427_v47  ;;  %v14520_v60 = vsel %vm21667_vm3, %v273_v35, %v275_v48  ;;  %v277_v61 = vrot.slane %v28_v49, 2  ;;  %v14699_v35 = vld [vmem:[%s21582_s1 + $0x50] sm:$0xff]  ;;  %s14325_s19 = smov 100   ;;  %s14326_s20 = smov 94  }
   0xe   :  { %v123_v62 = vrot.slane %v28_v49, 1  ;;  %v585_v63 = vrot.slane %v28_v49, 4  ;;  %v431_v0 = vrot.slane %v28_v49, 3  ;;  %v279_v1 = vrot.slane %v14410_v18, 2  ;;  %v804_v49 = vld [vmem:[%s21582_s1 + $0x28] sm:$0xff]  ;;  %v14778_v28 = vld [vmem:[%s21582_s1 + $0xb0] sm:$0xff] }
   0xf   :  { %v280_v2 = vrot.slane %v14423_v21, 2  ;;  %v14525_v3 = vsel %vm21671_vm1, %v119_v39, %v121_v54  ;;  %v125_v4 = vrot.slane %v14410_v18, 1  ;;  %v126_v5 = vrot.slane %v14423_v21, 1  ;;  %s14327_s23 = smov 44   ;;  %s14328_s24 = smov 16  }
  0x10   :  { %v587_v6 = vrot.slane %v14410_v18, 4  ;;  %v14533_v7 = vsel %vm572_vm2, %v581_v42, %v583_v57  ;;  %v14536_v8 = vsel %vm418_vm0, %v427_v47, %v429_v58  ;;  %v588_v9 = vrot.slane %v14423_v21, 4  ;;  %v36_v42 = vld [vmem:[%s21581_s0 + $0x78] sm:$0xf]  ;;  %s14329_s25 = smov 88   ;;  %s14330_s26 = smov 38  }
  0x11   :  { %631 = vrot.lane.b32.xlu1 %v577_v37, %s14316_s21  ;;  %477 = vrot.lane.b32.xlu0 %v423_v40, %s14314_s9  ;;  %v433_v10 = vrot.slane %v14410_v18, 3  ;;  %v14546_v12 = vsel %vm21667_vm3, %v275_v48, %v277_v61  ;;  %v21589_v13 = vrot.slane %v14423_v21, 3  ;;  %v21588_v14 = vrot.slane %v14428_v22, 2  ;;  %v800_v48 = vld [vmem:[%s21582_s1 + $0x8] sm:$0xff]  ;;  %s14332_s27 = smov 66   ;;  %s14333_s28 = smov 116  }
  0x12   :  { %v21587_v15 = vrot.slane %v14428_v22, 1  ;;  %v14559_v17 = vsel %vm21671_vm1, %v121_v54, %v123_v62  ;;  %v14562_v18 = vsel %vm572_vm2, %v583_v57, %v585_v63  ;;  %v14565_v19 = vsel %vm418_vm0, %v429_v58, %v431_v0  ;;  %v802_v54 = vld [vmem:[%s21582_s1 + $0x18] sm:$0xff] }
  0x13   :  { %v14568_v20 = vsel %vm21667_vm3, %v279_v1, %v280_v2  ;;  %v14571_v23 = vsel %vm21671_vm1, %v125_v4, %v126_v5  ;;  %v14574_v24 = vsel %vm572_vm2, %v587_v6, %v588_v9  ;;  %v590_v25 = vrot.slane %v14428_v22, 4  ;;  %v806_v62 = vld [vmem:[%s21582_s1 + $0x38] sm:$0xff]  ;;  %v803_v1 = vld [vmem:[%s21582_s1 + $0x20] sm:$0xff]  ;;  %v805_v4 = vld [vmem:[%s21582_s1 + $0x30] sm:$0xff] }
  0x14   :  { %v14583_v29 = vsel %vm418_vm0, %v433_v10, %v21589_v13  ;;  %v14588_v30 = vsel %vm21667_vm3, %v280_v2, %v21588_v14  ;;  %v592_v33 = vrot.slane %v14554_v16, 4  ;;  %v14595_v34 = vsel %vm21671_vm1, %v126_v5, %v21587_v15  ;;  %v801_v2 = vld [vmem:[%s21582_s1 + $0x10] sm:$0xff]  ;;  %v808_v10 = vld [vmem:[%s21582_s1 + $0x48] sm:$0xff]  ;;  %v14694_v15 = vld [vmem:[%s21582_s1 + $0x60] sm:$0xff] }
  0x15   :  { %325 = vrot.lane.b32.xlu1 %v271_v45, %s14317_s22  ;;  %171 = vrot.lane.b32.xlu0 %v117_v46, %s14315_s10  ;;  %v286_v36 = vrot.slane %v14440_v26, 2  ;;  %v287_v37 = vrot.slane %v14445_v27, 2  ;;  %v132_v39 = vrot.slane %v14440_v26, 1  ;;  %v133_v40 = vrot.slane %v14445_v27, 1  ;;  %v14721_v13 = vld [vmem:[%s21582_s1 + $0xa8] sm:$0xff] }
  0x16   :  { %v14601_v38 = vsel %vm572_vm2, %v590_v25, %v592_v33  ;;  %v594_v41 = vrot.slane %v14440_v26, 4  ;;  %v14610_v43 = vsel %vm572_vm2, %v588_v9, %v590_v25  ;;  %v595_v46 = vrot.slane %v14445_v27, 4  ;;  %v812_v25 = vld [vmem:[%s21582_s1 + $0x68] sm:$0xff]  ;;  %v810_v33 = vld [vmem:[%s21582_s1 + $0x58] sm:$0xff] }
  0x17   :  { %21825 = vst [vmem:[#allocation5_spill] sm:$0xff] %v14601_v38  ;;  %v14613_v45 = vsel %vm21667_vm3, %v286_v36, %v287_v37  ;;  %v440_v47 = vrot.slane %v14440_v26, 3  ;;  %v14631_v26 = vsel %vm21671_vm1, %v132_v39, %v133_v40  ;;  %v441_v57 = vrot.slane %v14445_v27, 3  ;;  %v814_v36 = vld [vmem:[%s21582_s1 + $0x78] sm:$0xff] }
  0x18   :  { %21826 = vst [vmem:[#allocation6_spill] sm:$0xff] %v14613_v45  ;;  %21827 = vst [vmem:[#allocation7_spill] sm:$0xff] %v14631_v26  ;;  %v289_v58 = vrot.slane %v14455_v31, 2  ;;  %v135_v61 = vrot.slane %v14455_v31, 1  ;;  %v14643_v63 = vsel %vm572_vm2, %v594_v41, %v595_v46  ;;  %v443_v0 = vrot.slane %v14455_v31, 3  ;;  %v15063_v26 = vld [vmem:[%s21582_s1 + $0x1a0] sm:$0xff] }
  0x19   :  { %633 = vrot.lane.b32.xlu1 %v14495_v51, %s14316_s21  ;;  %479 = vrot.lane.b32.xlu0 %v14498_v52, %s14314_s9  ;;  %v799_v51 = vld [vmem:[%s21582_s1] sm:$0xff]  ;;  %21828 = vst [vmem:[#allocation8_spill] sm:$0xff] %v14643_v63  ;;  %v597_v52 = vrot.slane %v14455_v31, 4  ;;  %v291_v27 = vrot.slane %v36_v42, 2  ;;  %v14657_v5 = vsel %vm418_vm0, %v440_v47, %v441_v57  ;;  %v137_v9 = vrot.slane %v36_v42, 1  ;;  %v15036_v63 = vld [vmem:[%s21582_s1 + $0x198] sm:$0xff] }
  0x1a   :  { %21829 = vst [vmem:[#allocation9_spill] sm:$0xff] %v14657_v5  ;;  %v14660_v6 = vsel %vm21667_vm3, %v287_v37, %v289_v58  ;;  %v14663_v31 = vsel %vm21671_vm1, %v133_v40, %v135_v61  ;;  %v14680_v37 = vld [vmem:[%s21582_s1 + $0x40] sm:$0xff]  ;;  %v14686_v40 = vsel %vm418_vm0, %v441_v57, %v443_v0  ;;  %v599_v47 = vrot.slane %v36_v42, 4  ;;  %v15229_v45 = vld [vmem:[%s21582_s1 + $0x230] sm:$0xf] }
  0x1b   :  { %21830 = vst [vmem:[#allocation10_spill] sm:$0xff] %v14660_v6  ;;  %21831 = vst [vmem:[#allocation11_spill] sm:$0xff] %v14663_v31  ;;  %v14683_v39 = vsel %vm572_vm2, %v595_v46, %v597_v52  ;;  %v14689_v41 = vsel %vm21667_vm3, %v289_v58, %v291_v27  ;;  %v14704_v46 = vld [vmem:[%s21582_s1 + $0x70] sm:$0xff]  ;;  %v14711_v57 = vsel %vm21671_vm1, %v135_v61, %v137_v9  ;;  %v445_v58 = vrot.slane %v36_v42, 3  ;;  %v14740_v61 = vld [vmem:[%s21581_s0 + $0xa0] sm:$0xff] }
  0x1c   :  { %21832 = vst [vmem:[#allocation12_spill] sm:$0xff] %v14683_v39  ;;  %21833 = vst [vmem:[#allocation13_spill] sm:$0xff] %v14686_v40  ;;  %v12732_v27 = vpack.c.bf16 %v804_v49, %v800_v48  ;;  %v12770_v14 = vpack.c.bf16 %v806_v62, %v802_v54  ;;  %v12734_v42 = vpack.c.bf16 %v803_v1, %v799_v51  ;;  %v293_v49 = vrot.slane %v14478_v44, 2  ;;  %v14735_v54 = vld [vmem:[%s21582_s1 + $0xb8] sm:$0xff]  ;;  %v14745_v62 = vld [vmem:[%s21581_s0 + $0xa8] sm:$0xff] }
  0x1d   :  { %21834 = vst [vmem:[#allocation14_spill] sm:$0xff] %v14689_v41  ;;  %327 = vrot.lane.b32.xlu1 %v14501_v53, %s14317_s22  ;;  %173 = vrot.lane.b32.xlu0 %v14509_v55, %s14315_s10  ;;  %21835 = vst [vmem:[#allocation15_spill] sm:$0xff] %v14711_v57  ;;  %v14726_v53 = vld [vmem:[%s21582_s1 + $0x98] sm:$0xff]  ;;  %v14729_v55 = vsel %vm572_vm2, %v597_v52, %v599_v47  ;;  %v12772_v48 = vpack.c.bf16 %v805_v4, %v801_v2  ;;  %v294_v52 = vrot.slane %v14490_v50, 2  ;;  %v14756_v4 = vld [vmem:[%s21582_s1 + $0x80] sm:$0xff]  ;;  %vm14318_vm5 = vmmov 1  }
  0x1e   :  { %21836 = vst [vmem:[#allocation16_spill] sm:$0xff] %v14729_v55  ;;  %v14748_v51 = vsel %vm418_vm0, %v443_v0, %v445_v58  ;;  %12733 = vmatprep.subr.bf16.mxu0 %v12732_v27  ;;  %12771 = vmatprep.subr.bf16.mxu1 %v12770_v14  ;;  %v139_v1 = vrot.slane %v14478_v44, 1  ;;  %v14761_v9 = vld [vmem:[%s21582_s1 + $0xa0] sm:$0xff]  ;;  %v14766_v14 = vld [vmem:[%s21582_s1 + $0x90] sm:$0xff]  ;;  %69 = vst.msk [vmem:[#allocation2 + $0xf0] sm:$0xff] %vm21657_vm4, %v14740_v61  ;;  %v12736_v0 = vpack.c.bf16 %v812_v25, %v808_v10  ;;  %vm239_vm7 = vcmask 457952  }
  0x1f   :  { %21837 = vst [vmem:[#allocation17_spill] sm:$0xff] %v14748_v51  ;;  %70 = vst.msk [vmem:[#allocation2 + $0x100] sm:$0xff] %vm21657_vm4, %v14745_v62  ;;  %12735 = vmatpush1.bf16.msra.mxu0 %v12734_v42  ;;  %12773 = vmatpush1.bf16.msra.mxu1 %v12772_v48  ;;  %v12774_v47 = vpack.c.bf16 %v814_v36, %v810_v33  ;;  %v12738_v58 = vpack.c.bf16 %v14694_v15, %v14680_v37  ;;  %v601_v27 = vrot.slane %v14478_v44, 4  ;;  %v14783_v2 = vld [vmem:[%s21582_s1 + $0xc8] sm:$0xff]  ;;  %v14818_v42 = vld [vmem:[%s21582_s1 + $0xc0] sm:$0xff]  ;;  %vm703_vm8 = vcmask 97280  }
  0x20   :  { %v14788_v10 = vld [vmem:[%s21582_s1 + $0xe8] sm:$0xff]  ;;  %v14795_v15 = vsel %vm21667_vm3, %v293_v49, %v294_v52  ;;  %v21839_v25 = vrot.slane %v14490_v50, 1  ;;  %v12776_v36 = vpack.c.bf16 %v14704_v46, %v14699_v35  ;;  %v14823_v35 = vld [vmem:[%s21582_s1 + $0xe0] sm:$0xff]  ;;  %12737 = vmatprep.subr.bf16.mxu0 %v12736_v0  ;;  %v447_v46 = vrot.slane %v14478_v44, 3  ;;  %v14839_v0 = vld [vmem:[%s21582_s1 + $0xf0] sm:$0xff] }
  0x21   :  { %635 = vrot.lane.b32.xlu1 %v14512_v56, %s14316_s21  ;;  %481 = vrot.lane.b32.xlu0 %v14517_v59, %s14314_s9  ;;  %21838 = vst [vmem:[#allocation18_spill] sm:$0xff] %v14795_v15  ;;  %v14808_v56 = vld [vmem:[%s21582_s1 + $0xd8] sm:$0xff]  ;;  %v12740_v49 = vpack.c.bf16 %v14721_v13, %v14716_v32  ;;  %v14844_v44 = vld [vmem:[%s21582_s1 + $0x108] sm:$0xff]  ;;  %v21841_v32 = vrot.slane %v14428_v22, 3  ;;  %v21844_v48 = vrot.slane %v14428_v22, 2  ;;  %v12742_v51 = vpack.c.bf16 %v14761_v9, %v14756_v4  ;;  %vm15358_vm6 = vmpackc.low %vm572_vm2, %vm14318_vm5 }
  0x22   :  { %v14800_v33 = vsel %vm21671_vm1, %v139_v1, %v21839_v25  ;;  %v14813_v59 = vld [vmem:[%s21582_s1 + $0xf8] sm:$0xff]  ;;  %12775 = vmatprep.subr.bf16.mxu1 %v12774_v47  ;;  %v12778_v1 = vpack.c.bf16 %v14735_v54, %v14726_v53  ;;  %v14834_v25 = vld [vmem:[%s21582_s1 + $0xd0] sm:$0xff]  ;;  %v14849_v13 = vld [vmem:[%s21582_s1 + $0x128] sm:$0xff]  ;;  %v21842_v53 = vrot.slane %v14423_v21, 3  ;;  %v21843_v47 = vrot.slane %v14554_v16, 2 }
  0x23   :  { %21840 = vst [vmem:[#allocation19_spill] sm:$0xff] %v14800_v33  ;;  %v21845_v33 = vrot.slane %v14490_v50, 4  ;;  %v14874_v21 = vld [vmem:[%s21582_s1 + $0x118] sm:$0xff]  ;;  %12739 = vmatpush1.bf16.msra.mxu0 %v12738_v58  ;;  %12777 = vmatpush1.bf16.msra.mxu1 %v12776_v36  ;;  %v142_v55 = vrot.slane %v14543_v11, 1  ;;  %v14909_v57 = vld [vmem:[%s21582_s1 + $0x110] sm:$0xff]  ;;  %v14919_v36 = vld [vmem:[%s21582_s1 + $0x148] sm:$0xff]  ;;  %v12744_v41 = vpack.c.bf16 %v14788_v10, %v14783_v2  ;;  %v12748_v6 = vpack.c.bf16 %v14849_v13, %v14844_v44 }
  0x24   :  { %v14856_v54 = vsel %vm418_vm0, %v21842_v53, %v21841_v32  ;;  %v14863_v37 = vsel %vm21667_vm3, %v21844_v48, %v21843_v47  ;;  %v14879_v32 = vld [vmem:[%s21582_s1 + $0x138] sm:$0xff]  ;;  %v14884_v48 = vld [vmem:[%s21582_s1 + $0x100] sm:$0xff]  ;;  %v21847_v53 = vrot.slane %v14490_v50, 3  ;;  %v14914_v58 = vld [vmem:[%s21582_s1 + $0x130] sm:$0xff]  ;;  %v21849_v9 = vrot.slane %v14554_v16, 1  ;;  %12741 = vmatprep.subr.bf16.mxu0 %v12740_v49  ;;  %12779 = vmatprep.subr.bf16.mxu1 %v12778_v1 }
  0x25   :  { %v14868_v15 = vsel %vm572_vm2, %v601_v27, %v21845_v33  ;;  %v14889_v27 = vld [vmem:[%s21582_s1 + $0x120] sm:$0xff]  ;;  %v14894_v33 = vld [vmem:[%s21581_s0 + $0x98] sm:$0xf]  ;;  %v14929_v4 = vld [vmem:[%s21581_s0 + $0xb0] sm:$0xff]  ;;  %329 = vrot.lane.b32.xlu1 %v14520_v60, %s14317_s22  ;;  %v21853_v10 = vrot.slane %v14490_v50, 1  ;;  %v12746_v60 = vpack.c.bf16 %v14823_v35, %v14818_v42  ;;  %v21856_v39 = vrot.slane %v14490_v50, 4 }
  0x26   :  { %21846 = vst [vmem:[#allocation20_spill] sm:$0xff] %v14868_v15  ;;  %v14899_v47 = vsel %vm418_vm0, %v447_v46, %v21847_v53  ;;  %v12780_v15 = vpack.c.bf16 %v14778_v28, %v14766_v14  ;;  %v14924_v28 = vld [vmem:[%s21582_s1 + $0x168] sm:$0xff]  ;;  %175 = vrot.lane.b32.xlu0 %v14525_v3, %s14315_s10  ;;  %v21850_v14 = vrot.slane %v14428_v22, 1  ;;  %v21851_v53 = vrot.slane %v14543_v11, 2  ;;  %v14953_v3 = vld [vmem:[%s21582_s1 + $0x158] sm:$0xff]  ;;  %71 = vst.msk [vmem:[#allocation2 + $0x110] sm:$0xff] %vm21657_vm4, %v14929_v4 }
  0x27   :  { %21848 = vst [vmem:[#allocation21_spill] sm:$0xff] %v14899_v47  ;;  %v14970_v2 = vld [vmem:[%s21581_s0 + $0xc8] sm:$0xff]  ;;  %v14985_v40 = vld [vmem:[%s21582_s1 + $0x140] sm:$0xff]  ;;  %v14995_v1 = vld [vmem:[%s21582_s1 + $0x150] sm:$0xff]  ;;  %v298_v5 = vrot.slane %v14894_v33, 2  ;;  %12743 = vmatpush1.bf16.msra.mxu0 %v12742_v51  ;;  %v12786_v13 = vpack.c.bf16 %v14879_v32, %v14874_v21  ;;  %v21860_v21 = vrot.slane %v14543_v11, 2 }
  0x28   :  { %v14940_v46 = vsel %vm21671_vm1, %v21850_v14, %v21849_v9  ;;  %v14945_v47 = vsel %vm21667_vm3, %v294_v52, %v21851_v53  ;;  %v14958_v9 = vld [vmem:[%s21582_s1 + $0x178] sm:$0xff]  ;;  %v14965_v52 = vld [vmem:[%s21581_s0 + $0xc0] sm:$0xff]  ;;  %v14975_v14 = vsel %vm21671_vm1, %v21853_v10, %v142_v55  ;;  %v12782_v53 = vpack.c.bf16 %v14813_v59, %v14808_v56  ;;  %v15000_v56 = vld [vmem:[%s21582_s1 + $0x170] sm:$0xff]  ;;  %73 = vst.msk [vmem:[#allocation2 + $0x130] sm:$0xff] %vm21657_vm4, %v14970_v2 }
  0x29   :  { %21852 = vst [vmem:[#allocation22_spill] sm:$0xff] %v14945_v47  ;;  %21854 = vst [vmem:[#allocation23_spill] sm:$0xff] %v14975_v14  ;;  %v450_v47 = vrot.slane %v14543_v11, 3  ;;  %v14990_v49 = vld [vmem:[%s21582_s1 + $0x160] sm:$0xff]  ;;  %v15005_v59 = vld [vmem:[%s21582_s1 + $0x188] sm:$0xff]  ;;  %v12784_v10 = vpack.c.bf16 %v14839_v0, %v14834_v25  ;;  %v21855_v14 = vrot.slane %v14543_v11, 4  ;;  %12781 = vmatpush1.bf16.msra.mxu1 %v12780_v15  ;;  %637 = vrot.lane.b32.xlu1 %v14533_v7, %s14316_s21 }
  0x2a   :  { %v15010_v42 = vld [vmem:[%s21582_s1 + $0x1a8] sm:$0xff]  ;;  %72 = vst.msk [vmem:[#allocation2 + $0x120] sm:$0xff] %vm21657_vm4, %v14965_v52  ;;  %v15019_v35 = vld [vmem:[%s21581_s0 + $0xd0] sm:$0xff]  ;;  %v15041_v25 = vld [vmem:[%s21582_s1 + $0x1b8] sm:$0xff]  ;;  %v21858_v0 = vrot.slane %v14490_v50, 3  ;;  %483 = vrot.lane.b32.xlu0 %v14536_v8, %s14314_s9  ;;  %v12788_v15 = vpack.c.bf16 %v14914_v58, %v14909_v57  ;;  %v15084_v32 = vsel %vm21667_vm3, %v21860_v21, %v298_v5  ;;  %12745 = vmatprep.subr.bf16.mxu0 %v12744_v41  ;;  %v606_v57 = vrot.slane %v14894_v33, 4 }
  0x2b   :  { %v15028_v31 = vsel %vm572_vm2, %v21856_v39, %v21855_v14  ;;  %v15046_v39 = vld [vmem:[%s21582_s1 + $0x180] sm:$0xff]  ;;  %74 = vst.msk [vmem:[#allocation2 + $0x140] sm:$0xff] %vm21657_vm4, %v15019_v35  ;;  %v12750_v14 = vpack.c.bf16 %v14889_v27, %v14884_v48  ;;  %v15068_v50 = vld [vmem:[%s21582_s1 + $0x190] sm:$0xff]  ;;  %21861 = vst [vmem:[#allocation26_spill] sm:$0xff] %v15084_v32  ;;  %12783 = vmatprep.subr.bf16.mxu1 %v12782_v53  ;;  %v12790_v5 = vpack.c.bf16 %v14958_v9, %v14953_v3  ;;  %vm393_vm9 = vcmask 687552  }
  0x2c   :  { %21857 = vst [vmem:[#allocation24_spill] sm:$0xff] %v15028_v31  ;;  %v15053_v44 = vsel %vm418_vm0, %v21858_v0, %v450_v47  ;;  %v144_v31 = vrot.slane %v14894_v33, 1  ;;  %v15073_v51 = vld [vmem:[%s21582_s1 + $0x1b0] sm:$0xff]  ;;  %v15091_v27 = vld [vmem:[%s21582_s1 + $0x1c8] sm:$0xff]  ;;  %v452_v58 = vrot.slane %v14894_v33, 3  ;;  %v15108_v0 = vld [vmem:[%s21582_s1 + $0x1d8] sm:$0xff]  ;;  %12747 = vmatpush1.bf16.msra.mxu0 %v12746_v60 }
  0x2d   :  { %21859 = vst [vmem:[#allocation25_spill] sm:$0xff] %v15053_v44  ;;  %v15096_v7 = vld [vmem:[%s21582_s1 + $0x1e8] sm:$0xff]  ;;  %v15113_v41 = vld [vmem:[%s21581_s0 + $0xe0] sm:$0xff]  ;;  %v15131_v53 = vld [vmem:[%s21582_s1 + $0x1f8] sm:$0xff]  ;;  %12785 = vmatpush1.bf16.msra.mxu1 %v12784_v10  ;;  %v21863_v3 = vrot.slane %v14543_v11, 4  ;;  %331 = vrot.lane.b32.xlu1 %v14546_v12, %s14317_s22  ;;  %v300_v10 = vrot.slane %v14740_v61, 2 }
  0x2e   :  { %v15099_v8 = vsel %vm21671_vm1, %v142_v55, %v144_v31  ;;  %v15118_v31 = vld [vmem:[%s21581_s0 + $0xe8] sm:$0xff]  ;;  %v15136_v21 = vld [vmem:[%s21582_s1 + $0x1c0] sm:$0xff]  ;;  %75 = vst.msk [vmem:[#allocation2 + $0x150] sm:$0xff] %vm21657_vm4, %v15113_v41  ;;  %v15154_v48 = vsel %vm418_vm0, %v450_v47, %v452_v58  ;;  %v15161_v32 = vld [vmem:[%s21582_s1 + $0x1d0] sm:$0xff]  ;;  %177 = vrot.lane.b32.xlu0 %v14559_v17, %s14315_s10  ;;  %v146_v58 = vrot.slane %v14740_v61, 1  ;;  %12749 = vmatprep.subr.bf16.mxu0 %v12748_v6  ;;  %v147_v17 = vrot.slane %v14745_v62, 1 }
  0x2f   :  { %21862 = vst [vmem:[#allocation27_spill] sm:$0xff] %v15099_v8  ;;  %v15141_v33 = vld [vmem:[%s21582_s1 + $0x1e0] sm:$0xff]  ;;  %76 = vst.msk [vmem:[#allocation2 + $0x160] sm:$0xff] %vm21657_vm4, %v15118_v31  ;;  %v15151_v55 = vsel %vm572_vm2, %v21863_v3, %v606_v57  ;;  %v15166_v60 = vld [vmem:[%s21582_s1 + $0x1f0] sm:$0xff]  ;;  %v301_v57 = vrot.slane %v14745_v62, 2  ;;  %12787 = vmatprep.subr.bf16.mxu1 %v12786_v13  ;;  %v608_v9 = vrot.slane %v14740_v61, 4 }
  0x30   :  { %21864 = vst [vmem:[#allocation28_spill] sm:$0xff] %v15151_v55  ;;  %21865 = vst [vmem:[#allocation29_spill] sm:$0xff] %v15154_v48  ;;  %v15171_v11 = vld [vmem:[%s21582_s1 + $0x208] sm:$0xff]  ;;  %v15190_v12 = vld [vmem:[%s21582_s1 + $0x218] sm:$0xff]  ;;  %v609_v55 = vrot.slane %v14745_v62, 4  ;;  %12751 = vmatpush1.bf16.msra.mxu0 %v12750_v14  ;;  %v454_v8 = vrot.slane %v14740_v61, 3 }
  0x31   :  { %v15185_v3 = vld [vmem:[%s21582_s1 + $0x228] sm:$0xf]  ;;  %v15202_v48 = vld [vmem:[%s21582_s1 + $0x238] sm:$0xf]  ;;  %v15207_v6 = vld [vmem:[%s21582_s1 + $0x200] sm:$0xff]  ;;  %v15215_v47 = vsel %vm21667_vm3, %v300_v10, %v301_v57  ;;  %12789 = vmatpush1.bf16.msra.mxu1 %v12788_v15  ;;  %v15232_v10 = vsel %vm21671_vm1, %v146_v58, %v147_v17  ;;  %639 = vrot.lane.b32.xlu1 %v14562_v18, %s14316_s21  ;;  %v21867_v15 = vpack.c.bf16 %v14924_v28, %v14919_v36  ;;  %v457_v36 = vrot.slane %v14929_v4, 3 }
  0x32   :  { %v15212_v13 = vld [vmem:[%s21582_s1 + $0x220] sm:$0xf]  ;;  %21866 = vst [vmem:[#allocation30_spill] sm:$0xff] %v15215_v47  ;;  %v15224_v44 = vld [vmem:[%s21582_s1 + $0x210] sm:$0xff]  ;;  %v455_v47 = vrot.slane %v14745_v62, 3  ;;  %485 = vrot.lane.b32.xlu0 %v14565_v19, %s14314_s9  ;;  %v15246_v14 = vsel %vm572_vm2, %v608_v9, %v609_v55  ;;  %12791 = vmatprep.subr.bf16.mxu1 %v12790_v5  ;;  %v303_v19 = vrot.slane %v14929_v4, 2 }
  0x33   :  { %v44_v22 = vld [vmem:[%s21581_s0 + $0xb8] sm:$0xf]  ;;  %12753 = vmatprep.subr.bf16.mxu0 %v21867_v15  ;;  %v149_v9 = vrot.slane %v14929_v4, 1  ;;  %v15265_v61 = vld [vmem:[%s21581_s0 + $0xf0] sm:$0xff]  ;;  %v611_v62 = vrot.slane %v14929_v4, 4  ;;  %v21870_v15 = vpack.c.bf16 %v15000_v56, %v14995_v1  ;;  %v307_v56 = vrot.slane %v14965_v52, 2 }
  0x34   :  { %v15256_v58 = vsel %vm418_vm0, %v454_v8, %v455_v47  ;;  %v305_v28 = vrot.slane %v44_v22, 2  ;;  %v151_v5 = vrot.slane %v44_v22, 1  ;;  %77 = vst.msk [vmem:[#allocation2 + $0x170] sm:$0xff] %vm21657_vm4, %v15265_v61  ;;  %v21869_v8 = vpack.c.bf16 %v14990_v49, %v14985_v40 }
  0x35   :  { %21868 = vst [vmem:[#allocation31_spill] sm:$0xff] %v15256_v58  ;;  %12793 = vmatpush1.bf16.msra.mxu1 %v21870_v15  ;;  %v15278_v18 = vsel %vm21667_vm3, %v301_v57, %v303_v19  ;;  %v15281_v38 = vsel %vm21671_vm1, %v147_v17, %v149_v9  ;;  %v613_v4 = vrot.slane %v44_v22, 4  ;;  %v459_v58 = vrot.slane %v44_v22, 3  ;;  %333 = vrot.lane.b32.xlu1 %v14568_v20, %s14317_s22 }
  0x36   :  { %12755 = vmatpush1.bf16.msra.mxu0 %v21869_v8  ;;  %179 = vrot.lane.b32.xlu0 %v14571_v23, %s14315_s10  ;;  %v15288_v40 = vsel %vm572_vm2, %v609_v55, %v611_v62  ;;  %v15291_v49 = vsel %vm418_vm0, %v455_v47, %v457_v36  ;;  %v15294_v1 = vsel %vm21667_vm3, %v303_v19, %v305_v28  ;;  %v308_v57 = vrot.slane %v14970_v2, 2 }
  0x37   :  { %v21871_v22 = vpack.c.bf16 %v15010_v42, %v15005_v59  ;;  %v21872_v20 = vpack.c.bf16 %v15041_v25, %v15036_v63  ;;  %v15304_v23 = vsel %vm21671_vm1, %v149_v9, %v151_v5  ;;  %v15307_v55 = vsel %vm572_vm2, %v611_v62, %v613_v4  ;;  %v48_v25 = vld [vmem:[%s21581_s0 + $0xd8] sm:$0xf] }
  0x38   :  { %v15310_v47 = vsel %vm418_vm0, %v457_v36, %v459_v58  ;;  %v153_v17 = vrot.slane %v14965_v52, 1  ;;  %v154_v59 = vrot.slane %v14970_v2, 1  ;;  %v615_v42 = vrot.slane %v14965_v52, 4 }
  0x39   :  { %12757 = vmatprep.subr.bf16.mxu0 %v21871_v22  ;;  %12795 = vmatprep.subr.bf16.mxu1 %v21872_v20  ;;  %v616_v63 = vrot.slane %v14970_v2, 4  ;;  %v21873_v62 = vpack.c.bf16 %v15063_v26, %v15046_v39  ;;  %v21874_v58 = vpack.c.bf16 %v15073_v51, %v15068_v50  ;;  %v15327_v19 = vsel %vm21667_vm3, %v307_v56, %v308_v57 }
  0x3a   :  { %v461_v9 = vrot.slane %v14965_v52, 3  ;;  %v462_v36 = vrot.slane %v14970_v2, 3  ;;  %v310_v28 = vrot.slane %v15019_v35, 2  ;;  %641 = vrot.lane.b32.xlu1 %v14574_v24, %s14316_s21  ;;  %487 = vrot.lane.b32.xlu0 %v14583_v29, %s14314_s9  ;;  %v15337_v26 = vsel %vm21671_vm1, %v153_v17, %v154_v59 }
  0x3b   :  { %12759 = vmatpush1.bf16.msra.mxu0 %v21873_v62  ;;  %12797 = vmatpush1.bf16.msra.mxu1 %v21874_v58  ;;  %v15340_v39 = vsel %vm572_vm2, %v615_v42, %v616_v63  ;;  %v156_v50 = vrot.slane %v15019_v35, 1  ;;  %v618_v52 = vrot.slane %v15019_v35, 4  ;;  %v21875_v2 = vpack.c.bf16 %v15096_v7, %v15091_v27 }
  0x3c   :  { %v21876_v24 = vpack.c.bf16 %v15131_v53, %v15108_v0  ;;  %v15351_v29 = vsel %vm418_vm0, %v461_v9, %v462_v36  ;;  %v15354_v51 = vsel %vm21667_vm3, %v308_v57, %v310_v28  ;;  %v464_v5 = vrot.slane %v15019_v35, 3 }
  0x3d   :  { %12761 = vmatprep.subr.bf16.mxu0 %v21875_v2  ;;  %v312_v8 = vrot.slane %v48_v25, 2  ;;  %v15363_v27 = vsel %vm21671_vm1, %v154_v59, %v156_v50  ;;  %v15366_v7 = vsel %vm572_vm2, %v616_v63, %v618_v52  ;;  %v158_v0 = vrot.slane %v48_v25, 1 }
  0x3e   :  { %12799 = vmatprep.subr.bf16.mxu1 %v21876_v24  ;;  %v620_v53 = vrot.slane %v48_v25, 4  ;;  %v21879_v4 = vpack.c.bf16 %v15141_v33, %v15136_v21  ;;  %v21880_v35 = vpack.c.bf16 %v15166_v60, %v15161_v32  ;;  %v15375_v56 = vsel %vm418_vm0, %v462_v36, %v464_v5  ;;  %335 = vrot.lane.b32.xlu1 %v14588_v30, %s14317_s22 }
  0x3f   :  { %v15378_v22 = vsel %vm21667_vm3, %v310_v28, %v312_v8  ;;  %v466_v20 = vrot.slane %v48_v25, 3  ;;  %v314_v57 = vrot.slane %v15113_v41, 2  ;;  %181 = vrot.lane.b32.xlu0 %v14595_v34, %s14315_s10  ;;  %v15386_v33 = vsel %vm21671_vm1, %v156_v50, %v158_v0  ;;  %v21886_v0 = vld [vmem:[#allocation4_spill] sm:$0xff] }
  0x40   :  { %12763 = vmatpush1.bf16.msra.mxu0 %v21879_v4  ;;  %12801 = vmatpush1.bf16.msra.mxu1 %v21880_v35  ;;  %v15389_v32 = vsel %vm572_vm2, %v618_v52, %v620_v53  ;;  %v315_v21 = vrot.slane %v15118_v31, 2  ;;  %v160_v60 = vrot.slane %v15113_v41, 1  ;;  %v21881_v17 = vpack.c.bf16 %v15185_v3, %v15171_v11  ;;  %v52_v11 = vld [vmem:[%s21581_s0 + $0xf8] sm:$0xf]  ;;  %v21888_v35 = vld [vmem:[#allocation5_spill] sm:$0xff] }
  0x41   :  { %v21882_v30 = vpack.c.bf16 %v15202_v48, %v15190_v12  ;;  %v15404_v34 = vsel %vm418_vm0, %v464_v5, %v466_v20  ;;  %v161_v59 = vrot.slane %v15118_v31, 1  ;;  %v622_v42 = vrot.slane %v15113_v41, 4  ;;  %v21889_v20 = vld [vmem:[#allocation6_spill] sm:$0xff] }
  0x42   :  { %12766 = vmatprep.subr.msk.bf16.mxu0 %vm15358_vm6, %v21881_v17  ;;  %v623_v63 = vrot.slane %v15118_v31, 4  ;;  %v15413_v3 = vsel %vm21667_vm3, %v314_v57, %v315_v21  ;;  %v468_v48 = vrot.slane %v15113_v41, 3  ;;  %v469_v12 = vrot.slane %v15118_v31, 3  ;;  %643 = vrot.lane.b32.xlu1 %v14610_v43, %s14316_s21  ;;  %v21893_v57 = vld [vmem:[#allocation10_spill] sm:$0xff]  ;;  %v21896_v17 = vld [vmem:[#allocation13_spill] sm:$0xff] }
  0x43   :  { %12804 = vmatprep.subr.msk.bf16.mxu1 %vm15358_vm6, %v21882_v30  ;;  %v317_v25 = vrot.slane %v15265_v61, 2  ;;  %v21883_v62 = vpack.c.bf16 %v15212_v13, %v15207_v6  ;;  %v21884_v58 = vpack.c.bf16 %v15229_v45, %v15224_v44  ;;  %v15429_v9 = vsel %vm21671_vm1, %v160_v60, %v161_v59  ;;  %489 = vrot.lane.b32.xlu0 %v14856_v54, %s14314_s9  ;;  %v21895_v60 = vld [vmem:[#allocation12_spill] sm:$0xff]  ;;  %v21897_v30 = vld [vmem:[#allocation14_spill] sm:$0xff] }
  0x44   :  { %v15432_v41 = vsel %vm572_vm2, %v622_v42, %v623_v63  ;;  %v163_v31 = vrot.slane %v15265_v61, 1  ;;  %v625_v36 = vrot.slane %v15265_v61, 4  ;;  %v15441_v45 = vsel %vm418_vm0, %v468_v48, %v469_v12  ;;  %v21899_v42 = vld [vmem:[#allocation16_spill] sm:$0xff]  ;;  %v21902_v48 = vld [vmem:[#allocation19_spill] sm:$0xff] }
  0x45   :  { %12769 = vmatpush1.bf16.msk.msra.mxu0 %vm15358_vm6, %v21883_v62  ;;  %12807 = vmatpush1.bf16.msk.msra.mxu1 %vm15358_vm6, %v21884_v58  ;;  %v15444_v44 = vsel %vm21667_vm3, %v315_v21, %v317_v25  ;;  %v471_v6 = vrot.slane %v15265_v61, 3  ;;  %v319_v13 = vrot.slane %v52_v11, 2  ;;  %v165_v52 = vrot.slane %v52_v11, 1  ;;  %v21894_v21 = vld [vmem:[#allocation11_spill] sm:$0xff]  ;;  %v21905_v62 = vld [vmem:[#allocation22_spill] sm:$0xff] }
  0x46   :  { %v15448_v28 = vsel %vm21671_vm1, %v161_v59, %v163_v31  ;;  %v15451_v50 = vsel %vm572_vm2, %v623_v63, %v625_v36  ;;  %v627_v43 = vrot.slane %v52_v11, 4  ;;  %v473_v24 = vrot.slane %v52_v11, 3  ;;  %337 = vrot.lane.b32.xlu1 %v14863_v37, %s14317_s22  ;;  %v21890_v37 = vld [vmem:[#allocation7_spill] sm:$0xff]  ;;  %v21900_v63 = vld [vmem:[#allocation17_spill] sm:$0xff]  ;;  %v21901_v11 = vld [vmem:[#allocation18_spill] sm:$0xff] }
  0x47   :  { %v15454_v2 = vsel %vm418_vm0, %v469_v12, %v471_v6  ;;  %v15457_v54 = vsel %vm21667_vm3, %v317_v25, %v319_v13  ;;  %v15460_v5 = vsel %vm21671_vm1, %v163_v31, %v165_v52  ;;  %183 = vrot.lane.b32.xlu0 %v14940_v46, %s14315_s10  ;;  %v21885_v15 = vrot.slane %v14554_v16, 3  ;;  %v21891_v46 = vld [vmem:[#allocation8_spill] sm:$0xff]  ;;  %v21892_v16 = vld [vmem:[#allocation9_spill] sm:$0xff]  ;;  %v21898_v59 = vld [vmem:[#allocation15_spill] sm:$0xff] }
  0x48   :  { %v15463_v61 = vsel %vm572_vm2, %v625_v36, %v627_v43  ;;  %v15470_v8 = vsel %vm418_vm0, %v471_v6, %v473_v24  ;;  %v21887_v53 = vrot.slane %v21886_v0, 3  ;;  %v21903_v12 = vld [vmem:[#allocation20_spill] sm:$0xff]  ;;  %v21904_v25 = vld [vmem:[#allocation21_spill] sm:$0xff]  ;;  %v21906_v58 = vld [vmem:[#allocation23_spill] sm:$0xff]  ;;  %vm547_vm10 = vcmask 917152  }
  0x49   :  { %v21907_v31 = vld [vmem:[#allocation24_spill] sm:$0xff]  ;;  %v21908_v36 = vld [vmem:[#allocation25_spill] sm:$0xff]  ;;  %v21909_v6 = vld [vmem:[#allocation26_spill] sm:$0xff]  ;;  %vm701_vm11 = vcmask 1048448   ;;  %vm2621_vm12 = vsmask.f32 256 }
  0x4a   :  { %v439_v4 = vsel %vm418_vm0, %v21887_v53, %v21885_v15  ;;  %645 = vrot.lane.b32.xlu1 %v21888_v35, %s14316_s21  ;;  %v21910_v13 = vld [vmem:[#allocation27_spill] sm:$0xff]  ;;  %v21911_v24 = vld [vmem:[#allocation28_spill] sm:$0xff]  ;;  %v21912_v15 = vld [vmem:[#allocation29_spill] sm:$0xff]  ;;  %vm2620_vm13 = vcmask 1040384   ;;  %vm21670_vm14 = vsmask.f32 4352 }
  0x4b   :  { %491 = vrot.lane.b32.xlu0 %v439_v4, %s14314_s9  ;;  %v21913_v4 = vld [vmem:[#allocation30_spill] sm:$0xff]  ;;  %vm21678_vm15 = vcmask 1044484   ;;  %vm2878_vm0 = vsmask.f32 1280  ;;  %vm21681_vm2 = vcmask 1041409   ;;  %vm16333_vm5 = vmand %vm2620_vm13, %vm2621_vm12 }
  0x4c   :  { %vm16339_vm6 = vmand %vm21678_vm15, %vm21670_vm14  ;;  %vm2983_vm4 = vsmask.f32 7942  ;;  %vm21691_vm3 = vsmask.f32 2304 }
  0x4e   :  { %339 = vrot.lane.b32.xlu1 %v21889_v20, %s14317_s22 }
  0x4f   :  { %185 = vrot.lane.b32.xlu0 %v21890_v37, %s14315_s10  ;;  %v21914_v37 = vld [vmem:[#allocation31_spill] sm:$0xff] }
  0x52   :  { %647 = vrot.lane.b32.xlu1 %v21891_v46, %s14316_s21 }
  0x53   :  { %493 = vrot.lane.b32.xlu0 %v21892_v16, %s14314_s9 }
  0x56   :  { %341 = vrot.lane.b32.xlu1 %v21893_v57, %s14317_s22 }
  0x57   :  { %187 = vrot.lane.b32.xlu0 %v21894_v21, %s14315_s10 }
  0x5a   :  { %649 = vrot.lane.b32.xlu1 %v21895_v60, %s14316_s21 }
  0x5b   :  { %495 = vrot.lane.b32.xlu0 %v21896_v17, %s14314_s9 }
  0x5e   :  { %343 = vrot.lane.b32.xlu1 %v21897_v30, %s14317_s22 }
  0x5f   :  { %189 = vrot.lane.b32.xlu0 %v21898_v59, %s14315_s10 }
  0x62   :  { %651 = vrot.lane.b32.xlu1 %v21899_v42, %s14316_s21 }
  0x63   :  { %497 = vrot.lane.b32.xlu0 %v21900_v63, %s14314_s9 }
  0x66   :  { %345 = vrot.lane.b32.xlu1 %v21901_v11, %s14317_s22 }
  0x67   :  { %191 = vrot.lane.b32.xlu0 %v21902_v48, %s14315_s10 }
  0x6a   :  { %653 = vrot.lane.b32.xlu1 %v21903_v12, %s14316_s21 }
  0x6b   :  { %499 = vrot.lane.b32.xlu0 %v21904_v25, %s14314_s9 }
  0x6e   :  { %347 = vrot.lane.b32.xlu1 %v21905_v62, %s14317_s22 }
  0x6f   :  { %193 = vrot.lane.b32.xlu0 %v21906_v58, %s14315_s10 }
  0x72   :  { %655 = vrot.lane.b32.xlu1 %v21907_v31, %s14316_s21 }
  0x73   :  { %501 = vrot.lane.b32.xlu0 %v21908_v36, %s14314_s9 }
  0x76   :  { %349 = vrot.lane.b32.xlu1 %v21909_v6, %s14317_s22 }
  0x77   :  { %195 = vrot.lane.b32.xlu0 %v21910_v13, %s14315_s10  ;;  %v476_v52 = vpop.permute.xlu1 %475  ;;  %v168_v43 = vpop.permute.xlu0 %167 }
  0x78   :  { %240 = vst.msk [vmem:[#allocation2] sm:$0xff] %vm239_vm7, %v168_v43 }
  0x7a   :  { %657 = vrot.lane.b32.xlu1 %v21911_v24, %s14316_s21 }
  0x7b   :  { %503 = vrot.lane.b32.xlu0 %v21912_v15, %s14314_s9  ;;  %v630_v0 = vpop.permute.xlu1 %629  ;;  %v322_v53 = vpop.permute.xlu0 %321 }
  0x7c   :  { %704 = vst.msk [vmem:[#allocation2 + $0x8] sm:$0xff] %vm703_vm8, %v630_v0 }
  0x7d   :  { %394 = vst.msk [vmem:[#allocation2] sm:$0xff] %vm393_vm9, %v322_v53 }
  0x7e   :  { %548 = vst.msk [vmem:[#allocation2] sm:$0xff] %vm547_vm10, %v476_v52  ;;  %351 = vrot.lane.b32.xlu1 %v21913_v4, %s14317_s22 }
  0x7f   :  { %197 = vrot.lane.b32.xlu0 %v15232_v10, %s14315_s10  ;;  %702 = vst.msk [vmem:[#allocation2] sm:$0xff] %vm701_vm11, %v630_v0  ;;  %v324_v35 = vpop.permute.xlu1 %323  ;;  %v170_v20 = vpop.permute.xlu0 %169 }
  0x80   :  { %241 = vst.msk [vmem:[#allocation2 + $0x10] sm:$0xff] %vm239_vm7, %v170_v20 }
  0x81   :  { %395 = vst.msk [vmem:[#allocation2 + $0x10] sm:$0xff] %vm393_vm9, %v324_v35 }
  0x82   :  { %659 = vrot.lane.b32.xlu1 %v15246_v14, %s14316_s21 }
  0x83   :  { %505 = vrot.lane.b32.xlu0 %v21914_v37, %s14314_s9  ;;  %v632_v46 = vpop.permute.xlu1 %631  ;;  %v478_v16 = vpop.permute.xlu0 %477  ;;  %v752_v57 = vld [vmem:[#allocation2 + $0x8] sm:$0xff] }
  0x84   :  { %706 = vst.msk [vmem:[#allocation2 + $0x18] sm:$0xff] %vm703_vm8, %v632_v46  ;;  %11220 = vmatprep.mubr.msk.f32.mxu0 %vm703_vm8, %v752_v57  ;;  %11246 = vmatprep.mubr.msk.f32.mxu1 %vm703_vm8, %v752_v57 }
  0x85   :  { %549 = vst.msk [vmem:[#allocation2 + $0x10] sm:$0xff] %vm547_vm10, %v478_v16 }
  0x86   :  { %705 = vst.msk [vmem:[#allocation2 + $0x10] sm:$0xff] %vm701_vm11, %v632_v46  ;;  %353 = vrot.lane.b32.xlu1 %v15278_v18, %s14317_s22  ;;  %v751_v10 = vld [vmem:[#allocation2] sm:$0xff] }
  0x87   :  { %199 = vrot.lane.b32.xlu0 %v15281_v38, %s14315_s10  ;;  %1042 = vmatmul.mubr.f32.vlgmr.msra.gmra.mrb[0].mxu0 %v751_v10  ;;  %v326_v14 = vpop.permute.xlu1 %325  ;;  %v172_v21 = vpop.permute.xlu0 %171 }
  0x88   :  { %1251 = vmatmul.mubr.f32.vlgmr.msra.gmra.mrb[0].mxu1 %v751_v10  ;;  %242 = vst.msk [vmem:[#allocation2 + $0x20] sm:$0xff] %vm239_vm7, %v172_v21 }
  0x89   :  { %396 = vst.msk [vmem:[#allocation2 + $0x20] sm:$0xff] %vm393_vm9, %v326_v14 }
  0x8a   :  { %661 = vrot.lane.b32.xlu1 %v15288_v40, %s14316_s21 }
  0x8b   :  { %507 = vrot.lane.b32.xlu0 %v15291_v49, %s14314_s9  ;;  %v634_v60 = vpop.permute.xlu1 %633  ;;  %v480_v18 = vpop.permute.xlu0 %479  ;;  %v754_v17 = vld [vmem:[#allocation2 + $0x18] sm:$0xff] }
  0x8c   :  { %708 = vst.msk [vmem:[#allocation2 + $0x28] sm:$0xff] %vm703_vm8, %v634_v60  ;;  %11221 = vmatprep.mubr.msk.f32.mxu0 %vm703_vm8, %v754_v17  ;;  %11247 = vmatprep.mubr.msk.f32.mxu1 %vm703_vm8, %v754_v17 }
  0x8d   :  { %550 = vst.msk [vmem:[#allocation2 + $0x20] sm:$0xff] %vm547_vm10, %v480_v18  ;;  %v753_v38 = vld [vmem:[#allocation2 + $0x10] sm:$0xff] }
  0x8e   :  { %707 = vst.msk [vmem:[#allocation2 + $0x20] sm:$0xff] %vm701_vm11, %v634_v60  ;;  %355 = vrot.lane.b32.xlu1 %v15294_v1, %s14317_s22  ;;  %1048 = vmatmul.mubr.f32.gmra.mrb[2].mxu0 %v753_v38 }
  0x8f   :  { %201 = vrot.lane.b32.xlu0 %v15304_v23, %s14315_s10  ;;  %1257 = vmatmul.mubr.f32.gmra.mrb[2].mxu1 %v753_v38  ;;  %v328_v40 = vpop.permute.xlu1 %327  ;;  %v174_v49 = vpop.permute.xlu0 %173 }
  0x90   :  { %243 = vst.msk [vmem:[#allocation2 + $0x30] sm:$0xff] %vm239_vm7, %v174_v49 }
  0x91   :  { %397 = vst.msk [vmem:[#allocation2 + $0x30] sm:$0xff] %vm393_vm9, %v328_v40 }
  0x92   :  { %663 = vrot.lane.b32.xlu1 %v15307_v55, %s14316_s21 }
  0x93   :  { %509 = vrot.lane.b32.xlu0 %v15310_v47, %s14314_s9  ;;  %v636_v30 = vpop.permute.xlu1 %635  ;;  %v482_v59 = vpop.permute.xlu0 %481  ;;  %v756_v1 = vld [vmem:[#allocation2 + $0x28] sm:$0xff] }
  0x94   :  { %710 = vst.msk [vmem:[#allocation2 + $0x38] sm:$0xff] %vm703_vm8, %v636_v30  ;;  %11222 = vmatprep.mubr.msk.f32.mxu0 %vm703_vm8, %v756_v1  ;;  %11248 = vmatprep.mubr.msk.f32.mxu1 %vm703_vm8, %v756_v1 }
  0x95   :  { %551 = vst.msk [vmem:[#allocation2 + $0x30] sm:$0xff] %vm547_vm10, %v482_v59  ;;  %v755_v23 = vld [vmem:[#allocation2 + $0x20] sm:$0xff] }
  0x96   :  { %709 = vst.msk [vmem:[#allocation2 + $0x30] sm:$0xff] %vm701_vm11, %v636_v30  ;;  %357 = vrot.lane.b32.xlu1 %v15327_v19, %s14317_s22  ;;  %1054 = vmatmul.mubr.f32.gmra.mrb[4].mxu0 %v755_v23 }
  0x97   :  { %203 = vrot.lane.b32.xlu0 %v15337_v26, %s14315_s10  ;;  %1263 = vmatmul.mubr.f32.gmra.mrb[4].mxu1 %v755_v23  ;;  %v330_v55 = vpop.permute.xlu1 %329 }
  0x98   :  { %v176_v47 = vpop.permute.xlu0 %175 }
  0x99   :  { %244 = vst.msk [vmem:[#allocation2 + $0x40] sm:$0xff] %vm239_vm7, %v176_v47 }
  0x9a   :  { %398 = vst.msk [vmem:[#allocation2 + $0x40] sm:$0xff] %vm393_vm9, %v330_v55  ;;  %665 = vrot.lane.b32.xlu1 %v15340_v39, %s14316_s21 }
  0x9b   :  { %511 = vrot.lane.b32.xlu0 %v15351_v29, %s14314_s9  ;;  %v638_v42 = vpop.permute.xlu1 %637  ;;  %v758_v19 = vld [vmem:[#allocation2 + $0x38] sm:$0xff] }
  0x9c   :  { %v484_v63 = vpop.permute.xlu0 %483  ;;  %712 = vst.msk [vmem:[#allocation2 + $0x48] sm:$0xff] %vm703_vm8, %v638_v42  ;;  %11223 = vmatprep.mubr.msk.f32.mxu0 %vm703_vm8, %v758_v19  ;;  %11249 = vmatprep.mubr.msk.f32.mxu1 %vm703_vm8, %v758_v19 }
  0x9d   :  { %552 = vst.msk [vmem:[#allocation2 + $0x40] sm:$0xff] %vm547_vm10, %v484_v63  ;;  %v757_v26 = vld [vmem:[#allocation2 + $0x30] sm:$0xff] }
  0x9e   :  { %711 = vst.msk [vmem:[#allocation2 + $0x40] sm:$0xff] %vm701_vm11, %v638_v42  ;;  %359 = vrot.lane.b32.xlu1 %v15354_v51, %s14317_s22  ;;  %1060 = vmatmul.mubr.f32.gmra.mrb[6].mxu0 %v757_v26 }
  0x9f   :  { %205 = vrot.lane.b32.xlu0 %v15363_v27, %s14315_s10  ;;  %1269 = vmatmul.mubr.f32.gmra.mrb[6].mxu1 %v757_v26  ;;  %v332_v39 = vpop.permute.xlu1 %331 }
  0xa0   :  { %v178_v29 = vpop.permute.xlu0 %177 }
  0xa1   :  { %245 = vst.msk [vmem:[#allocation2 + $0x50] sm:$0xff] %vm239_vm7, %v178_v29 }
  0xa2   :  { %399 = vst.msk [vmem:[#allocation2 + $0x50] sm:$0xff] %vm393_vm9, %v332_v39  ;;  %667 = vrot.lane.b32.xlu1 %v15366_v7, %s14316_s21 }
  0xa3   :  { %513 = vrot.lane.b32.xlu0 %v15375_v56, %s14314_s9  ;;  %v640_v11 = vpop.permute.xlu1 %639  ;;  %v760_v51 = vld [vmem:[#allocation2 + $0x48] sm:$0xff] }
  0xa4   :  { %v486_v48 = vpop.permute.xlu0 %485  ;;  %714 = vst.msk [vmem:[#allocation2 + $0x58] sm:$0xff] %vm703_vm8, %v640_v11  ;;  %11224 = vmatprep.mubr.msk.f32.mxu0 %vm703_vm8, %v760_v51  ;;  %11250 = vmatprep.mubr.msk.f32.mxu1 %vm703_vm8, %v760_v51 }
  0xa5   :  { %553 = vst.msk [vmem:[#allocation2 + $0x50] sm:$0xff] %vm547_vm10, %v486_v48  ;;  %v759_v27 = vld [vmem:[#allocation2 + $0x40] sm:$0xff] }
  0xa6   :  { %713 = vst.msk [vmem:[#allocation2 + $0x50] sm:$0xff] %vm701_vm11, %v640_v11  ;;  %361 = vrot.lane.b32.xlu1 %v15378_v22, %s14317_s22  ;;  %1066 = vmatmul.mubr.f32.gmra.mrb[8].mxu0 %v759_v27 }
  0xa7   :  { %207 = vrot.lane.b32.xlu0 %v15386_v33, %s14315_s10  ;;  %1275 = vmatmul.mubr.f32.gmra.mrb[8].mxu1 %v759_v27  ;;  %v334_v7 = vpop.permute.xlu1 %333 }
  0xa8   :  { %v180_v56 = vpop.permute.xlu0 %179 }
  0xa9   :  { %246 = vst.msk [vmem:[#allocation2 + $0x60] sm:$0xff] %vm239_vm7, %v180_v56 }
  0xaa   :  { %400 = vst.msk [vmem:[#allocation2 + $0x60] sm:$0xff] %vm393_vm9, %v334_v7  ;;  %669 = vrot.lane.b32.xlu1 %v15389_v32, %s14316_s21 }
  0xab   :  { %515 = vrot.lane.b32.xlu0 %v15404_v34, %s14314_s9  ;;  %v762_v22 = vld [vmem:[#allocation2 + $0x58] sm:$0xff] }
  0xac   :  { %v642_v12 = vpop.permute.xlu1 %641  ;;  %v488_v25 = vpop.permute.xlu0 %487  ;;  %11225 = vmatprep.mubr.msk.f32.mxu0 %vm703_vm8, %v762_v22  ;;  %11251 = vmatprep.mubr.msk.f32.mxu1 %vm703_vm8, %v762_v22 }
  0xad   :  { %716 = vst.msk [vmem:[#allocation2 + $0x68] sm:$0xff] %vm703_vm8, %v642_v12  ;;  %v761_v33 = vld [vmem:[#allocation2 + $0x50] sm:$0xff] }
  0xae   :  { %554 = vst.msk [vmem:[#allocation2 + $0x60] sm:$0xff] %vm547_vm10, %v488_v25  ;;  %363 = vrot.lane.b32.xlu1 %v15413_v3, %s14317_s22  ;;  %1072 = vmatmul.mubr.f32.gmra.mrb[10].mxu0 %v761_v33 }
  0xaf   :  { %715 = vst.msk [vmem:[#allocation2 + $0x60] sm:$0xff] %vm701_vm11, %v642_v12  ;;  %209 = vrot.lane.b32.xlu0 %v15429_v9, %s14315_s10  ;;  %1281 = vmatmul.mubr.f32.gmra.mrb[10].mxu1 %v761_v33 }
  0xb0   :  { %v336_v32 = vpop.permute.xlu1 %335 }
  0xb1   :  { %v182_v34 = vpop.permute.xlu0 %181 }
  0xb2   :  { %247 = vst.msk [vmem:[#allocation2 + $0x70] sm:$0xff] %vm239_vm7, %v182_v34  ;;  %671 = vrot.lane.b32.xlu1 %v15432_v41, %s14316_s21 }
  0xb3   :  { %401 = vst.msk [vmem:[#allocation2 + $0x70] sm:$0xff] %vm393_vm9, %v336_v32  ;;  %517 = vrot.lane.b32.xlu0 %v15441_v45, %s14314_s9 }
  0xb4   :  { %v644_v62 = vpop.permute.xlu1 %643  ;;  %v764_v3 = vld [vmem:[#allocation2 + $0x68] sm:$0xff] }
  0xb5   :  { %v490_v58 = vpop.permute.xlu0 %489  ;;  %718 = vst.msk [vmem:[#allocation2 + $0x78] sm:$0xff] %vm703_vm8, %v644_v62  ;;  %11226 = vmatprep.mubr.msk.f32.mxu0 %vm703_vm8, %v764_v3  ;;  %11252 = vmatprep.mubr.msk.f32.mxu1 %vm703_vm8, %v764_v3 }
  0xb6   :  { %555 = vst.msk [vmem:[#allocation2 + $0x70] sm:$0xff] %vm547_vm10, %v490_v58  ;;  %v763_v9 = vld [vmem:[#allocation2 + $0x60] sm:$0xff]  ;;  %365 = vrot.lane.b32.xlu1 %v15444_v44, %s14317_s22 }
  0xb7   :  { %717 = vst.msk [vmem:[#allocation2 + $0x70] sm:$0xff] %vm701_vm11, %v644_v62  ;;  %211 = vrot.lane.b32.xlu0 %v15448_v28, %s14315_s10  ;;  %1078 = vmatmul.mubr.f32.gmra.mrb[12].mxu0 %v763_v9 }
  0xb8   :  { %1287 = vmatmul.mubr.f32.gmra.mrb[12].mxu1 %v763_v9  ;;  %v338_v41 = vpop.permute.xlu1 %337 }
  0xb9   :  { %v184_v45 = vpop.permute.xlu0 %183 }
  0xba   :  { %248 = vst.msk [vmem:[#allocation2 + $0x80] sm:$0xff] %vm239_vm7, %v184_v45  ;;  %673 = vrot.lane.b32.xlu1 %v15451_v50, %s14316_s21 }
  0xbb   :  { %402 = vst.msk [vmem:[#allocation2 + $0x80] sm:$0xff] %vm393_vm9, %v338_v41  ;;  %519 = vrot.lane.b32.xlu0 %v15454_v2, %s14314_s9 }
  0xbc   :  { %v646_v31 = vpop.permute.xlu1 %645  ;;  %v766_v44 = vld [vmem:[#allocation2 + $0x78] sm:$0xff] }
  0xbd   :  { %v492_v36 = vpop.permute.xlu0 %491  ;;  %720 = vst.msk [vmem:[#allocation2 + $0x88] sm:$0xff] %vm703_vm8, %v646_v31  ;;  %11227 = vmatprep.mubr.msk.f32.mxu0 %vm703_vm8, %v766_v44  ;;  %11253 = vmatprep.mubr.msk.f32.mxu1 %vm703_vm8, %v766_v44 }
  0xbe   :  { %556 = vst.msk [vmem:[#allocation2 + $0x80] sm:$0xff] %vm547_vm10, %v492_v36  ;;  %v765_v28 = vld [vmem:[#allocation2 + $0x70] sm:$0xff]  ;;  %367 = vrot.lane.b32.xlu1 %v15457_v54, %s14317_s22 }
  0xbf   :  { %719 = vst.msk [vmem:[#allocation2 + $0x80] sm:$0xff] %vm701_vm11, %v646_v31  ;;  %213 = vrot.lane.b32.xlu0 %v15460_v5, %s14315_s10  ;;  %1084 = vmatmul.mubr.f32.gmra.mrb[14].mxu0 %v765_v28 }
  0xc0   :  { %1293 = vmatmul.mubr.f32.gmra.mrb[14].mxu1 %v765_v28  ;;  %v340_v50 = vpop.permute.xlu1 %339 }
  0xc1   :  { %v186_v2 = vpop.permute.xlu0 %185 }
  0xc2   :  { %249 = vst.msk [vmem:[#allocation2 + $0x90] sm:$0xff] %vm239_vm7, %v186_v2  ;;  %675 = vrot.lane.b32.xlu1 %v15463_v61, %s14316_s21 }
  0xc3   :  { %403 = vst.msk [vmem:[#allocation2 + $0x90] sm:$0xff] %vm393_vm9, %v340_v50  ;;  %521 = vrot.lane.b32.xlu0 %v15470_v8, %s14314_s9 }
  0xc4   :  { %v648_v6 = vpop.permute.xlu1 %647  ;;  %v768_v54 = vld [vmem:[#allocation2 + $0x88] sm:$0xff] }
  0xc5   :  { %v494_v13 = vpop.permute.xlu0 %493  ;;  %722 = vst.msk [vmem:[#allocation2 + $0x98] sm:$0xff] %vm703_vm8, %v648_v6  ;;  %11228 = vmatprep.mubr.msk.f32.mxu0 %vm703_vm8, %v768_v54  ;;  %11254 = vmatprep.mubr.msk.f32.mxu1 %vm703_vm8, %v768_v54 }
  0xc6   :  { %557 = vst.msk [vmem:[#allocation2 + $0x90] sm:$0xff] %vm547_vm10, %v494_v13  ;;  %v767_v5 = vld [vmem:[#allocation2 + $0x80] sm:$0xff] }
  0xc7   :  { %721 = vst.msk [vmem:[#allocation2 + $0x90] sm:$0xff] %vm701_vm11, %v648_v6  ;;  %1090 = vmatmul.mubr.f32.gmra.mrb[16].mxu0 %v767_v5  ;;  %1299 = vmatmul.mubr.f32.gmra.mrb[16].mxu1 %v767_v5 }
  0xc8   :  { %v342_v61 = vpop.permute.xlu1 %341 }
  0xc9   :  { %v188_v52 = vpop.permute.xlu0 %187 }
  0xca   :  { %250 = vst.msk [vmem:[#allocation2 + $0xa0] sm:$0xff] %vm239_vm7, %v188_v52 }
  0xcb   :  { %404 = vst.msk [vmem:[#allocation2 + $0xa0] sm:$0xff] %vm393_vm9, %v342_v61 }
  0xcc   :  { %v650_v8 = vpop.permute.xlu1 %649  ;;  %v770_v24 = vld [vmem:[#allocation2 + $0x98] sm:$0xff] }
  0xcd   :  { %v496_v43 = vpop.permute.xlu0 %495  ;;  %724 = vst.msk [vmem:[#allocation2 + $0xa8] sm:$0xff] %vm703_vm8, %v650_v8  ;;  %11229 = vmatprep.mubr.msk.f32.mxu0 %vm703_vm8, %v770_v24  ;;  %11255 = vmatprep.mubr.msk.f32.mxu1 %vm703_vm8, %v770_v24 }
  0xce   :  { %558 = vst.msk [vmem:[#allocation2 + $0xa0] sm:$0xff] %vm547_vm10, %v496_v43  ;;  %v769_v15 = vld [vmem:[#allocation2 + $0x90] sm:$0xff] }
  0xcf   :  { %723 = vst.msk [vmem:[#allocation2 + $0xa0] sm:$0xff] %vm701_vm11, %v650_v8  ;;  %1096 = vmatmul.mubr.f32.gmra.mrb[18].mxu0 %v769_v15  ;;  %1305 = vmatmul.mubr.f32.gmra.mrb[18].mxu1 %v769_v15 }
  0xd0   :  { %v344_v0 = vpop.permute.xlu1 %343 }
  0xd1   :  { %v190_v53 = vpop.permute.xlu0 %189 }
  0xd2   :  { %251 = vst.msk [vmem:[#allocation2 + $0xb0] sm:$0xff] %vm239_vm7, %v190_v53 }
  0xd3   :  { %405 = vst.msk [vmem:[#allocation2 + $0xb0] sm:$0xff] %vm393_vm9, %v344_v0 }
  0xd4   :  { %v652_v4 = vpop.permute.xlu1 %651  ;;  %v772_v20 = vld [vmem:[#allocation2 + $0xa8] sm:$0xff] }
  0xd5   :  { %v498_v35 = vpop.permute.xlu0 %497  ;;  %726 = vst.msk [vmem:[#allocation2 + $0xb8] sm:$0xff] %vm703_vm8, %v652_v4  ;;  %11230 = vmatprep.mubr.msk.f32.mxu0 %vm703_vm8, %v772_v20  ;;  %11256 = vmatprep.mubr.msk.f32.mxu1 %vm703_vm8, %v772_v20 }
  0xd6   :  { %559 = vst.msk [vmem:[#allocation2 + $0xb0] sm:$0xff] %vm547_vm10, %v498_v35  ;;  %v771_v37 = vld [vmem:[#allocation2 + $0xa0] sm:$0xff] }
  0xd7   :  { %725 = vst.msk [vmem:[#allocation2 + $0xb0] sm:$0xff] %vm701_vm11, %v652_v4  ;;  %1102 = vmatmul.mubr.f32.gmra.mrb[20].mxu0 %v771_v37  ;;  %1311 = vmatmul.mubr.f32.gmra.mrb[20].mxu1 %v771_v37 }
  0xd8   :  { %v346_v46 = vpop.permute.xlu1 %345 }
  0xd9   :  { %v192_v16 = vpop.permute.xlu0 %191 }
  0xda   :  { %252 = vst.msk [vmem:[#allocation2 + $0xc0] sm:$0xff] %vm239_vm7, %v192_v16 }
  0xdb   :  { %406 = vst.msk [vmem:[#allocation2 + $0xc0] sm:$0xff] %vm393_vm9, %v346_v46 }
  0xdc   :  { %v654_v57 = vpop.permute.xlu1 %653  ;;  %v774_v14 = vld [vmem:[#allocation2 + $0xb8] sm:$0xff] }
  0xdd   :  { %v500_v10 = vpop.permute.xlu0 %499  ;;  %728 = vst.msk [vmem:[#allocation2 + $0xc8] sm:$0xff] %vm703_vm8, %v654_v57  ;;  %11231 = vmatprep.mubr.msk.f32.mxu0 %vm703_vm8, %v774_v14  ;;  %11257 = vmatprep.mubr.msk.f32.mxu1 %vm703_vm8, %v774_v14 }
  0xde   :  { %560 = vst.msk [vmem:[#allocation2 + $0xc0] sm:$0xff] %vm547_vm10, %v500_v10  ;;  %v773_v21 = vld [vmem:[#allocation2 + $0xb0] sm:$0xff] }
  0xdf   :  { %727 = vst.msk [vmem:[#allocation2 + $0xc0] sm:$0xff] %vm701_vm11, %v654_v57  ;;  %1108 = vmatmul.mubr.f32.gmra.mrb[22].mxu0 %v773_v21  ;;  %1317 = vmatmul.mubr.f32.gmra.mrb[22].mxu1 %v773_v21 }
  0xe0   :  { %v348_v60 = vpop.permute.xlu1 %347 }
  0xe1   :  { %v194_v18 = vpop.permute.xlu0 %193 }
  0xe2   :  { %253 = vst.msk [vmem:[#allocation2 + $0xd0] sm:$0xff] %vm239_vm7, %v194_v18 }
  0xe3   :  { %407 = vst.msk [vmem:[#allocation2 + $0xd0] sm:$0xff] %vm393_vm9, %v348_v60 }
  0xe4   :  { %v656_v17 = vpop.permute.xlu1 %655  ;;  %v776_v40 = vld [vmem:[#allocation2 + $0xc8] sm:$0xff] }
  0xe5   :  { %v502_v38 = vpop.permute.xlu0 %501  ;;  %730 = vst.msk [vmem:[#allocation2 + $0xd8] sm:$0xff] %vm703_vm8, %v656_v17  ;;  %11232 = vmatprep.mubr.msk.f32.mxu0 %vm703_vm8, %v776_v40  ;;  %11258 = vmatprep.mubr.msk.f32.mxu1 %vm703_vm8, %v776_v40  ;;  %v873_v40 = vlaneseq }
  0xe6   :  { %561 = vst.msk [vmem:[#allocation2 + $0xd0] sm:$0xff] %vm547_vm10, %v502_v38  ;;  %v775_v49 = vld [vmem:[#allocation2 + $0xc0] sm:$0xff] }
  0xe7   :  { %729 = vst.msk [vmem:[#allocation2 + $0xd0] sm:$0xff] %vm701_vm11, %v656_v17  ;;  %1114 = vmatmul.mubr.f32.gmra.mrb[24].mxu0 %v775_v49  ;;  %1323 = vmatmul.mubr.f32.gmra.mrb[24].mxu1 %v775_v49  ;;  %v15768_v49 = vshrl.u32 %v873_v40, 7  ;;  %v13451_v40 = vld [vmem:[%s21584_s3 + $0x3e8] ss:$16 sps:$4 sm:$0xff]  }
  0xe8   :  { %v350_v30 = vpop.permute.xlu1 %349 }
  0xe9   :  { %v196_v59 = vpop.permute.xlu0 %195  ;;  %21915 = vst [vmem:[#allocation4_spill] sm:$0xff] %v15768_v49 }
  0xea   :  { %254 = vst.msk [vmem:[#allocation2 + $0xe0] sm:$0xff] %vm239_vm7, %v196_v59  ;;  %v871_v59 = vld [vmem:[%s21583_s2] sm:$0xf]  ;;  %s14319_s2 = smov 108  }
  0xeb   :  { %408 = vst.msk [vmem:[#allocation2 + $0xe0] sm:$0xff] %vm393_vm9, %v350_v30  ;;  %v21594_v30 = vsub.s32 0, %v15768_v49 }
  0xec   :  { %v658_v1 = vpop.permute.xlu1 %657  ;;  %v778_v55 = vld [vmem:[#allocation2 + $0xd8] sm:$0xff] }
  0xed   :  { %v504_v23 = vpop.permute.xlu0 %503  ;;  %732 = vst.msk [vmem:[#allocation2 + $0xe8] sm:$0xff] %vm703_vm8, %v658_v1  ;;  %11233 = vmatprep.mubr.msk.f32.mxu0 %vm703_vm8, %v778_v55  ;;  %11259 = vmatprep.mubr.msk.f32.mxu1 %vm703_vm8, %v778_v55  ;;  %v15778_v55 = vrot.slane %v871_v59, %v21594_v30  ;;  %v13495_v30 = vld [vmem:[%s21584_s3 + $0x4cc] ss:$16 sps:$4 sm:$0xff]  }
  0xee   :  { %562 = vst.msk [vmem:[#allocation2 + $0xe0] sm:$0xff] %vm547_vm10, %v504_v23  ;;  %v777_v47 = vld [vmem:[#allocation2 + $0xd0] sm:$0xff]  ;;  %v21592_v23 = vsub.s32 3, %v15768_v49 }
  0xef   :  { %731 = vst.msk [vmem:[#allocation2 + $0xe0] sm:$0xff] %vm701_vm11, %v658_v1  ;;  %1120 = vmatmul.mubr.f32.gmra.mrb[26].mxu0 %v777_v47  ;;  %1329 = vmatmul.mubr.f32.gmra.mrb[26].mxu1 %v777_v47  ;;  %v21593_v1 = vsub.s32 1, %v15768_v49 }
  0xf0   :  { %v352_v42 = vpop.permute.xlu1 %351 }
  0xf1   :  { %v198_v63 = vpop.permute.xlu0 %197  ;;  %v15782_v47 = vrot.slane %v871_v59, %v21593_v1  ;;  %v13492_v1 = vld [vmem:[%s21584_s3 + $0x4c4] ss:$16 sps:$4 sm:$0xff]  }
  0xf2   :  { %255 = vst.msk [vmem:[#allocation2 + $0xf0] sm:$0xff] %vm239_vm7, %v198_v63  ;;  %v21591_v63 = vsub.s32 2, %v15768_v49 }
  0xf3   :  { %409 = vst.msk [vmem:[#allocation2 + $0xf0] sm:$0xff] %vm393_vm9, %v352_v42  ;;  %v15786_v42 = vrot.slane %v871_v59, %v21592_v23 }
  0xf4   :  { %v660_v19 = vpop.permute.xlu1 %659  ;;  %v780_v39 = vld [vmem:[#allocation2 + $0xe8] sm:$0xff] }
  0xf5   :  { %v506_v26 = vpop.permute.xlu0 %505  ;;  %734 = vst.msk [vmem:[#allocation2 + $0xf8] sm:$0xff] %vm703_vm8, %v660_v19  ;;  %11234 = vmatprep.mubr.msk.f32.mxu0 %vm703_vm8, %v780_v39  ;;  %11260 = vmatprep.mubr.msk.f32.mxu1 %vm703_vm8, %v780_v39 }
  0xf6   :  { %563 = vst.msk [vmem:[#allocation2 + $0xf0] sm:$0xff] %vm547_vm10, %v506_v26  ;;  %v779_v29 = vld [vmem:[#allocation2 + $0xe0] sm:$0xff] }
  0xf7   :  { %733 = vst.msk [vmem:[#allocation2 + $0xf0] sm:$0xff] %vm701_vm11, %v660_v19  ;;  %1126 = vmatmul.mubr.f32.gmra.mrb[28].mxu0 %v779_v29  ;;  %1335 = vmatmul.mubr.f32.gmra.mrb[28].mxu1 %v779_v29 }
  0xf8   :  { %v354_v11 = vpop.permute.xlu1 %353 }
  0xf9   :  { %v200_v48 = vpop.permute.xlu0 %199 }
  0xfa   :  { %256 = vst.msk [vmem:[#allocation2 + $0x100] sm:$0xff] %vm239_vm7, %v200_v48 }
  0xfb   :  { %410 = vst.msk [vmem:[#allocation2 + $0x100] sm:$0xff] %vm393_vm9, %v354_v11 }
  0xfc   :  { %v662_v51 = vpop.permute.xlu1 %661  ;;  %v782_v7 = vld [vmem:[#allocation2 + $0xf8] sm:$0xff] }
  0xfd   :  { %v508_v27 = vpop.permute.xlu0 %507  ;;  %736 = vst.msk [vmem:[#allocation2 + $0x108] sm:$0xff] %vm703_vm8, %v662_v51  ;;  %11235 = vmatprep.mubr.msk.f32.mxu0 %vm703_vm8, %v782_v7  ;;  %11261 = vmatprep.mubr.msk.f32.mxu1 %vm703_vm8, %v782_v7  ;;  %v15801_v7 = vrot.slane %v871_v59, %v21591_v63 }
  0xfe   :  { %564 = vst.msk [vmem:[#allocation2 + $0x100] sm:$0xff] %vm547_vm10, %v508_v27  ;;  %v781_v56 = vld [vmem:[#allocation2 + $0xf0] sm:$0xff] }
  0xff   :  { %735 = vst.msk [vmem:[#allocation2 + $0x100] sm:$0xff] %vm701_vm11, %v662_v51  ;;  %1132 = vmatmul.mubr.f32.gmra.mrb[30].mxu0 %v781_v56  ;;  %1341 = vmatmul.mubr.f32.gmra.mrb[30].mxu1 %v781_v56 }
 0x100   :  { %v356_v12 = vpop.permute.xlu1 %355 }
 0x101   :  { %v202_v25 = vpop.permute.xlu0 %201 }
 0x102   :  { %257 = vst.msk [vmem:[#allocation2 + $0x110] sm:$0xff] %vm239_vm7, %v202_v25 }
 0x103   :  { %411 = vst.msk [vmem:[#allocation2 + $0x110] sm:$0xff] %vm393_vm9, %v356_v12 }
 0x104   :  { %v664_v22 = vpop.permute.xlu1 %663  ;;  %v784_v32 = vld [vmem:[#allocation2 + $0x108] sm:$0xff] }
 0x105   :  { %v510_v33 = vpop.permute.xlu0 %509  ;;  %738 = vst.msk [vmem:[#allocation2 + $0x118] sm:$0xff] %vm703_vm8, %v664_v22  ;;  %11236 = vmatprep.mubr.msk.f32.mxu0 %vm703_vm8, %v784_v32  ;;  %11262 = vmatprep.mubr.msk.f32.mxu1 %vm703_vm8, %v784_v32 }
 0x106   :  { %565 = vst.msk [vmem:[#allocation2 + $0x110] sm:$0xff] %vm547_vm10, %v510_v33  ;;  %v783_v34 = vld [vmem:[#allocation2 + $0x100] sm:$0xff] }
 0x107   :  { %737 = vst.msk [vmem:[#allocation2 + $0x110] sm:$0xff] %vm701_vm11, %v664_v22  ;;  %1138 = vmatmul.mubr.f32.gmra.mrb[32].mxu0 %v783_v34  ;;  %1347 = vmatmul.mubr.f32.gmra.mrb[32].mxu1 %v783_v34 }
 0x108   :  { %v358_v62 = vpop.permute.xlu1 %357 }
 0x109   :  { %v204_v58 = vpop.permute.xlu0 %203 }
 0x10a   :  { %258 = vst.msk [vmem:[#allocation2 + $0x120] sm:$0xff] %vm239_vm7, %v204_v58 }
 0x10b   :  { %412 = vst.msk [vmem:[#allocation2 + $0x120] sm:$0xff] %vm393_vm9, %v358_v62 }
 0x10c   :  { %v666_v3 = vpop.permute.xlu1 %665  ;;  %v786_v41 = vld [vmem:[#allocation2 + $0x118] sm:$0xff] }
 0x10d   :  { %v512_v9 = vpop.permute.xlu0 %511  ;;  %740 = vst.msk [vmem:[#allocation2 + $0x128] sm:$0xff] %vm703_vm8, %v666_v3  ;;  %11237 = vmatprep.mubr.msk.f32.mxu0 %vm703_vm8, %v786_v41  ;;  %11263 = vmatprep.mubr.msk.f32.mxu1 %vm703_vm8, %v786_v41 }
 0x10e   :  { %566 = vst.msk [vmem:[#allocation2 + $0x120] sm:$0xff] %vm547_vm10, %v512_v9  ;;  %v785_v45 = vld [vmem:[#allocation2 + $0x110] sm:$0xff] }
 0x10f   :  { %739 = vst.msk [vmem:[#allocation2 + $0x120] sm:$0xff] %vm701_vm11, %v666_v3  ;;  %1144 = vmatmul.mubr.f32.gmra.mrb[34].mxu0 %v785_v45  ;;  %1353 = vmatmul.mubr.f32.gmra.mrb[34].mxu1 %v785_v45 }
 0x110   :  { %v360_v31 = vpop.permute.xlu1 %359 }
 0x111   :  { %v206_v36 = vpop.permute.xlu0 %205 }
 0x112   :  { %259 = vst.msk [vmem:[#allocation2 + $0x130] sm:$0xff] %vm239_vm7, %v206_v36 }
 0x113   :  { %413 = vst.msk [vmem:[#allocation2 + $0x130] sm:$0xff] %vm393_vm9, %v360_v31 }
 0x114   :  { %v668_v44 = vpop.permute.xlu1 %667  ;;  %v788_v50 = vld [vmem:[#allocation2 + $0x128] sm:$0xff] }
 0x115   :  { %v514_v28 = vpop.permute.xlu0 %513  ;;  %742 = vst.msk [vmem:[#allocation2 + $0x138] sm:$0xff] %vm703_vm8, %v668_v44  ;;  %11238 = vmatprep.mubr.msk.f32.mxu0 %vm703_vm8, %v788_v50  ;;  %11264 = vmatprep.mubr.msk.f32.mxu1 %vm703_vm8, %v788_v50  ;;  %v13436_v50 = vld [vmem:[%s21584_s3 + $0x3a0] ss:$16 sps:$4 sm:$0xff]  }
 0x116   :  { %567 = vst.msk [vmem:[#allocation2 + $0x130] sm:$0xff] %vm547_vm10, %v514_v28  ;;  %v787_v2 = vld [vmem:[#allocation2 + $0x120] sm:$0xff] }
 0x117   :  { %741 = vst.msk [vmem:[#allocation2 + $0x130] sm:$0xff] %vm701_vm11, %v668_v44  ;;  %1150 = vmatmul.mubr.f32.gmra.mrb[36].mxu0 %v787_v2  ;;  %1359 = vmatmul.mubr.f32.gmra.mrb[36].mxu1 %v787_v2  ;;  %v13438_v2 = vld [vmem:[%s21584_s3 + $0x3a4] ss:$16 sps:$4 sm:$0xff]  }
 0x118   :  { %v362_v6 = vpop.permute.xlu1 %361  ;;  %5200 = vmatprep.subr.bf16.mxu0 %v13438_v2 }
 0x119   :  { %v208_v13 = vpop.permute.xlu0 %207  ;;  %5201 = vmatpush1.bf16.msra.mxu0 %v13436_v50 }
 0x11a   :  { %260 = vst.msk [vmem:[#allocation2 + $0x140] sm:$0xff] %vm239_vm7, %v208_v13 }
 0x11b   :  { %414 = vst.msk [vmem:[#allocation2 + $0x140] sm:$0xff] %vm393_vm9, %v362_v6 }
 0x11c   :  { %v670_v54 = vpop.permute.xlu1 %669  ;;  %v790_v61 = vld [vmem:[#allocation2 + $0x138] sm:$0xff] }
 0x11d   :  { %v516_v5 = vpop.permute.xlu0 %515  ;;  %744 = vst.msk [vmem:[#allocation2 + $0x148] sm:$0xff] %vm703_vm8, %v670_v54  ;;  %11239 = vmatprep.mubr.msk.f32.mxu0 %vm703_vm8, %v790_v61  ;;  %11265 = vmatprep.mubr.msk.f32.mxu1 %vm703_vm8, %v790_v61 }
 0x11e   :  { %568 = vst.msk [vmem:[#allocation2 + $0x140] sm:$0xff] %vm547_vm10, %v516_v5  ;;  %v789_v52 = vld [vmem:[#allocation2 + $0x130] sm:$0xff] }
 0x11f   :  { %743 = vst.msk [vmem:[#allocation2 + $0x140] sm:$0xff] %vm701_vm11, %v670_v54  ;;  %1156 = vmatmul.mubr.f32.gmra.mrb[38].mxu0 %v789_v52  ;;  %1365 = vmatmul.mubr.f32.gmra.mrb[38].mxu1 %v789_v52  ;;  %v13439_v52 = vld [vmem:[%s21584_s3 + $0x3a8] ss:$16 sps:$4 sm:$0xff]  }
 0x120   :  { %v364_v8 = vpop.permute.xlu1 %363 }
 0x121   :  { %v210_v43 = vpop.permute.xlu0 %209 }
 0x122   :  { %261 = vst.msk [vmem:[#allocation2 + $0x150] sm:$0xff] %vm239_vm7, %v210_v43 }
 0x123   :  { %415 = vst.msk [vmem:[#allocation2 + $0x150] sm:$0xff] %vm393_vm9, %v364_v8  ;;  %v13441_v8 = vld [vmem:[%s21584_s3 + $0x3ac] ss:$16 sps:$4 sm:$0xff]  }
 0x124   :  { %v672_v24 = vpop.permute.xlu1 %671  ;;  %v792_v0 = vld [vmem:[#allocation2 + $0x148] sm:$0xff]  ;;  %5346 = vmatprep.subr.bf16.mxu1 %v13441_v8 }
 0x125   :  { %v518_v15 = vpop.permute.xlu0 %517  ;;  %746 = vst.msk [vmem:[#allocation2 + $0x158] sm:$0xff] %vm703_vm8, %v672_v24  ;;  %11240 = vmatprep.mubr.msk.f32.mxu0 %vm703_vm8, %v792_v0  ;;  %11266 = vmatprep.mubr.msk.f32.mxu1 %vm703_vm8, %v792_v0  ;;  %v13459_v8 = vld [vmem:[%s21584_s3 + $0x40c] ss:$16 sps:$4 sm:$0xff]  }
 0x126   :  { %569 = vst.msk [vmem:[#allocation2 + $0x150] sm:$0xff] %vm547_vm10, %v518_v15  ;;  %v791_v53 = vld [vmem:[#allocation2 + $0x140] sm:$0xff]  ;;  %5347 = vmatpush1.bf16.msra.mxu1 %v13439_v52  ;;  %v13457_v52 = vld [vmem:[%s21584_s3 + $0x408] ss:$16 sps:$4 sm:$0xff]  }
 0x127   :  { %745 = vst.msk [vmem:[#allocation2 + $0x150] sm:$0xff] %vm701_vm11, %v672_v24  ;;  %1162 = vmatmul.mubr.f32.gmra.mrb[40].mxu0 %v791_v53  ;;  %1371 = vmatmul.mubr.f32.gmra.mrb[40].mxu1 %v791_v53  ;;  %v13444_v53 = vld [vmem:[%s21584_s3 + $0x3c4] ss:$16 sps:$4 sm:$0xff]  }
 0x128   :  { %v366_v4 = vpop.permute.xlu1 %365  ;;  %5202 = vmatprep.subr.bf16.mxu0 %v13444_v53 }
 0x129   :  { %v212_v35 = vpop.permute.xlu0 %211 }
 0x12a   :  { %262 = vst.msk [vmem:[#allocation2 + $0x160] sm:$0xff] %vm239_vm7, %v212_v35  ;;  %v13442_v35 = vld [vmem:[%s21584_s3 + $0x3c0] ss:$16 sps:$4 sm:$0xff]  }
 0x12b   :  { %416 = vst.msk [vmem:[#allocation2 + $0x160] sm:$0xff] %vm393_vm9, %v366_v4  ;;  %v13447_v4 = vld [vmem:[%s21584_s3 + $0x3cc] ss:$16 sps:$4 sm:$0xff]   ;;  %5203 = vmatpush1.bf16.msra.mxu0 %v13442_v35  ;;  %v13460_v35 = vld [vmem:[%s21584_s3 + $0x420] ss:$16 sps:$4 sm:$0xff]  }
 0x12c   :  { %v674_v20 = vpop.permute.xlu1 %673  ;;  %v794_v46 = vld [vmem:[#allocation2 + $0x158] sm:$0xff]  ;;  %5348 = vmatprep.subr.bf16.mxu1 %v13447_v4  ;;  %v13462_v4 = vld [vmem:[%s21584_s3 + $0x424] ss:$16 sps:$4 sm:$0xff]  }
 0x12d   :  { %v520_v37 = vpop.permute.xlu0 %519  ;;  %748 = vst.msk [vmem:[#allocation2 + $0x168] sm:$0xff] %vm703_vm8, %v674_v20  ;;  %11241 = vmatprep.mubr.msk.f32.mxu0 %vm703_vm8, %v794_v46  ;;  %11267 = vmatprep.mubr.msk.f32.mxu1 %vm703_vm8, %v794_v46 }
 0x12e   :  { %570 = vst.msk [vmem:[#allocation2 + $0x160] sm:$0xff] %vm547_vm10, %v520_v37  ;;  %v793_v16 = vld [vmem:[#allocation2 + $0x150] sm:$0xff] }
 0x12f   :  { %747 = vst.msk [vmem:[#allocation2 + $0x160] sm:$0xff] %vm701_vm11, %v674_v20  ;;  %1168 = vmatmul.mubr.f32.gmra.mrb[42].mxu0 %v793_v16  ;;  %1377 = vmatmul.mubr.f32.gmra.mrb[42].mxu1 %v793_v16  ;;  %v13445_v20 = vld [vmem:[%s21584_s3 + $0x3c8] ss:$16 sps:$4 sm:$0xff]  }
 0x130   :  { %v368_v57 = vpop.permute.xlu1 %367  ;;  %5349 = vmatpush1.bf16.msra.mxu1 %v13445_v20  ;;  %v13465_v20 = vld [vmem:[%s21584_s3 + $0x42c] ss:$16 sps:$4 sm:$0xff]  }
 0x131   :  { %v214_v10 = vpop.permute.xlu0 %213 }
 0x132   :  { %263 = vst.msk [vmem:[#allocation2 + $0x170] sm:$0xff] %vm239_vm7, %v214_v10  ;;  %v13450_v10 = vld [vmem:[%s21584_s3 + $0x3e4] ss:$16 sps:$4 sm:$0xff]   ;;  %vm21687_vm7 = vcmask 1045509  }
 0x133   :  { %417 = vst.msk [vmem:[#allocation2 + $0x170] sm:$0xff] %vm393_vm9, %v368_v57  ;;  %5204 = vmatprep.subr.bf16.mxu0 %v13450_v10  ;;  %vm16349_vm9 = vmand %vm21681_vm2, %vm2878_vm0  ;;  %vm21682_vm0 = vsmask.f32 7954 }
 0x134   :  { %v676_v14 = vpop.permute.xlu1 %675  ;;  %v796_v60 = vld [vmem:[#allocation2 + $0x168] sm:$0xff]  ;;  %vm16397_vm1 = vmand %vm21678_vm15, %vm21682_vm0  ;;  %vm21700_vm15 = vsmask.f32 6400 }
 0x135   :  { %v522_v21 = vpop.permute.xlu0 %521  ;;  %750 = vst.msk [vmem:[#allocation2 + $0x178] sm:$0xff] %vm703_vm8, %v676_v14  ;;  %11242 = vmatprep.mubr.msk.f32.mxu0 %vm703_vm8, %v796_v60  ;;  %11268 = vmatprep.mubr.msk.f32.mxu1 %vm703_vm8, %v796_v60 }
 0x136   :  { %571 = vst.msk [vmem:[#allocation2 + $0x170] sm:$0xff] %vm547_vm10, %v522_v21  ;;  %v795_v18 = vld [vmem:[#allocation2 + $0x160] sm:$0xff]  ;;  %vm21706_vm10 = vcmask 883712  }
 0x137   :  { %749 = vst.msk [vmem:[#allocation2 + $0x170] sm:$0xff] %vm701_vm11, %v676_v14  ;;  %1174 = vmatmul.mubr.f32.gmra.mrb[44].mxu0 %v795_v18  ;;  %1383 = vmatmul.mubr.f32.gmra.mrb[44].mxu1 %v795_v18  ;;  %v13453_v14 = vld [vmem:[%s21584_s3 + $0x3ec] ss:$16 sps:$4 sm:$0xff]   ;;  %vm2774_vm11 = vsmask.f32 7938 }
 0x138   :  { %5350 = vmatprep.subr.bf16.mxu1 %v13453_v14  ;;  %vm16391_vm14 = vmand %vm2620_vm13, %vm2774_vm11  ;;  %vm21701_vm11 = vcmask 1046534  }
 0x139   :  { %5351 = vmatpush1.bf16.msra.mxu1 %v13451_v40  ;;  %vm16417_vm13 = vmor %vm16339_vm6, %vm16333_vm5 }
 0x13a   :  { %5352 = vmatprep.subr.bf16.mxu1 %v13459_v8 }
 0x13c   :  { %v798_v17 = vld [vmem:[#allocation2 + $0x178] sm:$0xff] }
 0x13d   :  { %11243 = vmatprep.mubr.msk.f32.mxu0 %vm703_vm8, %v798_v17  ;;  %11269 = vmatprep.mubr.msk.f32.mxu1 %vm703_vm8, %v798_v17  ;;  %vm21662_vm8 = vsmask.f32 5376 }
 0x13e   :  { %v797_v38 = vld [vmem:[#allocation2 + $0x170] sm:$0xff]  ;;  %5353 = vmatpush1.bf16.msra.mxu1 %v13457_v52  ;;  %vm16359_vm12 = vmand %vm21687_vm7, %vm21662_vm8  ;;  %vm21688_vm8 = vsmask.f32 7958 }
 0x13f   :  { %1180 = vmatmul.mubr.f32.gmra.mrb[46].mxu0 %v797_v38  ;;  %1389 = vmatmul.mubr.f32.gmra.mrb[46].mxu1 %v797_v38  ;;  %v13448_v38 = vld [vmem:[%s21584_s3 + $0x3e0] ss:$16 sps:$4 sm:$0xff]   ;;  %vm16435_vm6 = vmor %vm16359_vm12, %vm16349_vm9 }
 0x140   :  { %5205 = vmatpush1.bf16.msra.mxu0 %v13448_v38  ;;  %5354 = vmatprep.subr.bf16.mxu1 %v13465_v20  ;;  %v13471_v38 = vld [vmem:[%s21584_s3 + $0x44c] ss:$16 sps:$4 sm:$0xff]   ;;  %v13475_v20 = vld [vmem:[%s21584_s3 + $0x468] ss:$16 sps:$4 sm:$0xff]   ;;  %vm16450_vm12 = vmand %vm21681_vm2, %vm2983_vm4  ;;  %vm22005_vm2 = vcmask 1046528  }
 0x141   :  { %vm16471_vm4 = vmand %vm21687_vm7, %vm21688_vm8  ;;  %vm22008_vm7 = vcmask 1042434  }
 0x142   :  { %vm22007_vm0 = vmmov %vm22005_vm2 }
 0x143   :  { %vm16488_vm8 = vmand %vm22008_vm7, %vm21691_vm3  ;;  %vm21704_vm3 = vsmask.f32 3328 }
 0x144   :  { %vm16503_vm7 = vmor %vm16397_vm1, %vm16391_vm14 }
 0x145   :  { %vm16532_vm1 = vmand %vm21701_vm11, %vm21700_vm15  ;;  %vm22026_vm15 = vcmask 1043459  }
 0x146   :  { %vm16560_vm11 = vmand %vm22026_vm15, %vm21704_vm3  ;;  %vm22036_vm15 = vsmask.f32 7946  ;;  %vm22037_vm3 = vcmask 1042434  }
 0x15a   :  { %v1043_v19 = vpop.f32.mrb[0].mxu0 }
 0x15b   :  { %v1252_v26 = vpop.f32.mrb[0].mxu1  ;;  %v15790_v39 = vadd.f32 %v1043_v19, %v15778_v55  ;;  %v1045_v29 = vpop.f32.mrb[1].mxu0 }
 0x15c   :  { %v1254_v11 = vpop.f32.mrb[1].mxu1  ;;  %v15793_v48 = vadd.f32 %v1045_v29, %v15782_v47  ;;  %v15809_v25 = vadd.f32 %v1252_v26, %v15801_v7 }
 0x15d   :  { %v15796_v51 = vadd.f32 %v1254_v11, %v15786_v42  ;;  %v21626_v27 = vmax.f32 %v15790_v39, 0.0 }
 0x15e   :  { %v21625_v56 = vmax.f32 %v15793_v48, 0.0  ;;  %21917 = vst [vmem:[#allocation6_spill] sm:$0xff] %v15809_v25  ;;  %v21600_v41 = vmax.f32 %v15809_v25, 0.0  ;;  %v21967_v25 = vmov 0 }
 0x15f   :  { %21916 = vst [vmem:[#allocation5_spill] sm:$0xff] %v15796_v51  ;;  %v21968_v25 = vsel %vm16349_vm9, 4294967295, %v21967_v25 }
 0x160   :  { %v13116_v12 = vpack.i.bf16 %v21625_v56, %v21626_v27  ;;  %21969 = vst [vmem:[#allocation52_spill] sm:$0xff] %v21968_v25 }
 0x161   :  { %v1049_v22 = vpop.f32.mrb[2].mxu0 }
 0x162   :  { %v1258_v33 = vpop.f32.mrb[2].mxu1  ;;  %13117 = vrot.lane.b32.xlu0 %v13116_v12, %s14319_s2  ;;  %v15813_v32 = vadd.f32 %v1049_v22, %v15778_v55  ;;  %v1051_v62 = vpop.f32.mrb[3].mxu0 }
 0x163   :  { %v15816_v34 = vadd.f32 %v1258_v33, %v15801_v7  ;;  %v1260_v58 = vpop.f32.mrb[3].mxu1  ;;  %v15819_v3 = vadd.f32 %v1051_v62, %v15782_v47 }
 0x164   :  { %v15822_v9 = vadd.f32 %v1260_v58, %v15786_v42  ;;  %v21622_v45 = vmax.f32 %v15813_v32, 0.0 }
 0x165   :  { %21918 = vst [vmem:[#allocation7_spill] sm:$0xff] %v15816_v34  ;;  %v21599_v31 = vmax.f32 %v15816_v34, 0.0  ;;  %v21621_v36 = vmax.f32 %v15819_v3, 0.0 }
 0x166   :  { %21919 = vst [vmem:[#allocation8_spill] sm:$0xff] %v15822_v9  ;;  %v13121_v44 = vpack.i.bf16 %v21622_v45, %v21600_v41 }
 0x167   :  { %v13126_v28 = vpack.i.bf16 %v21599_v31, %v21621_v36  ;;  %v13498_v31 = vld [vmem:[%s21584_s3 + $0x4e4] ss:$16 sps:$4 sm:$0xff]  }
 0x168   :  { %13122 = vrot.lane.b32.xlu1 %v13121_v44, %s14319_s2 }
 0x169   :  { %v1055_v6 = vpop.f32.mrb[4].mxu0  ;;  %13127 = vrot.lane.b32.xlu0 %v13126_v28, %s14319_s2 }
 0x16a   :  { %v1264_v13 = vpop.f32.mrb[4].mxu1  ;;  %v15845_v54 = vadd.f32 %v1055_v6, %v15778_v55  ;;  %v1057_v5 = vpop.f32.mrb[5].mxu0 }
 0x16b   :  { %v1266_v61 = vpop.f32.mrb[5].mxu1  ;;  %v15854_v43 = vadd.f32 %v1057_v5, %v15782_v47  ;;  %v15878_v46 = vadd.f32 %v1264_v13, %v15801_v7  ;;  %v13454_v13 = vld [vmem:[%s21584_s3 + $0x400] ss:$16 sps:$4 sm:$0xff]   ;;  %v13456_v5 = vld [vmem:[%s21584_s3 + $0x404] ss:$16 sps:$4 sm:$0xff]  }
 0x16c   :  { %v15857_v24 = vadd.f32 %v1266_v61, %v15786_v42  ;;  %v21620_v15 = vmax.f32 %v15845_v54, 0.0  ;;  %5206 = vmatprep.subr.bf16.mxu0 %v13456_v5 }
 0x16d   :  { %v21619_v0 = vmax.f32 %v15854_v43, 0.0  ;;  %21921 = vst [vmem:[#allocation10_spill] sm:$0xff] %v15878_v46  ;;  %v21598_v26 = vmax.f32 %v15878_v46, 0.0  ;;  %5207 = vmatpush1.bf16.msra.mxu0 %v13454_v13  ;;  %v13474_v13 = vld [vmem:[%s21584_s3 + $0x464] ss:$16 sps:$4 sm:$0xff]  }
 0x16e   :  { %21920 = vst [vmem:[#allocation9_spill] sm:$0xff] %v15857_v24  ;;  %5208 = vmatprep.subr.bf16.mxu0 %v13462_v4 }
 0x16f   :  { %v13131_v37 = vpack.i.bf16 %v21619_v0, %v21620_v15 }
 0x171   :  { %v1061_v16 = vpop.f32.mrb[6].mxu0  ;;  %13132 = vrot.lane.b32.xlu1 %v13131_v37, %s14319_s2  ;;  %5209 = vmatpush1.bf16.msra.mxu0 %v13460_v35  ;;  %v13472_v35 = vld [vmem:[%s21584_s3 + $0x460] ss:$16 sps:$4 sm:$0xff]  }
 0x172   :  { %v1270_v57 = vpop.f32.mrb[6].mxu1  ;;  %v15888_v21 = vadd.f32 %v1061_v16, %v15778_v55  ;;  %v1063_v18 = vpop.f32.mrb[7].mxu0  ;;  %v13463_v16 = vld [vmem:[%s21584_s3 + $0x428] ss:$16 sps:$4 sm:$0xff]  }
 0x173   :  { %v15891_v60 = vadd.f32 %v1270_v57, %v15801_v7  ;;  %v1272_v17 = vpop.f32.mrb[7].mxu1  ;;  %v15900_v59 = vadd.f32 %v1063_v18, %v15782_v47  ;;  %v13468_v57 = vld [vmem:[%s21584_s3 + $0x444] ss:$16 sps:$4 sm:$0xff]   ;;  %5355 = vmatpush1.bf16.msra.mxu1 %v13463_v16  ;;  %v13477_v16 = vld [vmem:[%s21584_s3 + $0x46c] ss:$16 sps:$4 sm:$0xff]  }
 0x174   :  { %v15903_v19 = vadd.f32 %v1272_v17, %v15786_v42  ;;  %v21616_v29 = vmax.f32 %v15888_v21, 0.0  ;;  %v13466_v17 = vld [vmem:[%s21584_s3 + $0x440] ss:$16 sps:$4 sm:$0xff]   ;;  %5210 = vmatprep.subr.bf16.mxu0 %v13468_v57  ;;  %5356 = vmatprep.subr.bf16.mxu1 %v13471_v38 }
 0x175   :  { %21922 = vst [vmem:[#allocation11_spill] sm:$0xff] %v15891_v60  ;;  %v21597_v11 = vmax.f32 %v15891_v60, 0.0  ;;  %v21613_v12 = vmax.f32 %v15900_v59, 0.0  ;;  %5211 = vmatpush1.bf16.msra.mxu0 %v13466_v17  ;;  %v13480_v17 = vld [vmem:[%s21584_s3 + $0x484] ss:$16 sps:$4 sm:$0xff]  }
 0x176   :  { %21923 = vst [vmem:[#allocation12_spill] sm:$0xff] %v15903_v19  ;;  %v13136_v22 = vpack.i.bf16 %v21616_v29, %v21598_v26  ;;  %5212 = vmatprep.subr.bf16.mxu0 %v13474_v13 }
 0x177   :  { %v13141_v33 = vpack.i.bf16 %v21597_v11, %v21613_v12  ;;  %v13525_v12 = vld [vmem:[%s21584_s3 + $0x56c] ss:$16 sps:$4 sm:$0xff]  }
 0x178   :  { %13137 = vrot.lane.b32.xlu0 %v13136_v22, %s14319_s2 }
 0x179   :  { %v1067_v62 = vpop.f32.mrb[8].mxu0  ;;  %13142 = vrot.lane.b32.xlu1 %v13141_v33, %s14319_s2  ;;  %5213 = vmatpush1.bf16.msra.mxu0 %v13472_v35  ;;  %v13483_v35 = vld [vmem:[%s21584_s3 + $0x48c] ss:$16 sps:$4 sm:$0xff]  }
 0x17a   :  { %v1276_v58 = vpop.f32.mrb[8].mxu1  ;;  %v15920_v44 = vadd.f32 %v1067_v62, %v15778_v55  ;;  %v1069_v28 = vpop.f32.mrb[9].mxu0  ;;  %5214 = vmatprep.subr.bf16.mxu0 %v13480_v17  ;;  %v13484_v17 = vld [vmem:[%s21584_s3 + $0x4a0] ss:$16 sps:$4 sm:$0xff]  }
 0x17b   :  { %v1278_v50 = vpop.f32.mrb[9].mxu1  ;;  %v15923_v2 = vadd.f32 %v1069_v28, %v15782_v47  ;;  %v15962_v10 = vadd.f32 %v1276_v58, %v15801_v7  ;;  %v13469_v58 = vld [vmem:[%s21584_s3 + $0x448] ss:$16 sps:$4 sm:$0xff]  }
 0x17c   :  { %v15926_v6 = vadd.f32 %v1278_v50, %v15786_v42  ;;  %v21612_v61 = vmax.f32 %v15920_v44, 0.0  ;;  %5357 = vmatpush1.bf16.msra.mxu1 %v13469_v58  ;;  %v13478_v58 = vld [vmem:[%s21584_s3 + $0x480] ss:$16 sps:$4 sm:$0xff]  }
 0x17d   :  { %v21611_v53 = vmax.f32 %v15923_v2, 0.0  ;;  %21925 = vst [vmem:[#allocation14_spill] sm:$0xff] %v15962_v10  ;;  %v21596_v5 = vmax.f32 %v15962_v10, 0.0  ;;  %5358 = vmatprep.subr.bf16.mxu1 %v13477_v16  ;;  %v13481_v16 = vld [vmem:[%s21584_s3 + $0x488] ss:$16 sps:$4 sm:$0xff]   ;;  %5215 = vmatpush1.bf16.msra.mxu0 %v13478_v58 }
 0x17e   :  { %21924 = vst [vmem:[#allocation13_spill] sm:$0xff] %v15926_v6 }
 0x17f   :  { %v13146_v37 = vpack.i.bf16 %v21611_v53, %v21612_v61 }
 0x180   :  { %5359 = vmatpush1.bf16.msra.mxu1 %v13475_v20  ;;  %v13489_v20 = vld [vmem:[%s21584_s3 + $0x4ac] ss:$16 sps:$4 sm:$0xff]  }
 0x181   :  { %v1073_v14 = vpop.f32.mrb[10].mxu0  ;;  %13147 = vrot.lane.b32.xlu0 %v13146_v37, %s14319_s2  ;;  %5360 = vmatprep.subr.bf16.mxu1 %v13483_v35 }
 0x182   :  { %v1282_v18 = vpop.f32.mrb[10].mxu1  ;;  %v15972_v40 = vadd.f32 %v1073_v14, %v15778_v55  ;;  %v1075_v33 = vpop.f32.mrb[11].mxu0 }
 0x183   :  { %v15975_v22 = vadd.f32 %v1282_v18, %v15801_v7  ;;  %v1284_v62 = vpop.f32.mrb[11].mxu1  ;;  %v15981_v28 = vadd.f32 %v1075_v33, %v15782_v47 }
 0x184   :  { %v15984_v50 = vadd.f32 %v1284_v62, %v15786_v42  ;;  %v21610_v52 = vmax.f32 %v15972_v40, 0.0  ;;  %5361 = vmatpush1.bf16.msra.mxu1 %v13481_v16 }
 0x185   :  { %21926 = vst [vmem:[#allocation15_spill] sm:$0xff] %v15975_v22  ;;  %v21595_v8 = vmax.f32 %v15975_v22, 0.0  ;;  %v21607_v4 = vmax.f32 %v15981_v28, 0.0  ;;  %5362 = vmatprep.subr.bf16.mxu1 %v13489_v20  ;;  %v13490_v20 = vld [vmem:[%s21584_s3 + $0x4c0] ss:$16 sps:$4 sm:$0xff]  }
 0x186   :  { %21927 = vst [vmem:[#allocation16_spill] sm:$0xff] %v15984_v50  ;;  %v13151_v37 = vpack.i.bf16 %v21610_v52, %v21596_v5 }
 0x187   :  { %v13156_v57 = vpack.i.bf16 %v21595_v8, %v21607_v4 }
 0x188   :  { %13152 = vrot.lane.b32.xlu1 %v13151_v37, %s14319_s2 }
 0x189   :  { %13157 = vrot.lane.b32.xlu0 %v13156_v57, %s14319_s2 }
 0x18a   :  { %v1079_v14 = vpop.f32.mrb[12].mxu0 }
 0x18b   :  { %v1288_v18 = vpop.f32.mrb[12].mxu1  ;;  %v16016_v38 = vadd.f32 %v1079_v14, %v15778_v55  ;;  %v1081_v33 = vpop.f32.mrb[13].mxu0 }
 0x18c   :  { %v1290_v62 = vpop.f32.mrb[13].mxu1  ;;  %v16022_v13 = vadd.f32 %v1081_v33, %v15782_v47  ;;  %v13486_v33 = vld [vmem:[%s21584_s3 + $0x4a4] ss:$16 sps:$4 sm:$0xff]   ;;  %v16052_v63 = vadd.f32 %v1288_v18, %v15801_v7 }
 0x18d   :  { %v16025_v37 = vadd.f32 %v1290_v62, %v15786_v42  ;;  %v21604_v57 = vmax.f32 %v16016_v38, 0.0  ;;  %v13487_v62 = vld [vmem:[%s21584_s3 + $0x4a8] ss:$16 sps:$4 sm:$0xff]   ;;  %5216 = vmatprep.subr.bf16.mxu0 %v13486_v33 }
 0x18e   :  { %v21603_v14 = vmax.f32 %v16022_v13, 0.0  ;;  %21929 = vst [vmem:[#allocation18_spill] sm:$0xff] %v16052_v63  ;;  %5217 = vmatpush1.bf16.msra.mxu0 %v13484_v17  ;;  %5363 = vmatpush1.bf16.msra.mxu1 %v13487_v62  ;;  %v13499_v62 = vld [vmem:[%s21584_s3 + $0x4e8] ss:$16 sps:$4 sm:$0xff]  }
 0x18f   :  { %21928 = vst [vmem:[#allocation17_spill] sm:$0xff] %v16025_v37  ;;  %5218 = vmatprep.subr.bf16.mxu0 %v13492_v1  ;;  %5364 = vmatprep.subr.bf16.mxu1 %v13495_v30  ;;  %v13496_v30 = vld [vmem:[%s21584_s3 + $0x4e0] ss:$16 sps:$4 sm:$0xff]  }
 0x190   :  { %v13161_v35 = vpack.i.bf16 %v21603_v14, %v21604_v57  ;;  %v13504_v57 = vld [vmem:[%s21584_s3 + $0x504] ss:$16 sps:$4 sm:$0xff]  }
 0x192   :  { %v1085_v58 = vpop.f32.mrb[14].mxu0  ;;  %13162 = vrot.lane.b32.xlu1 %v13161_v35, %s14319_s2  ;;  %v13493_v35 = vld [vmem:[%s21584_s3 + $0x4c8] ss:$16 sps:$4 sm:$0xff]   ;;  %5219 = vmatpush1.bf16.msra.mxu0 %v13490_v20 }
 0x193   :  { %v1294_v23 = vpop.f32.mrb[14].mxu1  ;;  %v16062_v8 = vadd.f32 %v1085_v58, %v15778_v55  ;;  %v1087_v18 = vpop.f32.mrb[15].mxu0  ;;  %5365 = vmatpush1.bf16.msra.mxu1 %v13493_v35  ;;  %5220 = vmatprep.subr.bf16.mxu0 %v13498_v31  ;;  %v13507_v31 = vld [vmem:[%s21584_s3 + $0x50c] ss:$16 sps:$4 sm:$0xff]  }
 0x194   :  { %v16065_v16 = vadd.f32 %v1294_v23, %v15801_v7  ;;  %v1296_v33 = vpop.f32.mrb[15].mxu1  ;;  %v16074_v5 = vadd.f32 %v1087_v18, %v15782_v47  ;;  %v21601_v23 = vmax.f32 %v16052_v63, 0.0  ;;  %v13501_v18 = vld [vmem:[%s21584_s3 + $0x4ec] ss:$16 sps:$4 sm:$0xff]  }
 0x195   :  { %v16077_v58 = vadd.f32 %v1296_v33, %v15786_v42  ;;  %v21602_v17 = vmax.f32 %v16062_v8, 0.0  ;;  %5366 = vmatprep.subr.bf16.mxu1 %v13501_v18 }
 0x196   :  { %21930 = vst [vmem:[#allocation19_spill] sm:$0xff] %v16065_v16  ;;  %v21605_v11 = vmax.f32 %v16065_v16, 0.0  ;;  %v21606_v26 = vmax.f32 %v16074_v5, 0.0  ;;  %5221 = vmatpush1.bf16.msra.mxu0 %v13496_v30 }
 0x197   :  { %21931 = vst [vmem:[#allocation20_spill] sm:$0xff] %v16077_v58  ;;  %v13166_v1 = vpack.i.bf16 %v21602_v17, %v21601_v23  ;;  %5367 = vmatpush1.bf16.msra.mxu1 %v13499_v62  ;;  %5222 = vmatprep.subr.bf16.mxu0 %v13504_v57  ;;  %v13508_v57 = vld [vmem:[%s21584_s3 + $0x520] ss:$16 sps:$4 sm:$0xff]   ;;  %v13511_v62 = vld [vmem:[%s21584_s3 + $0x528] ss:$16 sps:$4 sm:$0xff]  }
 0x198   :  { %v13171_v33 = vpack.i.bf16 %v21605_v11, %v21606_v26  ;;  %5368 = vmatprep.subr.bf16.mxu1 %v13507_v31 }
 0x199   :  { %13167 = vrot.lane.b32.xlu0 %v13166_v1, %s14319_s2  ;;  %v13505_v1 = vld [vmem:[%s21584_s3 + $0x508] ss:$16 sps:$4 sm:$0xff]  }
 0x19a   :  { %v1091_v41 = vpop.f32.mrb[16].mxu0  ;;  %v1300_v23 = vpop.f32.mrb[16].mxu1  ;;  %13172 = vrot.lane.b32.xlu1 %v13171_v33, %s14319_s2 }
 0x19b   :  { %v16105_v20 = vadd.f32 %v1091_v41, %v15778_v55  ;;  %v1093_v17 = vpop.f32.mrb[17].mxu0  ;;  %v1302_v14 = vpop.f32.mrb[17].mxu1  ;;  %v13502_v41 = vld [vmem:[%s21584_s3 + $0x500] ss:$16 sps:$4 sm:$0xff]   ;;  %v16145_v31 = vadd.f32 %v1300_v23, %v15801_v7  ;;  %5369 = vmatpush1.bf16.msra.mxu1 %v13505_v1  ;;  %v13516_v23 = vld [vmem:[%s21584_s3 + $0x544] ss:$16 sps:$4 sm:$0xff]  }
 0x19c   :  { %v16115_v35 = vadd.f32 %v1093_v17, %v15782_v47  ;;  %v16118_v18 = vadd.f32 %v1302_v14, %v15786_v42  ;;  %v13510_v14 = vld [vmem:[%s21584_s3 + $0x524] ss:$16 sps:$4 sm:$0xff]   ;;  %v13513_v17 = vld [vmem:[%s21584_s3 + $0x52c] ss:$16 sps:$4 sm:$0xff]   ;;  %5223 = vmatpush1.bf16.msra.mxu0 %v13502_v41 }
 0x19d   :  { %v21609_v33 = vmax.f32 %v16105_v20, 0.0  ;;  %21933 = vst [vmem:[#allocation22_spill] sm:$0xff] %v16145_v31  ;;  %5224 = vmatprep.subr.bf16.mxu0 %v13510_v14  ;;  %5370 = vmatprep.subr.bf16.mxu1 %v13513_v17  ;;  %v13519_v1 = vld [vmem:[%s21584_s3 + $0x54c] ss:$16 sps:$4 sm:$0xff]  }
 0x19e   :  { %21932 = vst [vmem:[#allocation21_spill] sm:$0xff] %v16118_v18  ;;  %v21608_v11 = vmax.f32 %v16115_v35, 0.0 }
 0x19f   :  { %5371 = vmatpush1.bf16.msra.mxu1 %v13511_v62 }
 0x1a0   :  { %v13176_v30 = vpack.i.bf16 %v21608_v11, %v21609_v33  ;;  %5225 = vmatpush1.bf16.msra.mxu0 %v13508_v57  ;;  %5372 = vmatprep.subr.bf16.mxu1 %v13519_v1  ;;  %v13522_v57 = vld [vmem:[%s21584_s3 + $0x564] ss:$16 sps:$4 sm:$0xff]   ;;  %v13523_v1 = vld [vmem:[%s21584_s3 + $0x568] ss:$16 sps:$4 sm:$0xff]  }
 0x1a1   :  { %5226 = vmatprep.subr.bf16.mxu0 %v13516_v23  ;;  %v13520_v23 = vld [vmem:[%s21584_s3 + $0x560] ss:$16 sps:$4 sm:$0xff]  }
 0x1a2   :  { %v1097_v26 = vpop.f32.mrb[18].mxu0  ;;  %v1306_v4 = vpop.f32.mrb[18].mxu1  ;;  %13177 = vrot.lane.b32.xlu0 %v13176_v30, %s14319_s2  ;;  %v21614_v30 = vmax.f32 %v16145_v31, 0.0 }
 0x1a3   :  { %v16149_v41 = vadd.f32 %v1097_v26, %v15778_v55  ;;  %v16152_v11 = vadd.f32 %v1306_v4, %v15801_v7  ;;  %v1099_v33 = vpop.f32.mrb[19].mxu0  ;;  %v1308_v52 = vpop.f32.mrb[19].mxu1  ;;  %v13514_v26 = vld [vmem:[%s21584_s3 + $0x540] ss:$16 sps:$4 sm:$0xff]   ;;  %v13517_v4 = vld [vmem:[%s21584_s3 + $0x548] ss:$16 sps:$4 sm:$0xff]  }
 0x1a4   :  { %v16161_v14 = vadd.f32 %v1099_v33, %v15782_v47  ;;  %v16164_v17 = vadd.f32 %v1308_v52, %v15786_v42  ;;  %5227 = vmatpush1.bf16.msra.mxu0 %v13514_v26  ;;  %5373 = vmatpush1.bf16.msra.mxu1 %v13517_v4  ;;  %v13526_v4 = vld [vmem:[%s21584_s3 + $0x580] ss:$16 sps:$4 sm:$0xff]  }
 0x1a5   :  { %21934 = vst [vmem:[#allocation23_spill] sm:$0xff] %v16149_v41  ;;  %21935 = vst [vmem:[#allocation24_spill] sm:$0xff] %v16152_v11  ;;  %v21615_v53 = vmax.f32 %v16149_v41, 0.0  ;;  %v21617_v61 = vmax.f32 %v16152_v11, 0.0  ;;  %5228 = vmatprep.subr.bf16.mxu0 %v13522_v57  ;;  %5374 = vmatprep.subr.bf16.mxu1 %v13525_v12  ;;  %v13529_v12 = vld [vmem:[%s21584_s3 + $0x588] ss:$16 sps:$4 sm:$0xff]  }
 0x1a6   :  { %21936 = vst [vmem:[#allocation25_spill] sm:$0xff] %v16161_v14  ;;  %21937 = vst [vmem:[#allocation26_spill] sm:$0xff] %v16164_v17  ;;  %v21618_v52 = vmax.f32 %v16161_v14, 0.0  ;;  %v22009_v41 = vmov 0 }
 0x1a7   :  { %v13181_v33 = vpack.i.bf16 %v21615_v53, %v21614_v30  ;;  %v22010_v41 = vsel %vm16488_vm8, 4294967295, %v22009_v41 }
 0x1a8   :  { %v13186_v62 = vpack.i.bf16 %v21617_v61, %v21618_v52  ;;  %5229 = vmatpush1.bf16.msra.mxu0 %v13520_v23  ;;  %5375 = vmatpush1.bf16.msra.mxu1 %v13523_v1  ;;  %22011 = vst [vmem:[#allocation65_spill] sm:$0xff] %v22010_v41 }
 0x1a9   :  { %13182 = vrot.lane.b32.xlu1 %v13181_v33, %s14319_s2 }
 0x1aa   :  { %v1103_v30 = vpop.f32.mrb[20].mxu0  ;;  %v1312_v53 = vpop.f32.mrb[20].mxu1  ;;  %13187 = vrot.lane.b32.xlu0 %v13186_v62, %s14319_s2 }
 0x1ab   :  { %v16199_v29 = vadd.f32 %v1103_v30, %v15778_v55  ;;  %v1105_v26 = vpop.f32.mrb[21].mxu0  ;;  %v1314_v61 = vpop.f32.mrb[21].mxu1  ;;  %v13528_v30 = vld [vmem:[%s21584_s3 + $0x584] ss:$16 sps:$4 sm:$0xff]   ;;  %v16226_v23 = vadd.f32 %v1312_v53, %v15801_v7 }
 0x1ac   :  { %v16202_v52 = vadd.f32 %v1105_v26, %v15782_v47  ;;  %v16205_v0 = vadd.f32 %v1314_v61, %v15786_v42  ;;  %v13531_v61 = vld [vmem:[%s21584_s3 + $0x58c] ss:$16 sps:$4 sm:$0xff]   ;;  %5230 = vmatprep.subr.bf16.mxu0 %v13528_v30 }
 0x1ad   :  { %21938 = vst [vmem:[#allocation27_spill] sm:$0xff] %v16199_v29  ;;  %v21624_v33 = vmax.f32 %v16199_v29, 0.0  ;;  %5376 = vmatprep.subr.bf16.mxu1 %v13531_v61  ;;  %5231 = vmatpush1.bf16.msra.mxu0 %v13526_v4  ;;  %21941 = vst [vmem:[#allocation30_spill] sm:$0xff] %v16226_v23  ;;  %v21629_v53 = vmax.f32 %v16226_v23, 0.0 }
 0x1ae   :  { %21939 = vst [vmem:[#allocation28_spill] sm:$0xff] %v16202_v52  ;;  %21940 = vst [vmem:[#allocation29_spill] sm:$0xff] %v16205_v0  ;;  %v21623_v57 = vmax.f32 %v16202_v52, 0.0  ;;  %5377 = vmatpush1.bf16.msra.mxu1 %v13529_v12 }
 0x1b0   :  { %v13191_v62 = vpack.i.bf16 %v21623_v57, %v21624_v33 }
 0x1b2   :  { %v1109_v1 = vpop.f32.mrb[22].mxu0  ;;  %v1318_v26 = vpop.f32.mrb[22].mxu1  ;;  %13192 = vrot.lane.b32.xlu1 %v13191_v62, %s14319_s2 }
 0x1b3   :  { %v16230_v15 = vadd.f32 %v1109_v1, %v15778_v55  ;;  %v16233_v30 = vadd.f32 %v1318_v26, %v15801_v7  ;;  %v1111_v36 = vpop.f32.mrb[23].mxu0  ;;  %v1320_v45 = vpop.f32.mrb[23].mxu1 }
 0x1b4   :  { %v16236_v57 = vadd.f32 %v1111_v36, %v15782_v47  ;;  %v16239_v4 = vadd.f32 %v1320_v45, %v15786_v42 }
 0x1b5   :  { %21942 = vst [vmem:[#allocation31_spill] sm:$0xff] %v16230_v15  ;;  %21943 = vst [vmem:[#allocation32_spill] sm:$0xff] %v16233_v30  ;;  %v21630_v12 = vmax.f32 %v16230_v15, 0.0  ;;  %v21631_v61 = vmax.f32 %v16233_v30, 0.0 }
 0x1b6   :  { %21944 = vst [vmem:[#allocation33_spill] sm:$0xff] %v16236_v57  ;;  %21945 = vst [vmem:[#allocation34_spill] sm:$0xff] %v16239_v4  ;;  %v21632_v62 = vmax.f32 %v16236_v57, 0.0 }
 0x1b7   :  { %v13196_v1 = vpack.i.bf16 %v21630_v12, %v21629_v53 }
 0x1b8   :  { %v13201_v36 = vpack.i.bf16 %v21631_v61, %v21632_v62 }
 0x1b9   :  { %13197 = vrot.lane.b32.xlu0 %v13196_v1, %s14319_s2 }
 0x1ba   :  { %v1115_v45 = vpop.f32.mrb[24].mxu0  ;;  %v1324_v26 = vpop.f32.mrb[24].mxu1  ;;  %13202 = vrot.lane.b32.xlu1 %v13201_v36, %s14319_s2 }
 0x1bb   :  { %v16256_v33 = vadd.f32 %v1115_v45, %v15778_v55  ;;  %v1117_v56 = vpop.f32.mrb[25].mxu0  ;;  %v1326_v27 = vpop.f32.mrb[25].mxu1  ;;  %v16271_v36 = vadd.f32 %v1324_v26, %v15801_v7 }
 0x1bc   :  { %v16259_v49 = vadd.f32 %v1117_v56, %v15782_v47  ;;  %v16262_v53 = vadd.f32 %v1326_v27, %v15786_v42 }
 0x1bd   :  { %21946 = vst [vmem:[#allocation35_spill] sm:$0xff] %v16256_v33  ;;  %v21637_v12 = vmax.f32 %v16256_v33, 0.0  ;;  %21949 = vst [vmem:[#allocation38_spill] sm:$0xff] %v16271_v36  ;;  %v21643_v26 = vmax.f32 %v16271_v36, 0.0 }
 0x1be   :  { %21947 = vst [vmem:[#allocation36_spill] sm:$0xff] %v16259_v49  ;;  %21948 = vst [vmem:[#allocation37_spill] sm:$0xff] %v16262_v53  ;;  %v21636_v61 = vmax.f32 %v16259_v49, 0.0 }
 0x1c0   :  { %v13206_v1 = vpack.i.bf16 %v21636_v61, %v21637_v12 }
 0x1c2   :  { %v1121_v45 = vpop.f32.mrb[26].mxu0  ;;  %v1330_v62 = vpop.f32.mrb[26].mxu1  ;;  %13207 = vrot.lane.b32.xlu0 %v13206_v1, %s14319_s2 }
 0x1c3   :  { %v16275_v56 = vadd.f32 %v1121_v45, %v15778_v55  ;;  %v16278_v27 = vadd.f32 %v1330_v62, %v15801_v7  ;;  %v1123_v30 = vpop.f32.mrb[27].mxu0  ;;  %v1332_v23 = vpop.f32.mrb[27].mxu1 }
 0x1c4   :  { %v16281_v11 = vadd.f32 %v1123_v30, %v15782_v47  ;;  %v16284_v61 = vadd.f32 %v1332_v23, %v15786_v42 }
 0x1c5   :  { %21950 = vst [vmem:[#allocation39_spill] sm:$0xff] %v16275_v56  ;;  %21951 = vst [vmem:[#allocation40_spill] sm:$0xff] %v16278_v27  ;;  %v21644_v12 = vmax.f32 %v16275_v56, 0.0  ;;  %v21645_v1 = vmax.f32 %v16278_v27, 0.0 }
 0x1c6   :  { %21952 = vst [vmem:[#allocation41_spill] sm:$0xff] %v16281_v11  ;;  %21953 = vst [vmem:[#allocation42_spill] sm:$0xff] %v16284_v61  ;;  %v21646_v45 = vmax.f32 %v16281_v11, 0.0 }
 0x1c7   :  { %v13211_v62 = vpack.i.bf16 %v21644_v12, %v21643_v26 }
 0x1c8   :  { %v13216_v30 = vpack.i.bf16 %v21645_v1, %v21646_v45 }
 0x1c9   :  { %13212 = vrot.lane.b32.xlu1 %v13211_v62, %s14319_s2 }
 0x1ca   :  { %v1127_v23 = vpop.f32.mrb[28].mxu0  ;;  %v1336_v31 = vpop.f32.mrb[28].mxu1  ;;  %13217 = vrot.lane.b32.xlu0 %v13216_v30, %s14319_s2 }
 0x1cb   :  { %v16301_v16 = vadd.f32 %v1127_v23, %v15778_v55  ;;  %v1129_v63 = vpop.f32.mrb[29].mxu0  ;;  %v1338_v22 = vpop.f32.mrb[29].mxu1  ;;  %v16316_v30 = vadd.f32 %v1336_v31, %v15801_v7 }
 0x1cc   :  { %v16304_v36 = vadd.f32 %v1129_v63, %v15782_v47  ;;  %v16307_v26 = vadd.f32 %v1338_v22, %v15786_v42 }
 0x1cd   :  { %21954 = vst [vmem:[#allocation43_spill] sm:$0xff] %v16301_v16  ;;  %v21650_v12 = vmax.f32 %v16301_v16, 0.0  ;;  %21957 = vst [vmem:[#allocation46_spill] sm:$0xff] %v16316_v30 }
 0x1ce   :  { %21955 = vst [vmem:[#allocation44_spill] sm:$0xff] %v16304_v36  ;;  %21956 = vst [vmem:[#allocation45_spill] sm:$0xff] %v16307_v26  ;;  %v21649_v1 = vmax.f32 %v16304_v36, 0.0 }
 0x1d0   :  { %v13221_v62 = vpack.i.bf16 %v21649_v1, %v21650_v12  ;;  %v21962_v12 = vmov 0 }
 0x1d1   :  { %v21963_v12 = vsel %vm16333_vm5, 4294967295, %v21962_v12 }
 0x1d2   :  { %v1133_v63 = vpop.f32.mrb[30].mxu0  ;;  %v1342_v22 = vpop.f32.mrb[30].mxu1  ;;  %13222 = vrot.lane.b32.xlu1 %v13221_v62, %s14319_s2  ;;  %21964 = vst [vmem:[#allocation51_spill] sm:$0xff] %v21963_v12 }
 0x1d3   :  { %v16320_v23 = vadd.f32 %v1133_v63, %v15778_v55  ;;  %v16323_v45 = vadd.f32 %v1342_v22, %v15801_v7  ;;  %v1135_v27 = vpop.f32.mrb[31].mxu0  ;;  %v1344_v10 = vpop.f32.mrb[31].mxu1 }
 0x1d4   :  { %v16326_v1 = vadd.f32 %v1135_v27, %v15782_v47  ;;  %v16329_v31 = vadd.f32 %v1344_v10, %v15786_v42  ;;  %v21659_v27 = vmax.f32 %v16316_v30, 0.0  ;;  %v13118_v22 = vpop.permute.xlu0 %13117  ;;  %v21996_v10 = vmov 0 }
 0x1d5   :  { %21958 = vst [vmem:[#allocation47_spill] sm:$0xff] %v16320_v23  ;;  %21959 = vst [vmem:[#allocation48_spill] sm:$0xff] %v16323_v45  ;;  %v21660_v63 = vmax.f32 %v16320_v23, 0.0  ;;  %v13120_v46 = vunpack.i.h.bf16 %v13118_v22  ;;  %v13119_v34 = vunpack.i.l.bf16 %v13118_v22  ;;  %v21972_v22 = vmax.f32 %v16323_v45, 0.0 }
 0x1d6   :  { %21960 = vst [vmem:[#allocation49_spill] sm:$0xff] %v16326_v1  ;;  %21961 = vst [vmem:[#allocation50_spill] sm:$0xff] %v16329_v31  ;;  %v21666_v60 = vmax.f32 %v16326_v1, 0.0  ;;  %v21997_v10 = vsel %vm16450_vm12, 4294967295, %v21996_v10 }
 0x1d7   :  { %v13226_v36 = vpack.i.bf16 %v21660_v63, %v21659_v27  ;;  %v1780_v27 = vsel %vm21706_vm10, %v13119_v34, %v13120_v46  ;;  %21998 = vst [vmem:[#allocation60_spill] sm:$0xff] %v21997_v10 }
 0x1d8   :  { %v13231_v16 = vpack.i.bf16 %v21972_v22, %v21666_v60 }
 0x1d9   :  { %13227 = vrot.lane.b32.xlu0 %v13226_v36, %s14319_s2 }
 0x1da   :  { %v1139_v63 = vpop.f32.mrb[32].mxu0  ;;  %v1348_v23 = vpop.f32.mrb[32].mxu1  ;;  %13232 = vrot.lane.b32.xlu1 %v13231_v16, %s14319_s2  ;;  %v21977_v16 = vmax.f32 %v15790_v39, 0.0 }
 0x1db   :  { %v16373_v1 = vadd.f32 %v1139_v63, %v15778_v55  ;;  %v1141_v45 = vpop.f32.mrb[33].mxu0  ;;  %v1350_v22 = vpop.f32.mrb[33].mxu1  ;;  %v16408_v49 = vadd.f32 %v1348_v23, %v15801_v7  ;;  %v21990_v23 = vmax.f32 %v15793_v48, 0.0  ;;  %v21995_v48 = vmax.f32 %v15819_v3, 0.0 }
 0x1dc   :  { %v16377_v36 = vadd.f32 %v1141_v45, %v15782_v47  ;;  %v16380_v30 = vadd.f32 %v1350_v22, %v15786_v42  ;;  %v16382_v34 = vpop.permute.xlu1 %13122  ;;  %v1948_v56 = vmax.f32 %v21977_v16, %v1780_v27  ;;  %v21978_v45 = vmov 0  ;;  %v16401_v39 = vpop.permute.xlu0 %13127 }
 0x1dd   :  { %21973 = vst [vmem:[#allocation53_spill] sm:$0xff] %v16373_v1  ;;  %21976 = vst [vmem:[#allocation56_spill] sm:$0xff] %v16382_v34  ;;  %v13125_v63 = vunpack.i.h.bf16 %v16382_v34  ;;  %v21979_v45 = vsel %vm16391_vm14, 4294967295, %v21978_v45  ;;  %v13129_v60 = vunpack.i.l.bf16 %v16401_v39  ;;  %v21985_v33 = vunpack.i.l.bf16 %v16382_v34 }
 0x1de   :  { %21974 = vst [vmem:[#allocation54_spill] sm:$0xff] %v16377_v36  ;;  %21975 = vst [vmem:[#allocation55_spill] sm:$0xff] %v16380_v30  ;;  %v21988_v16 = vmax.f32 %v16373_v1, 0.0  ;;  %v21989_v11 = vmax.f32 %v16377_v36, 0.0  ;;  %v2140_v62 = vrot.slane %v1948_v56, 1 }
 0x1df   :  { %21980 = vst [vmem:[#allocation57_spill] sm:$0xff] %v21979_v45  ;;  %21983 = vst [vmem:[#allocation58_spill] sm:$0xff] %v16401_v39  ;;  %v1781_v57 = vsel %vm21706_vm10, %v13120_v46, %v21985_v33  ;;  %v1783_v34 = vsel %vm21706_vm10, %v13125_v63, %v13129_v60  ;;  %v21991_v46 = vunpack.i.h.bf16 %v16401_v39  ;;  %v2627_v39 = vld [vmem:[#allocation3] sm:$0x11] }
 0x1e0   :  { %21984 = vst [vmem:[#allocation59_spill] sm:$0xff] %v16408_v49  ;;  %v13236_v15 = vpack.i.bf16 %v21989_v11, %v21988_v16  ;;  %v1949_v52 = vmax.f32 %v21990_v23, %v1781_v57  ;;  %v21994_v11 = vmax.f32 %v15813_v32, 0.0 }
 0x1e1   :  { %v1784_v33 = vsel %vm21706_vm10, %v13129_v60, %v21991_v46 }
 0x1e2   :  { %v16441_v16 = vmax.f32 %v21994_v11, %v1783_v34  ;;  %v16445_v57 = vmax.f32 %v21995_v48, %v1784_v33  ;;  %v2143_v63 = vrot.slane %v1949_v52, 1  ;;  %v1145_v60 = vpop.f32.mrb[34].mxu0  ;;  %v1354_v23 = vpop.f32.mrb[34].mxu1  ;;  %13237 = vrot.lane.b32.xlu0 %v13236_v15, %s14319_s2  ;;  %v22020_v34 = vmax.f32 %v15796_v51, 0.0 }
 0x1e3   :  { %v16457_v3 = vadd.f32 %v1145_v60, %v15778_v55  ;;  %v16460_v46 = vadd.f32 %v1354_v23, %v15801_v7  ;;  %v1147_v33 = vpop.f32.mrb[35].mxu0  ;;  %v1356_v11 = vpop.f32.mrb[35].mxu1 }
 0x1e4   :  { %v21690_v32 = vrot.slane %v16441_v16, 1  ;;  %v16464_v48 = vadd.f32 %v1147_v33, %v15782_v47  ;;  %v16467_v25 = vadd.f32 %v1356_v11, %v15786_v42  ;;  %v22006_v23 = vrot.slane %v16445_v57, 1  ;;  %v16483_v36 = vpop.permute.xlu1 %13132 }
 0x1e5   :  { %21999 = vst [vmem:[#allocation61_spill] sm:$0xff] %v16457_v3  ;;  %22000 = vst [vmem:[#allocation62_spill] sm:$0xff] %v16460_v46  ;;  %v21692_v33 = vmax.f32 %v16457_v3, 0.0  ;;  %v21694_v11 = vmax.f32 %v16460_v46, 0.0  ;;  %v3189_v3 = vld [vmem:[#allocation3] sm:$0x44] }
 0x1e6   :  { %22001 = vst [vmem:[#allocation63_spill] sm:$0xff] %v16464_v48  ;;  %22002 = vst [vmem:[#allocation64_spill] sm:$0xff] %v16467_v25  ;;  %v2142_v60 = vsel %vm22005_vm2, %v2140_v62, %v21690_v32  ;;  %v2145_v15 = vsel %vm22007_vm0, %v2143_v63, %v22006_v23  ;;  %v21695_v14 = vmax.f32 %v16464_v48, 0.0  ;;  %v2884_v62 = vld [vmem:[#allocation3] sm:$0x22]  ;;  %v22012_v63 = vmax.f32 %v16408_v49, 0.0 }
 0x1e7   :  { %v2396_v1 = vmax.f32 %v1948_v56, %v2142_v60  ;;  %v2397_v29 = vmax.f32 %v1949_v52, %v2145_v15  ;;  %v13135_v32 = vunpack.i.h.bf16 %v16483_v36  ;;  %v13134_v56 = vunpack.i.l.bf16 %v16483_v36  ;;  %vm16521_vm0 = vmor %vm16471_vm4, %vm16450_vm12 }
 0x1e8   :  { %v13241_v23 = vpack.i.bf16 %v21692_v33, %v22012_v63  ;;  %v13246_v63 = vpack.i.bf16 %v21694_v11, %v21695_v14  ;;  %v22021_v33 = vmax.f32 %v15822_v9, 0.0  ;;  %vm16590_vm4 = vmand %vm22037_vm3, %vm22036_vm15  ;;  %vm22042_vm12 = vcmask 883712  }
 0x1e9   :  { %v12652_v60 = vpack.c.bf16 %v2397_v29, %v2396_v1  ;;  %v1786_v49 = vsel %vm21706_vm10, %v13134_v56, %v13135_v32  ;;  %v22017_v56 = vmax.f32 %v15845_v54, 0.0  ;;  %v22022_v54 = vmax.f32 %v15857_v24, 0.0  ;;  %vm16606_vm3 = vmor %vm16532_vm1, %vm16488_vm8 }
 0x1ea   :  { %13242 = vrot.lane.b32.xlu1 %v13241_v23, %s14319_s2  ;;  %v1151_v23 = vpop.f32.mrb[36].mxu0  ;;  %v1360_v52 = vpop.f32.mrb[36].mxu1  ;;  %13247 = vrot.lane.b32.xlu0 %v13246_v63, %s14319_s2  ;;  %v22050_v29 = vmax.f32 %v16164_v17, 0.0  ;;  %vm22056_vm1 = vsmask.f32 7424  ;;  %vm22057_vm15 = vcmask 1047559  }
 0x1eb   :  { %v2628_v22 = vsel %vm16417_vm13, %v12652_v60, %v2627_v39  ;;  %v11302_v11 = vrot.slane %v12652_v60, 9  ;;  %v1956_v14 = vmax.f32 %v22017_v56, %v1786_v49  ;;  %v16540_v39 = vpack.i.bf16 %v22021_v33, %v22020_v34  ;;  %v1153_v46 = vpop.f32.mrb[37].mxu0  ;;  %v1362_v10 = vpop.f32.mrb[37].mxu1  ;;  %vm16641_vm10 = vmand %vm22057_vm15, %vm22056_vm1 }
 0x1ec   :  { %v22023_v49 = vmax.f32 %v15903_v19, 0.0  ;;  %2629 = vst [vmem:[#allocation3] sm:$0x11] %v2628_v22  ;;  %v16550_v36 = vadd.f32 %v1151_v23, %v15778_v55  ;;  %v2679_v51 = vshll.u32 %v12652_v60, 16  ;;  %v16556_v34 = vadd.f32 %v1360_v52, %v15801_v7  ;;  %v16564_v22 = vpop.permute.xlu0 %13137  ;;  %v16577_v24 = vpop.permute.xlu1 %13142 }
 0x1ed   :  { %v2885_v33 = vsel %vm16435_vm6, %v11302_v11, %v2884_v62  ;;  %22030 = vst [vmem:[#allocation69_spill] sm:$0xff] %v16564_v22  ;;  %v16569_v60 = vadd.f32 %v1153_v46, %v15782_v47  ;;  %v16572_v11 = vadd.f32 %v1362_v10, %v15786_v42  ;;  %v2152_v45 = vrot.slane %v1956_v14, 1  ;;  %22033 = vst [vmem:[#allocation72_spill] sm:$0xff] %v16577_v24 }
 0x1ee   :  { %v16546_v56 = vpack.i.bf16 %v22023_v49, %v22022_v54  ;;  %22024 = vst [vmem:[#allocation66_spill] sm:$0xff] %v16550_v36  ;;  %22025 = vst [vmem:[#allocation67_spill] sm:$0xff] %v16556_v34  ;;  %v22027_v54 = vmov 0  ;;  %v22034_v23 = vmax.f32 %v15926_v6, 0.0  ;;  %v22038_v52 = vmov 0 }
 0x1ef   :  { %v22028_v54 = vsel %vm16560_vm11, 4294967295, %v22027_v54  ;;  %2886 = vst [vmem:[#allocation3] sm:$0x22] %v2885_v33  ;;  %22031 = vst [vmem:[#allocation70_spill] sm:$0xff] %v16569_v60  ;;  %v22035_v33 = vmax.f32 %v15984_v50, 0.0  ;;  %v21711_v19 = vmax.f32 %v16569_v60, 0.0 }
 0x1f0   :  { %22029 = vst [vmem:[#allocation68_spill] sm:$0xff] %v22028_v54  ;;  %22032 = vst [vmem:[#allocation71_spill] sm:$0xff] %v16572_v11  ;;  %v22039_v52 = vsel %vm16590_vm4, 4294967295, %v22038_v52  ;;  %v11286_v62 = vrot.slane %v2679_v51, 9  ;;  %v11318_v63 = vrot.slane %v2679_v51, 10  ;;  %v22043_v10 = vmax.f32 %v16550_v36, 0.0 }
 0x1f1   :  { %v16583_v49 = vpack.i.bf16 %v22035_v33, %v22034_v23  ;;  %22040 = vst [vmem:[#allocation73_spill] sm:$0xff] %v22039_v52  ;;  %v22041_v23 = vunpack.i.l.bf16 %v16564_v22  ;;  %v13140_v51 = vunpack.i.h.bf16 %v16564_v22  ;;  %v22046_v6 = vmax.f32 %v15854_v43, 0.0 }
 0x1f2   :  { %v13251_v46 = vpack.i.bf16 %v21711_v19, %v22043_v10  ;;  %v22048_v60 = vmax.f32 %v16077_v58, 0.0  ;;  %v22049_v19 = vmax.f32 %v16118_v18, 0.0  ;;  %v22051_v36 = vmax.f32 %v16205_v0, 0.0  ;;  %v1157_v58 = vpop.f32.mrb[38].mxu0 }
 0x1f3   :  { %v1787_v33 = vsel %vm22042_vm12, %v13135_v32, %v22041_v23  ;;  %v13144_v32 = vunpack.i.l.bf16 %v16577_v24  ;;  %v22047_v23 = vmax.f32 %v16025_v37, 0.0  ;;  %v22052_v22 = vmax.f32 %v16239_v4, 0.0  ;;  %vm22055_vm12 = vmmov %vm22005_vm2  ;;  %v16669_v4 = vpop.permute.xlu0 %13147 }
 0x1f4   :  { %v1957_v9 = vmax.f32 %v22046_v6, %v1787_v33  ;;  %v16624_v41 = vpack.i.bf16 %v22050_v29, %v22049_v19  ;;  %v2779_v6 = vld [vmem:[#allocation3] sm:$0x11]  ;;  %v22054_v33 = vrot.slane %v16441_v16, 1  ;;  %v2404_v18 = vmax.f32 %v1956_v14, %v2152_v45  ;;  %13252 = vrot.lane.b32.xlu1 %v13251_v46, %s14319_s2  ;;  %v1159_v29 = vpop.f32.mrb[39].mxu0 }
 0x1f5   :  { %v16618_v10 = vpack.i.bf16 %v22048_v60, %v22047_v23  ;;  %v16630_v43 = vpack.i.bf16 %v22052_v22, %v22051_v36  ;;  %v1366_v60 = vpop.f32.mrb[38].mxu1  ;;  %v2780_v23 = vsel %vm16503_vm7, %v11286_v62, %v2779_v6  ;;  %vm22064_vm1 = vcmask 1046534  }
 0x1f6   :  { %v2153_v37 = vsel %vm22055_vm12, %v22054_v33, %v2152_v45  ;;  %v2154_v17 = vrot.slane %v1957_v9, 1  ;;  %v1368_v0 = vpop.f32.mrb[39].mxu1  ;;  %2781 = vst [vmem:[#allocation3] sm:$0x11] %v2780_v23  ;;  %v2988_v36 = vld [vmem:[#allocation3] sm:$0x22]  ;;  %v16646_v33 = vadd.f32 %v1157_v58, %v15778_v55  ;;  %v16649_v14 = vadd.f32 %v1366_v60, %v15801_v7 }
 0x1f7   :  { %22053 = vst [vmem:[#allocation74_spill] sm:$0xff] %v16630_v43  ;;  %v16652_v45 = vadd.f32 %v1159_v29, %v15782_v47  ;;  %v16655_v62 = vadd.f32 %v1368_v0, %v15786_v42  ;;  %v2989_v46 = vsel %vm16521_vm0, %v11318_v63, %v2988_v36  ;;  %vm22063_vm12 = vsmask.f32 7962  ;;  %v3664_v58 = vld [vmem:[#allocation3 + $0x10] sm:$0x11] }
 0x1f8   :  { %22060 = vst [vmem:[#allocation75_spill] sm:$0xff] %v16649_v14  ;;  %vm16661_vm15 = vmand %vm22064_vm1, %vm22063_vm12  ;;  %v22067_v23 = vrot.slane %v16445_v57, 1  ;;  %v2405_v19 = vmax.f32 %v1957_v9, %v2154_v17  ;;  %vm22068_vm8 = vcmask 883712   ;;  %v2400_v0 = vmax.f32 %v16441_v16, %v2153_v37 }
 0x1f9   :  { %22061 = vst [vmem:[#allocation76_spill] sm:$0xff] %v16652_v45  ;;  %22062 = vst [vmem:[#allocation77_spill] sm:$0xff] %v16655_v62  ;;  %v1789_v29 = vsel %vm22068_vm8, %v13140_v51, %v13144_v32  ;;  %v3904_v51 = vld [vmem:[#allocation3 + $0x10] sm:$0x22]  ;;  %v22071_v37 = vunpack.i.h.bf16 %v16577_v24  ;;  %v22072_v48 = vmax.f32 %v15888_v21, 0.0  ;;  %v22073_v36 = vmax.f32 %v16556_v34, 0.0 }
 0x1fa   :  { %v2155_v60 = vsel %vm22005_vm2, %v22067_v23, %v2154_v17  ;;  %2990 = vst [vmem:[#allocation3] sm:$0x22] %v2989_v46  ;;  %vm16679_vm2 = vmor %vm16641_vm10, %vm16560_vm11  ;;  %v3414_v17 = vld [vmem:[#allocation3] sm:$0x88]  ;;  %v12684_v46 = vpack.c.bf16 %v2405_v19, %v2404_v18  ;;  %v13150_v23 = vunpack.i.h.bf16 %v16669_v4  ;;  %v22074_v54 = vmax.f32 %v16646_v33, 0.0 }
 0x1fb   :  { %v2401_v63 = vmax.f32 %v16445_v57, %v2155_v60  ;;  %v1790_v16 = vsel %vm22068_vm8, %v13144_v32, %v22071_v37  ;;  %v21727_v57 = vmax.f32 %v16652_v45, 0.0  ;;  %v16692_v22 = vmax.f32 %v22072_v48, %v1789_v29  ;;  %vm16722_vm10 = vmor %vm16661_vm15, %vm16590_vm4 }
 0x1fc   :  { %v13256_v43 = vpack.i.bf16 %v22074_v54, %v22073_v36  ;;  %v13149_v18 = vunpack.i.l.bf16 %v16669_v4  ;;  %v22075_v19 = vmax.f32 %v16262_v53, 0.0  ;;  %v22076_v32 = vmax.f32 %v16284_v61, 0.0 }
 0x1fd   :  { %v16688_v60 = vpack.c.bf16 %v2401_v63, %v2400_v0  ;;  %v3665_v0 = vsel %vm16417_vm13, %v12684_v46, %v3664_v58  ;;  %v11382_v63 = vrot.slane %v12684_v46, 9  ;;  %v22077_v21 = vmax.f32 %v16649_v14, 0.0 }
 0x1fe   :  { %v16703_v37 = vpack.i.bf16 %v22076_v32, %v22075_v19  ;;  %v22078_v29 = vmax.f32 %v16307_v26, 0.0  ;;  %v22079_v54 = vmax.f32 %v16329_v31, 0.0  ;;  %vm22082_vm12 = vsmask.f32 7950  ;;  %3666 = vst [vmem:[#allocation3 + $0x10] sm:$0x11] %v3665_v0  ;;  %13257 = vrot.lane.b32.xlu0 %v13256_v43, %s14319_s2 }
 0x1ff   :  { %v13261_v48 = vpack.i.bf16 %v22077_v21, %v21727_v57  ;;  %vm22083_vm1 = vcmask 1043459   ;;  %v22084_v19 = vmov 0  ;;  %v3150_v32 = vrot.slane %v16688_v60, 6 }
 0x200   :  { %v16715_v4 = vpack.i.bf16 %v22079_v54, %v22078_v29  ;;  %vm16728_vm8 = vmand %vm22083_vm1, %vm22082_vm12  ;;  %v3375_v21 = vrot.slane %v16688_v60, 7  ;;  %v1163_v29 = vpop.f32.mrb[40].mxu0  ;;  %v1372_v54 = vpop.f32.mrb[40].mxu1  ;;  %vm22087_vm11 = vsmask.f32 7966  ;;  %vm22088_vm15 = vcmask 1047559  }
 0x201   :  { %v22085_v19 = vsel %vm16728_vm8, 4294967295, %v22084_v19  ;;  %vm16737_vm4 = vmand %vm22088_vm15, %vm22087_vm11  ;;  %v3713_v57 = vshll.u32 %v12684_v46, 16  ;;  %v3905_v36 = vsel %vm16435_vm6, %v11382_v63, %v3904_v51  ;;  %v22091_v14 = vmax.f32 %v15900_v59, 0.0  ;;  %13262 = vrot.lane.b32.xlu1 %v13261_v48, %s14319_s2  ;;  %v1165_v43 = vpop.f32.mrb[41].mxu0  ;;  %v1374_v26 = vpop.f32.mrb[41].mxu1 }
 0x202   :  { %22086 = vst [vmem:[#allocation78_spill] sm:$0xff] %v22085_v19  ;;  %vm22092_vm12 = vcmask 883712   ;;  %v3190_v31 = vsel %vm16606_vm3, %v3150_v32, %v3189_v3  ;;  %v3415_v53 = vsel %vm16679_vm2, %v3375_v21, %v3414_v17  ;;  %3906 = vst [vmem:[#allocation3 + $0x10] sm:$0x22] %v3905_v36  ;;  %v2160_v46 = vrot.slane %v16692_v22, 1  ;;  %v16770_v63 = vpop.permute.xlu0 %13157  ;;  %v1169_v24 = vpop.f32.mrb[42].mxu0 }
 0x203   :  { %v16745_v34 = vmax.f32 %v22091_v14, %v1790_v16  ;;  %v1792_v0 = vsel %vm22092_vm12, %v13149_v18, %v13150_v23  ;;  %v22093_v51 = vmax.f32 %v15920_v44, 0.0  ;;  %v16758_v14 = vpop.permute.xlu1 %13152  ;;  %3191 = vst [vmem:[#allocation3] sm:$0x44] %v3190_v31  ;;  %v3241_v16 = vshll.u32 %v16688_v60, 16  ;;  %3416 = vst [vmem:[#allocation3] sm:$0x88] %v3415_v53 }
 0x204   :  { %22094 = vst [vmem:[#allocation79_spill] sm:$0xff] %v16758_v14  ;;  %v16762_v18 = vadd.f32 %v1163_v29, %v15778_v55  ;;  %v16765_v3 = vadd.f32 %v1165_v43, %v15782_v47  ;;  %v16768_v17 = vadd.f32 %v1374_v26, %v15786_v42  ;;  %22098 = vst [vmem:[#allocation83_spill] sm:$0xff] %v16770_v63  ;;  %v13155_v48 = vunpack.i.h.bf16 %v16758_v14  ;;  %v1378_v45 = vpop.f32.mrb[42].mxu1 }
 0x205   :  { %v16756_v59 = vmax.f32 %v22093_v51, %v1792_v0  ;;  %v21736_v31 = vunpack.i.l.bf16 %v16758_v14  ;;  %vm16780_vm11 = vmor %vm16737_vm4, %vm16728_vm8  ;;  %v11366_v26 = vrot.slane %v3713_v57, 9  ;;  %v2163_v36 = vrot.slane %v16745_v34, 1  ;;  %v3808_v60 = vld [vmem:[#allocation3 + $0x10] sm:$0x11] }
 0x206   :  { %22095 = vst [vmem:[#allocation80_spill] sm:$0xff] %v16762_v18  ;;  %22096 = vst [vmem:[#allocation81_spill] sm:$0xff] %v16765_v3  ;;  %v21747_v32 = vmax.f32 %v16762_v18, 0.0  ;;  %v21742_v21 = vmax.f32 %v16765_v3, 0.0  ;;  %v11398_v29 = vrot.slane %v3713_v57, 10  ;;  %vm22101_vm1 = vcmask 1046528  }
 0x207   :  { %22097 = vst [vmem:[#allocation82_spill] sm:$0xff] %v16768_v17  ;;  %v2161_v44 = vrot.slane %v16756_v59, 1  ;;  %vm22102_vm15 = vmmov %vm22092_vm12  ;;  %v13159_v6 = vunpack.i.l.bf16 %v16770_v63  ;;  %v3243_v51 = vrot.slane %v3241_v16, 7  ;;  %v16793_v61 = vadd.f32 %v1372_v54, %v15801_v7 }
 0x208   :  { %v1793_v43 = vsel %vm22102_vm15, %v13150_v23, %v21736_v31  ;;  %v13266_v19 = vpack.i.bf16 %v21742_v21, %v21747_v32  ;;  %v22104_v57 = vmax.f32 %v15923_v2, 0.0  ;;  %vm22105_vm4 = vmmov %vm22092_vm12  ;;  %v22106_v14 = vunpack.i.h.bf16 %v16770_v63 }
 0x209   :  { %v2162_v0 = vsel %vm22101_vm1, %v2160_v46, %v2161_v44  ;;  %22103 = vst [vmem:[#allocation84_spill] sm:$0xff] %v16793_v61  ;;  %v3809_v46 = vsel %vm16503_vm7, %v11366_v26, %v3808_v60  ;;  %v1795_v31 = vsel %vm22105_vm4, %v13155_v48, %v13159_v6  ;;  %vm22107_vm12 = vmmov %vm22105_vm4  ;;  %v4000_v18 = vld [vmem:[#allocation3 + $0x10] sm:$0x22]  ;;  %v22108_v21 = vmax.f32 %v15972_v40, 0.0  ;;  %v1380_v48 = vpop.f32.mrb[43].mxu1 }
 0x20a   :  { %v1965_v52 = vmax.f32 %v22104_v57, %v1793_v43  ;;  %v2408_v23 = vmax.f32 %v16692_v22, %v2162_v0  ;;  %v1796_v54 = vsel %vm22107_vm12, %v13159_v6, %v22106_v14  ;;  %3810 = vst [vmem:[#allocation3 + $0x10] sm:$0x11] %v3809_v46  ;;  %v22109_v43 = vmax.f32 %v15981_v28, 0.0  ;;  %13267 = vrot.lane.b32.xlu0 %v13266_v19, %s14319_s2  ;;  %v1171_v22 = vpop.f32.mrb[43].mxu0  ;;  %v3325_v26 = vld [vmem:[#allocation3] sm:$0x44]  ;;  %vm22113_vm15 = vmmov %vm22101_vm1 }
 0x20b   :  { %v1968_v2 = vmax.f32 %v22108_v21, %v1795_v31  ;;  %v16813_v60 = vadd.f32 %v1169_v24, %v15778_v55  ;;  %v3486_v14 = vld [vmem:[#allocation3] sm:$0x88]  ;;  %v4001_v0 = vsel %vm16521_vm0, %v11398_v29, %v4000_v18  ;;  %v16819_v6 = vadd.f32 %v1378_v45, %v15801_v7  ;;  %vm22114_vm4 = vmmov %vm22101_vm1 }
 0x20c   :  { %v2164_v3 = vrot.slane %v1965_v52, 1  ;;  %v1969_v57 = vmax.f32 %v22109_v43, %v1796_v54  ;;  %v16822_v40 = vadd.f32 %v1171_v22, %v15782_v47  ;;  %v16825_v28 = vadd.f32 %v1380_v48, %v15786_v42  ;;  %4002 = vst [vmem:[#allocation3 + $0x10] sm:$0x22] %v4001_v0  ;;  %v2636_v43 = vld [vmem:[#allocation3 + $0x20] sm:$0x11] }
 0x20d   :  { %22110 = vst [vmem:[#allocation85_spill] sm:$0xff] %v16819_v6  ;;  %v3326_v24 = vsel %vm16722_vm10, %v3243_v51, %v3325_v26  ;;  %v3487_v19 = vsel %vm16780_vm11, %v3241_v16, %v3486_v14  ;;  %v2172_v21 = vrot.slane %v1968_v2, 1  ;;  %v21744_v29 = vmax.f32 %v16813_v60, 0.0  ;;  %v2893_v51 = vld [vmem:[#allocation3 + $0x20] sm:$0x22] }
 0x20e   :  { %22111 = vst [vmem:[#allocation86_spill] sm:$0xff] %v16822_v40  ;;  %22112 = vst [vmem:[#allocation87_spill] sm:$0xff] %v16825_v28  ;;  %v2165_v31 = vsel %vm22101_vm1, %v2163_v36, %v2164_v3  ;;  %v2174_v18 = vrot.slane %v1969_v57, 1  ;;  %v21745_v46 = vmax.f32 %v16819_v6, 0.0  ;;  %v21743_v54 = vmax.f32 %v16793_v61, 0.0 }
 0x20f   :  { %3327 = vst [vmem:[#allocation3] sm:$0x44] %v3326_v24  ;;  %3488 = vst [vmem:[#allocation3] sm:$0x88] %v3487_v19  ;;  %v2409_v45 = vmax.f32 %v16745_v34, %v2165_v31  ;;  %v2173_v22 = vsel %vm22113_vm15, %v2161_v44, %v2172_v21  ;;  %v2416_v16 = vmax.f32 %v1968_v2, %v2172_v21  ;;  %v21746_v48 = vmax.f32 %v16822_v40, 0.0  ;;  %v16840_v24 = vpop.permute.xlu1 %13162 }
 0x210   :  { %v3670_v26 = vld [vmem:[#allocation3 + $0x30] sm:$0x11]  ;;  %v2175_v14 = vsel %vm22114_vm4, %v2164_v3, %v2174_v18  ;;  %v2412_v34 = vmax.f32 %v16756_v59, %v2173_v22  ;;  %v2417_v0 = vmax.f32 %v1969_v57, %v2174_v18  ;;  %v21748_v19 = vmax.f32 %v16380_v30, 0.0  ;;  %v3198_v57 = vld [vmem:[#allocation3 + $0x20] sm:$0x44]  ;;  %v1384_v18 = vpop.f32.mrb[44].mxu1  ;;  %vm22120_vm1 = vmmov %vm22107_vm12 }
 0x211   :  { %v12654_v36 = vpack.c.bf16 %v2409_v45, %v2408_v23  ;;  %v2413_v31 = vmax.f32 %v1965_v52, %v2175_v14  ;;  %v13271_v44 = vpack.i.bf16 %v21744_v29, %v21743_v54  ;;  %v13276_v23 = vpack.i.bf16 %v21745_v46, %v21746_v48  ;;  %v1175_v45 = vpop.f32.mrb[44].mxu0  ;;  %v3423_v52 = vld [vmem:[#allocation3 + $0x20] sm:$0x88]  ;;  %v3910_v22 = vld [vmem:[#allocation3 + $0x30] sm:$0x22]  ;;  %vm22122_vm15 = vmmov %vm22120_vm1 }
 0x212   :  { %v12686_v21 = vpack.c.bf16 %v2417_v0, %v2416_v16  ;;  %v13165_v54 = vunpack.i.h.bf16 %v16840_v24  ;;  %v13164_v29 = vunpack.i.l.bf16 %v16840_v24  ;;  %v16859_v46 = vadd.f32 %v1175_v45, %v15778_v55  ;;  %v1386_v16 = vpop.f32.mrb[45].mxu1  ;;  %vm22124_vm4 = vmmov %vm22120_vm1 }
 0x213   :  { %v2637_v3 = vsel %vm16417_vm13, %v12654_v36, %v2636_v43  ;;  %v2689_v59 = vshll.u32 %v12654_v36, 16  ;;  %v11304_v2 = vrot.slane %v12654_v36, 9  ;;  %v16853_v14 = vpack.c.bf16 %v2413_v31, %v2412_v34  ;;  %13272 = vrot.lane.b32.xlu1 %v13271_v44, %s14319_s2  ;;  %13277 = vrot.lane.b32.xlu0 %v13276_v23, %s14319_s2  ;;  %v1177_v43 = vpop.f32.mrb[45].mxu0 }
 0x214   :  { %2638 = vst [vmem:[#allocation3 + $0x20] sm:$0x11] %v2637_v3  ;;  %v22115_v36 = vmax.f32 %v16467_v25, 0.0  ;;  %v3671_v24 = vsel %vm16417_vm13, %v12686_v21, %v3670_v26  ;;  %v3723_v45 = vshll.u32 %v12686_v21, 16  ;;  %v11384_v32 = vrot.slane %v12686_v21, 9  ;;  %v16890_v21 = vpop.permute.xlu1 %13172 }
 0x215   :  { %v11288_v34 = vrot.slane %v2689_v59, 9  ;;  %v2894_v31 = vsel %vm16435_vm6, %v11304_v2, %v2893_v51  ;;  %v3152_v44 = vrot.slane %v16853_v14, 6  ;;  %v21751_v23 = vshll.u32 %v16853_v14, 16  ;;  %3672 = vst [vmem:[#allocation3 + $0x30] sm:$0x11] %v3671_v24  ;;  %v16879_v51 = vpop.permute.xlu0 %13167 }
 0x216   :  { %v16866_v0 = vpack.i.bf16 %v22115_v36, %v21748_v19  ;;  %2895 = vst [vmem:[#allocation3 + $0x20] sm:$0x22] %v2894_v31  ;;  %v3377_v3 = vrot.slane %v16853_v14, 7  ;;  %v11320_v48 = vrot.slane %v2689_v59, 10  ;;  %v1798_v36 = vsel %vm22107_vm12, %v13164_v29, %v13165_v54  ;;  %22117 = vst [vmem:[#allocation89_spill] sm:$0xff] %v16879_v51  ;;  %v16881_v2 = vld [vmem:[#allocation3] sm:$0xff] }
 0x217   :  { %v16877_v19 = vadd.f32 %v1384_v18, %v15801_v7  ;;  %v3199_v26 = vsel %vm16606_vm3, %v3152_v44, %v3198_v57  ;;  %v3251_v31 = vrot.slane %v21751_v23, 7  ;;  %v11368_v29 = vrot.slane %v3723_v45, 9 }
 0x218   :  { %v3424_v24 = vsel %vm16679_vm2, %v3377_v3, %v3423_v52  ;;  %3200 = vst [vmem:[#allocation3 + $0x20] sm:$0x44] %v3199_v26  ;;  %v3911_v18 = vsel %vm16435_vm6, %v11384_v32, %v3910_v22  ;;  %v11400_v6 = vrot.slane %v3723_v45, 10  ;;  %v22118_v61 = vmax.f32 %v16016_v38, 0.0  ;;  %v1181_v22 = vpop.f32.mrb[46].mxu0  ;;  %v1390_v45 = vpop.f32.mrb[46].mxu1 }
 0x219   :  { %22116 = vst [vmem:[#allocation88_spill] sm:$0xff] %v16877_v19  ;;  %3425 = vst [vmem:[#allocation3 + $0x20] sm:$0x88] %v3424_v24  ;;  %v16899_v44 = vadd.f32 %v1177_v43, %v15782_v47  ;;  %v16902_v52 = vadd.f32 %v1386_v16, %v15786_v42  ;;  %v13170_v3 = vunpack.i.h.bf16 %v16879_v51  ;;  %v21756_v26 = vunpack.i.l.bf16 %v16879_v51  ;;  %v1392_v59 = vpop.f32.mrb[47].mxu1 }
 0x21a   :  { %v16896_v57 = vmax.f32 %v22118_v61, %v1798_v36  ;;  %3912 = vst [vmem:[#allocation3 + $0x30] sm:$0x22] %v3911_v18  ;;  %v13174_v61 = vunpack.i.l.bf16 %v16890_v21  ;;  %v1183_v18 = vpop.f32.mrb[47].mxu0  ;;  %v4199_v30 = vshrl.u32 %v16881_v2, 16  ;;  %v22121_v25 = vmax.f32 %v16022_v13, 0.0 }
 0x21b   :  { %22119 = vst [vmem:[#allocation90_spill] sm:$0xff] %v16902_v52  ;;  %v2787_v24 = vld [vmem:[#allocation3 + $0x20] sm:$0x11]  ;;  %v1799_v36 = vsel %vm22120_vm1, %v13165_v54, %v21756_v26  ;;  %v16924_v16 = vadd.f32 %v1181_v22, %v15778_v55  ;;  %v13178_v54 = vpop.permute.xlu0 %13177  ;;  %v22125_v51 = vmax.f32 %v16859_v46, 0.0  ;;  %vm22133_vm12 = vcmask 1046528  }
 0x21c   :  { %v2180_v23 = vrot.slane %v16896_v57, 1  ;;  %v2788_v43 = vsel %vm16503_vm7, %v11288_v34, %v2787_v24  ;;  %v3814_v38 = vld [vmem:[#allocation3 + $0x30] sm:$0x11]  ;;  %v1973_v63 = vmax.f32 %v22121_v25, %v1799_v36  ;;  %v1801_v40 = vsel %vm22122_vm15, %v13170_v3, %v13174_v61  ;;  %vm22134_vm1 = vmmov %vm22133_vm12 }
 0x21d   :  { %2789 = vst [vmem:[#allocation3 + $0x20] sm:$0x11] %v2788_v43  ;;  %v2996_v32 = vld [vmem:[#allocation3 + $0x20] sm:$0x22]  ;;  %v22123_v34 = vunpack.i.h.bf16 %v16890_v21  ;;  %v3815_v43 = vsel %vm16503_vm7, %v11368_v29, %v3814_v38  ;;  %v22126_v25 = vmax.f32 %v16899_v44, 0.0  ;;  %v22127_v3 = vmax.f32 %v16062_v8, 0.0  ;;  %vm22135_vm15 = vmmov %vm22124_vm4 }
 0x21e   :  { %v2997_v26 = vsel %vm16521_vm0, %v11320_v48, %v2996_v32  ;;  %3816 = vst [vmem:[#allocation3 + $0x30] sm:$0x11] %v3815_v43  ;;  %v2183_v55 = vrot.slane %v1973_v63, 1  ;;  %v21760_v48 = vmax.f32 %v16924_v16, 0.0  ;;  %v16944_v29 = vadd.f32 %v1390_v45, %v15801_v7 }
 0x21f   :  { %v1802_v24 = vsel %vm22124_vm4, %v13174_v61, %v22123_v34  ;;  %v13281_v13 = vpack.i.bf16 %v22126_v25, %v22125_v51  ;;  %v16936_v36 = vmax.f32 %v22127_v3, %v1801_v40  ;;  %2998 = vst [vmem:[#allocation3 + $0x20] sm:$0x22] %v2997_v26  ;;  %v22128_v61 = vmax.f32 %v16074_v5, 0.0  ;;  %v3333_v32 = vld [vmem:[#allocation3 + $0x20] sm:$0x44] }
 0x220   :  { %22129 = vst [vmem:[#allocation91_spill] sm:$0xff] %v16944_v29  ;;  %v3494_v38 = vld [vmem:[#allocation3 + $0x20] sm:$0x88]  ;;  %v16949_v8 = vadd.f32 %v1183_v18, %v15782_v47  ;;  %v16952_v40 = vadd.f32 %v1392_v59, %v15786_v42  ;;  %v13180_v5 = vunpack.i.h.bf16 %v13178_v54  ;;  %v3334_v26 = vsel %vm16722_vm10, %v3251_v31, %v3333_v32  ;;  %v2642_v25 = vld [vmem:[#allocation3 + $0x40] sm:$0x11] }
 0x221   :  { %v16940_v22 = vmax.f32 %v22128_v61, %v1802_v24  ;;  %v2181_v51 = vrot.slane %v16936_v36, 1  ;;  %13282 = vrot.lane.b32.xlu1 %v13281_v13, %s14319_s2  ;;  %v22131_v34 = vshll.u32 %v16853_v14, 16  ;;  %v4006_v45 = vld [vmem:[#allocation3 + $0x30] sm:$0x22]  ;;  %v22132_v43 = vmax.f32 %v16877_v19, 0.0 }
 0x222   :  { %22130 = vst [vmem:[#allocation92_spill] sm:$0xff] %v16952_v40  ;;  %3335 = vst [vmem:[#allocation3 + $0x20] sm:$0x44] %v3334_v26  ;;  %v4007_v42 = vsel %vm16521_vm0, %v11400_v6, %v4006_v45  ;;  %v21758_v31 = vmax.f32 %v16944_v29, 0.0  ;;  %v21759_v59 = vmax.f32 %v16949_v8, 0.0  ;;  %v21761_v18 = vmax.f32 %v16572_v11, 0.0  ;;  %v16990_v45 = vpop.permute.xlu0 %13187 }
 0x223   :  { %v3495_v7 = vsel %vm16780_vm11, %v22131_v34, %v3494_v38  ;;  %v2184_v24 = vrot.slane %v16940_v22, 1  ;;  %v13286_v47 = vpack.i.bf16 %v21760_v48, %v22132_v43  ;;  %v2182_v14 = vsel %vm22133_vm12, %v2180_v23, %v2181_v51  ;;  %4008 = vst [vmem:[#allocation3 + $0x30] sm:$0x22] %v4007_v42  ;;  %v16983_v38 = vpop.permute.xlu1 %13182  ;;  %vm22137_vm12 = vmmov %vm22135_vm15 }
 0x224   :  { %3496 = vst [vmem:[#allocation3 + $0x20] sm:$0x88] %v3495_v7  ;;  %v2420_v3 = vmax.f32 %v16896_v57, %v2182_v14  ;;  %v13179_v61 = vunpack.i.l.bf16 %v13178_v54  ;;  %v21762_v6 = vmax.f32 %v16655_v62, 0.0  ;;  %v13291_v32 = vpack.i.bf16 %v21758_v31, %v21759_v59  ;;  %v2899_v57 = vld [vmem:[#allocation3 + $0x40] sm:$0x22] }
 0x225   :  { %v2185_v13 = vsel %vm22134_vm1, %v2183_v55, %v2184_v24  ;;  %13287 = vrot.lane.b32.xlu0 %v13286_v47, %s14319_s2  ;;  %v4202_v26 = vshll.u32 %v16881_v2, 16  ;;  %v21763_v34 = vmax.f32 %v16768_v17, 0.0  ;;  %v21764_v55 = vmax.f32 %v16825_v28, 0.0 }
 0x226   :  { %v2421_v23 = vmax.f32 %v1973_v63, %v2185_v13  ;;  %v1804_v54 = vsel %vm22135_vm15, %v13179_v61, %v13180_v5  ;;  %v21765_v7 = vunpack.i.l.bf16 %v16983_v38  ;;  %v16992_v63 = vld [vmem:[#allocation3 + $0x10] sm:$0x11]  ;;  %vm4196_vm4 = vsmask.f32 7440  ;;  %13292 = vrot.lane.b32.xlu1 %v13291_v32, %s14319_s2  ;;  %vm22139_vm15 = vmmov %vm22137_vm12 }
 0x227   :  { %v22136_v47 = vmax.f32 %v16105_v20, 0.0  ;;  %v13185_v14 = vunpack.i.h.bf16 %v16983_v38  ;;  %v16998_v13 = vld [vmem:[#allocation3 + $0x30] sm:$0x11]  ;;  %v4201_v31 = vrot.slane %v4199_v30, 4  ;;  %v21766_v59 = vunpack.i.h.bf16 %v16990_v45 }
 0x228   :  { %v12656_v43 = vpack.c.bf16 %v2421_v23, %v2420_v3  ;;  %v1805_v61 = vsel %vm22137_vm12, %v13180_v5, %v21765_v7  ;;  %v13189_v48 = vunpack.i.l.bf16 %v16990_v45  ;;  %v4204_v20 = vrot.slane %v4202_v26, 5 }
 0x229   :  { %v1980_v42 = vmax.f32 %v22136_v47, %v1804_v54  ;;  %13297 = vrot.lane.b32.xlu0 %v16540_v39, %s14319_s2  ;;  %v17013_v30 = vpack.i.bf16 %v21762_v6, %v21761_v18  ;;  %v17019_v5 = vpack.i.bf16 %v21764_v55, %v21763_v34  ;;  %v4208_v6 = vshll.u32 %v16992_v63, 16  ;;  %v3676_v18 = vld [vmem:[#allocation3 + $0x50] sm:$0x11] }
 0x22a   :  { %v2643_v3 = vsel %vm16417_vm13, %v12656_v43, %v2642_v25  ;;  %v2699_v23 = vshll.u32 %v12656_v43, 16  ;;  %v11306_v32 = vrot.slane %v12656_v43, 9  ;;  %v22138_v25 = vmax.f32 %v16115_v35, 0.0  ;;  %13302 = vrot.lane.b32.xlu1 %v16546_v56, %s14319_s2  ;;  %v13534_v56 = vld [vmem:[%s21584_s3 + $0x5a4] ss:$16 sps:$4 sm:$0xff]  }
 0x22b   :  { %v2192_v54 = vrot.slane %v1980_v42, 1  ;;  %2644 = vst [vmem:[#allocation3 + $0x40] sm:$0x11] %v2643_v3  ;;  %v17024_v43 = vld [vmem:[#allocation3 + $0x20] sm:$0xff]  ;;  %v1807_v3 = vsel %vm22139_vm15, %v13185_v14, %v13189_v48  ;;  %5273 = vmatprep.subr.bf16.mxu0 %v13534_v56  ;;  %vm22144_vm15 = vmmov %vm22137_vm12  ;;  %vm22170_vm8 = vcmask 1042432  }
 0x22c   :  { %v1981_v26 = vmax.f32 %v22138_v25, %v1805_v61  ;;  %v2900_v47 = vsel %vm16435_vm6, %v11306_v32, %v2899_v57  ;;  %v4205_v57 = vor.u32 %v4204_v20, %v4201_v31  ;;  %v13537_v32 = vld [vmem:[%s21584_s3 + $0x5ac] ss:$16 sps:$4 sm:$0xff]   ;;  %v11290_v25 = vrot.slane %v2699_v23, 9  ;;  %v17052_v20 = vpop.permute.xlu1 %13192 }
 0x22d   :  { %2901 = vst [vmem:[#allocation3 + $0x40] sm:$0x22] %v2900_v47  ;;  %v2193_v35 = vsel %vm22134_vm1, %v2181_v51, %v2192_v54  ;;  %13307 = vrot.lane.b32.xlu0 %v16583_v49, %s14319_s2  ;;  %v11322_v47 = vrot.slane %v2699_v23, 10  ;;  %v1808_v51 = vsel %vm22137_vm12, %v13189_v48, %v21766_v59  ;;  %v4227_v14 = vshrl.u32 %v17024_v43, 16  ;;  %5419 = vmatprep.subr.bf16.mxu1 %v13537_v32  ;;  %v22142_v59 = vld [vmem:[#allocation25_spill] sm:$0xff] }
 0x22e   :  { %v2194_v61 = vrot.slane %v1981_v26, 1  ;;  %v2428_v55 = vmax.f32 %v1980_v42, %v2192_v54  ;;  %v4230_v7 = vshll.u32 %v17024_v43, 16  ;;  %v2424_v23 = vmax.f32 %v16936_v36, %v2193_v35  ;;  %13312 = vrot.lane.b32.xlu1 %v16618_v10, %s14319_s2  ;;  %v22140_v54 = vld [vmem:[#allocation23_spill] sm:$0xff]  ;;  %v3916_v35 = vld [vmem:[#allocation3 + $0x50] sm:$0x22] }
 0x22f   :  { %v13195_v48 = vunpack.i.h.bf16 %v17052_v20  ;;  %v13194_v42 = vunpack.i.l.bf16 %v17052_v20  ;;  %v22143_v56 = vmax.f32 %v22142_v59, 0.0  ;;  %v4206_v36 = vrot.slane %v4205_v57, 4  ;;  %v3429_v57 = vld [vmem:[#allocation3 + $0x40] sm:$0x88] }
 0x230   :  { %v2195_v49 = vsel %vm22134_vm1, %v2184_v24, %v2194_v61  ;;  %v2429_v31 = vmax.f32 %v1981_v26, %v2194_v61  ;;  %v22141_v26 = vmax.f32 %v22140_v54, 0.0  ;;  %v4229_v20 = vrot.slane %v4227_v14, 4  ;;  %v22149_v54 = vld [vmem:[#allocation27_spill] sm:$0xff] }
 0x231   :  { %v2425_v39 = vmax.f32 %v16940_v22, %v2195_v49  ;;  %v17067_v32 = vmax.f32 %v22143_v56, %v1808_v51  ;;  %13317 = vrot.lane.b32.xlu0 %v16624_v41, %s14319_s2  ;;  %v1810_v49 = vsel %vm22144_vm15, %v13194_v42, %v13195_v48  ;;  %vm22146_vm12 = vsmask.f32 3328 }
 0x232   :  { %v12688_v24 = vpack.c.bf16 %v2429_v31, %v2428_v55  ;;  %v17063_v61 = vmax.f32 %v22141_v26, %v1807_v3  ;;  %v2793_v22 = vld [vmem:[#allocation3 + $0x40] sm:$0x11]  ;;  %v17076_v55 = vcombine.high %v16881_v2, %v17024_v43  ;;  %vm17080_vm1 = vmor %vm22146_vm12, %vm4196_vm4  ;;  %v3204_v3 = vld [vmem:[#allocation3 + $0x40] sm:$0x44]  ;;  %v4232_v14 = vrot.slane %v4230_v7, 5 }
 0x233   :  { %v17071_v10 = vpack.c.bf16 %v2425_v39, %v2424_v23  ;;  %v2794_v41 = vsel %vm16503_vm7, %v11290_v25, %v2793_v22  ;;  %v22150_v26 = vmax.f32 %v22149_v54, 0.0  ;;  %v22151_v25 = vld [vmem:[#allocation74_spill] sm:$0xff]  ;;  %v4210_v22 = vrot.slane %v4208_v6, 5  ;;  %vm22153_vm12 = vmmov %vm22144_vm15 }
 0x234   :  { %22145 = vst [vmem:[#allocation23_spill] sm:$0xff] %v17076_v55  ;;  %v3677_v39 = vsel %vm16417_vm13, %v12688_v24, %v3676_v18  ;;  %v11386_v51 = vrot.slane %v12688_v24, 9  ;;  %2795 = vst [vmem:[#allocation3 + $0x40] sm:$0x11] %v2794_v41  ;;  %v3002_v31 = vld [vmem:[#allocation3 + $0x40] sm:$0x22]  ;;  %13322 = vrot.lane.b32.xlu1 %v22151_v25, %s14319_s2 }
 0x235   :  { %v3154_v23 = vrot.slane %v17071_v10, 6  ;;  %v3379_v42 = vrot.slane %v17071_v10, 7  ;;  %3678 = vst [vmem:[#allocation3 + $0x50] sm:$0x11] %v3677_v39  ;;  %v17092_v56 = vmax.f32 %v22150_v26, %v1810_v49  ;;  %v3003_v18 = vsel %vm16521_vm0, %v11322_v47, %v3002_v31  ;;  %13327 = vrot.lane.b32.xlu0 %v16703_v37, %s14319_s2  ;;  %v17115_v31 = vpop.permute.xlu1 %13202  ;;  %vm22157_vm4 = vmmov %vm22153_vm12  ;;  %v22195_v55 = vld [vmem:[#allocation44_spill] sm:$0xff] }
 0x236   :  { %v3733_v34 = vshll.u32 %v12688_v24, 16  ;;  %v3917_v7 = vsel %vm16435_vm6, %v11386_v51, %v3916_v35  ;;  %v2200_v41 = vrot.slane %v17063_v61, 1  ;;  %3004 = vst [vmem:[#allocation3 + $0x40] sm:$0x22] %v3003_v18  ;;  %v2203_v47 = vrot.slane %v17067_v32, 1  ;;  %v17110_v35 = vpop.permute.xlu0 %13197  ;;  %vm22158_vm15 = vmmov %vm22157_vm4 }
 0x237   :  { %v3205_v49 = vsel %vm16606_vm3, %v3154_v23, %v3204_v3  ;;  %v3430_v6 = vsel %vm16679_vm2, %v3379_v42, %v3429_v57  ;;  %3918 = vst [vmem:[#allocation3 + $0x50] sm:$0x22] %v3917_v7  ;;  %v4211_v24 = vsel %vm17080_vm1, %v4206_v36, %v4210_v22  ;;  %v2201_v37 = vrot.slane %v17092_v56, 1  ;;  %v22155_v22 = vld [vmem:[#allocation28_spill] sm:$0xff] }
 0x238   :  { %3206 = vst [vmem:[#allocation3 + $0x40] sm:$0x44] %v3205_v49  ;;  %3431 = vst [vmem:[#allocation3 + $0x40] sm:$0x88] %v3430_v6  ;;  %v4233_v39 = vor.u32 %v4232_v14, %v4229_v20  ;;  %v13200_v51 = vunpack.i.h.bf16 %v17110_v35  ;;  %v21767_v3 = vunpack.i.l.bf16 %v17110_v35  ;;  %v3257_v57 = vshll.u32 %v17071_v10, 16  ;;  %13332 = vrot.lane.b32.xlu1 %v16715_v4, %s14319_s2 }
 0x239   :  { %v22152_v23 = vshll.u32 %v16998_v13, 16  ;;  %v21768_v36 = vunpack.i.h.bf16 %v17115_v31  ;;  %v13204_v54 = vunpack.i.l.bf16 %v17115_v31  ;;  %v11370_v26 = vrot.slane %v3733_v34, 9  ;;  %13337 = vrot.lane.b32.xlu0 %v16866_v0, %s14319_s2 }
 0x23a   :  { %v4234_v20 = vrot.slane %v4233_v39, 4  ;;  %v1811_v14 = vsel %vm22153_vm12, %v13195_v48, %v21767_v3  ;;  %v17131_v10 = vcombine.low %v16881_v2, %v17024_v43  ;;  %v11402_v25 = vrot.slane %v3733_v34, 10  ;;  %v22160_v43 = vld [vmem:[#allocation31_spill] sm:$0xff]  ;;  %v22162_v39 = vld [vmem:[#allocation33_spill] sm:$0xff] }
 0x23b   :  { %v4238_v42 = vrot.slane %v22152_v23, 5  ;;  %v22156_v4 = vmax.f32 %v22155_v22, 0.0  ;;  %v1813_v7 = vsel %vm22157_vm4, %v13200_v51, %v13204_v54  ;;  %v1814_v49 = vsel %vm22158_vm15, %v13204_v54, %v21768_v36  ;;  %v13532_v51 = vld [vmem:[%s21584_s3 + $0x5a0] ss:$16 sps:$4 sm:$0xff]  }
 0x23c   :  { %22154 = vst [vmem:[#allocation25_spill] sm:$0xff] %v17131_v10  ;;  %v3820_v6 = vld [vmem:[#allocation3 + $0x50] sm:$0x11]  ;;  %vm22159_vm12 = vcmask 1046528   ;;  %v22161_v34 = vmax.f32 %v22160_v43, 0.0  ;;  %v22163_v23 = vmax.f32 %v22162_v39, 0.0  ;;  %13342 = vrot.lane.b32.xlu1 %v17013_v30, %s14319_s2 }
 0x23d   :  { %v17135_v18 = vmax.f32 %v22156_v4, %v1811_v14  ;;  %v2202_v0 = vsel %vm22159_vm12, %v2200_v41, %v2201_v37  ;;  %v4239_v2 = vsel %vm17080_vm1, %v4234_v20, %v4238_v42  ;;  %v17153_v22 = vld [vmem:[#allocation3] sm:$0xee]  ;;  %v3821_v54 = vsel %vm16503_vm7, %v11370_v26, %v3820_v6  ;;  %v13535_v42 = vld [vmem:[%s21584_s3 + $0x5a8] ss:$16 sps:$4 sm:$0xff]   ;;  %13347 = vrot.lane.b32.xlu0 %v17019_v5, %s14319_s2  ;;  %vm22166_vm4 = vmmov %vm22159_vm12 }
 0x23e   :  { %v1992_v48 = vmax.f32 %v22161_v34, %v1813_v7  ;;  %v1993_v14 = vmax.f32 %v22163_v23, %v1814_v49  ;;  %v11530_v4 = vcombine.low %v4211_v24, %v4239_v2  ;;  %v11531_v41 = vcombine.high %v4211_v24, %v4239_v2  ;;  %v13540_v20 = vld [vmem:[%s21584_s3 + $0x5c4] ss:$16 sps:$4 sm:$0xff]   ;;  %3822 = vst [vmem:[#allocation3 + $0x50] sm:$0x11] %v3821_v54  ;;  %v13543_v54 = vld [vmem:[%s21584_s3 + $0x5cc] ss:$16 sps:$4 sm:$0xff]   ;;  %vm22167_vm15 = vmmov %vm22166_vm4 }
 0x23f   :  { %v2204_v3 = vrot.slane %v17135_v18, 1  ;;  %v22164_v7 = vmax.f32 %v16902_v52, 0.0  ;;  %v22165_v49 = vmax.f32 %v16952_v40, 0.0  ;;  %v3259_v6 = vrot.slane %v3257_v57, 7  ;;  %v4012_v24 = vld [vmem:[#allocation3 + $0x50] sm:$0x22]  ;;  %vm22168_vm12 = vmmov %vm22166_vm4 }
 0x240   :  { %v2212_v2 = vrot.slane %v1992_v48, 1  ;;  %v2214_v43 = vrot.slane %v1993_v14, 1  ;;  %v3339_v30 = vld [vmem:[#allocation3 + $0x40] sm:$0x44]  ;;  %v3500_v34 = vld [vmem:[#allocation3 + $0x40] sm:$0x88]  ;;  %v4013_v39 = vsel %vm16521_vm0, %v11402_v25, %v4012_v24  ;;  %v2432_v23 = vmax.f32 %v17063_v61, %v2202_v0  ;;  %5232 = vmatprep.mubr.bf16.mxu0 %v11531_v41  ;;  %5378 = vmatprep.mubr.bf16.mxu1 %v11531_v41  ;;  %v17184_v0 = vpop.permute.xlu0 %13207 }
 0x241   :  { %v13351_v26 = vpack.i.bf16 %v22165_v49, %v22164_v7  ;;  %v2205_v36 = vsel %vm22166_vm4, %v2203_v47, %v2204_v3  ;;  %v3340_v7 = vsel %vm16722_vm10, %v3259_v6, %v3339_v30  ;;  %v3501_v5 = vsel %vm16780_vm11, %v3257_v57, %v3500_v34  ;;  %4014 = vst [vmem:[#allocation3 + $0x50] sm:$0x22] %v4013_v39  ;;  %v2648_v25 = vld [vmem:[#allocation3 + $0x60] sm:$0x11]  ;;  %v17186_v41 = vld [vmem:[#allocation3 + $0x20] sm:$0xee] }
 0x242   :  { %5233 = vmatmul.mubr.bf16.vlgmr.msra.gmra.mrb[48].mxu0 %v11530_v4  ;;  %5379 = vmatmul.mubr.bf16.vlgmr.msra.gmra.mrb[48].mxu1 %v11530_v4  ;;  %v2433_v61 = vmax.f32 %v17067_v32, %v2205_v36  ;;  %v11814_v47 = vrot.slane %v17153_v22, 9  ;;  %3341 = vst [vmem:[#allocation3 + $0x40] sm:$0x44] %v3340_v7  ;;  %3502 = vst [vmem:[#allocation3 + $0x40] sm:$0x88] %v3501_v5  ;;  %v2213_v57 = vsel %vm22167_vm15, %v2201_v37, %v2212_v2  ;;  %vm22169_vm4 = vcmask 1046532  }
 0x243   :  { %v2905_v49 = vld [vmem:[#allocation3 + $0x60] sm:$0x22]  ;;  %v3682_v24 = vld [vmem:[#allocation3 + $0x70] sm:$0x11]  ;;  %v2215_v6 = vsel %vm22168_vm12, %v2204_v3, %v2214_v43  ;;  %v2440_v4 = vmax.f32 %v1992_v48, %v2212_v2  ;;  %v2441_v30 = vmax.f32 %v1993_v14, %v2214_v43  ;;  %13352 = vrot.lane.b32.xlu1 %v13351_v26, %s14319_s2  ;;  %vm17196_vm14 = vmor %vm22170_vm8, %vm22169_vm4  ;;  %v2436_v34 = vmax.f32 %v17092_v56, %v2213_v57  ;;  %s14331_s2 = smov 122  }
 0x244   :  { %v12658_v36 = vpack.c.bf16 %v2433_v61, %v2432_v23  ;;  %v2437_v39 = vmax.f32 %v17135_v18, %v2215_v6  ;;  %5274 = vmatpush1.bf16.msra.mxu0 %v13532_v51  ;;  %5420 = vmatpush1.bf16.msra.mxu1 %v13535_v42  ;;  %v13538_v37 = vld [vmem:[%s21584_s3 + $0x5c0] ss:$16 sps:$4 sm:$0xff]   ;;  %v13541_v3 = vld [vmem:[%s21584_s3 + $0x5c8] ss:$16 sps:$4 sm:$0xff]   ;;  %v6513_v48 = vrot.slane %v16992_v63, 5  ;;  %v13210_v2 = vunpack.i.h.bf16 %v17184_v0 }
 0x245   :  { %v3210_v14 = vld [vmem:[#allocation3 + $0x60] sm:$0x44]  ;;  %v12690_v26 = vpack.c.bf16 %v2441_v30, %v2440_v4  ;;  %v13209_v56 = vunpack.i.l.bf16 %v17184_v0  ;;  %5275 = vmatprep.subr.bf16.mxu0 %v13540_v20  ;;  %5421 = vmatprep.subr.bf16.mxu1 %v13543_v54  ;;  %v13549_v51 = vld [vmem:[%s21584_s3 + $0x5ec] ss:$16 sps:$4 sm:$0xff]   ;;  %v11816_v42 = vrot.slane %v17186_v41, 9  ;;  %v6521_v57 = vrot.slane %v16998_v13, 5 }
 0x246   :  { %v13546_v18 = vld [vmem:[%s21584_s3 + $0x5e4] ss:$16 sps:$4 sm:$0xff]   ;;  %v2649_v63 = vsel %vm16417_vm13, %v12658_v36, %v2648_v25  ;;  %v2709_v43 = vshll.u32 %v12658_v36, 16  ;;  %v11308_v23 = vrot.slane %v12658_v36, 9  ;;  %v17220_v61 = vpack.c.bf16 %v2437_v39, %v2436_v34  ;;  %v13544_v0 = vld [vmem:[%s21584_s3 + $0x5e0] ss:$16 sps:$4 sm:$0xff]   ;;  %v17241_v39 = vpop.permute.xlu1 %13212 }
 0x247   :  { %v3435_v7 = vld [vmem:[#allocation3 + $0x60] sm:$0x88]  ;;  %v3922_v5 = vld [vmem:[#allocation3 + $0x70] sm:$0x22]  ;;  %2650 = vst [vmem:[#allocation3 + $0x60] sm:$0x11] %v2649_v63  ;;  %v3683_v20 = vsel %vm16417_vm13, %v12690_v26, %v3682_v24  ;;  %v6514_v36 = vsel %vm17196_vm14, %v11814_v47, %v6513_v48  ;;  %v13215_v48 = vunpack.i.h.bf16 %v17241_v39  ;;  %v17248_v63 = vpop.permute.xlu0 %13217 }
 0x248   :  { %v11388_v54 = vrot.slane %v12690_v26, 9  ;;  %v2906_v25 = vsel %vm16435_vm6, %v11308_v23, %v2905_v49  ;;  %v3156_v4 = vrot.slane %v17220_v61, 6  ;;  %3684 = vst [vmem:[#allocation3 + $0x70] sm:$0x11] %v3683_v20  ;;  %v3743_v30 = vshll.u32 %v12690_v26, 16  ;;  %5276 = vmatpush1.bf16.msra.mxu0 %v13538_v37  ;;  %5422 = vmatpush1.bf16.msra.mxu1 %v13541_v3 }
 0x249   :  { %v13547_v24 = vld [vmem:[%s21584_s3 + $0x5e8] ss:$16 sps:$4 sm:$0xff]   ;;  %2907 = vst [vmem:[#allocation3 + $0x60] sm:$0x22] %v2906_v25  ;;  %v3381_v13 = vrot.slane %v17220_v61, 7  ;;  %vm22173_vm8 = vcmask 883712   ;;  %5277 = vmatprep.subr.bf16.mxu0 %v13546_v18  ;;  %5423 = vmatprep.subr.bf16.mxu1 %v13549_v51  ;;  %v6522_v37 = vsel %vm17196_vm14, %v11816_v42, %v6521_v57  ;;  %v21771_v51 = vunpack.i.l.bf16 %v17241_v39 }
 0x24a   :  { %v3923_v34 = vsel %vm16435_vm6, %v11388_v54, %v3922_v5  ;;  %v1816_v49 = vsel %vm22173_vm8, %v13209_v56, %v13210_v2  ;;  %v11292_v3 = vrot.slane %v2709_v43, 9  ;;  %v11324_v26 = vrot.slane %v2709_v43, 10  ;;  %v17250_v23 = vld [vmem:[#allocation3 + $0x40] sm:$0xff]  ;;  %vm22176_vm15 = vmmov %vm22173_vm8 }
 0x24b   :  { %v3211_v47 = vsel %vm16606_vm3, %v3156_v4, %v3210_v14  ;;  %3924 = vst [vmem:[#allocation3 + $0x70] sm:$0x22] %v3923_v34  ;;  %v3265_v56 = vshll.u32 %v17220_v61, 16  ;;  %v3436_v18 = vsel %vm16679_vm2, %v3381_v13, %v3435_v7  ;;  %v21773_v42 = vunpack.i.h.bf16 %v17248_v63  ;;  %v22174_v14 = vld [vmem:[#allocation35_spill] sm:$0xff]  ;;  %vm22181_vm12 = vmmov %vm22173_vm8 }
 0x24c   :  { %3212 = vst [vmem:[#allocation3 + $0x60] sm:$0x44] %v3211_v47  ;;  %3437 = vst [vmem:[#allocation3 + $0x60] sm:$0x88] %v3436_v18  ;;  %v11372_v43 = vrot.slane %v3743_v30, 9  ;;  %v22175_v5 = vmax.f32 %v22174_v14, 0.0  ;;  %v13219_v54 = vunpack.i.l.bf16 %v17248_v63  ;;  %5278 = vmatpush1.bf16.msra.mxu0 %v13544_v0  ;;  %5424 = vmatpush1.bf16.msra.mxu1 %v13547_v24  ;;  %v1817_v61 = vsel %vm22176_vm15, %v13210_v2, %v21771_v51 }
 0x24d   :  { %v4255_v57 = vshrl.u32 %v17250_v23, 16  ;;  %v4258_v7 = vshll.u32 %v17250_v23, 16  ;;  %v17265_v25 = vcombine.low %v6514_v36, %v6522_v37  ;;  %v17267_v4 = vcombine.high %v6514_v36, %v6522_v37  ;;  %v22179_v47 = vld [vmem:[#allocation36_spill] sm:$0xff]  ;;  %vm22182_vm4 = vmmov %vm22173_vm8  ;;  %v22183_v51 = vld [vmem:[#allocation39_spill] sm:$0xff] }
 0x24e   :  { %v1996_v20 = vmax.f32 %v22175_v5, %v1816_v49  ;;  %v2799_v13 = vld [vmem:[#allocation3 + $0x60] sm:$0x11]  ;;  %v11404_v34 = vrot.slane %v3743_v30, 10  ;;  %v22180_v49 = vmax.f32 %v22179_v47, 0.0  ;;  %v1819_v14 = vsel %vm22181_vm12, %v13215_v48, %v13219_v54  ;;  %v22185_v37 = vld [vmem:[#allocation41_spill] sm:$0xff]  ;;  %vm22189_vm12 = vmmov %vm22182_vm4 }
 0x24f   :  { %22177 = vst [vmem:[#allocation27_spill] sm:$0xff] %v17265_v25  ;;  %22178 = vst [vmem:[#allocation74_spill] sm:$0xff] %v17267_v4  ;;  %v1820_v0 = vsel %vm22182_vm4, %v13219_v54, %v21773_v42  ;;  %v2800_v2 = vsel %vm16503_vm7, %v11292_v3, %v2799_v13  ;;  %v3267_v24 = vrot.slane %v3265_v56, 7  ;;  %v3826_v5 = vld [vmem:[#allocation3 + $0x70] sm:$0x11]  ;;  %v22184_v6 = vmax.f32 %v22183_v51, 0.0 }
 0x250   :  { %v1997_v18 = vmax.f32 %v22180_v49, %v1817_v61  ;;  %v22186_v30 = vmax.f32 %v22185_v37, 0.0  ;;  %2801 = vst [vmem:[#allocation3 + $0x60] sm:$0x11] %v2800_v2  ;;  %v3008_v61 = vld [vmem:[#allocation3 + $0x60] sm:$0x22]  ;;  %v3827_v48 = vsel %vm16503_vm7, %v11372_v43, %v3826_v5  ;;  %v2220_v47 = vrot.slane %v1996_v20, 1  ;;  %v13223_v5 = vpop.permute.xlu1 %13222 }
 0x251   :  { %v17279_v36 = vmax.f32 %v22184_v6, %v1819_v14  ;;  %v17287_v49 = vld [vmem:[#allocation3 + $0x50] sm:$0x11]  ;;  %v4257_v3 = vrot.slane %v4255_v57, 4  ;;  %v3009_v13 = vsel %vm16521_vm0, %v11324_v26, %v3008_v61  ;;  %3828 = vst [vmem:[#allocation3 + $0x70] sm:$0x11] %v3827_v48  ;;  %vm22187_vm8 = vcmask 1046528  }
 0x252   :  { %v17283_v25 = vmax.f32 %v22186_v30, %v1820_v0  ;;  %v2223_v54 = vrot.slane %v1997_v18, 1  ;;  %v4018_v6 = vld [vmem:[#allocation3 + $0x70] sm:$0x22]  ;;  %v4260_v0 = vrot.slane %v4258_v7, 5  ;;  %3010 = vst [vmem:[#allocation3 + $0x60] sm:$0x22] %v3009_v13  ;;  %vm22188_vm15 = vmmov %vm22187_vm8  ;;  %v13225_v61 = vunpack.i.h.bf16 %v13223_v5 }
 0x253   :  { %v21775_v51 = vrot.slane %v17279_v36, 1  ;;  %v3345_v2 = vld [vmem:[#allocation3 + $0x60] sm:$0x44]  ;;  %v4019_v43 = vsel %vm16521_vm0, %v11404_v34, %v4018_v6  ;;  %v13555_v26 = vld [vmem:[%s21584_s3 + $0x60c] ss:$16 sps:$4 sm:$0xff]   ;;  %v22196_v29 = vmax.f32 %v22195_v55, 0.0 }
 0x254   :  { %v21774_v14 = vrot.slane %v17283_v25, 1  ;;  %v13552_v57 = vld [vmem:[%s21584_s3 + $0x604] ss:$16 sps:$4 sm:$0xff]   ;;  %v3346_v37 = vsel %vm16722_vm10, %v3267_v24, %v3345_v2  ;;  %4020 = vst [vmem:[#allocation3 + $0x70] sm:$0x22] %v4019_v43  ;;  %v13224_v2 = vunpack.i.l.bf16 %v13223_v5  ;;  %5425 = vmatprep.subr.bf16.mxu1 %v13555_v26  ;;  %v4261_v42 = vor.u32 %v4260_v0, %v4257_v3  ;;  %v22190_v5 = vld [vmem:[#allocation43_spill] sm:$0xff] }
 0x255   :  { %v3506_v30 = vld [vmem:[#allocation3 + $0x60] sm:$0x88]  ;;  %v2222_v7 = vsel %vm22187_vm8, %v2220_v47, %v21775_v51  ;;  %3347 = vst [vmem:[#allocation3 + $0x60] sm:$0x44] %v3346_v37  ;;  %5279 = vmatprep.subr.bf16.mxu0 %v13552_v57  ;;  %v13553_v47 = vld [vmem:[%s21584_s3 + $0x608] ss:$16 sps:$4 sm:$0xff]  }
 0x256   :  { %v2225_v34 = vsel %vm22188_vm15, %v2223_v54, %v21774_v14  ;;  %v13550_v48 = vld [vmem:[%s21584_s3 + $0x600] ss:$16 sps:$4 sm:$0xff]   ;;  %v3507_v13 = vsel %vm16780_vm11, %v3265_v56, %v3506_v30  ;;  %v2444_v24 = vmax.f32 %v1996_v20, %v2222_v7  ;;  %v4264_v14 = vshll.u32 %v17287_v49, 16  ;;  %5426 = vmatpush1.bf16.msra.mxu1 %v13553_v47  ;;  %vm22197_vm15 = vmmov %vm22182_vm4 }
 0x257   :  { %v2445_v6 = vmax.f32 %v1997_v18, %v2225_v34  ;;  %v17317_v43 = vld [vmem:[#allocation3 + $0x40] sm:$0xee]  ;;  %3508 = vst [vmem:[#allocation3 + $0x60] sm:$0x88] %v3507_v13  ;;  %v2654_v54 = vld [vmem:[#allocation3 + $0x80] sm:$0x11]  ;;  %5280 = vmatpush1.bf16.msra.mxu0 %v13550_v48  ;;  %v1822_v18 = vsel %vm22189_vm12, %v13224_v2, %v13225_v61  ;;  %vm22200_vm12 = vmmov %vm22182_vm4 }
 0x258   :  { %v7698_v37 = vshll.u32 %v17153_v22, 16  ;;  %v2911_v56 = vld [vmem:[#allocation3 + $0x80] sm:$0x22]  ;;  %v22191_v57 = vmax.f32 %v22190_v5, 0.0  ;;  %v11818_v26 = vrot.slane %v17317_v43, 9  ;;  %v22192_v34 = vshrl.u32 %v17153_v22, 16 }
 0x259   :  { %v12660_v20 = vpack.c.bf16 %v2445_v6, %v2444_v24  ;;  %v17325_v7 = vld [vmem:[#allocation3 + $0x10] sm:$0x33]  ;;  %v17335_v6 = vpop.permute.xlu0 %13227  ;;  %v17339_v47 = vrot.slane %v4261_v42, 4  ;;  %v6529_v22 = vrot.slane %v17287_v49, 5 }
 0x25a   :  { %v2004_v30 = vmax.f32 %v22191_v57, %v1822_v18  ;;  %v17329_v3 = vrot.slane %v22192_v34, 5  ;;  %v17333_v24 = vrot.slane %v7698_v37, 6  ;;  %v17337_v2 = vld [vmem:[#allocation3 + $0x70] sm:$0x11]  ;;  %v17341_v18 = vrot.slane %v4264_v14, 5 }
 0x25b   :  { %v2655_v0 = vsel %vm16417_vm13, %v12660_v20, %v2654_v54  ;;  %v2719_v48 = vshll.u32 %v12660_v20, 16  ;;  %v11310_v13 = vrot.slane %v12660_v20, 9  ;;  %v13230_v54 = vunpack.i.h.bf16 %v17335_v6  ;;  %v17347_v20 = vpop.permute.xlu1 %13232 }
 0x25c   :  { %2656 = vst [vmem:[#allocation3 + $0x80] sm:$0x11] %v2655_v0  ;;  %v2232_v57 = vrot.slane %v2004_v30, 1  ;;  %v21782_v34 = vunpack.i.l.bf16 %v17335_v6  ;;  %v6530_v14 = vsel %vm17196_vm14, %v11818_v26, %v6529_v22  ;;  %v4292_v51 = vshll.u32 %v17337_v2, 16 }
 0x25d   :  { %v2912_v5 = vsel %vm16435_vm6, %v11310_v13, %v2911_v56  ;;  %v11294_v0 = vrot.slane %v2719_v48, 9  ;;  %v13234_v56 = vunpack.i.l.bf16 %v17347_v20  ;;  %v22194_v22 = vrot.slane %v17279_v36, 1 }
 0x25e   :  { %2913 = vst [vmem:[#allocation3 + $0x80] sm:$0x22] %v2912_v5  ;;  %v4054_v13 = vld [vmem:[#allocation3 + $0x60] sm:$0xff]  ;;  %v7701_v5 = vor.u32 %v17333_v24, %v17329_v3  ;;  %v1823_v37 = vsel %vm22182_vm4, %v13225_v61, %v21782_v34  ;;  %v11326_v24 = vrot.slane %v2719_v48, 10  ;;  %v22199_v61 = vunpack.i.h.bf16 %v17347_v20  ;;  %v22201_v48 = vld [vmem:[#allocation47_spill] sm:$0xff]  ;;  %vm22204_vm4 = vmmov %vm22187_vm8 }
 0x25f   :  { %v17357_v4 = vld [vmem:[#allocation3 + $0x60] sm:$0xee]  ;;  %v4283_v42 = vshrl.u32 %v4054_v13, 16  ;;  %v4286_v10 = vshll.u32 %v4054_v13, 16  ;;  %v17365_v26 = vcombine.high %v17250_v23, %v4054_v13  ;;  %v2233_v49 = vsel %vm22187_vm8, %v22194_v22, %v2232_v57 }
 0x260   :  { %v2005_v52 = vmax.f32 %v22196_v29, %v1823_v37  ;;  %v1825_v19 = vsel %vm22197_vm15, %v13230_v54, %v13234_v56  ;;  %v17374_v3 = vcombine.low %v17250_v23, %v4054_v13  ;;  %v1826_v34 = vsel %vm22200_vm12, %v13234_v56, %v22199_v61  ;;  %v3688_v54 = vld [vmem:[#allocation3 + $0x90] sm:$0x11]  ;;  %v22205_v61 = vld [vmem:[#allocation49_spill] sm:$0xff]  ;;  %vm22209_vm15 = vmmov %vm22200_vm12 }
 0x261   :  { %22193 = vst [vmem:[#allocation28_spill] sm:$0xff] %v17365_v26  ;;  %v4285_v40 = vrot.slane %v4283_v42, 4  ;;  %v4288_v17 = vrot.slane %v4286_v10, 5  ;;  %v2452_v28 = vmax.f32 %v2004_v30, %v2232_v57  ;;  %v11820_v22 = vrot.slane %v17357_v4, 9 }
 0x262   :  { %22198 = vst [vmem:[#allocation31_spill] sm:$0xff] %v17374_v3  ;;  %v2234_v11 = vrot.slane %v2005_v52, 1  ;;  %v6537_v55 = vrot.slane %v17337_v2, 5  ;;  %v2448_v23 = vmax.f32 %v17279_v36, %v2233_v49  ;;  %v22202_v37 = vmax.f32 %v22201_v48, 0.0 }
 0x263   :  { %v2805_v26 = vld [vmem:[#allocation3 + $0x80] sm:$0x11]  ;;  %v4289_v56 = vor.u32 %v4288_v17, %v4285_v40  ;;  %v22203_v30 = vrot.slane %v17283_v25, 1  ;;  %v22206_v2 = vmax.f32 %v22205_v61, 0.0  ;;  %v3928_v17 = vld [vmem:[#allocation3 + $0x90] sm:$0x22] }
 0x264   :  { %v2806_v29 = vsel %vm16503_vm7, %v11294_v0, %v2805_v26  ;;  %v17386_v13 = vmax.f32 %v22202_v37, %v1825_v19  ;;  %v2453_v42 = vmax.f32 %v2005_v52, %v2234_v11  ;;  %v17395_v0 = vpop.permute.xlu0 %13237  ;;  %v6538_v36 = vsel %vm17196_vm14, %v11820_v22, %v6537_v55  ;;  %v3441_v52 = vld [vmem:[#allocation3 + $0x80] sm:$0x88] }
 0x265   :  { %2807 = vst [vmem:[#allocation3 + $0x80] sm:$0x11] %v2806_v29  ;;  %v3014_v10 = vld [vmem:[#allocation3 + $0x80] sm:$0x22]  ;;  %v2235_v57 = vsel %vm22204_vm4, %v22203_v30, %v2234_v11  ;;  %v17393_v3 = vmax.f32 %v22206_v2, %v1826_v34  ;;  %v13240_v49 = vunpack.i.h.bf16 %v17395_v0  ;;  %v13239_v26 = vunpack.i.l.bf16 %v17395_v0  ;;  %v3216_v11 = vld [vmem:[#allocation3 + $0x80] sm:$0x44]  ;;  %vm22216_vm4 = vmmov %vm22200_vm12 }
 0x266   :  { %v3015_v19 = vsel %vm16521_vm0, %v11326_v24, %v3014_v10  ;;  %v2449_v40 = vmax.f32 %v17283_v25, %v2235_v57  ;;  %v12692_v34 = vpack.c.bf16 %v2453_v42, %v2452_v28  ;;  %v4290_v29 = vrot.slane %v4289_v56, 4  ;;  %v13558_v28 = vld [vmem:[%s21584_s3 + $0x624] ss:$16 sps:$4 sm:$0xff]   ;;  %v22210_v10 = vld [vmem:[#allocation53_spill] sm:$0xff] }
 0x267   :  { %3016 = vst [vmem:[#allocation3 + $0x80] sm:$0x22] %v3015_v19  ;;  %v17404_v48 = vcombine.high %v6530_v14, %v6538_v36  ;;  %v17406_v37 = vcombine.low %v6530_v14, %v6538_v36  ;;  %v1828_v24 = vsel %vm22209_vm15, %v13239_v26, %v13240_v49  ;;  %v4267_v25 = vsel %vm17080_vm1, %v17339_v47, %v17341_v18  ;;  %v13561_v14 = vld [vmem:[%s21584_s3 + $0x62c] ss:$16 sps:$4 sm:$0xff]   ;;  %v13559_v47 = vld [vmem:[%s21584_s3 + $0x628] ss:$16 sps:$4 sm:$0xff]   ;;  %vm22217_vm15 = vmmov %vm22216_vm4 }
 0x268   :  { %v17408_v22 = vpack.c.bf16 %v2449_v40, %v2448_v23  ;;  %v4294_v55 = vrot.slane %v4292_v51, 5  ;;  %v3689_v23 = vsel %vm16417_vm13, %v12692_v34, %v3688_v54  ;;  %v11390_v56 = vrot.slane %v12692_v34, 9  ;;  %v13556_v51 = vld [vmem:[%s21584_s3 + $0x620] ss:$16 sps:$4 sm:$0xff]   ;;  %5281 = vmatprep.subr.bf16.mxu0 %v13558_v28  ;;  %5427 = vmatprep.subr.bf16.mxu1 %v13561_v14 }
 0x269   :  { %22207 = vst [vmem:[#allocation33_spill] sm:$0xff] %v17404_v48  ;;  %22208 = vst [vmem:[#allocation35_spill] sm:$0xff] %v17406_v37  ;;  %v22211_v30 = vmax.f32 %v22210_v10, 0.0  ;;  %v17433_v18 = vrot.slane %v7701_v5, 4  ;;  %v3753_v54 = vshll.u32 %v12692_v34, 16  ;;  %v2240_v36 = vrot.slane %v17386_v13, 1  ;;  %5282 = vmatpush1.bf16.msra.mxu0 %v13556_v51  ;;  %5428 = vmatpush1.bf16.msra.mxu1 %v13559_v47 }
 0x26a   :  { %v3158_v42 = vrot.slane %v17408_v22, 6  ;;  %v3383_v61 = vrot.slane %v17408_v22, 7  ;;  %3690 = vst [vmem:[#allocation3 + $0x90] sm:$0x11] %v3689_v23  ;;  %v4295_v2 = vsel %vm17080_vm1, %v4290_v29, %v4294_v55  ;;  %v3929_v0 = vsel %vm16435_vm6, %v11390_v56, %v3928_v17  ;;  %v17457_v56 = vpop.permute.xlu0 %13247  ;;  %v22220_v37 = vld [vmem:[#allocation63_spill] sm:$0xff] }
 0x26b   :  { %v17425_v57 = vmax.f32 %v22211_v30, %v1828_v24  ;;  %v2243_v19 = vrot.slane %v17393_v3, 1  ;;  %v22212_v5 = vshrl.u32 %v17325_v7, 16  ;;  %v3273_v34 = vshll.u32 %v17408_v22, 16  ;;  %3930 = vst [vmem:[#allocation3 + $0x90] sm:$0x22] %v3929_v0  ;;  %v17452_v24 = vpop.permute.xlu1 %13242 }
 0x26c   :  { %v3217_v26 = vsel %vm16606_vm3, %v3158_v42, %v3216_v11  ;;  %v3442_v29 = vsel %vm16679_vm2, %v3383_v61, %v3441_v52  ;;  %v11535_v17 = vcombine.high %v4267_v25, %v4295_v2  ;;  %v11534_v28 = vcombine.low %v4267_v25, %v4295_v2  ;;  %v7678_v11 = vld [vmem:[#allocation3 + $0x30] sm:$0x33] }
 0x26d   :  { %v17445_v40 = vrot.slane %v22212_v5, 5  ;;  %3218 = vst [vmem:[#allocation3 + $0x80] sm:$0x44] %v3217_v26  ;;  %3443 = vst [vmem:[#allocation3 + $0x80] sm:$0x88] %v3442_v29  ;;  %v2241_v55 = vrot.slane %v17425_v57, 1  ;;  %v13245_v14 = vunpack.i.h.bf16 %v17452_v24  ;;  %v21789_v23 = vunpack.i.l.bf16 %v17452_v24 }
 0x26e   :  { %v11374_v22 = vrot.slane %v3753_v54, 9  ;;  %5242 = vmatprep.mubr.bf16.mxu0 %v11535_v17  ;;  %5388 = vmatprep.mubr.bf16.mxu1 %v11535_v17  ;;  %v21792_v52 = vunpack.i.h.bf16 %v17457_v56  ;;  %v13249_v10 = vunpack.i.l.bf16 %v17457_v56  ;;  %v22213_v30 = vshll.u32 %v17325_v7, 16  ;;  %v22214_v2 = vld [vmem:[#allocation54_spill] sm:$0xff] }
 0x26f   :  { %v11406_v47 = vrot.slane %v3753_v54, 10  ;;  %5243 = vmatmul.mubr.bf16.gmra.mrb[52].mxu0 %v11534_v28  ;;  %5389 = vmatmul.mubr.bf16.gmra.mrb[52].mxu1 %v11534_v28  ;;  %v1829_v25 = vsel %vm22200_vm12, %v13240_v49, %v21789_v23  ;;  %v7731_v42 = vshrl.u32 %v17186_v41, 16  ;;  %v7734_v61 = vshll.u32 %v17186_v41, 16 }
 0x270   :  { %v17463_v51 = vrot.slane %v22213_v30, 6  ;;  %v22215_v0 = vmax.f32 %v22214_v2, 0.0  ;;  %v1831_v26 = vsel %vm22216_vm4, %v13245_v14, %v13249_v10  ;;  %v1832_v7 = vsel %vm22217_vm15, %v13249_v10, %v21792_v52  ;;  %v22218_v30 = vld [vmem:[#allocation61_spill] sm:$0xff] }
 0x271   :  { %v7740_v54 = vshrl.u32 %v7678_v11, 16  ;;  %v3275_v29 = vrot.slane %v3273_v34, 7  ;;  %v3832_v17 = vld [vmem:[#allocation3 + $0x90] sm:$0x11]  ;;  %v2242_v28 = vsel %vm22187_vm8, %v2240_v36, %v2241_v55  ;;  %v22219_v49 = vmax.f32 %v22218_v30, 0.0 }
 0x272   :  { %v2013_v5 = vmax.f32 %v22215_v0, %v1829_v25  ;;  %v22221_v48 = vmax.f32 %v22220_v37, 0.0  ;;  %v3833_v25 = vsel %vm16503_vm7, %v11374_v22, %v3832_v17  ;;  %v17483_v14 = vrot.slane %v7731_v42, 5  ;;  %v4024_v36 = vld [vmem:[#allocation3 + $0x90] sm:$0x22]  ;;  %v2660_v17 = vld [vmem:[#allocation3 + $0xa0] sm:$0x11] }
 0x273   :  { %v2016_v23 = vmax.f32 %v22219_v49, %v1831_v26  ;;  %v7743_v0 = vshll.u32 %v7678_v11, 16  ;;  %vm22222_vm12 = vsmask.f32 6416  ;;  %vm22223_vm4 = vsmask.f32 2304 }
 0x274   :  { %v2017_v41 = vmax.f32 %v22221_v48, %v1832_v7  ;;  %v2244_v2 = vrot.slane %v2013_v5, 1  ;;  %vm17487_vm15 = vmor %vm22223_vm4, %vm22222_vm12  ;;  %v22224_v10 = vmov 0  ;;  %3834 = vst [vmem:[#allocation3 + $0x90] sm:$0x11] %v3833_v25  ;;  %v7710_v48 = vor.u32 %v17463_v51, %v17445_v40  ;;  %v3351_v7 = vld [vmem:[#allocation3 + $0x80] sm:$0x44] }
 0x275   :  { %v22225_v10 = vsel %vm17487_vm15, 4294967295, %v22224_v10  ;;  %v2252_v30 = vrot.slane %v2016_v23, 1  ;;  %v7736_v37 = vrot.slane %v7734_v61, 6  ;;  %v3512_v22 = vld [vmem:[#allocation3 + $0x80] sm:$0x88]  ;;  %v4025_v42 = vsel %vm16521_vm0, %v11406_v47, %v4024_v36  ;;  %vm22227_vm12 = vmmov %vm22187_vm8 }
 0x276   :  { %22226 = vst [vmem:[#allocation36_spill] sm:$0xff] %v22225_v10  ;;  %v2254_v26 = vrot.slane %v2017_v41, 1  ;;  %v2456_v11 = vmax.f32 %v17386_v13, %v2242_v28  ;;  %v2245_v49 = vsel %vm22187_vm8, %v2243_v19, %v2244_v2  ;;  %v17497_v52 = vrot.slane %v7740_v54, 5  ;;  %4026 = vst [vmem:[#allocation3 + $0x90] sm:$0x22] %v4025_v42  ;;  %v13253_v28 = vpop.permute.xlu1 %13252 }
 0x277   :  { %v3352_v25 = vsel %vm16722_vm10, %v3275_v29, %v3351_v7  ;;  %v3513_v62 = vsel %vm16780_vm11, %v3273_v34, %v3512_v22  ;;  %v2457_v40 = vmax.f32 %v17393_v3, %v2245_v49  ;;  %v3694_v51 = vld [vmem:[#allocation3 + $0xb0] sm:$0x11]  ;;  %v2253_v61 = vsel %vm22227_vm12, %v2241_v55, %v2252_v30  ;;  %vm22228_vm4 = vmmov %vm22187_vm8  ;;  %v2917_v22 = vld [vmem:[#allocation3 + $0xa0] sm:$0x22] }
 0x278   :  { %3353 = vst [vmem:[#allocation3 + $0x80] sm:$0x44] %v3352_v25  ;;  %3514 = vst [vmem:[#allocation3 + $0x80] sm:$0x88] %v3513_v62  ;;  %v2255_v13 = vsel %vm22228_vm4, %v2244_v2, %v2254_v26  ;;  %v2460_v19 = vmax.f32 %v17425_v57, %v2253_v61  ;;  %v2464_v47 = vmax.f32 %v2016_v23, %v2252_v30  ;;  %v17508_v34 = vrot.slane %v7743_v0, 6 }
 0x279   :  { %v2465_v54 = vmax.f32 %v2017_v41, %v2254_v26  ;;  %v12662_v36 = vpack.c.bf16 %v2457_v40, %v2456_v11  ;;  %v2461_v29 = vmax.f32 %v2013_v5, %v2255_v13  ;;  %v7737_v7 = vor.u32 %v7736_v37, %v17483_v14  ;;  %v3934_v23 = vld [vmem:[#allocation3 + $0xb0] sm:$0x22]  ;;  %v3222_v5 = vld [vmem:[#allocation3 + $0xa0] sm:$0x44]  ;;  %v3447_v37 = vld [vmem:[#allocation3 + $0xa0] sm:$0x88] }
 0x27a   :  { %v13255_v42 = vunpack.i.h.bf16 %v13253_v28  ;;  %v13254_v49 = vunpack.i.l.bf16 %v13253_v28  ;;  %v7767_v55 = vshrl.u32 %v17317_v43, 16  ;;  %v17520_v30 = vsel %vm17487_vm15, %v17433_v18, %v7710_v48 }
 0x27b   :  { %v12694_v3 = vpack.c.bf16 %v2465_v54, %v2464_v47  ;;  %v2661_v62 = vsel %vm16417_vm13, %v12662_v36, %v2660_v17  ;;  %v2729_v2 = vshll.u32 %v12662_v36, 16  ;;  %v11312_v57 = vrot.slane %v12662_v36, 9 }
 0x27c   :  { %v17513_v41 = vpack.c.bf16 %v2461_v29, %v2460_v19  ;;  %2662 = vst [vmem:[#allocation3 + $0xa0] sm:$0x11] %v2661_v62  ;;  %v7746_v17 = vor.u32 %v17508_v34, %v17497_v52  ;;  %v7770_v25 = vshll.u32 %v17317_v43, 16  ;;  %vm22229_vm8 = vcmask 883712   ;;  %v17534_v19 = vpop.permute.xlu0 %13257 }
 0x27d   :  { %v3695_v14 = vsel %vm16417_vm13, %v12694_v3, %v3694_v51  ;;  %v11392_v0 = vrot.slane %v12694_v3, 9  ;;  %v2918_v26 = vsel %vm16435_vm6, %v11312_v57, %v2917_v22  ;;  %v3763_v51 = vshll.u32 %v12694_v3, 16  ;;  %v17545_v22 = vpop.permute.xlu1 %13262  ;;  %v13562_v3 = vld [vmem:[%s21584_s3 + $0x640] ss:$16 sps:$4 sm:$0xff]   ;;  %vm22232_vm12 = vmmov %vm22229_vm8 }
 0x27e   :  { %v3160_v11 = vrot.slane %v17513_v41, 6  ;;  %3696 = vst [vmem:[#allocation3 + $0xb0] sm:$0x11] %v3695_v14  ;;  %2919 = vst [vmem:[#allocation3 + $0xa0] sm:$0x22] %v2918_v26  ;;  %v3385_v40 = vrot.slane %v17513_v41, 7  ;;  %v1834_v48 = vsel %vm22229_vm8, %v13254_v49, %v13255_v42  ;;  %v13260_v29 = vunpack.i.h.bf16 %v17534_v19 }
 0x27f   :  { %v3935_v18 = vsel %vm16435_vm6, %v11392_v0, %v3934_v23  ;;  %v11296_v61 = vrot.slane %v2729_v2, 9  ;;  %v17536_v47 = vld [vmem:[#allocation3 + $0x80] sm:$0xff]  ;;  %v7738_v52 = vrot.slane %v7737_v7, 4  ;;  %v17538_v54 = vrot.slane %v7767_v55, 5  ;;  %v22230_v55 = vld [vmem:[#allocation66_spill] sm:$0xff]  ;;  %vm22235_vm4 = vmmov %vm22229_vm8 }
 0x280   :  { %v3223_v13 = vsel %vm16606_vm3, %v3160_v11, %v3222_v5  ;;  %3936 = vst [vmem:[#allocation3 + $0xb0] sm:$0x22] %v3935_v18  ;;  %v3281_v28 = vshll.u32 %v17513_v41, 16  ;;  %v3448_v36 = vsel %vm16679_vm2, %v3385_v40, %v3447_v37  ;;  %v21794_v34 = vunpack.i.l.bf16 %v17534_v19  ;;  %v13564_v7 = vld [vmem:[%s21584_s3 + $0x644] ss:$16 sps:$4 sm:$0xff]   ;;  %vm22236_vm8 = vmmov %vm22235_vm4 }
 0x281   :  { %3224 = vst [vmem:[#allocation3 + $0xa0] sm:$0x44] %v3223_v13  ;;  %v11328_v49 = vrot.slane %v2729_v2, 10  ;;  %3449 = vst [vmem:[#allocation3 + $0xa0] sm:$0x88] %v3448_v36  ;;  %v22231_v62 = vmax.f32 %v22230_v55, 0.0  ;;  %v21795_v23 = vunpack.i.h.bf16 %v17545_v22  ;;  %v13264_v41 = vunpack.i.l.bf16 %v17545_v22  ;;  %5283 = vmatprep.subr.bf16.mxu0 %v13564_v7 }
 0x282   :  { %v13565_v5 = vld [vmem:[%s21584_s3 + $0x648] ss:$16 sps:$4 sm:$0xff]   ;;  %v13567_v14 = vld [vmem:[%s21584_s3 + $0x64c] ss:$16 sps:$4 sm:$0xff]   ;;  %v11376_v0 = vrot.slane %v3763_v51, 9  ;;  %v11408_v26 = vrot.slane %v3763_v51, 10  ;;  %v1835_v2 = vsel %vm22232_vm12, %v13255_v42, %v21794_v34  ;;  %5284 = vmatpush1.bf16.msra.mxu0 %v13562_v3 }
 0x283   :  { %v2020_v57 = vmax.f32 %v22231_v62, %v1834_v48  ;;  %v4311_v37 = vshrl.u32 %v17536_v47, 16  ;;  %v2811_v11 = vld [vmem:[#allocation3 + $0xa0] sm:$0x11]  ;;  %v22233_v40 = vld [vmem:[#allocation70_spill] sm:$0xff]  ;;  %v1837_v13 = vsel %vm22235_vm4, %v13260_v29, %v13264_v41  ;;  %v1838_v36 = vsel %vm22236_vm8, %v13264_v41, %v21795_v23  ;;  %5429 = vmatprep.subr.bf16.mxu1 %v13567_v14 }
 0x284   :  { %v22234_v18 = vmax.f32 %v22233_v40, 0.0  ;;  %v4314_v55 = vshll.u32 %v17536_v47, 16  ;;  %v2812_v42 = vsel %vm16503_vm7, %v11296_v61, %v2811_v11  ;;  %v3283_v51 = vrot.slane %v3281_v28, 7  ;;  %5430 = vmatpush1.bf16.msra.mxu1 %v13565_v5  ;;  %v17586_v23 = vld [vmem:[#allocation3 + $0x90] sm:$0x11] }
 0x285   :  { %v3838_v62 = vld [vmem:[#allocation3 + $0xb0] sm:$0x11]  ;;  %v22237_v7 = vmax.f32 %v16646_v33, 0.0  ;;  %2813 = vst [vmem:[#allocation3 + $0xa0] sm:$0x11] %v2812_v42  ;;  %v2260_v3 = vrot.slane %v2020_v57, 1  ;;  %v7747_v61 = vsel %vm17487_vm15, %v7738_v52, %v7746_v17 }
 0x286   :  { %v2021_v48 = vmax.f32 %v22234_v18, %v1835_v2  ;;  %v22238_v2 = vld [vmem:[#allocation76_spill] sm:$0xff]  ;;  %v3839_v14 = vsel %vm16503_vm7, %v11376_v0, %v3838_v62  ;;  %v4316_v62 = vrot.slane %v4314_v55, 5  ;;  %v17600_v17 = vcombine.high %v17520_v30, %v7747_v61  ;;  %v13268_v55 = vpop.permute.xlu0 %13267 }
 0x287   :  { %v17578_v34 = vmax.f32 %v22237_v7, %v1837_v13  ;;  %v22239_v40 = vmax.f32 %v22238_v2, 0.0  ;;  %v3020_v41 = vld [vmem:[#allocation3 + $0xa0] sm:$0x22]  ;;  %3840 = vst [vmem:[#allocation3 + $0xb0] sm:$0x11] %v3839_v14  ;;  %v17597_v7 = vcombine.low %v17520_v30, %v7747_v61  ;;  %vm22242_vm12 = vcmask 1046528  }
 0x288   :  { %v2263_v18 = vrot.slane %v2021_v48, 1  ;;  %v3021_v33 = vsel %vm16521_vm0, %v11328_v49, %v3020_v41  ;;  %v4030_v11 = vld [vmem:[#allocation3 + $0xb0] sm:$0x22]  ;;  %v3357_v42 = vld [vmem:[#allocation3 + $0xa0] sm:$0x44]  ;;  %22241 = vst [vmem:[#allocation41_spill] sm:$0xff] %v17600_v17  ;;  %vm22243_vm4 = vmmov %vm22242_vm12  ;;  %v13270_v61 = vunpack.i.h.bf16 %v13268_v55 }
 0x289   :  { %v17582_v29 = vmax.f32 %v22239_v40, %v1838_v36  ;;  %v21797_v13 = vrot.slane %v17578_v34, 1  ;;  %v4313_v36 = vrot.slane %v4311_v37, 4  ;;  %3022 = vst [vmem:[#allocation3 + $0xa0] sm:$0x22] %v3021_v33  ;;  %v4031_v0 = vsel %vm16521_vm0, %v11408_v26, %v4030_v11  ;;  %22240 = vst [vmem:[#allocation39_spill] sm:$0xff] %v17597_v7 }
 0x28a   :  { %v3358_v52 = vsel %vm16722_vm10, %v3283_v51, %v3357_v42  ;;  %v3518_v49 = vld [vmem:[#allocation3 + $0xa0] sm:$0x88]  ;;  %4032 = vst [vmem:[#allocation3 + $0xb0] sm:$0x22] %v4031_v0  ;;  %v2666_v2 = vld [vmem:[#allocation3 + $0xc0] sm:$0x11] }
 0x28b   :  { %v21796_v5 = vrot.slane %v17582_v29, 1  ;;  %v2262_v37 = vsel %vm22242_vm12, %v2260_v3, %v21797_v13  ;;  %v17610_v40 = vld [vmem:[#allocation3 + $0x50] sm:$0x33]  ;;  %v7772_v30 = vrot.slane %v7770_v25, 6  ;;  %3359 = vst [vmem:[#allocation3 + $0xa0] sm:$0x44] %v3358_v52  ;;  %v3519_v51 = vsel %vm16780_vm11, %v3281_v28, %v3518_v49  ;;  %vm22249_vm12 = vmmov %vm22236_vm8 }
 0x28c   :  { %v2468_v41 = vmax.f32 %v2020_v57, %v2262_v37  ;;  %3520 = vst [vmem:[#allocation3 + $0xa0] sm:$0x88] %v3519_v51  ;;  %v2923_v33 = vld [vmem:[#allocation3 + $0xc0] sm:$0x22]  ;;  %v13269_v3 = vunpack.i.l.bf16 %v13268_v55  ;;  %v4320_v11 = vshll.u32 %v17586_v23, 16  ;;  %v4317_v0 = vor.u32 %v4316_v62, %v4313_v36  ;;  %v17630_v51 = vpop.permute.xlu1 %13272  ;;  %v22252_v13 = vld [vmem:[#allocation81_spill] sm:$0xff] }
 0x28d   :  { %v2265_v26 = vsel %vm22243_vm4, %v2263_v18, %v21796_v5  ;;  %v6468_v42 = vld [vmem:[#allocation3 + $0x80] sm:$0xee]  ;;  %v7773_v43 = vor.u32 %v7772_v30, %v17538_v54  ;;  %v7776_v28 = vshrl.u32 %v17610_v40, 16  ;;  %v7803_v57 = vshrl.u32 %v17357_v4, 16  ;;  %22246 = vst [vmem:[#allocation43_spill] sm:$0xff] %v17630_v51 }
 0x28e   :  { %v2469_v14 = vmax.f32 %v2021_v48, %v2265_v26  ;;  %v1840_v5 = vsel %vm22236_vm8, %v13269_v3, %v13270_v61  ;;  %v22244_v48 = vld [vmem:[#allocation80_spill] sm:$0xff]  ;;  %v17625_v26 = vld [vmem:[#allocation3 + $0xb0] sm:$0x11]  ;;  %v4322_v55 = vrot.slane %v4320_v11, 5  ;;  %v4318_v62 = vrot.slane %v4317_v0, 4 }
 0x28f   :  { %v22245_v49 = vmax.f32 %v22244_v48, 0.0  ;;  %v11822_v54 = vrot.slane %v6468_v42, 9  ;;  %v6545_v30 = vrot.slane %v17586_v23, 5  ;;  %v7806_v3 = vshll.u32 %v17357_v4, 16  ;;  %v13568_v23 = vld [vmem:[%s21584_s3 + $0x660] ss:$16 sps:$4 sm:$0xff]  }
 0x290   :  { %v12664_v18 = vpack.c.bf16 %v2469_v14, %v2468_v41  ;;  %v17632_v41 = vpop.permute.xlu0 %13277  ;;  %v17634_v14 = vrot.slane %v7773_v43, 4  ;;  %v21804_v11 = vunpack.i.l.bf16 %v17630_v51  ;;  %v17643_v42 = vrot.slane %v7776_v28, 5  ;;  %v13570_v4 = vld [vmem:[%s21584_s3 + $0x664] ss:$16 sps:$4 sm:$0xff]  }
 0x291   :  { %v2028_v37 = vmax.f32 %v22245_v49, %v1840_v5  ;;  %v13275_v43 = vunpack.i.h.bf16 %v17630_v51  ;;  %v22253_v7 = vmax.f32 %v22252_v13, 0.0  ;;  %5285 = vmatprep.subr.bf16.mxu0 %v13570_v4  ;;  %v17666_v51 = vsel %vm17080_vm1, %v4318_v62, %v4322_v55  ;;  %v17675_v13 = vld [vmem:[#allocation3 + $0x70] sm:$0x33]  ;;  %v13573_v4 = vld [vmem:[%s21584_s3 + $0x66c] ss:$16 sps:$4 sm:$0xff]  }
 0x292   :  { %v2667_v25 = vsel %vm16417_vm13, %v12664_v18, %v2666_v2  ;;  %v11314_v52 = vrot.slane %v12664_v18, 9  ;;  %v2739_v2 = vshll.u32 %v12664_v18, 16  ;;  %22247 = vst [vmem:[#allocation44_spill] sm:$0xff] %v17634_v14  ;;  %22248 = vst [vmem:[#allocation47_spill] sm:$0xff] %v17643_v42  ;;  %v17645_v18 = vrot.slane %v7803_v57, 5  ;;  %5286 = vmatpush1.bf16.msra.mxu0 %v13568_v23  ;;  %5431 = vmatprep.subr.bf16.mxu1 %v13573_v4 }
 0x293   :  { %2668 = vst [vmem:[#allocation3 + $0xc0] sm:$0x11] %v2667_v25  ;;  %v4058_v25 = vld [vmem:[#allocation3 + $0xa0] sm:$0xff]  ;;  %v2272_v0 = vrot.slane %v2028_v37, 1  ;;  %v1841_v49 = vsel %vm22249_vm12, %v13270_v61, %v21804_v11  ;;  %v13571_v11 = vld [vmem:[%s21584_s3 + $0x668] ss:$16 sps:$4 sm:$0xff]   ;;  %vm22256_vm12 = vmmov %vm22243_vm4 }
 0x294   :  { %v2924_v36 = vsel %vm16435_vm6, %v11314_v52, %v2923_v33  ;;  %v4348_v33 = vshll.u32 %v17625_v26, 16  ;;  %v13279_v52 = vunpack.i.l.bf16 %v17632_v41  ;;  %v4339_v48 = vshrl.u32 %v4058_v25, 16  ;;  %5432 = vmatpush1.bf16.msra.mxu1 %v13571_v11  ;;  %v3453_v4 = vld [vmem:[#allocation3 + $0xc0] sm:$0x88] }
 0x295   :  { %2925 = vst [vmem:[#allocation3 + $0xc0] sm:$0x22] %v2924_v36  ;;  %v4342_v36 = vshll.u32 %v4058_v25, 16  ;;  %v17656_v28 = vcombine.high %v17536_v47, %v4058_v25  ;;  %v17659_v57 = vcombine.low %v17536_v47, %v4058_v25  ;;  %v11298_v5 = vrot.slane %v2739_v2, 9 }
 0x296   :  { %v2029_v17 = vmax.f32 %v22253_v7, %v1841_v49  ;;  %v4341_v14 = vrot.slane %v4339_v48, 4  ;;  %v17673_v47 = vsel %vm17196_vm14, %v11822_v54, %v6545_v30  ;;  %v11330_v25 = vrot.slane %v2739_v2, 10  ;;  %v13574_v54 = vld [vmem:[%s21584_s3 + $0x680] ss:$16 sps:$4 sm:$0xff]  }
 0x297   :  { %22250 = vst [vmem:[#allocation49_spill] sm:$0xff] %v17656_v28  ;;  %22251 = vst [vmem:[#allocation53_spill] sm:$0xff] %v17659_v57  ;;  %v4344_v61 = vrot.slane %v4342_v36, 5  ;;  %v22254_v48 = vrot.slane %v17578_v34, 1  ;;  %v2476_v23 = vmax.f32 %v2028_v37, %v2272_v0  ;;  %v1843_v49 = vsel %vm22236_vm8, %v13275_v43, %v13279_v52  ;;  %v3700_v43 = vld [vmem:[#allocation3 + $0xd0] sm:$0x11] }
 0x298   :  { %v2274_v62 = vrot.slane %v2029_v17, 1  ;;  %v4350_v2 = vrot.slane %v4348_v33, 5  ;;  %v13582_v33 = vld [vmem:[%s21584_s3 + $0x6a4] ss:$16 sps:$4 sm:$0xff]   ;;  %v7812_v11 = vshrl.u32 %v17675_v13, 16  ;;  %vm22294_vm15 = vcmask 1045504  }
 0x299   :  { %v2273_v55 = vsel %vm22243_vm4, %v22254_v48, %v2272_v0  ;;  %v22255_v48 = vrot.slane %v17582_v29, 1  ;;  %vm22258_vm4 = vmmov %vm22236_vm8 }
 0x29a   :  { %v2817_v42 = vld [vmem:[#allocation3 + $0xc0] sm:$0x11]  ;;  %v2477_v57 = vmax.f32 %v2029_v17, %v2274_v62  ;;  %v2472_v0 = vmax.f32 %v17578_v34, %v2273_v55  ;;  %v6553_v34 = vrot.slane %v17625_v26, 5  ;;  %v3940_v55 = vld [vmem:[#allocation3 + $0xd0] sm:$0x22]  ;;  %vm22263_vm8 = vmmov %vm22258_vm4 }
 0x29b   :  { %v2818_v7 = vsel %vm16503_vm7, %v11298_v5, %v2817_v42  ;;  %v4345_v5 = vor.u32 %v4344_v61, %v4341_v14  ;;  %v13576_v42 = vld [vmem:[%s21584_s3 + $0x684] ss:$16 sps:$4 sm:$0xff]   ;;  %v2275_v10 = vsel %vm22256_vm12, %v22255_v48, %v2274_v62  ;;  %v13579_v14 = vld [vmem:[%s21584_s3 + $0x68c] ss:$16 sps:$4 sm:$0xff]   ;;  %vm22267_vm12 = vmmov %vm22258_vm4 }
 0x29c   :  { %2819 = vst [vmem:[#allocation3 + $0xc0] sm:$0x11] %v2818_v7  ;;  %v3026_v30 = vld [vmem:[#allocation3 + $0xc0] sm:$0x22]  ;;  %v22257_v7 = vunpack.i.h.bf16 %v17632_v41  ;;  %v2473_v61 = vmax.f32 %v17582_v29, %v2275_v10  ;;  %5287 = vmatprep.subr.bf16.mxu0 %v13576_v42  ;;  %v3228_v62 = vld [vmem:[#allocation3 + $0xc0] sm:$0x44]  ;;  %5433 = vmatprep.subr.bf16.mxu1 %v13579_v14 }
 0x29d   :  { %v3027_v36 = vsel %vm16521_vm0, %v11330_v25, %v3026_v30  ;;  %v4346_v17 = vrot.slane %v4345_v5, 4  ;;  %v17711_v25 = vrot.slane %v7806_v3, 6  ;;  %v17713_v30 = vpack.c.bf16 %v2477_v57, %v2476_v23  ;;  %5288 = vmatpush1.bf16.msra.mxu0 %v13574_v54  ;;  %v22261_v57 = vld [vmem:[#allocation86_spill] sm:$0xff]  ;;  %v13585_v54 = vld [vmem:[%s21584_s3 + $0x6ac] ss:$16 sps:$4 sm:$0xff]  }
 0x29e   :  { %v1844_v37 = vsel %vm22258_vm4, %v13279_v52, %v22257_v7  ;;  %3028 = vst [vmem:[#allocation3 + $0xc0] sm:$0x22] %v3027_v36  ;;  %v13577_v52 = vld [vmem:[%s21584_s3 + $0x688] ss:$16 sps:$4 sm:$0xff]   ;;  %v6470_v36 = vld [vmem:[#allocation3 + $0xa0] sm:$0xee]  ;;  %v17721_v5 = vpack.c.bf16 %v2473_v61, %v2472_v0  ;;  %5289 = vmatprep.subr.bf16.mxu0 %v13582_v33  ;;  %v13283_v7 = vpop.permute.xlu1 %13282 }
 0x29f   :  { %v22259_v10 = vshll.u32 %v17610_v40, 16  ;;  %v22260_v3 = vmax.f32 %v16813_v60, 0.0  ;;  %v22262_v23 = vmax.f32 %v22261_v57, 0.0  ;;  %v4351_v26 = vsel %vm17080_vm1, %v4346_v17, %v4350_v2  ;;  %v13580_v40 = vld [vmem:[%s21584_s3 + $0x6a0] ss:$16 sps:$4 sm:$0xff]   ;;  %5434 = vmatpush1.bf16.msra.mxu1 %v13577_v52 }
 0x2a0   :  { %v3701_v60 = vsel %vm16417_vm13, %v17713_v30, %v3700_v43  ;;  %v13583_v2 = vld [vmem:[%s21584_s3 + $0x6a8] ss:$16 sps:$4 sm:$0xff]   ;;  %v13588_v14 = vld [vmem:[%s21584_s3 + $0x6c4] ss:$16 sps:$4 sm:$0xff]   ;;  %v11824_v33 = vrot.slane %v6470_v36, 9  ;;  %v3162_v0 = vrot.slane %v17721_v5, 6  ;;  %v13285_v43 = vunpack.i.h.bf16 %v13283_v7  ;;  %5435 = vmatprep.subr.bf16.mxu1 %v13585_v54 }
 0x2a1   :  { %v17718_v29 = vrot.slane %v22259_v10, 6  ;;  %v17725_v42 = vmax.f32 %v22260_v3, %v1843_v49  ;;  %v17729_v48 = vmax.f32 %v22262_v23, %v1844_v37  ;;  %v11394_v49 = vrot.slane %v17713_v30, 9  ;;  %3702 = vst [vmem:[#allocation3 + $0xd0] sm:$0x11] %v3701_v60  ;;  %v13591_v17 = vld [vmem:[%s21584_s3 + $0x6cc] ss:$16 sps:$4 sm:$0xff]   ;;  %5290 = vmatpush1.bf16.msra.mxu0 %v13580_v40 }
 0x2a2   :  { %v11539_v37 = vcombine.high %v17666_v51, %v4351_v26  ;;  %v3387_v61 = vrot.slane %v17721_v5, 7  ;;  %v7809_v10 = vor.u32 %v17711_v25, %v17645_v18  ;;  %v3773_v3 = vshll.u32 %v17713_v30, 16  ;;  %v13586_v23 = vld [vmem:[%s21584_s3 + $0x6c0] ss:$16 sps:$4 sm:$0xff]   ;;  %5291 = vmatprep.subr.bf16.mxu0 %v13588_v14  ;;  %v13589_v40 = vld [vmem:[%s21584_s3 + $0x6c8] ss:$16 sps:$4 sm:$0xff]  }
 0x2a3   :  { %v3941_v57 = vsel %vm16435_vm6, %v11394_v49, %v3940_v55  ;;  %v13284_v36 = vunpack.i.l.bf16 %v13283_v7  ;;  %v17763_v52 = vrot.slane %v7812_v11, 5  ;;  %v3229_v60 = vsel %vm16606_vm3, %v3162_v0, %v3228_v62  ;;  %v17771_v55 = vpop.permute.xlu0 %13287  ;;  %v13597_v7 = vld [vmem:[%s21584_s3 + $0x6ec] ss:$16 sps:$4 sm:$0xff]   ;;  %v17802_v0 = vpop.permute.xlu1 %13292  ;;  %5436 = vmatpush1.bf16.msra.mxu1 %v13583_v2 }
 0x2a4   :  { %5252 = vmatprep.mubr.bf16.mxu0 %v11539_v37  ;;  %5398 = vmatprep.mubr.bf16.mxu1 %v11539_v37  ;;  %v3454_v18 = vsel %vm16679_vm2, %v3387_v61, %v3453_v4  ;;  %3942 = vst [vmem:[#allocation3 + $0xd0] sm:$0x22] %v3941_v57  ;;  %v2280_v25 = vrot.slane %v17725_v42, 1  ;;  %v11538_v30 = vcombine.low %v17666_v51, %v4351_v26  ;;  %3230 = vst [vmem:[#allocation3 + $0xc0] sm:$0x44] %v3229_v60 }
 0x2a5   :  { %v3289_v49 = vshll.u32 %v17721_v5, 16  ;;  %3455 = vst [vmem:[#allocation3 + $0xc0] sm:$0x88] %v3454_v18  ;;  %v1846_v11 = vsel %vm22263_vm8, %v13284_v36, %v13285_v43  ;;  %v21806_v62 = vunpack.i.l.bf16 %v17771_v55  ;;  %v13594_v4 = vld [vmem:[%s21584_s3 + $0x6e4] ss:$16 sps:$4 sm:$0xff]   ;;  %v6554_v51 = vsel %vm17196_vm14, %v11824_v33, %v6553_v34  ;;  %5437 = vmatprep.subr.bf16.mxu1 %v13591_v17  ;;  %5292 = vmatpush1.bf16.msra.mxu0 %v13586_v23 }
 0x2a6   :  { %v22264_v26 = vmax.f32 %v16859_v46, 0.0  ;;  %5253 = vmatmul.mubr.bf16.gmra.mrb[56].mxu0 %v11538_v30  ;;  %5399 = vmatmul.mubr.bf16.gmra.mrb[56].mxu1 %v11538_v30  ;;  %v13290_v5 = vunpack.i.h.bf16 %v17771_v55  ;;  %v17793_v37 = vcombine.high %v17673_v47, %v6554_v51  ;;  %v17796_v34 = vcombine.low %v17673_v47, %v6554_v51  ;;  %v13592_v61 = vld [vmem:[%s21584_s3 + $0x6e0] ss:$16 sps:$4 sm:$0xff]  }
 0x2a7   :  { %v11378_v46 = vrot.slane %v3773_v3, 9  ;;  %v2283_v14 = vrot.slane %v17729_v48, 1  ;;  %v1847_v33 = vsel %vm22267_vm12, %v13285_v43, %v21806_v62  ;;  %v17807_v57 = vrot.slane %v7809_v10, 4  ;;  %v13298_v43 = vpop.permute.xlu0 %13297  ;;  %5293 = vmatprep.subr.bf16.mxu0 %v13594_v4  ;;  %vm22271_vm12 = vmmov %vm22258_vm4  ;;  %5438 = vmatpush1.bf16.msra.mxu1 %v13589_v40 }
 0x2a8   :  { %v17783_v54 = vmax.f32 %v22264_v26, %v1846_v11  ;;  %22265 = vst [vmem:[#allocation54_spill] sm:$0xff] %v17793_v37  ;;  %22266 = vst [vmem:[#allocation61_spill] sm:$0xff] %v17796_v34  ;;  %v22269_v47 = vmax.f32 %v16899_v44, 0.0  ;;  %v21812_v18 = vunpack.i.h.bf16 %v17802_v0  ;;  %v13294_v30 = vunpack.i.l.bf16 %v17802_v0  ;;  %v3844_v11 = vld [vmem:[#allocation3 + $0xd0] sm:$0x11]  ;;  %v22273_v37 = vld [vmem:[#allocation8_spill] sm:$0xff]  ;;  %5439 = vmatprep.subr.bf16.mxu1 %v13597_v7 }
 0x2a9   :  { %22268 = vst [vmem:[#allocation63_spill] sm:$0xff] %v17807_v57  ;;  %v3291_v2 = vrot.slane %v3289_v49, 7  ;;  %v11410_v51 = vrot.slane %v3773_v3, 10  ;;  %v13300_v26 = vunpack.i.h.bf16 %v13298_v43  ;;  %v13299_v10 = vunpack.i.l.bf16 %v13298_v43  ;;  %v13595_v44 = vld [vmem:[%s21584_s3 + $0x6e8] ss:$16 sps:$4 sm:$0xff]   ;;  %5294 = vmatpush1.bf16.msra.mxu0 %v13592_v61 }
 0x2aa   :  { %v2281_v36 = vrot.slane %v17783_v54, 1  ;;  %v17812_v60 = vmax.f32 %v22269_v47, %v1847_v33  ;;  %v3845_v33 = vsel %vm16503_vm7, %v11378_v46, %v3844_v11  ;;  %vm22270_vm8 = vcmask 1046528   ;;  %v22285_v61 = vld [vmem:[#allocation5_spill] sm:$0xff] }
 0x2ab   :  { %v1849_v17 = vsel %vm22271_vm12, %v13290_v5, %v13294_v30  ;;  %3846 = vst [vmem:[#allocation3 + $0xd0] sm:$0x11] %v3845_v33  ;;  %v4036_v23 = vld [vmem:[#allocation3 + $0xd0] sm:$0x22]  ;;  %v1850_v4 = vsel %vm22258_vm4, %v13294_v30, %v21812_v18  ;;  %v22272_v43 = vmax.f32 %v16924_v16, 0.0  ;;  %v22274_v28 = vmax.f32 %v22273_v37, 0.0  ;;  %vm22278_vm12 = vmmov %vm22258_vm4  ;;  %5440 = vmatpush1.bf16.msra.mxu1 %v13595_v44 }
 0x2ac   :  { %v2282_v47 = vsel %vm22270_vm8, %v2280_v25, %v2281_v36  ;;  %v2284_v62 = vrot.slane %v17812_v60, 1  ;;  %v3363_v25 = vld [vmem:[#allocation3 + $0xc0] sm:$0x44]  ;;  %v3524_v11 = vld [vmem:[#allocation3 + $0xc0] sm:$0x88]  ;;  %v4037_v5 = vsel %vm16521_vm0, %v11410_v51, %v4036_v23 }
 0x2ad   :  { %v2480_v3 = vmax.f32 %v17725_v42, %v2282_v47  ;;  %v2040_v34 = vmax.f32 %v22272_v43, %v1849_v17  ;;  %v17832_v46 = vmax.f32 %v22274_v28, %v13300_v26  ;;  %v2672_v33 = vld [vmem:[#allocation3 + $0xe0] sm:$0x11]  ;;  %v22275_v47 = vmax.f32 %v16949_v8, 0.0  ;;  %4038 = vst [vmem:[#allocation3 + $0xd0] sm:$0x22] %v4037_v5 }
 0x2ae   :  { %v2285_v42 = vsel %vm22270_vm8, %v2283_v14, %v2284_v62  ;;  %v22276_v30 = vld [vmem:[#allocation56_spill] sm:$0xff]  ;;  %v3364_v28 = vsel %vm16722_vm10, %v3291_v2, %v3363_v25  ;;  %v3525_v40 = vsel %vm16780_vm11, %v3289_v49, %v3524_v11  ;;  %vm22281_vm8 = vmmov %vm22258_vm4  ;;  %v3706_v11 = vld [vmem:[#allocation3 + $0xf0] sm:$0x11] }
 0x2af   :  { %v2041_v57 = vmax.f32 %v22275_v47, %v1850_v4  ;;  %v22277_v16 = vunpack.i.l.bf16 %v22276_v30  ;;  %v2481_v37 = vmax.f32 %v17729_v48, %v2285_v42  ;;  %v2292_v51 = vrot.slane %v2040_v34, 1  ;;  %3365 = vst [vmem:[#allocation3 + $0xc0] sm:$0x44] %v3364_v28  ;;  %3526 = vst [vmem:[#allocation3 + $0xc0] sm:$0x88] %v3525_v40  ;;  %v22279_v4 = vld [vmem:[#allocation58_spill] sm:$0xff]  ;;  %v17875_v40 = vpop.permute.xlu1 %13302 }
 0x2b0   :  { %v2929_v8 = vld [vmem:[#allocation3 + $0xe0] sm:$0x22]  ;;  %v2150_v23 = vrot.slane %v17832_v46, 1  ;;  %v22280_v43 = vunpack.i.h.bf16 %v22279_v4  ;;  %v22282_v47 = vld [vmem:[#allocation6_spill] sm:$0xff]  ;;  %v22286_v42 = vmax.f32 %v22285_v61, 0.0  ;;  %v13305_v50 = vunpack.i.h.bf16 %v17875_v40 }
 0x2b1   :  { %v1782_v17 = vsel %vm22278_vm12, %v22277_v16, %v13299_v10  ;;  %v2294_v14 = vrot.slane %v2041_v57, 1  ;;  %v22283_v2 = vmax.f32 %v22282_v47, 0.0  ;;  %v12666_v49 = vpack.c.bf16 %v2481_v37, %v2480_v3  ;;  %v13598_v16 = vld [vmem:[%s21584_s3 + $0x700] ss:$16 sps:$4 sm:$0xff]   ;;  %v13601_v3 = vld [vmem:[%s21584_s3 + $0x708] ss:$16 sps:$4 sm:$0xff]  }
 0x2b2   :  { %v1785_v7 = vsel %vm22281_vm8, %v22280_v43, %v13300_v26  ;;  %vm22284_vm12 = vcmask 1046528   ;;  %v2488_v5 = vmax.f32 %v2040_v34, %v2292_v51  ;;  %v17858_v30 = vmax.f32 %v22286_v42, %v13299_v10  ;;  %v13600_v26 = vld [vmem:[%s21584_s3 + $0x704] ss:$16 sps:$4 sm:$0xff]   ;;  %v22288_v10 = vld [vmem:[#allocation7_spill] sm:$0xff] }
 0x2b3   :  { %v17853_v25 = vmax.f32 %v22283_v2, %v1782_v17  ;;  %v2293_v48 = vsel %vm22284_vm12, %v2281_v36, %v2292_v51  ;;  %vm22287_vm8 = vmmov %vm22284_vm12  ;;  %v2489_v17 = vmax.f32 %v2041_v57, %v2294_v14  ;;  %v22289_v28 = vmax.f32 %v22288_v10, 0.0  ;;  %v13603_v37 = vld [vmem:[%s21584_s3 + $0x70c] ss:$16 sps:$4 sm:$0xff]   ;;  %v13604_v51 = vld [vmem:[%s21584_s3 + $0x724] ss:$16 sps:$4 sm:$0x3f]   ;;  %5295 = vmatprep.subr.bf16.mxu0 %v13600_v26 }
 0x2b4   :  { %v2295_v36 = vsel %vm22287_vm8, %v2284_v62, %v2294_v14  ;;  %v2484_v34 = vmax.f32 %v17783_v54, %v2293_v48  ;;  %v2673_v62 = vsel %vm16417_vm13, %v12666_v49, %v2672_v33  ;;  %v2749_v4 = vshll.u32 %v12666_v49, 16  ;;  %v13606_v14 = vld [vmem:[%s21584_s3 + $0x72c] ss:$16 sps:$4 sm:$0x3f]   ;;  %v3234_v43 = vld [vmem:[#allocation3 + $0xe0] sm:$0x44]  ;;  %5441 = vmatprep.subr.bf16.mxu1 %v13603_v37  ;;  %5296 = vmatpush1.bf16.msra.mxu0 %v13598_v16 }
 0x2b5   :  { %v17873_v44 = vmax.f32 %v22289_v28, %v1785_v7  ;;  %v11316_v54 = vrot.slane %v12666_v49, 9  ;;  %v2485_v57 = vmax.f32 %v17812_v60, %v2295_v36  ;;  %2674 = vst [vmem:[#allocation3 + $0xe0] sm:$0x11] %v2673_v62  ;;  %v12698_v7 = vpack.c.bf16 %v2489_v17, %v2488_v5  ;;  %v3946_v49 = vld [vmem:[#allocation3 + $0xf0] sm:$0x22]  ;;  %v17902_v5 = vpop.permute.xlu0 %13307  ;;  %5442 = vmatpush1.bf16.msra.mxu1 %v13601_v3  ;;  %v22326_v16 = vld [vmem:[#allocation9_spill] sm:$0xff] }
 0x2b6   :  { %v2146_v47 = vrot.slane %v17853_v25, 1  ;;  %v2149_v48 = vrot.slane %v17858_v30, 1  ;;  %v11300_v33 = vrot.slane %v2749_v4, 9  ;;  %vm22290_vm12 = vsmask.f32 4352  ;;  %11662 = vmatprep.subr.msk.bf16.mxu0 %vm22294_vm15, %v13604_v51 }
 0x2b7   :  { %v2147_v2 = vrot.slane %v17873_v44, 1  ;;  %v2930_v60 = vsel %vm16435_vm6, %v11316_v54, %v2929_v8  ;;  %v17894_v61 = vpack.c.bf16 %v2485_v57, %v2484_v34  ;;  %vm22291_vm8 = vcmask 618500   ;;  %v3459_v26 = vld [vmem:[#allocation3 + $0xe0] sm:$0x88] }
 0x2b8   :  { %vm17898_vm4 = vmand %vm22291_vm8, %vm22290_vm12  ;;  %2931 = vst [vmem:[#allocation3 + $0xe0] sm:$0x22] %v2930_v60  ;;  %v3707_v8 = vsel %vm16417_vm13, %v12698_v7, %v3706_v11  ;;  %v3783_v36 = vshll.u32 %v12698_v7, 16  ;;  %v11396_v34 = vrot.slane %v12698_v7, 9  ;;  %vm22295_vm12 = vcmask 1046528  }
 0x2b9   :  { %v2148_v17 = vsel %vm22295_vm12, %v2146_v47, %v2147_v2  ;;  %vm22296_vm8 = vmmov %vm22294_vm15  ;;  %v3164_v10 = vrot.slane %v17894_v61, 6  ;;  %v3297_v3 = vshll.u32 %v17894_v61, 16  ;;  %v3389_v28 = vrot.slane %v17894_v61, 7  ;;  %3708 = vst [vmem:[#allocation3 + $0xf0] sm:$0x11] %v3707_v8  ;;  %v22330_v8 = vld [vmem:[#allocation57_spill] sm:$0xff] }
 0x2ba   :  { %11667 = vmatprep.subr.msk.bf16.mxu1 %vm22296_vm8, %v13606_v14  ;;  %vm22297_vm15 = vmmov %vm22295_vm12  ;;  %vm3192_vm13 = vcmask 620550   ;;  %v11332_v11 = vrot.slane %v2749_v4, 10  ;;  %v11380_v37 = vrot.slane %v3783_v36, 9  ;;  %v3947_v51 = vsel %vm16435_vm6, %v11396_v34, %v3946_v49  ;;  %v17929_v14 = vpop.permute.xlu1 %13312  ;;  %v2633_v47 = vld [vmem:[#allocation3 + $0x8] sm:$0x11] }
 0x2bb   :  { %v2151_v27 = vsel %vm22297_vm15, %v2149_v48, %v2150_v23  ;;  %vm17924_vm12 = vmor %vm17898_vm4, %vm16333_vm5  ;;  %v2398_v57 = vmax.f32 %v17853_v25, %v2148_v17  ;;  %vm3417_vm8 = vcmask 621575   ;;  %v3235_v4 = vsel %vm16606_vm3, %v3164_v10, %v3234_v43  ;;  %3948 = vst [vmem:[#allocation3 + $0xf0] sm:$0x22] %v3947_v51  ;;  %v2890_v10 = vld [vmem:[#allocation3 + $0x8] sm:$0x22] }
 0x2bc   :  { %v3460_v12 = vsel %vm16679_vm2, %v3389_v28, %v3459_v26  ;;  %v11412_v7 = vrot.slane %v3783_v36, 10  ;;  %vm22301_vm6 = vsmask.f32 5376  ;;  %vm22302_vm15 = vcmask 619525   ;;  %3236 = vst [vmem:[#allocation3 + $0xe0] sm:$0x44] %v3235_v4 }
 0x2bd   :  { %vm17937_vm5 = vmand %vm22302_vm15, %vm22301_vm6  ;;  %v2399_v25 = vmax.f32 %v17858_v30, %v2151_v27  ;;  %v3299_v60 = vrot.slane %v3297_v3, 7  ;;  %3461 = vst [vmem:[#allocation3 + $0xe0] sm:$0x88] %v3460_v12  ;;  %v13304_v9 = vunpack.i.l.bf16 %v17875_v40  ;;  %v13310_v43 = vunpack.i.h.bf16 %v17902_v5  ;;  %v2823_v49 = vld [vmem:[#allocation3 + $0xe0] sm:$0x11]  ;;  %v17950_v30 = vpop.permute.xlu0 %13317  ;;  %v22310_v51 = vld [vmem:[#allocation69_spill] sm:$0xff] }
 0x2be   :  { %v13309_v26 = vunpack.i.l.bf16 %v17902_v5  ;;  %v2824_v34 = vsel %vm16503_vm7, %v11300_v33, %v2823_v49  ;;  %vm17958_vm3 = vmor %vm17937_vm5, %vm16349_vm9  ;;  %v22308_v28 = vld [vmem:[#allocation12_spill] sm:$0xff]  ;;  %v22311_v62 = vunpack.i.l.bf16 %v22310_v51  ;;  %vm22312_vm2 = vcmask 883712   ;;  %v3667_v61 = vld [vmem:[#allocation3 + $0x18] sm:$0x11] }
 0x2bf   :  { %v12653_v42 = vpack.c.bf16 %v2399_v25, %v2398_v57  ;;  %v22309_v5 = vmax.f32 %v22308_v28, 0.0  ;;  %v22313_v4 = vld [vmem:[#allocation72_spill] sm:$0xff]  ;;  %vm22315_vm4 = vmmov %vm22312_vm2  ;;  %2825 = vst [vmem:[#allocation3 + $0xe0] sm:$0x11] %v2824_v34  ;;  %vm22316_vm6 = vsmask.f32 7954 }
 0x2c0   :  { %v1788_v57 = vsel %vm22312_vm2, %v22311_v62, %v13304_v9  ;;  %v22314_v12 = vunpack.i.h.bf16 %v22313_v4  ;;  %v3032_v25 = vld [vmem:[#allocation3 + $0xe0] sm:$0x22]  ;;  %vm22317_vm9 = vcmask 618500   ;;  %vm22322_vm5 = vsmask.f32 7958 }
 0x2c1   :  { %v17964_v27 = vmax.f32 %v22309_v5, %v13305_v50  ;;  %vm17974_vm15 = vmand %vm22317_vm9, %vm22316_vm6  ;;  %v2634_v49 = vsel %vm17924_vm12, %v12653_v42, %v2633_v47  ;;  %v2684_v17 = vshll.u32 %v12653_v42, 16  ;;  %v11303_v28 = vrot.slane %v12653_v42, 9  ;;  %v22320_v5 = vld [vmem:[#allocation10_spill] sm:$0xff] }
 0x2c2   :  { %v1791_v33 = vsel %vm22315_vm4, %v22314_v12, %v13305_v50  ;;  %v22321_v51 = vmax.f32 %v22320_v5, 0.0  ;;  %v3033_v4 = vsel %vm16521_vm0, %v11332_v11, %v3032_v25  ;;  %v3850_v50 = vld [vmem:[#allocation3 + $0xf0] sm:$0x11]  ;;  %vm22323_vm2 = vcmask 619525   ;;  %2635 = vst [vmem:[#allocation3 + $0x8] sm:$0x11] %v2634_v49 }
 0x2c3   :  { %vm17986_vm4 = vmand %vm22323_vm2, %vm22322_vm5  ;;  %v2169_v12 = vrot.slane %v17964_v27, 1  ;;  %v22327_v47 = vmax.f32 %v22326_v16, 0.0  ;;  %3034 = vst [vmem:[#allocation3 + $0xe0] sm:$0x22] %v3033_v4  ;;  %v11287_v11 = vrot.slane %v2684_v17, 9  ;;  %v2891_v25 = vsel %vm17958_vm3, %v11303_v28, %v2890_v10  ;;  %v22328_v5 = vld [vmem:[#allocation11_spill] sm:$0xff] }
 0x2c4   :  { %v1958_v62 = vmax.f32 %v22321_v51, %v1788_v57  ;;  %v3851_v57 = vsel %vm16503_vm7, %v11380_v37, %v3850_v50  ;;  %v22329_v51 = vmax.f32 %v22328_v5, 0.0  ;;  %v4042_v49 = vld [vmem:[#allocation3 + $0xf0] sm:$0x22]  ;;  %vm22331_vm6 = vnez %v22330_v8  ;;  %2892 = vst [vmem:[#allocation3 + $0x8] sm:$0x22] %v2891_v25  ;;  %v22334_v4 = vld [vmem:[#allocation16_spill] sm:$0xff] }
 0x2c5   :  { %v1959_v18 = vmax.f32 %v22327_v47, %v13304_v9  ;;  %3852 = vst [vmem:[#allocation3 + $0xf0] sm:$0x11] %v3851_v57  ;;  %vm18006_vm9 = vmor %vm17974_vm15, %vm22331_vm6  ;;  %v11319_v15 = vrot.slane %v2684_v17, 10  ;;  %v22335_v10 = vmax.f32 %v22334_v4, 0.0  ;;  %v3530_v50 = vld [vmem:[#allocation3 + $0xe0] sm:$0x88]  ;;  %v4043_v47 = vsel %vm16521_vm0, %v11412_v7, %v4042_v49 }
 0x2c6   :  { %v18000_v36 = vmax.f32 %v22329_v51, %v1791_v33  ;;  %v2156_v37 = vrot.slane %v1958_v62, 1  ;;  %v3369_v33 = vld [vmem:[#allocation3 + $0xe0] sm:$0x44]  ;;  %v22340_v17 = vld [vmem:[#allocation79_spill] sm:$0xff]  ;;  %vm22342_vm5 = vcmask 883712   ;;  %v3531_v34 = vsel %vm16780_vm11, %v3297_v3, %v3530_v50  ;;  %v22356_v50 = vld [vmem:[#allocation14_spill] sm:$0xff] }
 0x2c7   :  { %v2158_v9 = vrot.slane %v1959_v18, 1  ;;  %v18012_v28 = vmax.f32 %v22335_v10, %v13310_v43  ;;  %v22336_v8 = vld [vmem:[#allocation60_spill] sm:$0xff]  ;;  %v22341_v57 = vunpack.i.l.bf16 %v22340_v17  ;;  %v22343_v5 = vld [vmem:[#allocation83_spill] sm:$0xff]  ;;  %vm22345_vm2 = vmmov %vm22342_vm5  ;;  %v3370_v7 = vsel %vm16722_vm10, %v3299_v60, %v3369_v33  ;;  %4044 = vst [vmem:[#allocation3 + $0xf0] sm:$0x22] %v4043_v47 }
 0x2c8   :  { %vm22337_vm7 = vnez %v22336_v8  ;;  %v22344_v51 = vunpack.i.h.bf16 %v22343_v5  ;;  %v22346_v10 = vld [vmem:[#allocation13_spill] sm:$0xff]  ;;  %vm22348_vm0 = vsmask.f32 6400  ;;  %vm22351_vm6 = vcmask 1046528   ;;  %3371 = vst [vmem:[#allocation3 + $0xe0] sm:$0x44] %v3370_v7 }
 0x2c9   :  { %vm18020_vm15 = vmor %vm17986_vm4, %vm22337_vm7  ;;  %v1794_v25 = vsel %vm22342_vm5, %v22341_v57, %v13309_v26  ;;  %v22347_v42 = vmax.f32 %v22346_v10, 0.0  ;;  %3532 = vst [vmem:[#allocation3 + $0xe0] sm:$0x88] %v3531_v34  ;;  %vm22353_vm10 = vsmask.f32 7424  ;;  %v2166_v33 = vrot.slane %v18000_v36, 1 }
 0x2ca   :  { %v1797_v4 = vsel %vm22345_vm2, %v22344_v51, %v13310_v43  ;;  %vm18042_vm4 = vmand %vm3192_vm13, %vm22348_vm0  ;;  %v2157_v43 = vsel %vm22351_vm6, %v2147_v2, %v2156_v37  ;;  %v3195_v2 = vld [vmem:[#allocation3 + $0x8] sm:$0x44]  ;;  %v22357_v47 = vmax.f32 %v22356_v50, 0.0  ;;  %v2784_v57 = vld [vmem:[#allocation3 + $0x8] sm:$0x11] }
 0x2cb   :  { %v18032_v1 = vmax.f32 %v22347_v42, %v13309_v26  ;;  %vm22352_vm7 = vmmov %vm22351_vm6  ;;  %v2402_v3 = vmax.f32 %v17873_v44, %v2157_v43  ;;  %v2406_v26 = vmax.f32 %v1958_v62, %v2156_v37  ;;  %v2407_v42 = vmax.f32 %v1959_v18, %v2158_v9  ;;  %v22358_v5 = vld [vmem:[#allocation65_spill] sm:$0xff]  ;;  %v22362_v37 = vld [vmem:[#allocation15_spill] sm:$0xff] }
 0x2cc   :  { %v2159_v58 = vsel %vm22352_vm7, %v2150_v23, %v2158_v9  ;;  %vm18054_vm11 = vmand %vm3417_vm8, %vm22353_vm10  ;;  %v2178_v23 = vrot.slane %v18012_v28, 1  ;;  %v1966_v8 = vmax.f32 %v22357_v47, %v1794_v25  ;;  %vm22359_vm5 = vnez %v22358_v5  ;;  %v3420_v18 = vld [vmem:[#allocation3 + $0x8] sm:$0x88]  ;;  %v22365_v10 = vld [vmem:[#allocation20_spill] sm:$0xff] }
 0x2cd   :  { %v2403_v60 = vmax.f32 %v17832_v46, %v2159_v58  ;;  %v2170_v17 = vrot.slane %v18032_v1, 1  ;;  %vm18069_vm2 = vmor %vm18042_vm4, %vm22359_vm5  ;;  %v12685_v62 = vpack.c.bf16 %v2407_v42, %v2406_v26  ;;  %v22363_v9 = vmax.f32 %v22362_v37, 0.0  ;;  %v22367_v43 = vld [vmem:[#allocation68_spill] sm:$0xff]  ;;  %v22372_v42 = vld [vmem:[#allocation89_spill] sm:$0xff] }
 0x2ce   :  { %v22364_v25 = vunpack.i.h.bf16 %v17929_v14  ;;  %v22366_v7 = vmax.f32 %v22365_v10, 0.0  ;;  %v2785_v49 = vsel %vm18006_vm9, %v11287_v11, %v2784_v57  ;;  %vm22368_vm0 = vnez %v22367_v43  ;;  %v2993_v11 = vld [vmem:[#allocation3 + $0x8] sm:$0x22]  ;;  %vm22375_vm10 = vmmov %vm22351_vm6  ;;  %v13612_v54 = vld [vmem:[%s21584_s3 + $0x4] ss:$16 sps:$4 sm:$0xff]  }
 0x2cf   :  { %v18073_v46 = vpack.c.bf16 %v2403_v60, %v2402_v3  ;;  %v1970_v51 = vmax.f32 %v22363_v9, %v1797_v4  ;;  %vm18089_vm4 = vmor %vm18054_vm11, %vm22368_vm0  ;;  %v3907_v3 = vld [vmem:[#allocation3 + $0x18] sm:$0x22]  ;;  %v2167_v60 = vrot.slane %v1966_v8, 1  ;;  %v2171_v4 = vsel %vm22351_vm6, %v2169_v12, %v2170_v17  ;;  %2786 = vst [vmem:[#allocation3 + $0x8] sm:$0x11] %v2785_v49 }
 0x2d0   :  { %v18081_v34 = vmax.f32 %v22366_v7, %v22364_v25  ;;  %v22371_v26 = vunpack.i.l.bf16 %v17929_v14  ;;  %v22373_v50 = vunpack.i.l.bf16 %v22372_v42  ;;  %vm22374_vm7 = vcmask 883712   ;;  %vm22379_vm0 = vmmov %vm22351_vm6 }
 0x2d1   :  { %v3151_v57 = vrot.slane %v18073_v46, 6  ;;  %v3245_v53 = vshll.u32 %v18073_v46, 16  ;;  %v3376_v5 = vrot.slane %v18073_v46, 7  ;;  %v3668_v37 = vsel %vm17924_vm12, %v12685_v62, %v3667_v61  ;;  %vm22380_vm6 = vmmov %vm22379_vm0  ;;  %v3426_v61 = vld [vmem:[#allocation3 + $0x28] sm:$0x88] }
 0x2d2   :  { %v1800_v47 = vsel %vm22374_vm7, %v22373_v50, %v22371_v26  ;;  %v2994_v12 = vsel %vm18020_vm15, %v11319_v15, %v2993_v11  ;;  %3669 = vst [vmem:[#allocation3 + $0x18] sm:$0x11] %v3668_v37  ;;  %v3718_v9 = vshll.u32 %v12685_v62, 16  ;;  %v11383_v25 = vrot.slane %v12685_v62, 9 }
 0x2d3   :  { %v2168_v10 = vsel %vm22375_vm10, %v2166_v33, %v2167_v60  ;;  %2995 = vst [vmem:[#allocation3 + $0x8] sm:$0x22] %v2994_v12  ;;  %v3196_v7 = vsel %vm18069_vm2, %v3151_v57, %v3195_v2  ;;  %v3421_v49 = vsel %vm18089_vm4, %v3376_v5, %v3420_v18  ;;  %v2419_v43 = vmax.f32 %v18012_v28, %v2178_v23  ;;  %v2639_v28 = vld [vmem:[#allocation3 + $0x28] sm:$0x11] }
 0x2d4   :  { %v2176_v26 = vrot.slane %v1970_v51, 1  ;;  %vm22376_vm11 = vsmask.f32 7962  ;;  %3197 = vst [vmem:[#allocation3 + $0x8] sm:$0x44] %v3196_v7  ;;  %v3247_v15 = vrot.slane %v3245_v53, 7  ;;  %v3908_v2 = vsel %vm17958_vm3, %v11383_v25, %v3907_v3 }
 0x2d5   :  { %vm18114_vm5 = vmand %vm3192_vm13, %vm22376_vm11  ;;  %3422 = vst [vmem:[#allocation3 + $0x8] sm:$0x88] %v3421_v49  ;;  %v11367_v33 = vrot.slane %v3718_v9, 9  ;;  %v2179_v18 = vsel %vm22379_vm0, %v2170_v17, %v2178_v23  ;;  %v2410_v42 = vmax.f32 %v18000_v36, %v2168_v10  ;;  %v2411_v50 = vmax.f32 %v17964_v27, %v2171_v4  ;;  %v3673_v3 = vld [vmem:[#allocation3 + $0x38] sm:$0x11]  ;;  %v22387_v12 = vld [vmem:[#allocation73_spill] sm:$0xff] }
 0x2d6   :  { %3909 = vst [vmem:[#allocation3 + $0x18] sm:$0x22] %v3908_v2  ;;  %v2177_v62 = vsel %vm22380_vm6, %v2167_v60, %v2176_v26  ;;  %v2415_v11 = vmax.f32 %v18032_v1, %v2179_v18  ;;  %vm22381_vm13 = vsmask.f32 7966  ;;  %v11399_v5 = vrot.slane %v3718_v9, 10  ;;  %v22394_v10 = vld [vmem:[#allocation17_spill] sm:$0xff] }
 0x2d7   :  { %vm18129_vm7 = vmand %vm3417_vm8, %vm22381_vm13  ;;  %v2414_v37 = vmax.f32 %v1966_v8, %v2177_v62  ;;  %v2418_v23 = vmax.f32 %v1970_v51, %v2176_v26  ;;  %v22384_v17 = vunpack.i.h.bf16 %v17929_v14  ;;  %v22385_v60 = vunpack.i.h.bf16 %v16890_v21  ;;  %v2896_v1 = vld [vmem:[#allocation3 + $0x28] sm:$0x22]  ;;  %v22391_v8 = vld [vmem:[#allocation18_spill] sm:$0xff] }
 0x2d8   :  { %vm22386_vm10 = vcmask 883712   ;;  %vm22388_vm11 = vnez %v22387_v12  ;;  %v12655_v4 = vpack.c.bf16 %v2411_v50, %v2410_v42  ;;  %v2190_v9 = vrot.slane %v18081_v34, 1  ;;  %v3201_v26 = vld [vmem:[#allocation3 + $0x28] sm:$0x44]  ;;  %v22396_v62 = vld [vmem:[#allocation19_spill] sm:$0xff] }
 0x2d9   :  { %v1803_v36 = vsel %vm22386_vm10, %v22385_v60, %v22384_v17  ;;  %vm18142_vm0 = vmor %vm18114_vm5, %vm22388_vm11  ;;  %v22392_v51 = vmax.f32 %v22391_v8, 0.0  ;;  %v22393_v21 = vunpack.i.l.bf16 %v17929_v14  ;;  %v22395_v7 = vmax.f32 %v22394_v10, 0.0  ;;  %v22399_v60 = vld [vmem:[#allocation26_spill] sm:$0xff] }
 0x2da   :  { %v18157_v2 = vpack.c.bf16 %v2415_v11, %v2414_v37  ;;  %v12687_v18 = vpack.c.bf16 %v2419_v43, %v2418_v23  ;;  %v22397_v17 = vmax.f32 %v22396_v62, 0.0  ;;  %v22398_v50 = vunpack.i.h.bf16 %v17950_v30  ;;  %v22401_v14 = vld [vmem:[#allocation78_spill] sm:$0xff]  ;;  %v3811_v11 = vld [vmem:[#allocation3 + $0x18] sm:$0x11]  ;;  %vm22406_vm6 = vmmov %vm22386_vm10 }
 0x2db   :  { %v18149_v25 = vmax.f32 %v22392_v51, %v1800_v47  ;;  %v18155_v49 = vmax.f32 %v22395_v7, %v22393_v21  ;;  %v22400_v47 = vmax.f32 %v22399_v60, 0.0  ;;  %vm22402_vm8 = vnez %v22401_v14  ;;  %v3330_v7 = vld [vmem:[#allocation3 + $0x8] sm:$0x44]  ;;  %v3913_v14 = vld [vmem:[#allocation3 + $0x38] sm:$0x22]  ;;  %vm22409_vm13 = vmmov %vm22406_vm6 }
 0x2dc   :  { %v18161_v42 = vmax.f32 %v22397_v17, %v1803_v36  ;;  %vm18173_vm5 = vmor %vm18129_vm7, %vm22402_vm8  ;;  %v2640_v43 = vsel %vm17924_vm12, %v12655_v4, %v2639_v28  ;;  %v2694_v37 = vshll.u32 %v12655_v4, 16  ;;  %v11305_v23 = vrot.slane %v12655_v4, 9  ;;  %v3491_v62 = vld [vmem:[#allocation3 + $0x8] sm:$0x88] }
 0x2dd   :  { %v18167_v12 = vmax.f32 %v22400_v47, %v22398_v50  ;;  %v13319_v36 = vunpack.i.l.bf16 %v17950_v30  ;;  %v3812_v51 = vsel %vm18006_vm9, %v11367_v33, %v3811_v11  ;;  %2641 = vst [vmem:[#allocation3 + $0x28] sm:$0x11] %v2640_v43  ;;  %v3153_v21 = vrot.slane %v18157_v2, 6  ;;  %v4003_v47 = vld [vmem:[#allocation3 + $0x18] sm:$0x22] }
 0x2de   :  { %v3253_v57 = vshll.u32 %v18157_v2, 16  ;;  %v3378_v10 = vrot.slane %v18157_v2, 7  ;;  %3813 = vst [vmem:[#allocation3 + $0x18] sm:$0x11] %v3812_v51  ;;  %v11289_v17 = vrot.slane %v2694_v37, 9  ;;  %v2897_v28 = vsel %vm17958_vm3, %v11305_v23, %v2896_v1 }
 0x2df   :  { %v3674_v4 = vsel %vm17924_vm12, %v12687_v18, %v3673_v3  ;;  %v2186_v50 = vrot.slane %v18149_v25, 1  ;;  %v3331_v33 = vsel %vm18142_vm0, %v3247_v15, %v3330_v7  ;;  %v3492_v60 = vsel %vm18173_vm5, %v3245_v53, %v3491_v62  ;;  %2898 = vst [vmem:[#allocation3 + $0x28] sm:$0x22] %v2897_v28  ;;  %v2645_v28 = vld [vmem:[#allocation3 + $0x48] sm:$0x11] }
 0x2e0   :  { %v11321_v11 = vrot.slane %v2694_v37, 10  ;;  %v3202_v1 = vsel %vm18069_vm2, %v3153_v21, %v3201_v26  ;;  %3675 = vst [vmem:[#allocation3 + $0x38] sm:$0x11] %v3674_v4  ;;  %3332 = vst [vmem:[#allocation3 + $0x8] sm:$0x44] %v3331_v33  ;;  %v4004_v3 = vsel %vm18020_vm15, %v11399_v5, %v4003_v47  ;;  %v3427_v46 = vsel %vm18089_vm4, %v3378_v10, %v3426_v61  ;;  %v18209_v5 = vpop.permute.xlu1 %13322  ;;  %v22412_v33 = vld [vmem:[#allocation22_spill] sm:$0xff] }
 0x2e1   :  { %3493 = vst [vmem:[#allocation3 + $0x8] sm:$0x88] %v3492_v60  ;;  %3203 = vst [vmem:[#allocation3 + $0x28] sm:$0x44] %v3202_v1  ;;  %v3728_v15 = vshll.u32 %v12687_v18, 16  ;;  %v11385_v43 = vrot.slane %v12687_v18, 9  ;;  %v22405_v23 = vunpack.i.l.bf16 %v16983_v38  ;;  %v22407_v10 = vunpack.i.h.bf16 %v17950_v30 }
 0x2e2   :  { %4005 = vst [vmem:[#allocation3 + $0x18] sm:$0x22] %v4004_v3  ;;  %v3255_v53 = vrot.slane %v3253_v57, 7  ;;  %3428 = vst [vmem:[#allocation3 + $0x28] sm:$0x88] %v3427_v46  ;;  %v2187_v37 = vrot.slane %v18161_v42, 1  ;;  %v22408_v7 = vunpack.i.h.bf16 %v16990_v45 }
 0x2e3   :  { %v2189_v26 = vrot.slane %v18155_v49, 1  ;;  %v1806_v51 = vsel %vm22406_vm6, %v22405_v23, %v13319_v36  ;;  %v11369_v21 = vrot.slane %v3728_v15, 9  ;;  %v3914_v61 = vsel %vm17958_vm3, %v11385_v43, %v3913_v14  ;;  %v22414_v14 = vld [vmem:[#allocation21_spill] sm:$0xff]  ;;  %v22416_v43 = vld [vmem:[#allocation24_spill] sm:$0xff] }
 0x2e4   :  { %v2209_v18 = vrot.slane %v18167_v12, 1  ;;  %v1809_v62 = vsel %vm22409_vm13, %v22408_v7, %v22407_v10  ;;  %3915 = vst [vmem:[#allocation3 + $0x38] sm:$0x22] %v3914_v61  ;;  %vm22410_vm7 = vcmask 1046528   ;;  %v22413_v60 = vmax.f32 %v22412_v33, 0.0  ;;  %vm22424_vm13 = vmmov %vm22406_vm6 }
 0x2e5   :  { %v2188_v38 = vsel %vm22410_vm7, %v2186_v50, %v2187_v37  ;;  %vm22411_vm10 = vmmov %vm22410_vm7  ;;  %v22415_v1 = vmax.f32 %v22414_v14, 0.0  ;;  %v2790_v46 = vld [vmem:[#allocation3 + $0x28] sm:$0x11]  ;;  %v22417_v23 = vmax.f32 %v22416_v43, 0.0  ;;  %v13325_v50 = vunpack.i.h.bf16 %v18209_v5 }
 0x2e6   :  { %v2191_v4 = vsel %vm22411_vm10, %v2189_v26, %v2190_v9  ;;  %v1982_v47 = vmax.f32 %v22413_v60, %v1806_v51  ;;  %v2422_v30 = vmax.f32 %v18149_v25, %v2188_v38  ;;  %v2791_v26 = vsel %vm18006_vm9, %v11289_v17, %v2790_v46  ;;  %v2999_v33 = vld [vmem:[#allocation3 + $0x28] sm:$0x22]  ;;  %v22418_v38 = vld [vmem:[#allocation34_spill] sm:$0xff]  ;;  %vm22420_vm11 = vmmov %vm22410_vm7 }
 0x2e7   :  { %v1983_v3 = vmax.f32 %v22415_v1, %v13319_v36  ;;  %v2423_v45 = vmax.f32 %v18155_v49, %v2191_v4  ;;  %v18231_v61 = vmax.f32 %v22417_v23, %v1809_v62  ;;  %v11401_v10 = vrot.slane %v3728_v15, 10  ;;  %2792 = vst [vmem:[#allocation3 + $0x28] sm:$0x11] %v2791_v26  ;;  %v3817_v36 = vld [vmem:[#allocation3 + $0x38] sm:$0x11]  ;;  %vm22421_vm8 = vmmov %vm22410_vm7 }
 0x2e8   :  { %v2196_v7 = vrot.slane %v1982_v47, 1  ;;  %v22419_v49 = vmax.f32 %v22418_v38, 0.0  ;;  %v13324_v62 = vunpack.i.l.bf16 %v18209_v5  ;;  %v3000_v14 = vsel %vm18020_vm15, %v11321_v11, %v2999_v33  ;;  %v3336_v1 = vld [vmem:[#allocation3 + $0x28] sm:$0x44]  ;;  %v2902_v15 = vld [vmem:[#allocation3 + $0x48] sm:$0x22]  ;;  %vm22431_vm10 = vmmov %vm22410_vm7 }
 0x2e9   :  { %v2198_v51 = vrot.slane %v1983_v3, 1  ;;  %v12657_v60 = vpack.c.bf16 %v2423_v45, %v2422_v30  ;;  %v2206_v25 = vrot.slane %v18231_v61, 1  ;;  %v3818_v17 = vsel %vm18006_vm9, %v11369_v21, %v3817_v36  ;;  %3001 = vst [vmem:[#allocation3 + $0x28] sm:$0x22] %v3000_v14  ;;  %v3497_v43 = vld [vmem:[#allocation3 + $0x28] sm:$0x88] }
 0x2ea   :  { %v18239_v4 = vmax.f32 %v22419_v49, %v13325_v50  ;;  %v2197_v46 = vsel %vm22420_vm11, %v2187_v37, %v2196_v7  ;;  %v3337_v45 = vsel %vm18142_vm0, %v3255_v53, %v3336_v1  ;;  %3819 = vst [vmem:[#allocation3 + $0x38] sm:$0x11] %v3818_v17  ;;  %v3498_v37 = vsel %vm18173_vm5, %v3253_v57, %v3497_v43  ;;  %v3679_v36 = vld [vmem:[#allocation3 + $0x58] sm:$0x11]  ;;  %v3919_v49 = vld [vmem:[#allocation3 + $0x58] sm:$0x22]  ;;  %vm22432_vm11 = vmmov %vm22410_vm7 }
 0x2eb   :  { %v2199_v30 = vsel %vm22421_vm8, %v2190_v9, %v2198_v51  ;;  %v2646_v11 = vsel %vm17924_vm12, %v12657_v60, %v2645_v28  ;;  %v2704_v5 = vshll.u32 %v12657_v60, 16  ;;  %v11307_v23 = vrot.slane %v12657_v60, 9  ;;  %3338 = vst [vmem:[#allocation3 + $0x28] sm:$0x44] %v3337_v45  ;;  %3499 = vst [vmem:[#allocation3 + $0x28] sm:$0x88] %v3498_v37 }
 0x2ec   :  { %2647 = vst [vmem:[#allocation3 + $0x48] sm:$0x11] %v2646_v11  ;;  %v2426_v9 = vmax.f32 %v18161_v42, %v2197_v46  ;;  %v2427_v21 = vmax.f32 %v18081_v34, %v2199_v30  ;;  %v2430_v26 = vmax.f32 %v1982_v47, %v2196_v7  ;;  %v4009_v53 = vld [vmem:[#allocation3 + $0x38] sm:$0x22]  ;;  %v2431_v60 = vmax.f32 %v1983_v3, %v2198_v51  ;;  %v3207_v42 = vld [vmem:[#allocation3 + $0x48] sm:$0x44]  ;;  %vm22433_vm8 = vmmov %vm22410_vm7 }
 0x2ed   :  { %v11291_v33 = vrot.slane %v2704_v5, 9  ;;  %v2903_v28 = vsel %vm17958_vm3, %v11307_v23, %v2902_v15  ;;  %v22422_v38 = vunpack.i.h.bf16 %v17115_v31  ;;  %v4010_v57 = vsel %vm18020_vm15, %v11401_v10, %v4009_v53  ;;  %v3432_v51 = vld [vmem:[#allocation3 + $0x48] sm:$0x88]  ;;  %v22425_v1 = vld [vmem:[#allocation30_spill] sm:$0xff]  ;;  %v22429_v11 = vld [vmem:[#allocation32_spill] sm:$0xff] }
 0x2ee   :  { %2904 = vst [vmem:[#allocation3 + $0x48] sm:$0x22] %v2903_v28  ;;  %v18267_v34 = vpack.c.bf16 %v2427_v21, %v2426_v9  ;;  %v2218_v47 = vrot.slane %v18239_v4, 1  ;;  %v22423_v7 = vunpack.i.l.bf16 %v17110_v35  ;;  %4011 = vst [vmem:[#allocation3 + $0x38] sm:$0x22] %v4010_v57  ;;  %v11323_v3 = vrot.slane %v2704_v5, 10 }
 0x2ef   :  { %v1815_v2 = vsel %vm22406_vm6, %v22422_v38, %v13325_v50  ;;  %v12689_v31 = vpack.c.bf16 %v2431_v60, %v2430_v26  ;;  %v22426_v50 = vmax.f32 %v22425_v1, 0.0  ;;  %v22427_v15 = vld [vmem:[#allocation29_spill] sm:$0xff]  ;;  %v22430_v35 = vmax.f32 %v22429_v11, 0.0  ;;  %v13328_v60 = vpop.permute.xlu0 %13327 }
 0x2f0   :  { %v1812_v14 = vsel %vm22424_vm13, %v22423_v7, %v13324_v62  ;;  %v22428_v10 = vmax.f32 %v22427_v15, 0.0  ;;  %v3155_v30 = vrot.slane %v18267_v34, 6  ;;  %v3261_v45 = vshll.u32 %v18267_v34, 16  ;;  %vm22438_vm13 = vmmov %vm22406_vm6 }
 0x2f1   :  { %v1990_v17 = vmax.f32 %v22426_v50, %v1812_v14  ;;  %v3380_v43 = vrot.slane %v18267_v34, 7  ;;  %v1994_v23 = vmax.f32 %v22430_v35, %v1815_v2  ;;  %v3680_v5 = vsel %vm17924_vm12, %v12689_v31, %v3679_v36  ;;  %v3438_v34 = vld [vmem:[#allocation3 + $0x68] sm:$0x88] }
 0x2f2   :  { %v1991_v46 = vmax.f32 %v22428_v10, %v13324_v62  ;;  %v3738_v37 = vshll.u32 %v12689_v31, 16  ;;  %v11387_v9 = vrot.slane %v12689_v31, 9  ;;  %v3208_v26 = vsel %vm18069_vm2, %v3155_v30, %v3207_v42  ;;  %3681 = vst [vmem:[#allocation3 + $0x58] sm:$0x11] %v3680_v5  ;;  %v2908_v10 = vld [vmem:[#allocation3 + $0x68] sm:$0x22] }
 0x2f3   :  { %v2207_v21 = vrot.slane %v1990_v17, 1  ;;  %v3433_v62 = vsel %vm18089_vm4, %v3380_v43, %v3432_v51  ;;  %v2443_v53 = vmax.f32 %v18239_v4, %v2218_v47  ;;  %v2796_v38 = vld [vmem:[#allocation3 + $0x48] sm:$0x11]  ;;  %3209 = vst [vmem:[#allocation3 + $0x48] sm:$0x44] %v3208_v26  ;;  %v3263_v2 = vrot.slane %v3261_v45, 7 }
 0x2f4   :  { %v2210_v28 = vrot.slane %v1991_v46, 1  ;;  %3434 = vst [vmem:[#allocation3 + $0x48] sm:$0x88] %v3433_v62  ;;  %v11371_v36 = vrot.slane %v3738_v37, 9  ;;  %v3920_v57 = vsel %vm17958_vm3, %v11387_v9, %v3919_v49  ;;  %v2797_v7 = vsel %vm18006_vm9, %v11291_v33, %v2796_v38  ;;  %v2651_v33 = vld [vmem:[#allocation3 + $0x68] sm:$0x11] }
 0x2f5   :  { %v2208_v42 = vsel %vm22410_vm7, %v2206_v25, %v2207_v21  ;;  %3921 = vst [vmem:[#allocation3 + $0x58] sm:$0x22] %v3920_v57  ;;  %v2216_v14 = vrot.slane %v1994_v23, 1  ;;  %2798 = vst [vmem:[#allocation3 + $0x48] sm:$0x11] %v2797_v7  ;;  %v13330_v15 = vunpack.i.h.bf16 %v13328_v60  ;;  %v13329_v11 = vunpack.i.l.bf16 %v13328_v60  ;;  %v22434_v9 = vld [vmem:[#allocation42_spill] sm:$0xff] }
 0x2f6   :  { %v2211_v4 = vsel %vm22431_vm10, %v2209_v18, %v2210_v28  ;;  %v2219_v51 = vsel %vm22432_vm11, %v2210_v28, %v2218_v47  ;;  %v3005_v31 = vld [vmem:[#allocation3 + $0x48] sm:$0x22]  ;;  %v2434_v1 = vmax.f32 %v18231_v61, %v2208_v42  ;;  %v3685_v30 = vld [vmem:[#allocation3 + $0x78] sm:$0x11]  ;;  %v11403_v47 = vrot.slane %v3738_v37, 10  ;;  %vm22448_vm10 = vmmov %vm22406_vm6 }
 0x2f7   :  { %v2435_v49 = vmax.f32 %v18167_v12, %v2211_v4  ;;  %v2439_v50 = vmax.f32 %v1991_v46, %v2219_v51  ;;  %v3006_v25 = vsel %vm18020_vm15, %v11323_v3, %v3005_v31  ;;  %v2217_v43 = vsel %vm22433_vm8, %v2207_v21, %v2216_v14  ;;  %v22439_v21 = vld [vmem:[#allocation37_spill] sm:$0xff]  ;;  %v13333_v31 = vpop.permute.xlu1 %13332  ;;  %vm22449_vm11 = vmmov %vm22410_vm7 }
 0x2f8   :  { %v2442_v18 = vmax.f32 %v1994_v23, %v2216_v14  ;;  %3007 = vst [vmem:[#allocation3 + $0x48] sm:$0x22] %v3006_v25  ;;  %v2438_v35 = vmax.f32 %v1990_v17, %v2217_v43  ;;  %v22435_v61 = vmax.f32 %v22434_v9, 0.0  ;;  %v22436_v46 = vunpack.i.l.bf16 %v17241_v39  ;;  %v3925_v17 = vld [vmem:[#allocation3 + $0x78] sm:$0x22]  ;;  %v22441_v25 = vld [vmem:[#allocation40_spill] sm:$0xff]  ;;  %v18348_v9 = vpop.permute.xlu0 %13337  ;;  %vm22451_vm8 = vmmov %vm22406_vm6 }
 0x2f9   :  { %v12659_v5 = vpack.c.bf16 %v2435_v49, %v2434_v1  ;;  %v22437_v62 = vunpack.i.h.bf16 %v17248_v63  ;;  %v22440_v23 = vmax.f32 %v22439_v21, 0.0  ;;  %v3823_v37 = vld [vmem:[#allocation3 + $0x58] sm:$0x11] }
 0x2fa   :  { %v18309_v26 = vmax.f32 %v22435_v61, %v13330_v15  ;;  %v12691_v12 = vpack.c.bf16 %v2443_v53, %v2442_v18  ;;  %v1818_v3 = vsel %vm22406_vm6, %v22436_v46, %v13329_v11  ;;  %v18323_v53 = vpack.c.bf16 %v2439_v50, %v2438_v35  ;;  %v3342_v39 = vld [vmem:[#allocation3 + $0x48] sm:$0x44]  ;;  %v22443_v46 = vld [vmem:[#allocation38_spill] sm:$0xff] }
 0x2fb   :  { %v1821_v28 = vsel %vm22438_vm13, %v22437_v62, %v13330_v15  ;;  %v18319_v60 = vmax.f32 %v22440_v23, %v13329_v11  ;;  %v2652_v38 = vsel %vm17924_vm12, %v12659_v5, %v2651_v33  ;;  %v2714_v57 = vshll.u32 %v12659_v5, 16  ;;  %v3503_v7 = vld [vmem:[#allocation3 + $0x48] sm:$0x88]  ;;  %v3213_v15 = vld [vmem:[#allocation3 + $0x68] sm:$0x44]  ;;  %vm22462_vm13 = vmmov %vm22406_vm6 }
 0x2fc   :  { %v11309_v42 = vrot.slane %v12659_v5, 9  ;;  %v3824_v63 = vsel %vm18006_vm9, %v11371_v36, %v3823_v37  ;;  %2653 = vst [vmem:[#allocation3 + $0x68] sm:$0x11] %v2652_v38  ;;  %v3686_v4 = vsel %vm17924_vm12, %v12691_v12, %v3685_v30  ;;  %v3748_v14 = vshll.u32 %v12691_v12, 16  ;;  %v4015_v50 = vld [vmem:[#allocation3 + $0x58] sm:$0x22] }
 0x2fd   :  { %v11389_v51 = vrot.slane %v12691_v12, 9  ;;  %v3343_v1 = vsel %vm18142_vm0, %v3263_v2, %v3342_v39  ;;  %v3504_v49 = vsel %vm18173_vm5, %v3261_v45, %v3503_v7  ;;  %3825 = vst [vmem:[#allocation3 + $0x58] sm:$0x11] %v3824_v63  ;;  %3687 = vst [vmem:[#allocation3 + $0x78] sm:$0x11] %v3686_v4  ;;  %v22442_v33 = vmax.f32 %v22441_v25, 0.0  ;;  %v18362_v7 = vpop.permute.xlu1 %13342 }
 0x2fe   :  { %v2909_v36 = vsel %vm17958_vm3, %v11309_v42, %v2908_v10  ;;  %3344 = vst [vmem:[#allocation3 + $0x48] sm:$0x44] %v3343_v1  ;;  %3505 = vst [vmem:[#allocation3 + $0x48] sm:$0x88] %v3504_v49  ;;  %v4016_v2 = vsel %vm18020_vm15, %v11403_v47, %v4015_v50  ;;  %v11293_v43 = vrot.slane %v2714_v57, 9  ;;  %v3157_v45 = vrot.slane %v18323_v53, 6 }
 0x2ff   :  { %v18339_v30 = vmax.f32 %v22442_v33, %v1821_v28  ;;  %2910 = vst [vmem:[#allocation3 + $0x68] sm:$0x22] %v2909_v36  ;;  %v3269_v18 = vshll.u32 %v18323_v53, 16  ;;  %4017 = vst [vmem:[#allocation3 + $0x58] sm:$0x22] %v4016_v2  ;;  %v11325_v11 = vrot.slane %v2714_v57, 10  ;;  %v3926_v5 = vsel %vm17958_vm3, %v11389_v51, %v3925_v17 }
 0x300   :  { %v3382_v10 = vrot.slane %v18323_v53, 7  ;;  %v11373_v35 = vrot.slane %v3748_v14, 9  ;;  %v3214_v47 = vsel %vm18069_vm2, %v3157_v45, %v3213_v15  ;;  %3927 = vst [vmem:[#allocation3 + $0x78] sm:$0x22] %v3926_v5  ;;  %v11405_v61 = vrot.slane %v3748_v14, 10  ;;  %v22445_v4 = vld [vmem:[#allocation50_spill] sm:$0xff] }
 0x301   :  { %v2230_v12 = vrot.slane %v18309_v26, 1  ;;  %v22444_v62 = vmax.f32 %v22443_v46, 0.0  ;;  %3215 = vst [vmem:[#allocation3 + $0x68] sm:$0x44] %v3214_v47  ;;  %v2227_v23 = vrot.slane %v18339_v30, 1  ;;  %v2229_v37 = vrot.slane %v18319_v60, 1 }
 0x302   :  { %v3439_v21 = vsel %vm18089_vm4, %v3382_v10, %v3438_v34  ;;  %v13335_v17 = vunpack.i.h.bf16 %v13333_v31  ;;  %v3271_v38 = vrot.slane %v3269_v18, 7  ;;  %v13334_v42 = vunpack.i.l.bf16 %v13333_v31  ;;  %v22452_v10 = vld [vmem:[#allocation46_spill] sm:$0xff]  ;;  %v22454_v46 = vld [vmem:[#allocation45_spill] sm:$0xff] }
 0x303   :  { %v1998_v28 = vmax.f32 %v22444_v62, %v1818_v3  ;;  %3440 = vst [vmem:[#allocation3 + $0x68] sm:$0x88] %v3439_v21  ;;  %v13340_v39 = vunpack.i.h.bf16 %v18348_v9  ;;  %v2802_v3 = vld [vmem:[#allocation3 + $0x68] sm:$0x11]  ;;  %v2231_v63 = vsel %vm22410_vm7, %v2229_v37, %v2230_v12  ;;  %v22446_v14 = vmax.f32 %v22445_v4, 0.0  ;;  %v22456_v37 = vld [vmem:[#allocation64_spill] sm:$0xff] }
 0x304   :  { %v22447_v1 = vunpack.i.h.bf16 %v17347_v20  ;;  %v13339_v50 = vunpack.i.l.bf16 %v18348_v9  ;;  %v2803_v31 = vsel %vm18006_vm9, %v11293_v43, %v2802_v3  ;;  %v3829_v15 = vld [vmem:[#allocation3 + $0x78] sm:$0x11]  ;;  %v2447_v25 = vmax.f32 %v18319_v60, %v2231_v63  ;;  %v2657_v60 = vld [vmem:[#allocation3 + $0x88] sm:$0x11]  ;;  %v22458_v3 = vld [vmem:[#allocation48_spill] sm:$0xff] }
 0x305   :  { %v2226_v57 = vrot.slane %v1998_v28, 1  ;;  %v18367_v51 = vmax.f32 %v22446_v14, %v13335_v17  ;;  %v22450_v33 = vunpack.i.l.bf16 %v17335_v6  ;;  %2804 = vst [vmem:[#allocation3 + $0x68] sm:$0x11] %v2803_v31  ;;  %v3830_v20 = vsel %vm18006_vm9, %v11373_v35, %v3829_v15  ;;  %v2914_v15 = vld [vmem:[#allocation3 + $0x88] sm:$0x22] }
 0x306   :  { %v1827_v49 = vsel %vm22448_vm10, %v22447_v1, %v13335_v17  ;;  %v3011_v34 = vld [vmem:[#allocation3 + $0x68] sm:$0x22]  ;;  %v22453_v5 = vmax.f32 %v22452_v10, 0.0  ;;  %v13345_v43 = vunpack.i.h.bf16 %v18362_v7  ;;  %3831 = vst [vmem:[#allocation3 + $0x78] sm:$0x11] %v3830_v20  ;;  %v22455_v62 = vmax.f32 %v22454_v46, 0.0  ;;  %vm22463_vm10 = vmmov %vm22410_vm7 }
 0x307   :  { %v2228_v36 = vsel %vm22449_vm11, %v2226_v57, %v2227_v23  ;;  %v1824_v2 = vsel %vm22451_vm8, %v22450_v33, %v13334_v42  ;;  %v3012_v47 = vsel %vm18020_vm15, %v11325_v11, %v3011_v34  ;;  %v2249_v6 = vrot.slane %v18367_v51, 1  ;;  %v4021_v35 = vld [vmem:[#allocation3 + $0x78] sm:$0x22]  ;;  %vm22473_vm11 = vmmov %vm22406_vm6  ;;  %v18711_v16 = vld [vmem:[#allocation3 + $0x58] sm:$0x11] }
 0x308   :  { %v2446_v45 = vmax.f32 %v1998_v28, %v2228_v36  ;;  %v2006_v9 = vmax.f32 %v22453_v5, %v1824_v2  ;;  %v2007_v21 = vmax.f32 %v22455_v62, %v13334_v42  ;;  %v22457_v17 = vmax.f32 %v22456_v37, 0.0  ;;  %3013 = vst [vmem:[#allocation3 + $0x68] sm:$0x22] %v3012_v47  ;;  %v3348_v31 = vld [vmem:[#allocation3 + $0x68] sm:$0x44]  ;;  %v22464_v62 = vld [vmem:[#allocation59_spill] sm:$0xff]  ;;  %vm22474_vm8 = vmmov %vm22410_vm7 }
 0x309   :  { %v22459_v63 = vmax.f32 %v22458_v3, 0.0  ;;  %v22460_v11 = vunpack.i.l.bf16 %v17452_v24  ;;  %v4022_v42 = vsel %vm18020_vm15, %v11405_v61, %v4021_v35  ;;  %v22461_v2 = vunpack.i.h.bf16 %v17457_v56  ;;  %v22468_v3 = vld [vmem:[#allocation62_spill] sm:$0xff] }
 0x30a   :  { %v18392_v57 = vmax.f32 %v22457_v17, %v13340_v39  ;;  %v12661_v28 = vpack.c.bf16 %v2447_v25, %v2446_v45  ;;  %v2236_v14 = vrot.slane %v2006_v9, 1  ;;  %v2238_v36 = vrot.slane %v2007_v21, 1  ;;  %v3509_v34 = vld [vmem:[#allocation3 + $0x68] sm:$0x88]  ;;  %4023 = vst [vmem:[#allocation3 + $0x78] sm:$0x22] %v4022_v42 }
 0x30b   :  { %v18396_v4 = vmax.f32 %v22459_v63, %v1827_v49  ;;  %v1830_v1 = vsel %vm22406_vm6, %v22460_v11, %v13339_v50  ;;  %v1833_v25 = vsel %vm22462_vm13, %v22461_v2, %v13340_v39  ;;  %v3349_v49 = vsel %vm18142_vm0, %v3271_v38, %v3348_v31  ;;  %v3691_v17 = vld [vmem:[#allocation3 + $0x98] sm:$0x11]  ;;  %vm22475_vm6 = vmmov %vm22410_vm7 }
 0x30c   :  { %v2258_v33 = vrot.slane %v18392_v57, 1  ;;  %v2658_v24 = vsel %vm17924_vm12, %v12661_v28, %v2657_v60  ;;  %v2724_v20 = vshll.u32 %v12661_v28, 16  ;;  %v11311_v45 = vrot.slane %v12661_v28, 9  ;;  %3350 = vst [vmem:[#allocation3 + $0x68] sm:$0x44] %v3349_v49  ;;  %vm22477_vm13 = vmmov %vm22473_vm11 }
 0x30d   :  { %v3510_v61 = vsel %vm18173_vm5, %v3269_v18, %v3509_v34  ;;  %2659 = vst [vmem:[#allocation3 + $0x88] sm:$0x11] %v2658_v24  ;;  %v2237_v56 = vsel %vm22410_vm7, %v2227_v23, %v2236_v14  ;;  %v2239_v39 = vsel %vm22463_vm10, %v2230_v12, %v2238_v36  ;;  %v2454_v10 = vmax.f32 %v2006_v9, %v2236_v14  ;;  %v22466_v9 = vld [vmem:[#allocation55_spill] sm:$0xff]  ;;  %vm22478_vm7 = vmmov %vm22475_vm6 }
 0x30e   :  { %3511 = vst [vmem:[#allocation3 + $0x68] sm:$0x88] %v3510_v61  ;;  %v11295_v38 = vrot.slane %v2724_v20, 9  ;;  %v2915_v5 = vsel %vm17958_vm3, %v11311_v45, %v2914_v15  ;;  %v2246_v47 = vrot.slane %v18396_v4, 1  ;;  %v2450_v60 = vmax.f32 %v18339_v30, %v2237_v56  ;;  %v22470_v30 = vld [vmem:[#allocation77_spill] sm:$0xff]  ;;  %vm22479_vm10 = vmmov %vm22475_vm6 }
 0x30f   :  { %2916 = vst [vmem:[#allocation3 + $0x88] sm:$0x22] %v2915_v5  ;;  %v11327_v53 = vrot.slane %v2724_v20, 10  ;;  %v2451_v46 = vmax.f32 %v18309_v26, %v2239_v39  ;;  %v2455_v18 = vmax.f32 %v2007_v21, %v2238_v36  ;;  %v22465_v37 = vmax.f32 %v22464_v62, 0.0  ;;  %v3219_v26 = vld [vmem:[#allocation3 + $0x88] sm:$0x44] }
 0x310   :  { %v2467_v12 = vmax.f32 %v18392_v57, %v2258_v33  ;;  %v22467_v35 = vmax.f32 %v22466_v9, 0.0  ;;  %v22469_v63 = vmax.f32 %v22468_v3, 0.0  ;;  %v22471_v11 = vmax.f32 %v22470_v30, 0.0  ;;  %v3444_v36 = vld [vmem:[#allocation3 + $0x88] sm:$0x88]  ;;  %v22482_v57 = vld [vmem:[#allocation71_spill] sm:$0xff] }
 0x311   :  { %v2014_v23 = vmax.f32 %v22465_v37, %v1830_v1  ;;  %v18435_v21 = vpack.c.bf16 %v2451_v46, %v2450_v60  ;;  %v12693_v42 = vpack.c.bf16 %v2455_v18, %v2454_v10  ;;  %v13344_v15 = vunpack.i.l.bf16 %v18362_v7  ;;  %v3931_v24 = vld [vmem:[#allocation3 + $0x98] sm:$0x22]  ;;  %v2663_v30 = vld [vmem:[#allocation3 + $0xa8] sm:$0x11] }
 0x312   :  { %v2015_v28 = vmax.f32 %v22467_v35, %v13339_v50  ;;  %v2018_v14 = vmax.f32 %v22469_v63, %v1833_v25  ;;  %v18433_v31 = vmax.f32 %v22471_v11, %v13345_v43  ;;  %v22472_v50 = vunpack.i.h.bf16 %v17545_v22  ;;  %v18472_v63 = vpop.permute.xlu0 %13347 }
 0x313   :  { %v2247_v1 = vrot.slane %v2014_v23, 1  ;;  %v3159_v20 = vrot.slane %v18435_v21, 6  ;;  %v3277_v45 = vshll.u32 %v18435_v21, 16  ;;  %v3384_v61 = vrot.slane %v18435_v21, 7 }
 0x314   :  { %v2250_v2 = vrot.slane %v2015_v28, 1  ;;  %v2256_v49 = vrot.slane %v2018_v14, 1  ;;  %v2270_v34 = vrot.slane %v18433_v31, 1  ;;  %v1839_v25 = vsel %vm22473_vm11, %v22472_v50, %v13345_v43  ;;  %v2808_v7 = vld [vmem:[#allocation3 + $0x88] sm:$0x11]  ;;  %vm22486_vm11 = vmmov %vm22475_vm6 }
 0x315   :  { %v3692_v56 = vsel %vm17924_vm12, %v12693_v42, %v3691_v17  ;;  %v3758_v39 = vshll.u32 %v12693_v42, 16  ;;  %v11391_v10 = vrot.slane %v12693_v42, 9  ;;  %v2248_v5 = vsel %vm22474_vm8, %v2246_v47, %v2247_v1  ;;  %vm22491_vm8 = vmmov %vm22477_vm13 }
 0x316   :  { %3693 = vst [vmem:[#allocation3 + $0x98] sm:$0x11] %v3692_v56  ;;  %v2251_v22 = vsel %vm22475_vm6, %v2249_v6, %v2250_v2  ;;  %v2809_v43 = vsel %vm18006_vm9, %v11295_v38, %v2808_v7  ;;  %v3220_v60 = vsel %vm18069_vm2, %v3159_v20, %v3219_v26  ;;  %v3445_v46 = vsel %vm18089_vm4, %v3384_v61, %v3444_v36  ;;  %v3017_v37 = vld [vmem:[#allocation3 + $0x88] sm:$0x22]  ;;  %v3697_v56 = vld [vmem:[#allocation3 + $0xb8] sm:$0x11] }
 0x317   :  { %v22476_v18 = vunpack.i.l.bf16 %v17534_v19  ;;  %2810 = vst [vmem:[#allocation3 + $0x88] sm:$0x11] %v2809_v43  ;;  %3221 = vst [vmem:[#allocation3 + $0x88] sm:$0x44] %v3220_v60  ;;  %v3279_v47 = vrot.slane %v3277_v45, 7  ;;  %v11375_v6 = vrot.slane %v3758_v39, 9  ;;  %v3932_v38 = vsel %vm17958_vm3, %v11391_v10, %v3931_v24 }
 0x318   :  { %3446 = vst [vmem:[#allocation3 + $0x88] sm:$0x88] %v3445_v46  ;;  %v2257_v17 = vsel %vm22478_vm7, %v2247_v1, %v2256_v49  ;;  %v3018_v9 = vsel %vm18020_vm15, %v11327_v53, %v3017_v37  ;;  %3933 = vst [vmem:[#allocation3 + $0x98] sm:$0x22] %v3932_v38  ;;  %v2259_v19 = vsel %vm22479_vm10, %v2250_v2, %v2258_v33  ;;  %v22480_v1 = vld [vmem:[#allocation67_spill] sm:$0xff]  ;;  %v11407_v53 = vrot.slane %v3758_v39, 10 }
 0x319   :  { %v1836_v62 = vsel %vm22477_vm13, %v22476_v18, %v13344_v15  ;;  %v2458_v35 = vmax.f32 %v18396_v4, %v2248_v5  ;;  %v2459_v3 = vmax.f32 %v18367_v51, %v2251_v22  ;;  %3019 = vst [vmem:[#allocation3 + $0x88] sm:$0x22] %v3018_v9  ;;  %v2462_v11 = vmax.f32 %v2014_v23, %v2257_v17  ;;  %v22484_v4 = vld [vmem:[#allocation75_spill] sm:$0xff]  ;;  %v2920_v61 = vld [vmem:[#allocation3 + $0xa8] sm:$0x22]  ;;  %vm22493_vm13 = vmmov %vm22491_vm8 }
 0x31a   :  { %v2463_v26 = vmax.f32 %v2015_v28, %v2259_v19  ;;  %v2466_v42 = vmax.f32 %v2018_v14, %v2256_v49  ;;  %v22481_v36 = vmax.f32 %v22480_v1, 0.0  ;;  %v22483_v20 = vmax.f32 %v22482_v57, 0.0  ;;  %v3225_v39 = vld [vmem:[#allocation3 + $0xa8] sm:$0x44]  ;;  %v3450_v43 = vld [vmem:[#allocation3 + $0xa8] sm:$0x88]  ;;  %vm22502_vm7 = vmmov %vm22475_vm6 }
 0x31b   :  { %v12663_v24 = vpack.c.bf16 %v2459_v3, %v2458_v35  ;;  %v22485_v2 = vmax.f32 %v22484_v4, 0.0  ;;  %v13350_v14 = vunpack.i.h.bf16 %v18472_v63  ;;  %v13349_v22 = vunpack.i.l.bf16 %v18472_v63  ;;  %v3937_v3 = vld [vmem:[#allocation3 + $0xb8] sm:$0x22]  ;;  %v18524_v4 = vpop.permute.xlu1 %13352  ;;  %vm22503_vm10 = vmmov %vm22475_vm6 }
 0x31c   :  { %v18476_v50 = vmax.f32 %v22481_v36, %v1836_v62  ;;  %v18480_v33 = vmax.f32 %v22483_v20, %v13344_v15  ;;  %v18486_v7 = vpack.c.bf16 %v2463_v26, %v2462_v11  ;;  %v12695_v23 = vpack.c.bf16 %v2467_v12, %v2466_v42  ;;  %v22487_v1 = vld [vmem:[#allocation87_spill] sm:$0xff] }
 0x31d   :  { %v18484_v51 = vmax.f32 %v22485_v2, %v1839_v25  ;;  %v3835_v49 = vld [vmem:[#allocation3 + $0x98] sm:$0x11]  ;;  %v2664_v10 = vsel %vm17924_vm12, %v12663_v24, %v2663_v30  ;;  %v2734_v15 = vshll.u32 %v12663_v24, 16  ;;  %v11313_v5 = vrot.slane %v12663_v24, 9 }
 0x31e   :  { %v2266_v28 = vrot.slane %v18476_v50, 1  ;;  %v3836_v25 = vsel %vm18006_vm9, %v11375_v6, %v3835_v49  ;;  %2665 = vst [vmem:[#allocation3 + $0xa8] sm:$0x11] %v2664_v10  ;;  %v3161_v12 = vrot.slane %v18486_v7, 6  ;;  %v3386_v60 = vrot.slane %v18486_v7, 7  ;;  %v22489_v57 = vld [vmem:[#allocation43_spill] sm:$0xff] }
 0x31f   :  { %v2267_v46 = vrot.slane %v18484_v51, 1  ;;  %v3354_v18 = vld [vmem:[#allocation3 + $0x88] sm:$0x44]  ;;  %v3515_v62 = vld [vmem:[#allocation3 + $0x88] sm:$0x88]  ;;  %v11297_v37 = vrot.slane %v2734_v15, 9  ;;  %v2921_v38 = vsel %vm17958_vm3, %v11313_v5, %v2920_v61  ;;  %v3698_v6 = vsel %vm17924_vm12, %v12695_v23, %v3697_v56 }
 0x320   :  { %3837 = vst [vmem:[#allocation3 + $0x98] sm:$0x11] %v3836_v25  ;;  %v3285_v17 = vshll.u32 %v18486_v7, 16  ;;  %v3355_v9 = vsel %vm18142_vm0, %v3279_v47, %v3354_v18  ;;  %v3516_v19 = vsel %vm18173_vm5, %v3277_v45, %v3515_v62  ;;  %v4027_v35 = vld [vmem:[#allocation3 + $0x98] sm:$0x22]  ;;  %v11329_v63 = vrot.slane %v2734_v15, 10 }
 0x321   :  { %2922 = vst [vmem:[#allocation3 + $0xa8] sm:$0x22] %v2921_v38  ;;  %v3226_v30 = vsel %vm18069_vm2, %v3161_v12, %v3225_v39  ;;  %3699 = vst [vmem:[#allocation3 + $0xb8] sm:$0x11] %v3698_v6  ;;  %v4028_v11 = vsel %vm18020_vm15, %v11407_v53, %v4027_v35  ;;  %v3451_v21 = vsel %vm18089_vm4, %v3386_v60, %v3450_v43  ;;  %v3768_v47 = vshll.u32 %v12695_v23, 16  ;;  %v22494_v15 = vld [vmem:[#allocation84_spill] sm:$0xff] }
 0x322   :  { %3356 = vst [vmem:[#allocation3 + $0x88] sm:$0x44] %v3355_v9  ;;  %3517 = vst [vmem:[#allocation3 + $0x88] sm:$0x88] %v3516_v19  ;;  %v11393_v26 = vrot.slane %v12695_v23, 9  ;;  %v2268_v45 = vsel %vm22486_vm11, %v2266_v28, %v2267_v46  ;;  %v2269_v42 = vrot.slane %v18480_v33, 1  ;;  %v22490_v20 = vunpack.i.l.bf16 %v22489_v57 }
 0x323   :  { %3227 = vst [vmem:[#allocation3 + $0xa8] sm:$0x44] %v3226_v30  ;;  %4029 = vst [vmem:[#allocation3 + $0x98] sm:$0x22] %v4028_v11  ;;  %v22488_v36 = vmax.f32 %v22487_v1, 0.0  ;;  %v3287_v2 = vrot.slane %v3285_v17, 7  ;;  %v2470_v23 = vmax.f32 %v18476_v50, %v2268_v45  ;;  %v22492_v39 = vunpack.i.h.bf16 %v17632_v41 }
 0x324   :  { %3452 = vst [vmem:[#allocation3 + $0xa8] sm:$0x88] %v3451_v21  ;;  %v1842_v53 = vsel %vm22491_vm8, %v22490_v20, %v13349_v22  ;;  %v11377_v61 = vrot.slane %v3768_v47, 9  ;;  %v3938_v56 = vsel %vm17958_vm3, %v11393_v26, %v3937_v3  ;;  %v11409_v28 = vrot.slane %v3768_v47, 10  ;;  %v18539_v43 = vld [vmem:[#allocation3 + $0xc0] sm:$0xff]  ;;  %v22496_v18 = vld [vmem:[#allocation82_spill] sm:$0xff]  ;;  %vm22505_vm11 = vmmov %vm22491_vm8 }
 0x325   :  { %v18519_v24 = vmax.f32 %v22488_v36, %v13350_v14  ;;  %3939 = vst [vmem:[#allocation3 + $0xb8] sm:$0x22] %v3938_v56  ;;  %v2271_v49 = vsel %vm22475_vm6, %v2269_v42, %v2270_v34  ;;  %v1845_v10 = vsel %vm22493_vm13, %v22492_v39, %v13350_v14  ;;  %v22495_v5 = vmax.f32 %v22494_v15, 0.0  ;;  %v2814_v12 = vld [vmem:[#allocation3 + $0xa8] sm:$0x11]  ;;  %v22500_v26 = vld [vmem:[#allocation92_spill] sm:$0xff]  ;;  %vm22513_vm13 = vmmov %vm22475_vm6 }
 0x326   :  { %v2471_v60 = vmax.f32 %v18480_v33, %v2271_v49  ;;  %v22497_v62 = vmax.f32 %v22496_v18, 0.0  ;;  %v13355_v6 = vunpack.i.h.bf16 %v18524_v4  ;;  %v2815_v41 = vsel %vm18006_vm9, %v11297_v37, %v2814_v12  ;;  %v2669_v9 = vld [vmem:[#allocation3 + $0xc8] sm:$0x11]  ;;  %v2926_v57 = vld [vmem:[#allocation3 + $0xc8] sm:$0x22] }
 0x327   :  { %v2030_v25 = vmax.f32 %v22495_v5, %v1842_v53  ;;  %v2289_v50 = vrot.slane %v18519_v24, 1  ;;  %v22498_v14 = vld [vmem:[#allocation85_spill] sm:$0xff]  ;;  %v13354_v30 = vunpack.i.l.bf16 %v18524_v4  ;;  %2816 = vst [vmem:[#allocation3 + $0xa8] sm:$0x11] %v2815_v41  ;;  %v4367_v42 = vshrl.u32 %v18539_v43, 16 }
 0x328   :  { %v2031_v38 = vmax.f32 %v22497_v62, %v13349_v22  ;;  %v22499_v19 = vmax.f32 %v22498_v14, 0.0  ;;  %v3023_v33 = vld [vmem:[#allocation3 + $0xa8] sm:$0x22]  ;;  %v3841_v11 = vld [vmem:[#allocation3 + $0xb8] sm:$0x11]  ;;  %v12665_v21 = vpack.c.bf16 %v2471_v60, %v2470_v23  ;;  %v22501_v22 = vmax.f32 %v22500_v26, 0.0 }
 0x329   :  { %v2276_v3 = vrot.slane %v2030_v25, 1  ;;  %v3024_v37 = vsel %vm18020_vm15, %v11329_v63, %v3023_v33  ;;  %v3842_v36 = vsel %vm18006_vm9, %v11377_v61, %v3841_v11  ;;  %v3231_v62 = vld [vmem:[#allocation3 + $0xc8] sm:$0x44]  ;;  %v22507_v14 = vld [vmem:[#allocation88_spill] sm:$0xff]  ;;  %v18737_v48 = vld [vmem:[#allocation3 + $0x98] sm:$0x11] }
 0x32a   :  { %v18550_v35 = vmax.f32 %v22499_v19, %v1845_v10  ;;  %v2278_v47 = vrot.slane %v2031_v38, 1  ;;  %v18555_v45 = vmax.f32 %v22501_v22, %v13355_v6  ;;  %v3360_v1 = vld [vmem:[#allocation3 + $0xa8] sm:$0x44]  ;;  %3025 = vst [vmem:[#allocation3 + $0xa8] sm:$0x22] %v3024_v37  ;;  %v2670_v23 = vsel %vm17924_vm12, %v12665_v21, %v2669_v9 }
 0x32b   :  { %v2277_v20 = vsel %vm22502_vm7, %v2267_v46, %v2276_v3  ;;  %v2478_v53 = vmax.f32 %v2030_v25, %v2276_v3  ;;  %v3361_v4 = vsel %vm18142_vm0, %v3287_v2, %v3360_v1  ;;  %v3521_v56 = vld [vmem:[#allocation3 + $0xa8] sm:$0x88]  ;;  %3843 = vst [vmem:[#allocation3 + $0xb8] sm:$0x11] %v3842_v36  ;;  %v2744_v49 = vshll.u32 %v12665_v21, 16  ;;  %v22509_v3 = vld [vmem:[#allocation90_spill] sm:$0xff]  ;;  %vm22514_vm7 = vmmov %vm22475_vm6 }
 0x32c   :  { %v11315_v39 = vrot.slane %v12665_v21, 9  ;;  %3362 = vst [vmem:[#allocation3 + $0xa8] sm:$0x44] %v3361_v4  ;;  %v3522_v63 = vsel %vm18173_vm5, %v3285_v17, %v3521_v56  ;;  %2671 = vst [vmem:[#allocation3 + $0xc8] sm:$0x11] %v2670_v23  ;;  %v2279_v46 = vsel %vm22503_vm10, %v2270_v34, %v2278_v47  ;;  %v2474_v2 = vmax.f32 %v18484_v51, %v2277_v20  ;;  %v18728_v8 = vld [vmem:[#allocation3 + $0x88] sm:$0xff] }
 0x32d   :  { %v2479_v61 = vmax.f32 %v2031_v38, %v2278_v47  ;;  %3523 = vst [vmem:[#allocation3 + $0xa8] sm:$0x88] %v3522_v63  ;;  %v4033_v10 = vld [vmem:[#allocation3 + $0xb8] sm:$0x22]  ;;  %v11299_v15 = vrot.slane %v2744_v49, 9  ;;  %v2286_v7 = vrot.slane %v18550_v35, 1  ;;  %v2475_v12 = vmax.f32 %v18433_v31, %v2279_v46  ;;  %vm22515_vm10 = vmmov %vm22475_vm6 }
 0x32e   :  { %v2927_v5 = vsel %vm17958_vm3, %v11315_v39, %v2926_v57  ;;  %v3703_v25 = vld [vmem:[#allocation3 + $0xd8] sm:$0x11]  ;;  %v4034_v17 = vsel %vm18020_vm15, %v11409_v28, %v4033_v10  ;;  %v2298_v34 = vrot.slane %v18555_v45, 1  ;;  %v22504_v51 = vunpack.i.l.bf16 %v17771_v55  ;;  %v3943_v38 = vld [vmem:[#allocation3 + $0xd8] sm:$0x22] }
 0x32f   :  { %2928 = vst [vmem:[#allocation3 + $0xc8] sm:$0x22] %v2927_v5  ;;  %v12697_v60 = vpack.c.bf16 %v2479_v61, %v2478_v53  ;;  %4035 = vst [vmem:[#allocation3 + $0xb8] sm:$0x22] %v4034_v17  ;;  %v18585_v41 = vpack.c.bf16 %v2475_v12, %v2474_v2  ;;  %v22506_v9 = vunpack.i.h.bf16 %v17802_v0  ;;  %v22508_v19 = vmax.f32 %v22507_v14, 0.0 }
 0x330   :  { %v1848_v18 = vsel %vm22505_vm11, %v22504_v51, %v13354_v30  ;;  %v22510_v33 = vmax.f32 %v22509_v3, 0.0  ;;  %v11331_v21 = vrot.slane %v2744_v49, 10  ;;  %v3456_v47 = vld [vmem:[#allocation3 + $0xc8] sm:$0x88]  ;;  %v2491_v0 = vmax.f32 %v18555_v45, %v2298_v34  ;;  %v18622_v17 = vld [vmem:[#allocation3 + $0xd0] sm:$0x11] }
 0x331   :  { %v1851_v31 = vsel %vm22491_vm8, %v22506_v9, %v13355_v6  ;;  %v2038_v28 = vmax.f32 %v22508_v19, %v1848_v18  ;;  %v3704_v55 = vsel %vm17924_vm12, %v12697_v60, %v3703_v25  ;;  %v3778_v26 = vshll.u32 %v12697_v60, 16  ;;  %v22511_v6 = vld [vmem:[#allocation91_spill] sm:$0xff] }
 0x332   :  { %v2039_v11 = vmax.f32 %v22510_v33, %v13354_v30  ;;  %v11395_v22 = vrot.slane %v12697_v60, 9  ;;  %v3163_v37 = vrot.slane %v18585_v41, 6  ;;  %v3388_v1 = vrot.slane %v18585_v41, 7  ;;  %3705 = vst [vmem:[#allocation3 + $0xd8] sm:$0x11] %v3704_v55 }
 0x333   :  { %v22512_v36 = vmax.f32 %v22511_v6, 0.0  ;;  %v3293_v20 = vshll.u32 %v18585_v41, 16  ;;  %v11379_v30 = vrot.slane %v3778_v26, 9  ;;  %v2287_v4 = vrot.slane %v2038_v28, 1  ;;  %v2820_v56 = vld [vmem:[#allocation3 + $0xc8] sm:$0x11] }
 0x334   :  { %v3944_v53 = vsel %vm17958_vm3, %v11395_v22, %v3943_v38  ;;  %v3232_v23 = vsel %vm18069_vm2, %v3163_v37, %v3231_v62  ;;  %v3457_v49 = vsel %vm18089_vm4, %v3388_v1, %v3456_v47  ;;  %v11411_v39 = vrot.slane %v3778_v26, 10  ;;  %v3709_v60 = vld [vmem:[#allocation3 + $0xf8] sm:$0x11]  ;;  %v2932_v38 = vld [vmem:[#allocation3 + $0xe8] sm:$0x22] }
 0x335   :  { %v2042_v57 = vmax.f32 %v22512_v36, %v1851_v31  ;;  %3945 = vst [vmem:[#allocation3 + $0xd8] sm:$0x22] %v3944_v53  ;;  %v2290_v45 = vrot.slane %v2039_v11, 1  ;;  %v2821_v63 = vsel %vm18006_vm9, %v11299_v15, %v2820_v56  ;;  %3233 = vst [vmem:[#allocation3 + $0xc8] sm:$0x44] %v3232_v23  ;;  %v2288_v46 = vsel %vm22475_vm6, %v2286_v7, %v2287_v4  ;;  %v18620_v15 = vld [vmem:[#allocation3 + $0xe0] sm:$0xff] }
 0x336   :  { %3458 = vst [vmem:[#allocation3 + $0xc8] sm:$0x88] %v3457_v49  ;;  %v18613_v61 = vrot.slane %v4367_v42, 4  ;;  %2822 = vst [vmem:[#allocation3 + $0xc8] sm:$0x11] %v2821_v63  ;;  %v2482_v12 = vmax.f32 %v18550_v35, %v2288_v46  ;;  %v4370_v7 = vshll.u32 %v18539_v43, 16 }
 0x337   :  { %v2296_v2 = vrot.slane %v2042_v57, 1  ;;  %v3029_v10 = vld [vmem:[#allocation3 + $0xc8] sm:$0x22]  ;;  %v2291_v5 = vsel %vm22513_vm13, %v2289_v50, %v2290_v45  ;;  %v2299_v25 = vsel %vm22514_vm7, %v2290_v45, %v2298_v34  ;;  %v18629_v50 = vld [vmem:[#allocation3 + $0xf0] sm:$0x11]  ;;  %v3295_v35 = vrot.slane %v3293_v20, 7 }
 0x338   :  { %v3030_v42 = vsel %vm18020_vm15, %v11331_v21, %v3029_v10  ;;  %v2483_v18 = vmax.f32 %v18519_v24, %v2291_v5  ;;  %v2487_v62 = vmax.f32 %v2039_v11, %v2299_v25  ;;  %v2675_v34 = vld [vmem:[#allocation3 + $0xe8] sm:$0x11]  ;;  %v4372_v14 = vrot.slane %v4370_v7, 5  ;;  %v3237_v47 = vld [vmem:[#allocation3 + $0xe8] sm:$0x44] }
 0x339   :  { %v2297_v51 = vsel %vm22515_vm10, %v2287_v4, %v2296_v2  ;;  %3031 = vst [vmem:[#allocation3 + $0xc8] sm:$0x22] %v3030_v42  ;;  %v2490_v31 = vmax.f32 %v2042_v57, %v2296_v2  ;;  %v3847_v19 = vld [vmem:[#allocation3 + $0xd8] sm:$0x11]  ;;  %v4376_v33 = vshll.u32 %v18622_v17, 16  ;;  %v4395_v21 = vshrl.u32 %v18620_v15, 16 }
 0x33a   :  { %v2486_v9 = vmax.f32 %v2038_v28, %v2297_v51  ;;  %v12667_v3 = vpack.c.bf16 %v2483_v18, %v2482_v12  ;;  %v4398_v24 = vshll.u32 %v18620_v15, 16  ;;  %v3848_v11 = vsel %vm18006_vm9, %v11379_v30, %v3847_v19  ;;  %v13608_v28 = vld [vmem:[%s21584_s3 + $0x720] ss:$16 sps:$4 sm:$0x3f]   ;;  %v3462_v1 = vld [vmem:[#allocation3 + $0xe8] sm:$0x88] }
 0x33b   :  { %v12699_v26 = vpack.c.bf16 %v2491_v0, %v2490_v31  ;;  %v4404_v22 = vshll.u32 %v18629_v50, 16  ;;  %3849 = vst [vmem:[#allocation3 + $0xd8] sm:$0x11] %v3848_v11  ;;  %v4373_v30 = vor.u32 %v4372_v14, %v18613_v61  ;;  %v3949_v56 = vld [vmem:[#allocation3 + $0xf8] sm:$0x22]  ;;  %v4378_v2 = vrot.slane %v4376_v33, 5 }
 0x33c   :  { %v18638_v55 = vpack.c.bf16 %v2487_v62, %v2486_v9  ;;  %v4039_v37 = vld [vmem:[#allocation3 + $0xd8] sm:$0x22]  ;;  %v2676_v6 = vsel %vm17924_vm12, %v12667_v3, %v2675_v34  ;;  %v2754_v36 = vshll.u32 %v12667_v3, 16  ;;  %v11317_v57 = vrot.slane %v12667_v3, 9  ;;  %v3366_v53 = vld [vmem:[#allocation3 + $0xc8] sm:$0x44] }
 0x33d   :  { %v3527_v4 = vld [vmem:[#allocation3 + $0xc8] sm:$0x88]  ;;  %v4040_v0 = vsel %vm18020_vm15, %v11411_v39, %v4039_v37  ;;  %2677 = vst [vmem:[#allocation3 + $0xe8] sm:$0x11] %v2676_v6  ;;  %v3710_v45 = vsel %vm17924_vm12, %v12699_v26, %v3709_v60  ;;  %v3367_v63 = vsel %vm18142_vm0, %v3295_v35, %v3366_v53  ;;  %v18670_v25 = vld [vmem:[#allocation3 + $0x18] sm:$0x11] }
 0x33e   :  { %v3165_v23 = vrot.slane %v18638_v55, 6  ;;  %v3301_v49 = vshll.u32 %v18638_v55, 16  ;;  %v3528_v46 = vsel %vm18173_vm5, %v3293_v20, %v3527_v4  ;;  %4041 = vst [vmem:[#allocation3 + $0xd8] sm:$0x22] %v4040_v0  ;;  %v2933_v39 = vsel %vm17958_vm3, %v11317_v57, %v2932_v38  ;;  %3711 = vst [vmem:[#allocation3 + $0xf8] sm:$0x11] %v3710_v45 }
 0x33f   :  { %v13609_v61 = vld [vmem:[%s21584_s3 + $0x728] ss:$16 sps:$4 sm:$0x3f]   ;;  %3368 = vst [vmem:[#allocation3 + $0xc8] sm:$0x44] %v3367_v63  ;;  %v11301_v41 = vrot.slane %v2754_v36, 9 }
 0x340   :  { %3529 = vst [vmem:[#allocation3 + $0xc8] sm:$0x88] %v3528_v46  ;;  %2934 = vst [vmem:[#allocation3 + $0xe8] sm:$0x22] %v2933_v39  ;;  %v11333_v10 = vrot.slane %v2754_v36, 10  ;;  %v3238_v20 = vsel %vm18069_vm2, %v3165_v23, %v3237_v47  ;;  %v3390_v5 = vrot.slane %v18638_v55, 7 }
 0x341   :  { %v13615_v12 = vld [vmem:[%s21584_s3 + $0xc] ss:$16 sps:$4 sm:$0xff]   ;;  %3239 = vst [vmem:[#allocation3 + $0xe8] sm:$0x44] %v3238_v20  ;;  %v3303_v7 = vrot.slane %v3301_v49, 7  ;;  %v3788_v42 = vshll.u32 %v12699_v26, 16 }
 0x342   :  { %v11397_v60 = vrot.slane %v12699_v26, 9  ;;  %v4397_v51 = vrot.slane %v4395_v21, 4  ;;  %v18677_v18 = vld [vmem:[#allocation3 + $0x8] sm:$0xff]  ;;  %v3463_v44 = vsel %vm18089_vm4, %v3390_v5, %v3462_v1  ;;  %v4374_v62 = vrot.slane %v4373_v30, 4  ;;  %v18684_v9 = vld [vmem:[#allocation3 + $0x38] sm:$0x11] }
 0x343   :  { %v4400_v35 = vrot.slane %v4398_v24, 5  ;;  %vm22516_vm12 = vcmask 1045504   ;;  %v18682_v38 = vld [vmem:[#allocation3 + $0x28] sm:$0xff]  ;;  %3464 = vst [vmem:[#allocation3 + $0xe8] sm:$0x88] %v3463_v44  ;;  %v11381_v31 = vrot.slane %v3788_v42, 9 }
 0x344   :  { %v5189_v34 = vsel %vm22516_vm12, %v13608_v28, 0  ;;  %v3950_v14 = vsel %vm17958_vm3, %v11397_v60, %v3949_v56  ;;  %v18688_v19 = vrot.slane %v3788_v42, 10  ;;  %v4406_v3 = vrot.slane %v4404_v22, 5  ;;  %vm22517_vm2 = vmmov %vm22516_vm12  ;;  %v2826_v11 = vld [vmem:[#allocation3 + $0xe8] sm:$0x11] }
 0x345   :  { %5298 = vmatpush1.bf16.msra.mxu0 %v5189_v34  ;;  %3951 = vst [vmem:[#allocation3 + $0xf8] sm:$0x22] %v3950_v14  ;;  %v4401_v58 = vor.u32 %v4400_v35, %v4397_v51  ;;  %v5195_v33 = vsel %vm22517_vm2, %v13609_v61, 0  ;;  %v4213_v21 = vshrl.u32 %v18677_v18, 16  ;;  %v4216_v24 = vshll.u32 %v18677_v18, 16  ;;  %v18703_v56 = vld [vmem:[#allocation3 + $0x48] sm:$0xff]  ;;  %vm22533_vm4 = vmmov %vm22517_vm2 }
 0x346   :  { %6168 = vmatprep.subr.bf16.mxu0 %v13612_v54  ;;  %5444 = vmatpush1.bf16.msra.mxu1 %v5195_v33  ;;  %v4222_v47 = vshll.u32 %v18670_v25, 16  ;;  %v4241_v40 = vshrl.u32 %v18682_v38, 16  ;;  %v4244_v26 = vshll.u32 %v18682_v38, 16  ;;  %v4250_v22 = vshll.u32 %v18684_v9, 16  ;;  %v3853_v37 = vld [vmem:[#allocation3 + $0xf8] sm:$0x11] }
 0x347   :  { %v2827_v28 = vsel %vm18006_vm9, %v11301_v41, %v2826_v11  ;;  %v4402_v1 = vrot.slane %v4401_v58, 4  ;;  %v4215_v6 = vrot.slane %v4213_v21, 4  ;;  %v4218_v36 = vrot.slane %v4216_v24, 5  ;;  %6314 = vmatprep.subr.bf16.mxu1 %v13615_v12  ;;  %v3035_v57 = vld [vmem:[#allocation3 + $0xe8] sm:$0x22] }
 0x348   :  { %2828 = vst [vmem:[#allocation3 + $0xe8] sm:$0x11] %v2827_v28  ;;  %v3854_v30 = vsel %vm18006_vm9, %v11381_v31, %v3853_v37  ;;  %v4379_v53 = vsel %vm17080_vm1, %v4374_v62, %v4378_v2  ;;  %v4243_v4 = vrot.slane %v4241_v40, 4  ;;  %v4246_v0 = vrot.slane %v4244_v26, 5  ;;  %v3372_v45 = vld [vmem:[#allocation3 + $0xe8] sm:$0x44] }
 0x349   :  { %v3036_v23 = vsel %vm18020_vm15, %v11333_v10, %v3035_v57  ;;  %3855 = vst [vmem:[#allocation3 + $0xf8] sm:$0x11] %v3854_v30  ;;  %v4407_v63 = vsel %vm17080_vm1, %v4402_v1, %v4406_v3  ;;  %v4219_v46 = vor.u32 %v4218_v36, %v4215_v6  ;;  %v4224_v39 = vrot.slane %v4222_v47, 5  ;;  %v18709_v61 = vld [vmem:[#allocation3 + $0x68] sm:$0xff]  ;;  %v18715_v5 = vld [vmem:[#allocation3 + $0x78] sm:$0x11] }
 0x34a   :  { %3037 = vst [vmem:[#allocation3 + $0xe8] sm:$0x22] %v3036_v23  ;;  %v3373_v2 = vsel %vm18142_vm0, %v3303_v7, %v3372_v45  ;;  %v11543_v54 = vcombine.high %v4379_v53, %v4407_v63  ;;  %v11542_v41 = vcombine.low %v4379_v53, %v4407_v63  ;;  %v4247_v20 = vor.u32 %v4246_v0, %v4243_v4  ;;  %v3533_v10 = vld [vmem:[#allocation3 + $0xe8] sm:$0x88]  ;;  %v13610_v40 = vld [vmem:[%s21584_s3] ss:$16 sps:$4 sm:$0xff]   ;;  %vm22534_vm0 = vmmov %vm22517_vm2 }
 0x34b   :  { %3374 = vst [vmem:[#allocation3 + $0xe8] sm:$0x44] %v3373_v2  ;;  %v4220_v12 = vrot.slane %v4219_v46, 4  ;;  %v4252_v42 = vrot.slane %v4250_v22, 5  ;;  %v4269_v60 = vshrl.u32 %v18703_v56, 16  ;;  %v4272_v51 = vshll.u32 %v18703_v56, 16  ;;  %vm22536_vm11 = vmmov %vm22534_vm0 }
 0x34c   :  { %v3534_v44 = vsel %vm18173_vm5, %v3301_v49, %v3533_v10  ;;  %v4045_v27 = vld [vmem:[#allocation3 + $0xf8] sm:$0x22]  ;;  %5262 = vmatprep.mubr.bf16.mxu0 %v11543_v54  ;;  %5408 = vmatprep.mubr.bf16.mxu1 %v11543_v54  ;;  %v4248_v7 = vrot.slane %v4247_v20, 4  ;;  %v4278_v62 = vshll.u32 %v18711_v16, 16  ;;  %v4297_v35 = vshrl.u32 %v18709_v61, 16  ;;  %v18735_v33 = vld [vmem:[#allocation3 + $0xa8] sm:$0xff]  ;;  %vm22535_vm5 = vmmov %vm22534_vm0 }
 0x34d   :  { %3535 = vst [vmem:[#allocation3 + $0xe8] sm:$0x88] %v3534_v44  ;;  %v4046_v34 = vsel %vm18020_vm15, %v18688_v19, %v4045_v27  ;;  %5263 = vmatmul.mubr.bf16.gmra.mrb[60].mxu0 %v11542_v41  ;;  %5409 = vmatmul.mubr.bf16.gmra.mrb[60].mxu1 %v11542_v41  ;;  %vm5175_vm3 = vcmask 621568   ;;  %v4271_v55 = vrot.slane %v4269_v60, 4  ;;  %v4274_v31 = vrot.slane %v4272_v51, 5  ;;  %v18755_v53 = vld [vmem:[#allocation3 + $0xc8] sm:$0xff]  ;;  %vm22543_vm8 = vmmov %vm22534_vm0 }
 0x34e   :  { %4047 = vst [vmem:[#allocation3 + $0xf8] sm:$0x22] %v4046_v34  ;;  %v4225_v49 = vsel %vm17080_vm1, %v4220_v12, %v4224_v39  ;;  %v4253_v14 = vsel %vm17080_vm1, %v4248_v7, %v4252_v42  ;;  %v4299_v3 = vrot.slane %v4297_v35, 4  ;;  %v4300_v58 = vshll.u32 %v18709_v61, 16  ;;  %v13613_v26 = vld [vmem:[%s21584_s3 + $0x8] ss:$16 sps:$4 sm:$0xff]   ;;  %vm22544_vm6 = vmmov %vm22534_vm0 }
 0x34f   :  { %v11533_v19 = vcombine.high %v4225_v49, %v4253_v14  ;;  %v4275_v21 = vor.u32 %v4274_v31, %v4271_v55  ;;  %v4280_v24 = vrot.slane %v4278_v62, 5  ;;  %v4306_v11 = vshll.u32 %v18715_v5, 16  ;;  %v18746_v28 = vld [vmem:[#allocation3 + $0xb8] sm:$0x11]  ;;  %v13618_v23 = vld [vmem:[%s21584_s3 + $0x24] ss:$16 sps:$4 sm:$0xff]   ;;  %vm22545_vm13 = vmmov %vm22534_vm0 }
 0x350   :  { %v11532_v47 = vcombine.low %v4225_v49, %v4253_v14  ;;  %v4302_v22 = vrot.slane %v4300_v58, 5  ;;  %v4325_v37 = vshrl.u32 %v18728_v8, 16  ;;  %v4328_v1 = vshll.u32 %v18728_v8, 16  ;;  %v13621_v39 = vld [vmem:[%s21584_s3 + $0x2c] ss:$16 sps:$4 sm:$0xff]   ;;  %vm22546_vm7 = vmmov %vm22534_vm0 }
 0x351   :  { %11663 = vmatprep.mubr.msk.bf16.mxu0 %vm5175_vm3, %v11533_v19  ;;  %11668 = vmatprep.mubr.msk.bf16.mxu1 %vm5175_vm3, %v11533_v19  ;;  %v4276_v6 = vrot.slane %v4275_v21, 4  ;;  %v4334_v36 = vshll.u32 %v18737_v48, 16  ;;  %v4353_v57 = vshrl.u32 %v18735_v33, 16  ;;  %v4356_v30 = vshll.u32 %v18735_v33, 16  ;;  %v13616_v10 = vld [vmem:[%s21584_s3 + $0x20] ss:$16 sps:$4 sm:$0xff]   ;;  %vm22549_vm10 = vmmov %vm22534_vm0 }
 0x352   :  { %v4303_v4 = vor.u32 %v4302_v22, %v4299_v3  ;;  %v4308_v0 = vrot.slane %v4306_v11, 5  ;;  %v4327_v45 = vrot.slane %v4325_v37, 4  ;;  %v4330_v63 = vrot.slane %v4328_v1, 5  ;;  %v18771_v60 = vld [vmem:[#allocation3 + $0xd8] sm:$0x11]  ;;  %vm22550_vm12 = vmmov %vm22534_vm0 }
 0x353   :  { %v4281_v46 = vsel %vm17080_vm1, %v4276_v6, %v4280_v24  ;;  %v4355_v2 = vrot.slane %v4353_v57, 4  ;;  %v4358_v54 = vrot.slane %v4356_v30, 5  ;;  %v4362_v41 = vshll.u32 %v18746_v28, 16  ;;  %v13619_v27 = vld [vmem:[%s21584_s3 + $0x28] ss:$16 sps:$4 sm:$0xff]   ;;  %vm22551_vm2 = vmmov %vm22534_vm0 }
 0x354   :  { %v4304_v20 = vrot.slane %v4303_v4, 4  ;;  %v4331_v12 = vor.u32 %v4330_v63, %v4327_v45  ;;  %v18769_v42 = vld [vmem:[#allocation3 + $0xe8] sm:$0xff]  ;;  %v4381_v51 = vshrl.u32 %v18755_v53, 16  ;;  %v4384_v44 = vshll.u32 %v18755_v53, 16  ;;  %v13624_v7 = vld [vmem:[%s21584_s3 + $0x44] ss:$16 sps:$4 sm:$0xff]  }
 0x355   :  { %5306 = vmatmul.mubr.bf16.vlgmr.msra.gmra.mrb[48].mxu0 %v11532_v47  ;;  %5452 = vmatmul.mubr.bf16.vlgmr.msra.gmra.mrb[48].mxu1 %v11532_v47  ;;  %v4359_v62 = vor.u32 %v4358_v54, %v4355_v2  ;;  %v4409_v35 = vshrl.u32 %v18769_v42, 16  ;;  %v22518_v34 = vld [vmem:[#allocation47_spill] sm:$0xff]  ;;  %v22519_v31 = vshll.u32 %v17675_v13, 16  ;;  %v4364_v47 = vrot.slane %v4362_v41, 5  ;;  %v18810_v4 = vld [vmem:[#allocation3 + $0xc0] sm:$0xee] }
 0x356   :  { %v7782_v55 = vor.u32 %v17718_v29, %v22518_v34  ;;  %6169 = vmatpush1.bf16.msra.mxu0 %v13610_v40  ;;  %6315 = vmatpush1.bf16.msra.mxu1 %v13613_v26  ;;  %v4309_v14 = vsel %vm17080_vm1, %v4304_v20, %v4308_v0  ;;  %v4332_v3 = vrot.slane %v4331_v12, 4  ;;  %v18790_v58 = vld [vmem:[#allocation3 + $0xf8] sm:$0x11]  ;;  %v4383_v19 = vrot.slane %v4381_v51, 4  ;;  %v13622_v0 = vld [vmem:[%s21584_s3 + $0x40] ss:$16 sps:$4 sm:$0xff]  }
 0x357   :  { %v18786_v49 = vrot.slane %v22519_v31, 6  ;;  %v4386_v21 = vrot.slane %v4384_v44, 5  ;;  %v11537_v24 = vcombine.high %v4281_v46, %v4309_v14  ;;  %6170 = vmatprep.subr.bf16.mxu0 %v13618_v23  ;;  %6316 = vmatprep.subr.bf16.mxu1 %v13621_v39  ;;  %v13627_v11 = vld [vmem:[%s21584_s3 + $0x4c] ss:$16 sps:$4 sm:$0xff]   ;;  %v4360_v13 = vrot.slane %v4359_v62, 4 }
 0x358   :  { %v4390_v40 = vshll.u32 %v18771_v60, 16  ;;  %v4336_v26 = vrot.slane %v4334_v36, 5  ;;  %v4411_v37 = vrot.slane %v4409_v35, 4  ;;  %v4412_v1 = vshll.u32 %v18769_v42, 16  ;;  %v13625_v23 = vld [vmem:[%s21584_s3 + $0x48] ss:$16 sps:$4 sm:$0xff]  }
 0x359   :  { %v4387_v22 = vor.u32 %v4386_v21, %v4383_v19  ;;  %11664 = vmatprep.mubr.msk.bf16.mxu0 %vm5175_vm3, %v11537_v24  ;;  %11669 = vmatprep.mubr.msk.bf16.mxu1 %vm5175_vm3, %v11537_v24  ;;  %v4365_v6 = vsel %vm17080_vm1, %v4360_v13, %v4364_v47  ;;  %v4418_v57 = vshll.u32 %v18790_v58, 16  ;;  %v18804_v30 = vcombine.high %v18539_v43, %v18620_v15  ;;  %v13630_v2 = vld [vmem:[%s21584_s3 + $0x64] ss:$16 sps:$4 sm:$0xff]   ;;  %v13633_v54 = vld [vmem:[%s21584_s3 + $0x6c] ss:$16 sps:$4 sm:$0xff]  }
 0x35a   :  { %v18808_v36 = vcombine.low %v18539_v43, %v18620_v15  ;;  %6171 = vmatpush1.bf16.msra.mxu0 %v13616_v10  ;;  %6317 = vmatpush1.bf16.msra.mxu1 %v13619_v27  ;;  %v11536_v45 = vcombine.low %v4281_v46, %v4309_v14  ;;  %v4337_v63 = vsel %vm17080_vm1, %v4332_v3, %v4336_v26  ;;  %v4414_v39 = vrot.slane %v4412_v1, 5  ;;  %v18840_v27 = vld [vmem:[#allocation3 + $0xe0] sm:$0xee]  ;;  %v18860_v14 = vld [vmem:[#allocation3 + $0x28] sm:$0xee] }
 0x35b   :  { %v7818_v43 = vor.u32 %v18786_v49, %v17763_v52  ;;  %6172 = vmatprep.subr.bf16.mxu0 %v13624_v7  ;;  %6318 = vmatprep.subr.bf16.mxu1 %v13627_v11  ;;  %v11541_v15 = vcombine.high %v4337_v63, %v4365_v6  ;;  %v4388_v41 = vrot.slane %v4387_v22, 4  ;;  %v4392_v46 = vrot.slane %v4390_v40, 5  ;;  %v18842_v7 = vld [vmem:[#allocation3 + $0x8] sm:$0xee]  ;;  %v13628_v62 = vld [vmem:[%s21584_s3 + $0x60] ss:$16 sps:$4 sm:$0xff]  }
 0x35c   :  { %v18830_v20 = vcombine.high %v18677_v18, %v18682_v38  ;;  %v4415_v10 = vor.u32 %v4414_v39, %v4411_v37  ;;  %v4420_v12 = vrot.slane %v4418_v57, 5  ;;  %v18834_v51 = vcombine.low %v18677_v18, %v18682_v38  ;;  %v13631_v3 = vld [vmem:[%s21584_s3 + $0x68] ss:$16 sps:$4 sm:$0xff]   ;;  %v13639_v21 = vld [vmem:[%s21584_s3 + $0x8c] ss:$16 sps:$4 sm:$0xff]  }
 0x35d   :  { %v18838_v44 = vcombine.high %v18703_v56, %v18709_v61  ;;  %5316 = vmatmul.mubr.bf16.gmra.mrb[52].mxu0 %v11536_v45  ;;  %5462 = vmatmul.mubr.bf16.gmra.mrb[52].mxu1 %v11536_v45  ;;  %v18849_v35 = vcombine.low %v18703_v56, %v18709_v61  ;;  %v18853_v18 = vcombine.high %v18728_v8, %v18735_v33  ;;  %v11826_v31 = vrot.slane %v18810_v4, 9  ;;  %v13636_v56 = vld [vmem:[%s21584_s3 + $0x84] ss:$16 sps:$4 sm:$0xff]   ;;  %v18892_v26 = vld [vmem:[#allocation3 + $0x48] sm:$0xee] }
 0x35e   :  { %v18857_v38 = vcombine.low %v18728_v8, %v18735_v33  ;;  %6173 = vmatpush1.bf16.msra.mxu0 %v13622_v0  ;;  %6319 = vmatpush1.bf16.msra.mxu1 %v13625_v23  ;;  %v4416_v61 = vrot.slane %v4415_v10, 4  ;;  %v18870_v19 = vcombine.high %v18755_v53, %v18769_v42  ;;  %v18874_v8 = vcombine.low %v18755_v53, %v18769_v42  ;;  %v18916_v0 = vld [vmem:[#allocation3 + $0x68] sm:$0xee]  ;;  %v13642_v10 = vld [vmem:[%s21584_s3 + $0xa4] ss:$16 sps:$4 sm:$0xff]  }
 0x35f   :  { %v6561_v33 = vrot.slane %v18622_v17, 5  ;;  %11665 = vmatprep.mubr.msk.bf16.mxu0 %vm5175_vm3, %v11541_v15  ;;  %11670 = vmatprep.mubr.msk.bf16.mxu1 %vm5175_vm3, %v11541_v15  ;;  %v11828_v24 = vrot.slane %v18840_v27, 9  ;;  %v6569_v11 = vrot.slane %v18629_v50, 5  ;;  %v11815_v13 = vrot.slane %v18842_v7, 9  ;;  %v13634_v50 = vld [vmem:[%s21584_s3 + $0x80] ss:$16 sps:$4 sm:$0xff]  }
 0x360   :  { %v6517_v47 = vrot.slane %v18670_v25, 5  ;;  %6174 = vmatprep.subr.bf16.mxu0 %v13630_v2  ;;  %6320 = vmatprep.subr.bf16.mxu1 %v13633_v54  ;;  %v11540_v53 = vcombine.low %v4337_v63, %v4365_v6  ;;  %v18888_v17 = vsel %vm17080_vm1, %v4388_v41, %v4392_v46  ;;  %v11817_v42 = vrot.slane %v18860_v14, 9  ;;  %v18918_v23 = vld [vmem:[#allocation3 + $0x88] sm:$0xee]  ;;  %v13640_v46 = vld [vmem:[%s21584_s3 + $0xa0] ss:$16 sps:$4 sm:$0xff]  }
 0x361   :  { %v6525_v40 = vrot.slane %v18684_v9, 5  ;;  %v18899_v25 = vsel %vm17080_vm1, %v4416_v61, %v4420_v12  ;;  %v6562_v22 = vsel %vm17196_vm14, %v11826_v31, %v6561_v33  ;;  %v6570_v37 = vsel %vm17196_vm14, %v11828_v24, %v6569_v11  ;;  %v13637_v9 = vld [vmem:[%s21584_s3 + $0x88] ss:$16 sps:$4 sm:$0xff]   ;;  %v13645_v12 = vld [vmem:[%s21584_s3 + $0xac] ss:$16 sps:$4 sm:$0xff]   ;;  %v22521_v31 = vld [vmem:[#allocation36_spill] sm:$0xff] }
 0x362   :  { %v6518_v1 = vsel %vm17196_vm14, %v11815_v13, %v6517_v47  ;;  %6175 = vmatpush1.bf16.msra.mxu0 %v13628_v62  ;;  %6321 = vmatpush1.bf16.msra.mxu1 %v13631_v3  ;;  %v18910_v6 = vcombine.high %v6562_v22, %v6570_v37  ;;  %v18912_v59 = vcombine.low %v6562_v22, %v6570_v37  ;;  %v11819_v39 = vrot.slane %v18892_v26, 9  ;;  %v18926_v2 = vld [vmem:[#allocation3 + $0xa8] sm:$0xee]  ;;  %v22520_v62 = vld [vmem:[#allocation44_spill] sm:$0xff] }
 0x363   :  { %v6526_v57 = vsel %vm17196_vm14, %v11817_v42, %v6525_v40  ;;  %6176 = vmatprep.subr.bf16.mxu0 %v13636_v56  ;;  %6322 = vmatprep.subr.bf16.mxu1 %v13639_v21  ;;  %v6533_v15 = vrot.slane %v18711_v16, 5  ;;  %v18928_v54 = vld [vmem:[#allocation3 + $0xc8] sm:$0xee]  ;;  %v11545_v41 = vcombine.high %v18888_v17, %v18899_v25  ;;  %vm22522_vm1 = vnez %v22521_v31  ;;  %v22523_v56 = vld [vmem:[#allocation63_spill] sm:$0xff]  ;;  %v13648_v52 = vld [vmem:[%s21584_s3 + $0xc4] ss:$16 sps:$4 sm:$0xff]  }
 0x364   :  { %v18920_v45 = vcombine.low %v6518_v1, %v6526_v57  ;;  %v18922_v63 = vcombine.high %v6518_v1, %v6526_v57  ;;  %v18941_v16 = vld [vmem:[#allocation3 + $0xe8] sm:$0xee]  ;;  %v7783_v3 = vsel %vm22522_vm1, %v22520_v62, %v7782_v55  ;;  %v7819_v61 = vsel %vm22522_vm1, %v22523_v56, %v7818_v43  ;;  %v13660_v62 = vld [vmem:[%s21584_s3 + $0x104] ss:$16 sps:$4 sm:$0xff]   ;;  %v14072_v31 = vld [vmem:[%s21584_s3 + $0xd40] ss:$16 sps:$4 sm:$0xff]  }
 0x365   :  { %5326 = vmatmul.mubr.bf16.gmra.mrb[56].mxu0 %v11540_v53  ;;  %5472 = vmatmul.mubr.bf16.gmra.mrb[56].mxu1 %v11540_v53  ;;  %v13643_v33 = vld [vmem:[%s21584_s3 + $0xa8] ss:$16 sps:$4 sm:$0xff]   ;;  %v6534_v29 = vsel %vm17196_vm14, %v11819_v39, %v6533_v15  ;;  %v11821_v34 = vrot.slane %v18916_v0, 9  ;;  %v6541_v55 = vrot.slane %v18715_v5, 5  ;;  %v11823_v21 = vrot.slane %v18918_v23, 9 }
 0x366   :  { %6177 = vmatpush1.bf16.msra.mxu0 %v13634_v50  ;;  %6323 = vmatpush1.bf16.msra.mxu1 %v13637_v9  ;;  %v6549_v49 = vrot.slane %v18737_v48, 5  ;;  %v11825_v43 = vrot.slane %v18926_v2, 9  ;;  %v6557_v24 = vrot.slane %v18746_v28, 5  ;;  %v11827_v11 = vrot.slane %v18928_v54, 9  ;;  %v13651_v5 = vld [vmem:[%s21584_s3 + $0xcc] ss:$16 sps:$4 sm:$0xff]  }
 0x367   :  { %11666 = vmatprep.mubr.msk.bf16.mxu0 %vm5175_vm3, %v11545_v41  ;;  %11671 = vmatprep.mubr.msk.bf16.mxu1 %vm5175_vm3, %v11545_v41  ;;  %v6542_v13 = vsel %vm17196_vm14, %v11821_v34, %v6541_v55  ;;  %v6565_v47 = vrot.slane %v18771_v60, 5  ;;  %v11829_v48 = vrot.slane %v18941_v16, 9  ;;  %v6573_v53 = vrot.slane %v18790_v58, 5  ;;  %v13646_v58 = vld [vmem:[%s21584_s3 + $0xc0] ss:$16 sps:$4 sm:$0xff]  }
 0x368   :  { %6178 = vmatprep.subr.bf16.mxu0 %v13642_v10  ;;  %6324 = vmatprep.subr.bf16.mxu1 %v13645_v12  ;;  %v18980_v28 = vcombine.high %v6534_v29, %v6542_v13  ;;  %v18982_v42 = vcombine.low %v6534_v29, %v6542_v13  ;;  %v6550_v40 = vsel %vm17196_vm14, %v11823_v21, %v6549_v49  ;;  %v13649_v1 = vld [vmem:[%s21584_s3 + $0xc8] ss:$16 sps:$4 sm:$0xff]   ;;  %v13657_v10 = vld [vmem:[%s21584_s3 + $0xec] ss:$16 sps:$4 sm:$0xff]   ;;  %v7911_v56 = vshrl.u32 %v18810_v4, 16 }
 0x369   :  { %v6558_v50 = vsel %vm17196_vm14, %v11825_v43, %v6557_v24  ;;  %v6566_v22 = vsel %vm17196_vm14, %v11827_v11, %v6565_v47  ;;  %v6574_v60 = vsel %vm17196_vm14, %v11829_v48, %v6573_v53  ;;  %v18992_v37 = vcombine.high %v7783_v3, %v7819_v61  ;;  %v22524_v12 = vld [vmem:[#allocation23_spill] sm:$0xff]  ;;  %v13658_v29 = vld [vmem:[%s21584_s3 + $0x100] ss:$16 sps:$4 sm:$0xff]   ;;  %v13672_v47 = vld [vmem:[%s21584_s3 + $0x144] ss:$16 sps:$4 sm:$0xff]  }
 0x36a   :  { %6179 = vmatpush1.bf16.msra.mxu0 %v13640_v46  ;;  %6325 = vmatpush1.bf16.msra.mxu1 %v13643_v33  ;;  %v19000_v9 = vcombine.high %v6550_v40, %v6558_v50  ;;  %v19002_v57 = vcombine.low %v6550_v40, %v6558_v50  ;;  %v19004_v39 = vcombine.high %v6566_v22, %v6574_v60  ;;  %v13654_v46 = vld [vmem:[%s21584_s3 + $0xe4] ss:$16 sps:$4 sm:$0xff]   ;;  %v13661_v34 = vld [vmem:[%s21584_s3 + $0x108] ss:$16 sps:$4 sm:$0xff]   ;;  %v7913_v55 = vrot.slane %v7911_v56, 5 }
 0x36b   :  { %6180 = vmatprep.subr.bf16.mxu0 %v13648_v52  ;;  %6326 = vmatprep.subr.bf16.mxu1 %v13651_v5  ;;  %v11544_v32 = vcombine.low %v18888_v17, %v18899_v25  ;;  %v19008_v15 = vcombine.low %v6566_v22, %v6574_v60  ;;  %v19010_v41 = vcombine.low %v7783_v3, %v7819_v61  ;;  %v13652_v17 = vld [vmem:[%s21584_s3 + $0xe0] ss:$16 sps:$4 sm:$0xff]   ;;  %v13655_v25 = vld [vmem:[%s21584_s3 + $0xe8] ss:$16 sps:$4 sm:$0xff]   ;;  %v13663_v3 = vld [vmem:[%s21584_s3 + $0x10c] ss:$16 sps:$4 sm:$0xff]  }
 0x36c   :  { %v7914_v61 = vshll.u32 %v18810_v4, 16  ;;  %v19034_v33 = vld [vmem:[#allocation3 + $0xd0] sm:$0x33]  ;;  %v13669_v52 = vld [vmem:[%s21584_s3 + $0x12c] ss:$16 sps:$4 sm:$0xff]   ;;  %v7947_v13 = vshrl.u32 %v18840_v27, 16 }
 0x36d   :  { %5336 = vmatmul.mubr.bf16.gmra.mrb[60].mxu0 %v11544_v32  ;;  %5482 = vmatmul.mubr.bf16.gmra.mrb[60].mxu1 %v11544_v32  ;;  %v13666_v4 = vld [vmem:[%s21584_s3 + $0x124] ss:$16 sps:$4 sm:$0xff]   ;;  %v7920_v43 = vshrl.u32 %v19034_v33, 16  ;;  %v7923_v24 = vshll.u32 %v19034_v33, 16  ;;  %v13664_v11 = vld [vmem:[%s21584_s3 + $0x120] ss:$16 sps:$4 sm:$0xff]  }
 0x36e   :  { %6181 = vmatpush1.bf16.msra.mxu0 %v13646_v58  ;;  %6327 = vmatpush1.bf16.msra.mxu1 %v13649_v1  ;;  %v7916_v21 = vrot.slane %v7914_v61, 6  ;;  %v19048_v49 = vld [vmem:[#allocation3 + $0xf0] sm:$0x33]  ;;  %v13667_v5 = vld [vmem:[%s21584_s3 + $0x128] ss:$16 sps:$4 sm:$0xff]   ;;  %v7950_v53 = vshll.u32 %v18840_v27, 16 }
 0x36f   :  { %6200 = vmatprep.mubr.bf16.mxu0 %v22524_v12  ;;  %6346 = vmatprep.mubr.bf16.mxu1 %v22524_v12  ;;  %v7956_v40 = vshrl.u32 %v19048_v49, 16  ;;  %v7959_v50 = vshll.u32 %v19048_v49, 16  ;;  %v13675_v22 = vld [vmem:[%s21584_s3 + $0x14c] ss:$16 sps:$4 sm:$0xff]   ;;  %v7949_v60 = vrot.slane %v7947_v13, 5  ;;  %v7713_v1 = vshrl.u32 %v18842_v7, 16 }
 0x370   :  { %6182 = vmatprep.subr.bf16.mxu0 %v13654_v46  ;;  %6328 = vmatprep.subr.bf16.mxu1 %v13657_v10  ;;  %v7917_v48 = vor.u32 %v7916_v21, %v7913_v55  ;;  %v19068_v58 = vld [vmem:[#allocation3 + $0x18] sm:$0x33]  ;;  %v13670_v32 = vld [vmem:[%s21584_s3 + $0x140] ss:$16 sps:$4 sm:$0xff]   ;;  %v7922_v46 = vrot.slane %v7920_v43, 5  ;;  %v7925_v10 = vrot.slane %v7923_v24, 6 }
 0x371   :  { %v13673_v27 = vld [vmem:[%s21584_s3 + $0x148] ss:$16 sps:$4 sm:$0xff]   ;;  %v7958_v12 = vrot.slane %v7956_v40, 5  ;;  %v7716_v61 = vshll.u32 %v18842_v7, 16  ;;  %v7752_v43 = vshll.u32 %v18860_v14, 16  ;;  %vm9131_vm14 = vcmask 1041408  }
 0x372   :  { %6183 = vmatpush1.bf16.msra.mxu0 %v13652_v17  ;;  %6329 = vmatpush1.bf16.msra.mxu1 %v13655_v25  ;;  %v13678_v17 = vld [vmem:[%s21584_s3 + $0x164] ss:$16 sps:$4 sm:$0xff]   ;;  %v7952_v25 = vrot.slane %v7950_v53, 6  ;;  %v7918_v56 = vrot.slane %v7917_v48, 4  ;;  %v19086_v21 = vld [vmem:[#allocation3 + $0x38] sm:$0x33] }
 0x373   :  { %6184 = vmatprep.subr.bf16.mxu0 %v13660_v62  ;;  %6330 = vmatprep.subr.bf16.mxu1 %v13663_v3  ;;  %v7961_v62 = vrot.slane %v7959_v50, 6  ;;  %v13681_v3 = vld [vmem:[%s21584_s3 + $0x16c] ss:$16 sps:$4 sm:$0xff]   ;;  %v13676_v24 = vld [vmem:[%s21584_s3 + $0x160] ss:$16 sps:$4 sm:$0xff]   ;;  %v7754_v50 = vrot.slane %v7752_v43, 6 }
 0x374   :  { %v7953_v55 = vor.u32 %v7952_v25, %v7949_v60  ;;  %v7761_v60 = vshll.u32 %v19086_v21, 16  ;;  %v7785_v25 = vshrl.u32 %v18892_v26, 16  ;;  %v7788_v43 = vshll.u32 %v18892_v26, 16  ;;  %v19134_v26 = vld [vmem:[#allocation3 + $0x78] sm:$0x33] }
 0x375   :  { %v7962_v7 = vor.u32 %v7961_v62, %v7958_v12  ;;  %vm9132_vm9 = vcmask 1045508  }
 0x376   :  { %6185 = vmatpush1.bf16.msra.mxu0 %v13658_v29  ;;  %6331 = vmatpush1.bf16.msra.mxu1 %v13661_v34  ;;  %v7722_v29 = vshrl.u32 %v19068_v58, 16  ;;  %v7725_v34 = vshll.u32 %v19068_v58, 16  ;;  %v7954_v13 = vrot.slane %v7953_v55, 4  ;;  %v7763_v55 = vrot.slane %v7761_v60, 6  ;;  %vm19276_vm15 = vmor %vm9131_vm14, %vm9132_vm9 }
 0x377   :  { %6186 = vmatprep.subr.bf16.mxu0 %v13666_v4  ;;  %6332 = vmatprep.subr.bf16.mxu1 %v13669_v52  ;;  %v7715_v4 = vrot.slane %v7713_v1, 5  ;;  %v7749_v52 = vshrl.u32 %v18860_v14, 16  ;;  %v13684_v14 = vld [vmem:[%s21584_s3 + $0x184] ss:$16 sps:$4 sm:$0xff]   ;;  %v13687_v1 = vld [vmem:[%s21584_s3 + $0x18c] ss:$16 sps:$4 sm:$0xff]   ;;  %vm22554_vm14 = vmmov %vm22534_vm0 }
 0x378   :  { %v7724_v48 = vrot.slane %v7722_v29, 5  ;;  %v7727_v53 = vrot.slane %v7725_v34, 6  ;;  %vm22555_vm9 = vmmov %vm22534_vm0 }
 0x379   :  { %v7751_v40 = vrot.slane %v7749_v52, 5 }
 0x37a   :  { %6187 = vmatpush1.bf16.msra.mxu0 %v13664_v11  ;;  %6333 = vmatpush1.bf16.msra.mxu1 %v13667_v5  ;;  %v7926_v11 = vor.u32 %v7925_v10, %v7922_v46  ;;  %v13679_v5 = vld [vmem:[%s21584_s3 + $0x168] ss:$16 sps:$4 sm:$0xff]   ;;  %v7728_v29 = vor.u32 %v7727_v53, %v7724_v48  ;;  %v7824_v48 = vshll.u32 %v18916_v0, 16 }
 0x37b   :  { %6188 = vmatprep.subr.bf16.mxu0 %v13672_v47  ;;  %6334 = vmatprep.subr.bf16.mxu1 %v13675_v22  ;;  %v7718_v47 = vrot.slane %v7716_v61, 6  ;;  %v7758_v22 = vshrl.u32 %v19086_v21, 16  ;;  %v19108_v10 = vld [vmem:[#allocation3 + $0x58] sm:$0x33] }
 0x37d   :  { %v7719_v46 = vor.u32 %v7718_v47, %v7715_v4  ;;  %v7760_v34 = vrot.slane %v7758_v22, 5  ;;  %v13690_v4 = vld [vmem:[%s21584_s3 + $0x1a4] ss:$16 sps:$4 sm:$0xff]  }
 0x37e   :  { %6189 = vmatpush1.bf16.msra.mxu0 %v13670_v32  ;;  %6335 = vmatpush1.bf16.msra.mxu1 %v13673_v27  ;;  %v7927_v32 = vsel %vm22522_vm1, %v7918_v56, %v7926_v11  ;;  %v7963_v27 = vsel %vm22522_vm1, %v7954_v13, %v7962_v7  ;;  %v13685_v56 = vld [vmem:[%s21584_s3 + $0x188] ss:$16 sps:$4 sm:$0xff]   ;;  %v7794_v11 = vshrl.u32 %v19108_v10, 16  ;;  %v7797_v7 = vshll.u32 %v19108_v10, 16  ;;  %v13693_v13 = vld [vmem:[%s21584_s3 + $0x1ac] ss:$16 sps:$4 sm:$0xff]  }
 0x37f   :  { %6190 = vmatprep.subr.bf16.mxu0 %v13678_v17  ;;  %6336 = vmatprep.subr.bf16.mxu1 %v13681_v3  ;;  %v13682_v17 = vld [vmem:[%s21584_s3 + $0x180] ss:$16 sps:$4 sm:$0xff]   ;;  %v19114_v12 = vcombine.high %v7927_v32, %v7963_v27  ;;  %v19116_v62 = vcombine.low %v7927_v32, %v7963_v27  ;;  %v7755_v3 = vor.u32 %v7754_v50, %v7751_v40  ;;  %v7720_v61 = vrot.slane %v7719_v46, 4 }
 0x380   :  { %v7764_v47 = vor.u32 %v7763_v55, %v7760_v34  ;;  %v7790_v50 = vrot.slane %v7788_v43, 6  ;;  %v7796_v22 = vrot.slane %v7794_v11, 5  ;;  %v7799_v60 = vrot.slane %v7797_v7, 6  ;;  %v13694_v34 = vld [vmem:[%s21584_s3 + $0x1c0] ss:$16 sps:$4 sm:$0xff]  }
 0x381   :  { %v7756_v52 = vrot.slane %v7755_v3, 4  ;;  %v7729_v53 = vsel %vm22522_vm1, %v7720_v61, %v7728_v29  ;;  %v7826_v46 = vrot.slane %v7824_v48, 6  ;;  %v13696_v3 = vld [vmem:[%s21584_s3 + $0x1c4] ss:$16 sps:$4 sm:$0xff]   ;;  %v7830_v61 = vshrl.u32 %v19134_v26, 16 }
 0x382   :  { %6191 = vmatpush1.bf16.msra.mxu0 %v13676_v24  ;;  %6337 = vmatpush1.bf16.msra.mxu1 %v13679_v5  ;;  %v7787_v24 = vrot.slane %v7785_v25, 5  ;;  %v7821_v5 = vshrl.u32 %v18916_v0, 16  ;;  %v13691_v0 = vld [vmem:[%s21584_s3 + $0x1a8] ss:$16 sps:$4 sm:$0xff]   ;;  %v7833_v29 = vshll.u32 %v19134_v26, 16  ;;  %v7800_v55 = vor.u32 %v7799_v60, %v7796_v22 }
 0x383   :  { %6192 = vmatprep.subr.bf16.mxu0 %v13684_v14  ;;  %6338 = vmatprep.subr.bf16.mxu1 %v13687_v1  ;;  %v13688_v14 = vld [vmem:[%s21584_s3 + $0x1a0] ss:$16 sps:$4 sm:$0xff]   ;;  %v7765_v40 = vsel %vm22522_vm1, %v7756_v52, %v7764_v47  ;;  %v19148_v25 = vld [vmem:[#allocation3 + $0x98] sm:$0x33]  ;;  %v7857_v52 = vshrl.u32 %v18918_v23, 16  ;;  %v7860_v43 = vshll.u32 %v18918_v23, 16 }
 0x384   :  { %v19144_v1 = vcombine.low %v7729_v53, %v7765_v40  ;;  %v19146_v32 = vcombine.high %v7729_v53, %v7765_v40  ;;  %v7823_v27 = vrot.slane %v7821_v5, 5  ;;  %v7832_v7 = vrot.slane %v7830_v61, 5  ;;  %v19163_v47 = vld [vmem:[#allocation3 + $0xb8] sm:$0x33]  ;;  %v13702_v23 = vld [vmem:[%s21584_s3 + $0x1e4] ss:$16 sps:$4 sm:$0xff]  }
 0x385   :  { %v13697_v5 = vld [vmem:[%s21584_s3 + $0x1c8] ss:$16 sps:$4 sm:$0xff]   ;;  %v7859_v53 = vrot.slane %v7857_v52, 5  ;;  %v7869_v40 = vshll.u32 %v19148_v25, 16  ;;  %v7862_v60 = vrot.slane %v7860_v43, 6 }
 0x386   :  { %6193 = vmatpush1.bf16.msra.mxu0 %v13682_v17  ;;  %6339 = vmatpush1.bf16.msra.mxu1 %v13685_v56  ;;  %v13699_v17 = vld [vmem:[%s21584_s3 + $0x1cc] ss:$16 sps:$4 sm:$0xff]   ;;  %v7791_v56 = vor.u32 %v7790_v50, %v7787_v24  ;;  %v7866_v24 = vshrl.u32 %v19148_v25, 16 }
 0x387   :  { %6194 = vmatprep.subr.bf16.mxu0 %v13690_v4  ;;  %6340 = vmatprep.subr.bf16.mxu1 %v13693_v13  ;;  %v7827_v4 = vor.u32 %v7826_v46, %v7823_v27  ;;  %v7835_v13 = vrot.slane %v7833_v29, 6  ;;  %v13705_v50 = vld [vmem:[%s21584_s3 + $0x1ec] ss:$16 sps:$4 sm:$0xff]   ;;  %v7896_v27 = vshll.u32 %v18926_v2, 16  ;;  %v7902_v46 = vshrl.u32 %v19163_v47, 16 }
 0x388   :  { %v7792_v11 = vrot.slane %v7791_v56, 4  ;;  %v7863_v56 = vor.u32 %v7862_v60, %v7859_v53  ;;  %v7868_v61 = vrot.slane %v7866_v24, 5  ;;  %v19186_v29 = vld [vmem:[#allocation3 + $0xd8] sm:$0x33]  ;;  %v7871_v43 = vrot.slane %v7869_v40, 6 }
 0x389   :  { %v7828_v48 = vrot.slane %v7827_v4, 4  ;;  %v7836_v22 = vor.u32 %v7835_v13, %v7832_v7  ;;  %v7898_v7 = vrot.slane %v7896_v27, 6  ;;  %v7904_v13 = vrot.slane %v7902_v46, 5  ;;  %v13706_v60 = vld [vmem:[%s21584_s3 + $0x200] ss:$16 sps:$4 sm:$0xff]  }
 0x38a   :  { %6195 = vmatpush1.bf16.msra.mxu0 %v13688_v14  ;;  %6341 = vmatpush1.bf16.msra.mxu1 %v13691_v0  ;;  %v7801_v14 = vsel %vm22522_vm1, %v7792_v11, %v7800_v55  ;;  %v7893_v0 = vshrl.u32 %v18926_v2, 16  ;;  %v13703_v55 = vld [vmem:[%s21584_s3 + $0x1e8] ss:$16 sps:$4 sm:$0xff]   ;;  %v13708_v2 = vld [vmem:[%s21584_s3 + $0x204] ss:$16 sps:$4 sm:$0xff]   ;;  %v7905_v24 = vshll.u32 %v19163_v47, 16 }
 0x38b   :  { %6196 = vmatprep.subr.bf16.mxu0 %v13696_v3  ;;  %6342 = vmatprep.subr.bf16.mxu1 %v13699_v17  ;;  %v13700_v3 = vld [vmem:[%s21584_s3 + $0x1e0] ss:$16 sps:$4 sm:$0xff]   ;;  %v7837_v17 = vsel %vm22522_vm1, %v7828_v48, %v7836_v22  ;;  %v7929_v48 = vshrl.u32 %v18928_v54, 16  ;;  %v7932_v53 = vshll.u32 %v18928_v54, 16  ;;  %v13709_v54 = vld [vmem:[%s21584_s3 + $0x208] ss:$16 sps:$4 sm:$0xff]  }
 0x38c   :  { %v19194_v4 = vcombine.high %v7801_v14, %v7837_v17  ;;  %v19196_v52 = vcombine.low %v7801_v14, %v7837_v17  ;;  %v7895_v11 = vrot.slane %v7893_v0, 5  ;;  %v7938_v14 = vshrl.u32 %v19186_v29, 16  ;;  %v13714_v17 = vld [vmem:[%s21584_s3 + $0x224] ss:$16 sps:$4 sm:$0xff]  }
 0x38d   :  { %v7907_v40 = vrot.slane %v7905_v24, 6  ;;  %v7872_v0 = vor.u32 %v7871_v43, %v7868_v61  ;;  %v7931_v27 = vrot.slane %v7929_v48, 5  ;;  %v7934_v46 = vrot.slane %v7932_v53, 6  ;;  %v19221_v43 = vld [vmem:[#allocation3 + $0xf8] sm:$0x33]  ;;  %v22526_v53 = vld [vmem:[#allocation28_spill] sm:$0xff] }
 0x38e   :  { %6197 = vmatpush1.bf16.msra.mxu0 %v13694_v34  ;;  %6343 = vmatpush1.bf16.msra.mxu1 %v13697_v5  ;;  %v13711_v34 = vld [vmem:[%s21584_s3 + $0x20c] ss:$16 sps:$4 sm:$0xff]   ;;  %v7864_v5 = vrot.slane %v7863_v56, 4  ;;  %v7899_v22 = vor.u32 %v7898_v7, %v7895_v11  ;;  %v7968_v11 = vshll.u32 %v18941_v16, 16 }
 0x38f   :  { %6198 = vmatprep.subr.bf16.mxu0 %v13702_v23  ;;  %6344 = vmatprep.subr.bf16.mxu1 %v13705_v50  ;;  %v7941_v23 = vshll.u32 %v19186_v29, 16  ;;  %v7965_v50 = vshrl.u32 %v18941_v16, 16  ;;  %v22525_v7 = vld [vmem:[#allocation25_spill] sm:$0xff] }
 0x390   :  { %v7900_v56 = vrot.slane %v7899_v22, 4  ;;  %v7873_v61 = vsel %vm22522_vm1, %v7864_v5, %v7872_v0  ;;  %v13712_v5 = vld [vmem:[%s21584_s3 + $0x220] ss:$16 sps:$4 sm:$0xff]   ;;  %v13715_v16 = vld [vmem:[%s21584_s3 + $0x228] ss:$16 sps:$4 sm:$0xff]   ;;  %v7977_v0 = vshll.u32 %v19221_v43, 16 }
 0x391   :  { %v7943_v24 = vrot.slane %v7941_v23, 6  ;;  %v7967_v48 = vrot.slane %v7965_v50, 5  ;;  %v7970_v50 = vrot.slane %v7968_v11, 6 }
 0x392   :  { %6199 = vmatpush1.bf16.msra.mxu0 %v13700_v3  ;;  %6345 = vmatpush1.bf16.msra.mxu1 %v13703_v55  ;;  %v7908_v3 = vor.u32 %v7907_v40, %v7904_v13  ;;  %v13717_v55 = vld [vmem:[%s21584_s3 + $0x22c] ss:$16 sps:$4 sm:$0xff]   ;;  %v7940_v13 = vrot.slane %v7938_v14, 5  ;;  %v13720_v14 = vld [vmem:[%s21584_s3 + $0x244] ss:$16 sps:$4 sm:$0xff]  }
 0x393   :  { %6241 = vmatprep.subr.bf16.mxu0 %v13708_v2  ;;  %6387 = vmatprep.subr.bf16.mxu1 %v13711_v34  ;;  %v7935_v2 = vor.u32 %v7934_v46, %v7931_v27  ;;  %v13723_v27 = vld [vmem:[%s21584_s3 + $0x24c] ss:$16 sps:$4 sm:$0xff]   ;;  %v7684_v46 = vld [vmem:[#allocation3 + $0x90] sm:$0x33] }
 0x394   :  { %v7909_v34 = vsel %vm22522_vm1, %v7900_v56, %v7908_v3  ;;  %v9091_v56 = vld [vmem:[#allocation3 + $0x80] sm:$0xcc]  ;;  %v7686_v3 = vld [vmem:[#allocation3 + $0xb0] sm:$0x33] }
 0x395   :  { %6201 = vmatmul.mubr.bf16.vlgmr.msra.gmra.mrb[48].mxu0 %v22525_v7  ;;  %6347 = vmatmul.mubr.bf16.vlgmr.msra.gmra.mrb[48].mxu1 %v22525_v7  ;;  %v19235_v22 = vcombine.high %v7873_v61, %v7909_v34  ;;  %v19237_v40 = vcombine.low %v7873_v61, %v7909_v34  ;;  %v7936_v23 = vrot.slane %v7935_v2, 4  ;;  %v7971_v61 = vor.u32 %v7970_v50, %v7967_v48  ;;  %v13718_v2 = vld [vmem:[%s21584_s3 + $0x240] ss:$16 sps:$4 sm:$0xff]  }
 0x396   :  { %6210 = vmatprep.mubr.bf16.mxu0 %v22526_v53  ;;  %6242 = vmatpush1.bf16.msra.mxu0 %v13706_v60  ;;  %v7974_v60 = vshrl.u32 %v19221_v43, 16  ;;  %v7979_v34 = vrot.slane %v7977_v0, 6  ;;  %v12354_v48 = vrot.slane %v9091_v56, 10  ;;  %v9176_v50 = vrot.slane %v7686_v3, 6  ;;  %v13727_v3 = vld [vmem:[%s21584_s3 + $0x268] ss:$16 sps:$4 sm:$0xff]  }
 0x397   :  { %22527 = vst [vmem:[#allocation66_spill] sm:$0xff] %v19237_v40  ;;  %6356 = vmatprep.mubr.bf16.mxu1 %v22526_v53  ;;  %6388 = vmatpush1.bf16.msra.mxu1 %v13709_v54  ;;  %v7944_v54 = vor.u32 %v7943_v24, %v7940_v13  ;;  %v9093_v53 = vld [vmem:[#allocation3 + $0xa0] sm:$0xcc]  ;;  %v7972_v13 = vrot.slane %v7971_v61, 4  ;;  %v22529_v40 = vld [vmem:[#allocation49_spill] sm:$0xff] }
 0x398   :  { %6243 = vmatprep.subr.bf16.mxu0 %v13714_v17  ;;  %6389 = vmatprep.subr.bf16.mxu1 %v13717_v55  ;;  %v7976_v7 = vrot.slane %v7974_v60, 5  ;;  %v13721_v17 = vld [vmem:[%s21584_s3 + $0x248] ss:$16 sps:$4 sm:$0xff]   ;;  %v13726_v55 = vld [vmem:[%s21584_s3 + $0x264] ss:$16 sps:$4 sm:$0xff]  }
 0x399   :  { %v7945_v11 = vsel %vm22522_vm1, %v7936_v23, %v7944_v54  ;;  %v22528_v60 = vld [vmem:[#allocation31_spill] sm:$0xff]  ;;  %v13724_v23 = vld [vmem:[%s21584_s3 + $0x260] ss:$16 sps:$4 sm:$0xff]   ;;  %v13732_v54 = vld [vmem:[%s21584_s3 + $0x284] ss:$16 sps:$4 sm:$0xff]  }
 0x39a   :  { %6244 = vmatpush1.bf16.msra.mxu0 %v13712_v5  ;;  %v7980_v24 = vor.u32 %v7979_v34, %v7976_v7  ;;  %v13729_v5 = vld [vmem:[%s21584_s3 + $0x26c] ss:$16 sps:$4 sm:$0xff]  }
 0x39b   :  { %6390 = vmatpush1.bf16.msra.mxu1 %v13715_v16  ;;  %6245 = vmatprep.subr.bf16.mxu0 %v13720_v14  ;;  %v9168_v16 = vrot.slane %v7684_v46, 6  ;;  %v12356_v14 = vrot.slane %v9093_v53, 10  ;;  %v14234_v46 = vld [vmem:[%s21584_s3 + $0x10a0] ss:$16 sps:$4 sm:$0xff]  }
 0x39c   :  { %6391 = vmatprep.subr.bf16.mxu1 %v13723_v27  ;;  %v7981_v0 = vsel %vm22522_vm1, %v7972_v13, %v7980_v24  ;;  %v13741_v13 = vld [vmem:[%s21584_s3 + $0x2ac] ss:$16 sps:$4 sm:$0xff]  }
 0x39d   :  { %6211 = vmatmul.mubr.bf16.gmra.mrb[52].mxu0 %v22528_v60  ;;  %6357 = vmatmul.mubr.bf16.gmra.mrb[52].mxu1 %v22528_v60  ;;  %v19270_v27 = vcombine.high %v7945_v11, %v7981_v0  ;;  %v19272_v56 = vcombine.low %v7945_v11, %v7981_v0  ;;  %v9169_v61 = vsel %vm19276_vm15, %v12354_v48, %v9168_v16  ;;  %v13738_v11 = vld [vmem:[%s21584_s3 + $0x2a4] ss:$16 sps:$4 sm:$0xff]   ;;  %v22532_v24 = vld [vmem:[#allocation53_spill] sm:$0xff]  ;;  %v13736_v48 = vld [vmem:[%s21584_s3 + $0x2a0] ss:$16 sps:$4 sm:$0xff]   ;;  %v9192_v0 = vrot.slane %v19048_v49, 6 }
 0x39e   :  { %6220 = vmatprep.mubr.bf16.mxu0 %v22529_v40  ;;  %6246 = vmatpush1.bf16.msra.mxu0 %v13718_v2  ;;  %v9177_v7 = vsel %vm19276_vm15, %v12356_v14, %v9176_v50  ;;  %v13730_v2 = vld [vmem:[%s21584_s3 + $0x280] ss:$16 sps:$4 sm:$0xff]   ;;  %v9184_v14 = vrot.slane %v19034_v33, 6  ;;  %v13744_v50 = vld [vmem:[%s21584_s3 + $0x2c4] ss:$16 sps:$4 sm:$0xff]  }
 0x39f   :  { %6366 = vmatprep.mubr.bf16.mxu1 %v22529_v40  ;;  %6392 = vmatpush1.bf16.msra.mxu1 %v13721_v17  ;;  %v13735_v40 = vld [vmem:[%s21584_s3 + $0x28c] ss:$16 sps:$4 sm:$0xff]   ;;  %v19294_v34 = vcombine.high %v9169_v61, %v9177_v7  ;;  %v19296_v53 = vcombine.low %v9169_v61, %v9177_v7  ;;  %v13733_v17 = vld [vmem:[%s21584_s3 + $0x288] ss:$16 sps:$4 sm:$0xff]   ;;  %v9097_v60 = vld [vmem:[#allocation3 + $0xe0] sm:$0xcc] }
 0x3a0   :  { %6247 = vmatprep.subr.bf16.mxu0 %v13726_v55  ;;  %6393 = vmatprep.subr.bf16.mxu1 %v13729_v5  ;;  %v9095_v55 = vld [vmem:[#allocation3 + $0xc0] sm:$0xcc]  ;;  %v13739_v5 = vld [vmem:[%s21584_s3 + $0x2a8] ss:$16 sps:$4 sm:$0xff]  }
 0x3a1   :  { %v12358_v16 = vrot.slane %v9095_v55, 10  ;;  %v13745_v49 = vld [vmem:[%s21584_s3 + $0x2c8] ss:$16 sps:$4 sm:$0xff]  }
 0x3a2   :  { %6248 = vmatpush1.bf16.msra.mxu0 %v13724_v23  ;;  %v13747_v23 = vld [vmem:[%s21584_s3 + $0x2cc] ss:$16 sps:$4 sm:$0xff]  }
 0x3a3   :  { %6394 = vmatpush1.bf16.msra.mxu1 %v13727_v3  ;;  %6249 = vmatprep.subr.bf16.mxu0 %v13732_v54  ;;  %v12360_v3 = vrot.slane %v9097_v60, 10  ;;  %v9185_v33 = vsel %vm19276_vm15, %v12358_v16, %v9184_v14  ;;  %v13759_v16 = vld [vmem:[%s21584_s3 + $0x30c] ss:$16 sps:$4 sm:$0xff]  }
 0x3a4   :  { %6395 = vmatprep.subr.bf16.mxu1 %v13735_v40  ;;  %v9084_v40 = vld [vmem:[#allocation3 + $0x8] sm:$0xcc] }
 0x3a5   :  { %6221 = vmatmul.mubr.bf16.gmra.mrb[56].mxu0 %v22532_v24  ;;  %6367 = vmatmul.mubr.bf16.gmra.mrb[56].mxu1 %v22532_v24  ;;  %v9193_v54 = vsel %vm19276_vm15, %v12360_v3, %v9192_v0  ;;  %v12347_v55 = vrot.slane %v9084_v40, 10  ;;  %v9086_v24 = vld [vmem:[#allocation3 + $0x28] sm:$0xcc]  ;;  %v9156_v3 = vrot.slane %v19108_v10, 6  ;;  %v13760_v10 = vld [vmem:[%s21584_s3 + $0x320] ss:$16 sps:$4 sm:$0xff]  }
 0x3a6   :  { %6230 = vmatprep.mubr.bf16.mxu0 %v18804_v30  ;;  %6250 = vmatpush1.bf16.msra.mxu0 %v13730_v2  ;;  %v19338_v61 = vcombine.high %v9185_v33, %v9193_v54  ;;  %v19340_v7 = vcombine.low %v9185_v33, %v9193_v54  ;;  %v13750_v2 = vld [vmem:[%s21584_s3 + $0x2e4] ss:$16 sps:$4 sm:$0xff]   ;;  %v9090_v33 = vld [vmem:[#allocation3 + $0x68] sm:$0xcc] }
 0x3a7   :  { %6376 = vmatprep.mubr.bf16.mxu1 %v18804_v30  ;;  %6396 = vmatpush1.bf16.msra.mxu1 %v13733_v17  ;;  %v13742_v30 = vld [vmem:[%s21584_s3 + $0x2c0] ss:$16 sps:$4 sm:$0xff]   ;;  %v13753_v17 = vld [vmem:[%s21584_s3 + $0x2ec] ss:$16 sps:$4 sm:$0xff]  }
 0x3a8   :  { %6251 = vmatprep.subr.bf16.mxu0 %v13738_v11  ;;  %6397 = vmatprep.subr.bf16.mxu1 %v13741_v13  ;;  %v9140_v11 = vrot.slane %v19068_v58, 6  ;;  %v13748_v13 = vld [vmem:[%s21584_s3 + $0x2e0] ss:$16 sps:$4 sm:$0xff]   ;;  %v13756_v58 = vld [vmem:[%s21584_s3 + $0x304] ss:$16 sps:$4 sm:$0xff]  }
 0x3a9   :  { %v13765_v40 = vld [vmem:[%s21584_s3 + $0x32c] ss:$16 sps:$4 sm:$0xff]  }
 0x3aa   :  { %6252 = vmatpush1.bf16.msra.mxu0 %v13736_v48  ;;  %v9148_v48 = vrot.slane %v19086_v21, 6  ;;  %v13754_v21 = vld [vmem:[%s21584_s3 + $0x300] ss:$16 sps:$4 sm:$0xff]  }
 0x3ab   :  { %6398 = vmatpush1.bf16.msra.mxu1 %v13739_v5  ;;  %6253 = vmatprep.subr.bf16.mxu0 %v13744_v50  ;;  %v12349_v5 = vrot.slane %v9086_v24, 10  ;;  %v13757_v50 = vld [vmem:[%s21584_s3 + $0x308] ss:$16 sps:$4 sm:$0xff]  }
 0x3ac   :  { %6399 = vmatprep.subr.bf16.mxu1 %v13747_v23  ;;  %v9088_v23 = vld [vmem:[#allocation3 + $0x48] sm:$0xcc] }
 0x3ad   :  { %6231 = vmatmul.mubr.bf16.gmra.mrb[60].mxu0 %v18808_v36  ;;  %6377 = vmatmul.mubr.bf16.gmra.mrb[60].mxu1 %v18808_v36  ;;  %v13751_v36 = vld [vmem:[%s21584_s3 + $0x2e8] ss:$16 sps:$4 sm:$0xff]   ;;  %v9149_v14 = vsel %vm19276_vm15, %v12349_v5, %v9148_v48  ;;  %v12351_v54 = vrot.slane %v9088_v23, 10  ;;  %v9172_v5 = vrot.slane %v19148_v25, 6  ;;  %v13777_v25 = vld [vmem:[%s21584_s3 + $0x36c] ss:$16 sps:$4 sm:$0xff]  }
 0x3ae   :  { %6254 = vmatpush1.bf16.msra.mxu0 %v13742_v30  ;;  %11805 = vmatprep.mubr.msk.bf16.mxu0 %vm5175_vm3, %v18830_v20  ;;  %v13762_v30 = vld [vmem:[%s21584_s3 + $0x324] ss:$16 sps:$4 sm:$0xff]   ;;  %v9092_v48 = vld [vmem:[#allocation3 + $0x88] sm:$0xcc] }
 0x3af   :  { %6400 = vmatpush1.bf16.msra.mxu1 %v13745_v49  ;;  %11810 = vmatprep.mubr.msk.bf16.mxu1 %vm5175_vm3, %v18830_v20  ;;  %v9141_v20 = vsel %vm19276_vm15, %v12347_v55, %v9140_v11  ;;  %v9164_v49 = vrot.slane %v19134_v26, 6  ;;  %v13763_v26 = vld [vmem:[%s21584_s3 + $0x328] ss:$16 sps:$4 sm:$0xff]   ;;  %v13768_v11 = vld [vmem:[%s21584_s3 + $0x344] ss:$16 sps:$4 sm:$0xff]  }
 0x3b0   :  { %6255 = vmatprep.subr.bf16.mxu0 %v13750_v2  ;;  %6401 = vmatprep.subr.bf16.mxu1 %v13753_v17  ;;  %v19378_v60 = vcombine.low %v9141_v20, %v9149_v14  ;;  %v19380_v0 = vcombine.high %v9141_v20, %v9149_v14  ;;  %v12353_v2 = vrot.slane %v9090_v33, 10  ;;  %v9157_v17 = vsel %vm19276_vm15, %v12351_v54, %v9156_v3  ;;  %v13769_v14 = vld [vmem:[%s21584_s3 + $0x348] ss:$16 sps:$4 sm:$0xff]   ;;  %v13778_v3 = vld [vmem:[%s21584_s3 + $0x384] ss:$16 sps:$4 sm:$0x3f]  }
 0x3b1   :  { %v9180_v20 = vrot.slane %v19163_v47, 6  ;;  %v13772_v47 = vld [vmem:[%s21584_s3 + $0x360] ss:$16 sps:$4 sm:$0xff]  }
 0x3b2   :  { %6256 = vmatpush1.bf16.msra.mxu0 %v13748_v13  ;;  %v9165_v55 = vsel %vm19276_vm15, %v12353_v2, %v9164_v49  ;;  %v13782_v54 = vld [vmem:[%s21584_s3 + $0x380] ss:$16 sps:$4 sm:$0x3f]   ;;  %v9096_v2 = vld [vmem:[#allocation3 + $0xc8] sm:$0xcc] }
 0x3b3   :  { %6402 = vmatpush1.bf16.msra.mxu1 %v13751_v36  ;;  %6257 = vmatprep.subr.bf16.mxu0 %v13756_v58  ;;  %v19403_v13 = vcombine.high %v9157_v17, %v9165_v55  ;;  %v19405_v24 = vcombine.low %v9157_v17, %v9165_v55  ;;  %v13771_v36 = vld [vmem:[%s21584_s3 + $0x34c] ss:$16 sps:$4 sm:$0xff]   ;;  %v12355_v58 = vrot.slane %v9092_v48, 10  ;;  %v9188_v17 = vrot.slane %v19186_v29, 6 }
 0x3b4   :  { %6403 = vmatprep.subr.bf16.mxu1 %v13759_v16  ;;  %v13766_v16 = vld [vmem:[%s21584_s3 + $0x340] ss:$16 sps:$4 sm:$0xff]   ;;  %v9098_v55 = vld [vmem:[#allocation3 + $0xe8] sm:$0xcc] }
 0x3b5   :  { %v13780_v48 = vld [vmem:[%s21584_s3 + $0x38c] ss:$16 sps:$4 sm:$0x3f]  }
 0x3b6   :  { %6258 = vmatpush1.bf16.msra.mxu0 %v13754_v21  ;;  %v9094_v21 = vld [vmem:[#allocation3 + $0xa8] sm:$0xcc] }
 0x3b7   :  { %6404 = vmatpush1.bf16.msra.mxu1 %v13757_v50  ;;  %6259 = vmatprep.subr.bf16.mxu0 %v13762_v30  ;;  %v13774_v50 = vld [vmem:[%s21584_s3 + $0x364] ss:$16 sps:$4 sm:$0xff]   ;;  %v12357_v23 = vrot.slane %v9094_v21, 10  ;;  %v9173_v30 = vsel %vm19276_vm15, %v12355_v58, %v9172_v5  ;;  %v12361_v58 = vrot.slane %v9098_v55, 10  ;;  %v6157_v5 = vsel %vm22534_vm0, %v13782_v54, 0 }
 0x3b8   :  { %6405 = vmatprep.subr.bf16.mxu1 %v13765_v40  ;;  %v13796_v54 = vld [vmem:[%s21584_s3 + $0x780] ss:$16 sps:$4 sm:$0xff]  }
 0x3b9   :  { %v9181_v33 = vsel %vm19276_vm15, %v12357_v23, %v9180_v20  ;;  %v13789_v20 = vld [vmem:[%s21584_s3 + $0x74c] ss:$16 sps:$4 sm:$0xff]   ;;  %v13784_v23 = vld [vmem:[%s21584_s3 + $0x740] ss:$16 sps:$4 sm:$0xff]  }
 0x3ba   :  { %6260 = vmatpush1.bf16.msra.mxu0 %v13760_v10  ;;  %v19437_v49 = vcombine.high %v9173_v30, %v9181_v33  ;;  %v19439_v40 = vcombine.low %v9173_v30, %v9181_v33  ;;  %v13775_v10 = vld [vmem:[%s21584_s3 + $0x368] ss:$16 sps:$4 sm:$0xff]   ;;  %v13790_v30 = vld [vmem:[%s21584_s3 + $0x760] ss:$16 sps:$4 sm:$0xff]  }
 0x3bb   :  { %6406 = vmatpush1.bf16.msra.mxu1 %v13763_v26  ;;  %6261 = vmatprep.subr.bf16.mxu0 %v13768_v11  ;;  %v12359_v26 = vrot.slane %v9096_v2, 10  ;;  %v9196_v11 = vrot.slane %v19221_v43, 6  ;;  %v13786_v43 = vld [vmem:[%s21584_s3 + $0x744] ss:$16 sps:$4 sm:$0xff]   ;;  %v13793_v33 = vld [vmem:[%s21584_s3 + $0x768] ss:$16 sps:$4 sm:$0xff]  }
 0x3bc   :  { %6407 = vmatprep.subr.bf16.mxu1 %v13771_v36  ;;  %v13783_v36 = vld [vmem:[%s21584_s3 + $0x388] ss:$16 sps:$4 sm:$0x3f]   ;;  %v13802_v55 = vld [vmem:[%s21584_s3 + $0x7a0] ss:$16 sps:$4 sm:$0xff]  }
 0x3bd   :  { %v9189_v29 = vsel %vm19276_vm15, %v12359_v26, %v9188_v17  ;;  %v6163_v21 = vsel %vm22536_vm11, %v13783_v36, 0  ;;  %v13799_v2 = vld [vmem:[%s21584_s3 + $0x788] ss:$16 sps:$4 sm:$0xff]   ;;  %v13804_v17 = vld [vmem:[%s21584_s3 + $0x7a4] ss:$16 sps:$4 sm:$0xff]  }
 0x3be   :  { %6262 = vmatpush1.bf16.msra.mxu0 %v13766_v16  ;;  %v9197_v16 = vsel %vm19276_vm15, %v12361_v58, %v9196_v11  ;;  %v13805_v26 = vld [vmem:[%s21584_s3 + $0x7a8] ss:$16 sps:$4 sm:$0xff]   ;;  %v13808_v11 = vld [vmem:[%s21584_s3 + $0x7c0] ss:$16 sps:$4 sm:$0xff]   ;;  %v13816_v36 = vld [vmem:[%s21584_s3 + $0x7e4] ss:$16 sps:$4 sm:$0xff]  }
 0x3bf   :  { %6408 = vmatpush1.bf16.msra.mxu1 %v13769_v14  ;;  %6263 = vmatprep.subr.bf16.mxu0 %v13774_v50  ;;  %v19466_v14 = vcombine.high %v9189_v29, %v9197_v16  ;;  %v19468_v50 = vcombine.low %v9189_v29, %v9197_v16  ;;  %v13819_v29 = vld [vmem:[%s21584_s3 + $0x7ec] ss:$16 sps:$4 sm:$0xff]   ;;  %v13814_v58 = vld [vmem:[%s21584_s3 + $0x7e0] ss:$16 sps:$4 sm:$0xff]   ;;  %v13823_v16 = vld [vmem:[%s21584_s3 + $0x808] ss:$16 sps:$4 sm:$0xff]  }
 0x3c0   :  { %6409 = vmatprep.subr.bf16.mxu1 %v13777_v25  ;;  %v13787_v25 = vld [vmem:[%s21584_s3 + $0x748] ss:$16 sps:$4 sm:$0xff]  }
 0x3c2   :  { %6264 = vmatpush1.bf16.msra.mxu0 %v13772_v47  ;;  %v13792_v47 = vld [vmem:[%s21584_s3 + $0x764] ss:$16 sps:$4 sm:$0xff]  }
 0x3c3   :  { %6410 = vmatpush1.bf16.msra.mxu1 %v13775_v10  ;;  %11804 = vmatprep.subr.msk.bf16.mxu0 %vm22533_vm4, %v13778_v3  ;;  %v13795_v3 = vld [vmem:[%s21584_s3 + $0x76c] ss:$16 sps:$4 sm:$0xff]   ;;  %vm22557_vm4 = vmmov %vm22534_vm0 }
 0x3c4   :  { %11809 = vmatprep.subr.msk.bf16.mxu1 %vm22535_vm5, %v13780_v48  ;;  %v13807_v10 = vld [vmem:[%s21584_s3 + $0x7ac] ss:$16 sps:$4 sm:$0xff]   ;;  %v13811_v48 = vld [vmem:[%s21584_s3 + $0x7c8] ss:$16 sps:$4 sm:$0xff]   ;;  %vm22564_vm5 = vcmask 1042434  }
 0x3c6   :  { %6266 = vmatpush1.bf16.msra.mxu0 %v6157_v5  ;;  %v13817_v5 = vld [vmem:[%s21584_s3 + $0x7e8] ss:$16 sps:$4 sm:$0xff]  }
 0x3c7   :  { %6412 = vmatpush1.bf16.msra.mxu1 %v6163_v21  ;;  %7352 = vmatprep.subr.bf16.mxu0 %v13786_v43  ;;  %v13820_v43 = vld [vmem:[%s21584_s3 + $0x800] ss:$16 sps:$4 sm:$0xff]   ;;  %v13828_v21 = vld [vmem:[%s21584_s3 + $0x824] ss:$16 sps:$4 sm:$0xff]  }
 0x3c8   :  { %7498 = vmatprep.subr.bf16.mxu1 %v13789_v20  ;;  %v13831_v20 = vld [vmem:[%s21584_s3 + $0x82c] ss:$16 sps:$4 sm:$0xff]  }
 0x3c9   :  { %6274 = vmatmul.mubr.bf16.vlgmr.msra.gmra.mrb[48].mxu0 %v18834_v51 }
 0x3ca   :  { %6420 = vmatmul.mubr.bf16.vlgmr.msra.gmra.mrb[48].mxu1 %v18834_v51  ;;  %11806 = vmatprep.mubr.msk.bf16.mxu0 %vm5175_vm3, %v18838_v44  ;;  %v13798_v51 = vld [vmem:[%s21584_s3 + $0x784] ss:$16 sps:$4 sm:$0xff]  }
 0x3cb   :  { %11811 = vmatprep.mubr.msk.bf16.mxu1 %vm5175_vm3, %v18838_v44  ;;  %7353 = vmatpush1.bf16.msra.mxu0 %v13784_v23  ;;  %v13801_v44 = vld [vmem:[%s21584_s3 + $0x78c] ss:$16 sps:$4 sm:$0xff]   ;;  %v22537_v23 = vld [vmem:[#allocation74_spill] sm:$0xff] }
 0x3cc   :  { %7499 = vmatpush1.bf16.msra.mxu1 %v13787_v25  ;;  %7354 = vmatprep.subr.bf16.mxu0 %v13792_v47  ;;  %v13826_v25 = vld [vmem:[%s21584_s3 + $0x820] ss:$16 sps:$4 sm:$0xff]   ;;  %v13829_v47 = vld [vmem:[%s21584_s3 + $0x828] ss:$16 sps:$4 sm:$0xff]  }
 0x3cd   :  { %7500 = vmatprep.subr.bf16.mxu1 %v13795_v3  ;;  %v13834_v3 = vld [vmem:[%s21584_s3 + $0x844] ss:$16 sps:$4 sm:$0xff]  }
 0x3cf   :  { %7355 = vmatpush1.bf16.msra.mxu0 %v13790_v30  ;;  %v13832_v30 = vld [vmem:[%s21584_s3 + $0x840] ss:$16 sps:$4 sm:$0xff]  }
 0x3d0   :  { %7501 = vmatpush1.bf16.msra.mxu1 %v13793_v33  ;;  %7356 = vmatprep.subr.bf16.mxu0 %v13798_v51  ;;  %v13835_v33 = vld [vmem:[%s21584_s3 + $0x848] ss:$16 sps:$4 sm:$0xff]   ;;  %v13840_v51 = vld [vmem:[%s21584_s3 + $0x864] ss:$16 sps:$4 sm:$0xff]  }
 0x3d1   :  { %6284 = vmatmul.mubr.bf16.gmra.mrb[52].mxu0 %v18849_v35  ;;  %7502 = vmatprep.subr.bf16.mxu1 %v13801_v44  ;;  %v13843_v44 = vld [vmem:[%s21584_s3 + $0x86c] ss:$16 sps:$4 sm:$0xff]  }
 0x3d2   :  { %6430 = vmatmul.mubr.bf16.gmra.mrb[52].mxu1 %v18849_v35  ;;  %11807 = vmatprep.mubr.msk.bf16.mxu0 %vm5175_vm3, %v18853_v18  ;;  %v13810_v35 = vld [vmem:[%s21584_s3 + $0x7c4] ss:$16 sps:$4 sm:$0xff]  }
 0x3d3   :  { %11812 = vmatprep.mubr.msk.bf16.mxu1 %vm5175_vm3, %v18853_v18  ;;  %7357 = vmatpush1.bf16.msra.mxu0 %v13796_v54  ;;  %v13813_v18 = vld [vmem:[%s21584_s3 + $0x7cc] ss:$16 sps:$4 sm:$0xff]   ;;  %v13838_v54 = vld [vmem:[%s21584_s3 + $0x860] ss:$16 sps:$4 sm:$0xff]  }
 0x3d4   :  { %7503 = vmatpush1.bf16.msra.mxu1 %v13799_v2  ;;  %7358 = vmatprep.subr.bf16.mxu0 %v13804_v17  ;;  %v13841_v2 = vld [vmem:[%s21584_s3 + $0x868] ss:$16 sps:$4 sm:$0xff]   ;;  %v13846_v17 = vld [vmem:[%s21584_s3 + $0x884] ss:$16 sps:$4 sm:$0xff]  }
 0x3d5   :  { %7504 = vmatprep.subr.bf16.mxu1 %v13807_v10  ;;  %v13849_v10 = vld [vmem:[%s21584_s3 + $0x88c] ss:$16 sps:$4 sm:$0xff]  }
 0x3d7   :  { %7359 = vmatpush1.bf16.msra.mxu0 %v13802_v55  ;;  %v13844_v55 = vld [vmem:[%s21584_s3 + $0x880] ss:$16 sps:$4 sm:$0xff]  }
 0x3d8   :  { %7505 = vmatpush1.bf16.msra.mxu1 %v13805_v26  ;;  %7360 = vmatprep.subr.bf16.mxu0 %v13810_v35  ;;  %v13847_v26 = vld [vmem:[%s21584_s3 + $0x888] ss:$16 sps:$4 sm:$0xff]   ;;  %v13852_v35 = vld [vmem:[%s21584_s3 + $0x8a4] ss:$16 sps:$4 sm:$0xff]  }
 0x3d9   :  { %6294 = vmatmul.mubr.bf16.gmra.mrb[56].mxu0 %v18857_v38  ;;  %7506 = vmatprep.subr.bf16.mxu1 %v13813_v18  ;;  %v13855_v18 = vld [vmem:[%s21584_s3 + $0x8ac] ss:$16 sps:$4 sm:$0xff]  }
 0x3da   :  { %6440 = vmatmul.mubr.bf16.gmra.mrb[56].mxu1 %v18857_v38  ;;  %11808 = vmatprep.mubr.msk.bf16.mxu0 %vm5175_vm3, %v18870_v19  ;;  %v13822_v38 = vld [vmem:[%s21584_s3 + $0x804] ss:$16 sps:$4 sm:$0xff]  }
 0x3db   :  { %11813 = vmatprep.mubr.msk.bf16.mxu1 %vm5175_vm3, %v18870_v19  ;;  %7361 = vmatpush1.bf16.msra.mxu0 %v13808_v11  ;;  %v13825_v19 = vld [vmem:[%s21584_s3 + $0x80c] ss:$16 sps:$4 sm:$0xff]   ;;  %v13850_v11 = vld [vmem:[%s21584_s3 + $0x8a0] ss:$16 sps:$4 sm:$0xff]  }
 0x3dc   :  { %7507 = vmatpush1.bf16.msra.mxu1 %v13811_v48  ;;  %7362 = vmatprep.subr.bf16.mxu0 %v13816_v36  ;;  %v13853_v48 = vld [vmem:[%s21584_s3 + $0x8a8] ss:$16 sps:$4 sm:$0xff]   ;;  %v13858_v36 = vld [vmem:[%s21584_s3 + $0x8c4] ss:$16 sps:$4 sm:$0xff]  }
 0x3dd   :  { %7508 = vmatprep.subr.bf16.mxu1 %v13819_v29  ;;  %v13861_v29 = vld [vmem:[%s21584_s3 + $0x8cc] ss:$16 sps:$4 sm:$0xff]  }
 0x3df   :  { %7363 = vmatpush1.bf16.msra.mxu0 %v13814_v58  ;;  %v13856_v58 = vld [vmem:[%s21584_s3 + $0x8c0] ss:$16 sps:$4 sm:$0xff]  }
 0x3e0   :  { %7509 = vmatpush1.bf16.msra.mxu1 %v13817_v5  ;;  %7364 = vmatprep.subr.bf16.mxu0 %v13822_v38  ;;  %v13859_v5 = vld [vmem:[%s21584_s3 + $0x8c8] ss:$16 sps:$4 sm:$0xff]   ;;  %v13864_v38 = vld [vmem:[%s21584_s3 + $0x8e4] ss:$16 sps:$4 sm:$0xff]  }
 0x3e1   :  { %6304 = vmatmul.mubr.bf16.gmra.mrb[60].mxu0 %v18874_v8  ;;  %7510 = vmatprep.subr.bf16.mxu1 %v13825_v19  ;;  %v13867_v19 = vld [vmem:[%s21584_s3 + $0x8ec] ss:$16 sps:$4 sm:$0xff]  }
 0x3e2   :  { %6450 = vmatmul.mubr.bf16.gmra.mrb[60].mxu1 %v18874_v8  ;;  %7384 = vmatprep.mubr.bf16.mxu0 %v22537_v23  ;;  %v13837_v8 = vld [vmem:[%s21584_s3 + $0x84c] ss:$16 sps:$4 sm:$0xff]  }
 0x3e3   :  { %7365 = vmatpush1.bf16.msra.mxu0 %v13820_v43  ;;  %7530 = vmatprep.mubr.bf16.mxu1 %v22537_v23  ;;  %v13862_v43 = vld [vmem:[%s21584_s3 + $0x8e0] ss:$16 sps:$4 sm:$0xff]  }
 0x3e4   :  { %7511 = vmatpush1.bf16.msra.mxu1 %v13823_v16  ;;  %7366 = vmatprep.subr.bf16.mxu0 %v13828_v21  ;;  %v13865_v16 = vld [vmem:[%s21584_s3 + $0x8e8] ss:$16 sps:$4 sm:$0xff]   ;;  %v13870_v21 = vld [vmem:[%s21584_s3 + $0x904] ss:$16 sps:$4 sm:$0xff]   ;;  %v13868_v23 = vld [vmem:[%s21584_s3 + $0x900] ss:$16 sps:$4 sm:$0xff]  }
 0x3e5   :  { %7512 = vmatprep.subr.bf16.mxu1 %v13831_v20  ;;  %v13873_v20 = vld [vmem:[%s21584_s3 + $0x90c] ss:$16 sps:$4 sm:$0xff]  }
 0x3e7   :  { %7367 = vmatpush1.bf16.msra.mxu0 %v13826_v25  ;;  %v13871_v25 = vld [vmem:[%s21584_s3 + $0x908] ss:$16 sps:$4 sm:$0xff]  }
 0x3e8   :  { %7513 = vmatpush1.bf16.msra.mxu1 %v13829_v47  ;;  %7368 = vmatprep.subr.bf16.mxu0 %v13834_v3  ;;  %v13876_v47 = vld [vmem:[%s21584_s3 + $0x924] ss:$16 sps:$4 sm:$0xff]   ;;  %v13879_v3 = vld [vmem:[%s21584_s3 + $0x92c] ss:$16 sps:$4 sm:$0xff]  }
 0x3e9   :  { %7514 = vmatprep.subr.bf16.mxu1 %v13837_v8  ;;  %v13874_v8 = vld [vmem:[%s21584_s3 + $0x920] ss:$16 sps:$4 sm:$0xff]  }
 0x3eb   :  { %7369 = vmatpush1.bf16.msra.mxu0 %v13832_v30  ;;  %v13877_v30 = vld [vmem:[%s21584_s3 + $0x928] ss:$16 sps:$4 sm:$0xff]  }
 0x3ec   :  { %7515 = vmatpush1.bf16.msra.mxu1 %v13835_v33  ;;  %7370 = vmatprep.subr.bf16.mxu0 %v13840_v51  ;;  %v13882_v33 = vld [vmem:[%s21584_s3 + $0x944] ss:$16 sps:$4 sm:$0xff]   ;;  %v13885_v51 = vld [vmem:[%s21584_s3 + $0x94c] ss:$16 sps:$4 sm:$0xff]  }
 0x3ed   :  { %7516 = vmatprep.subr.bf16.mxu1 %v13843_v44  ;;  %v13880_v44 = vld [vmem:[%s21584_s3 + $0x940] ss:$16 sps:$4 sm:$0xff]  }
 0x3ef   :  { %7371 = vmatpush1.bf16.msra.mxu0 %v13838_v54  ;;  %v13883_v54 = vld [vmem:[%s21584_s3 + $0x948] ss:$16 sps:$4 sm:$0xff]  }
 0x3f0   :  { %7517 = vmatpush1.bf16.msra.mxu1 %v13841_v2  ;;  %7372 = vmatprep.subr.bf16.mxu0 %v13846_v17  ;;  %v13888_v2 = vld [vmem:[%s21584_s3 + $0x964] ss:$16 sps:$4 sm:$0xff]   ;;  %v22538_v17 = vld [vmem:[#allocation27_spill] sm:$0xff] }
 0x3f1   :  { %7518 = vmatprep.subr.bf16.mxu1 %v13849_v10  ;;  %v13891_v10 = vld [vmem:[%s21584_s3 + $0x96c] ss:$16 sps:$4 sm:$0xff]  }
 0x3f3   :  { %7373 = vmatpush1.bf16.msra.mxu0 %v13844_v55  ;;  %v22539_v55 = vld [vmem:[#allocation33_spill] sm:$0xff] }
 0x3f4   :  { %7519 = vmatpush1.bf16.msra.mxu1 %v13847_v26  ;;  %7374 = vmatprep.subr.bf16.mxu0 %v13852_v35  ;;  %v13886_v26 = vld [vmem:[%s21584_s3 + $0x960] ss:$16 sps:$4 sm:$0xff]   ;;  %v13889_v35 = vld [vmem:[%s21584_s3 + $0x968] ss:$16 sps:$4 sm:$0xff]  }
 0x3f5   :  { %7520 = vmatprep.subr.bf16.mxu1 %v13855_v18  ;;  %v13894_v18 = vld [vmem:[%s21584_s3 + $0x984] ss:$16 sps:$4 sm:$0xff]  }
 0x3f7   :  { %7375 = vmatpush1.bf16.msra.mxu0 %v13850_v11  ;;  %v13897_v11 = vld [vmem:[%s21584_s3 + $0x98c] ss:$16 sps:$4 sm:$0xff]  }
 0x3f8   :  { %7521 = vmatpush1.bf16.msra.mxu1 %v13853_v48  ;;  %7376 = vmatprep.subr.bf16.mxu0 %v13858_v36  ;;  %v13892_v48 = vld [vmem:[%s21584_s3 + $0x980] ss:$16 sps:$4 sm:$0xff]   ;;  %v13895_v36 = vld [vmem:[%s21584_s3 + $0x988] ss:$16 sps:$4 sm:$0xff]  }
 0x3f9   :  { %7522 = vmatprep.subr.bf16.mxu1 %v13861_v29  ;;  %v13900_v29 = vld [vmem:[%s21584_s3 + $0x9a4] ss:$16 sps:$4 sm:$0xff]  }
 0x3fb   :  { %7377 = vmatpush1.bf16.msra.mxu0 %v13856_v58  ;;  %v22540_v58 = vld [vmem:[#allocation35_spill] sm:$0xff] }
 0x3fc   :  { %7523 = vmatpush1.bf16.msra.mxu1 %v13859_v5  ;;  %7378 = vmatprep.subr.bf16.mxu0 %v13864_v38  ;;  %v13903_v5 = vld [vmem:[%s21584_s3 + $0x9ac] ss:$16 sps:$4 sm:$0xff]   ;;  %v22541_v38 = vld [vmem:[#allocation54_spill] sm:$0xff] }
 0x3fd   :  { %7524 = vmatprep.subr.bf16.mxu1 %v13867_v19  ;;  %v13898_v19 = vld [vmem:[%s21584_s3 + $0x9a0] ss:$16 sps:$4 sm:$0xff]  }
 0x3ff   :  { %7379 = vmatpush1.bf16.msra.mxu0 %v13862_v43  ;;  %v13901_v43 = vld [vmem:[%s21584_s3 + $0x9a8] ss:$16 sps:$4 sm:$0xff]  }
 0x400   :  { %7525 = vmatpush1.bf16.msra.mxu1 %v13865_v16  ;;  %7380 = vmatprep.subr.bf16.mxu0 %v13870_v21  ;;  %v13906_v16 = vld [vmem:[%s21584_s3 + $0x9c4] ss:$16 sps:$4 sm:$0xff]   ;;  %v13909_v21 = vld [vmem:[%s21584_s3 + $0x9cc] ss:$16 sps:$4 sm:$0xff]  }
 0x401   :  { %7526 = vmatprep.subr.bf16.mxu1 %v13873_v20  ;;  %v13904_v20 = vld [vmem:[%s21584_s3 + $0x9c0] ss:$16 sps:$4 sm:$0xff]  }
 0x403   :  { %7381 = vmatpush1.bf16.msra.mxu0 %v13868_v23  ;;  %v13907_v23 = vld [vmem:[%s21584_s3 + $0x9c8] ss:$16 sps:$4 sm:$0xff]  }
 0x404   :  { %7527 = vmatpush1.bf16.msra.mxu1 %v13871_v25  ;;  %7382 = vmatprep.subr.bf16.mxu0 %v13876_v47  ;;  %v13912_v25 = vld [vmem:[%s21584_s3 + $0x9e4] ss:$16 sps:$4 sm:$0xff]   ;;  %v22542_v47 = vld [vmem:[#allocation61_spill] sm:$0xff] }
 0x405   :  { %7528 = vmatprep.subr.bf16.mxu1 %v13879_v3  ;;  %v13915_v3 = vld [vmem:[%s21584_s3 + $0x9ec] ss:$16 sps:$4 sm:$0xff]  }
 0x407   :  { %7383 = vmatpush1.bf16.msra.mxu0 %v13874_v8  ;;  %v13910_v8 = vld [vmem:[%s21584_s3 + $0x9e0] ss:$16 sps:$4 sm:$0xff]  }
 0x408   :  { %7529 = vmatpush1.bf16.msra.mxu1 %v13877_v30  ;;  %7425 = vmatprep.subr.bf16.mxu0 %v13882_v33  ;;  %v13913_v30 = vld [vmem:[%s21584_s3 + $0x9e8] ss:$16 sps:$4 sm:$0xff]   ;;  %v13918_v33 = vld [vmem:[%s21584_s3 + $0xa04] ss:$16 sps:$4 sm:$0xff]  }
 0x409   :  { %7571 = vmatprep.subr.bf16.mxu1 %v13885_v51  ;;  %v13921_v51 = vld [vmem:[%s21584_s3 + $0xa0c] ss:$16 sps:$4 sm:$0xff]  }
 0x40a   :  { %7385 = vmatmul.mubr.bf16.vlgmr.msra.gmra.mrb[48].mxu0 %v22538_v17 }
 0x40b   :  { %7531 = vmatmul.mubr.bf16.vlgmr.msra.gmra.mrb[48].mxu1 %v22538_v17  ;;  %7394 = vmatprep.mubr.bf16.mxu0 %v22539_v55  ;;  %v13922_v17 = vld [vmem:[%s21584_s3 + $0xa20] ss:$16 sps:$4 sm:$0xff]  }
 0x40c   :  { %7426 = vmatpush1.bf16.msra.mxu0 %v13880_v44  ;;  %7540 = vmatprep.mubr.bf16.mxu1 %v22539_v55  ;;  %v13919_v44 = vld [vmem:[%s21584_s3 + $0xa08] ss:$16 sps:$4 sm:$0xff]   ;;  %v13933_v55 = vld [vmem:[%s21584_s3 + $0xa4c] ss:$16 sps:$4 sm:$0xff]  }
 0x40d   :  { %7572 = vmatpush1.bf16.msra.mxu1 %v13883_v54  ;;  %7427 = vmatprep.subr.bf16.mxu0 %v13888_v2  ;;  %v13924_v54 = vld [vmem:[%s21584_s3 + $0xa24] ss:$16 sps:$4 sm:$0xff]   ;;  %v13927_v2 = vld [vmem:[%s21584_s3 + $0xa2c] ss:$16 sps:$4 sm:$0xff]  }
 0x40e   :  { %7573 = vmatprep.subr.bf16.mxu1 %v13891_v10  ;;  %v13925_v10 = vld [vmem:[%s21584_s3 + $0xa28] ss:$16 sps:$4 sm:$0xff]  }
 0x410   :  { %7428 = vmatpush1.bf16.msra.mxu0 %v13886_v26  ;;  %v13931_v26 = vld [vmem:[%s21584_s3 + $0xa48] ss:$16 sps:$4 sm:$0xff]  }
 0x411   :  { %7574 = vmatpush1.bf16.msra.mxu1 %v13889_v35  ;;  %7429 = vmatprep.subr.bf16.mxu0 %v13894_v18  ;;  %v13936_v35 = vld [vmem:[%s21584_s3 + $0xa64] ss:$16 sps:$4 sm:$0xff]   ;;  %v13939_v18 = vld [vmem:[%s21584_s3 + $0xa6c] ss:$16 sps:$4 sm:$0xff]  }
 0x412   :  { %7395 = vmatmul.mubr.bf16.gmra.mrb[52].mxu0 %v22540_v58  ;;  %7575 = vmatprep.subr.bf16.mxu1 %v13897_v11  ;;  %v13934_v11 = vld [vmem:[%s21584_s3 + $0xa60] ss:$16 sps:$4 sm:$0xff]  }
 0x413   :  { %7541 = vmatmul.mubr.bf16.gmra.mrb[52].mxu1 %v22540_v58  ;;  %7404 = vmatprep.mubr.bf16.mxu0 %v22541_v38  ;;  %v13940_v58 = vld [vmem:[%s21584_s3 + $0xa80] ss:$16 sps:$4 sm:$0xff]  }
 0x414   :  { %7430 = vmatpush1.bf16.msra.mxu0 %v13892_v48  ;;  %7550 = vmatprep.mubr.bf16.mxu1 %v22541_v38  ;;  %v13937_v48 = vld [vmem:[%s21584_s3 + $0xa68] ss:$16 sps:$4 sm:$0xff]   ;;  %v13948_v38 = vld [vmem:[%s21584_s3 + $0xaa4] ss:$16 sps:$4 sm:$0xff]  }
 0x415   :  { %7576 = vmatpush1.bf16.msra.mxu1 %v13895_v36  ;;  %7431 = vmatprep.subr.bf16.mxu0 %v13900_v29  ;;  %v13942_v36 = vld [vmem:[%s21584_s3 + $0xa84] ss:$16 sps:$4 sm:$0xff]   ;;  %v13945_v29 = vld [vmem:[%s21584_s3 + $0xa8c] ss:$16 sps:$4 sm:$0xff]  }
 0x416   :  { %7577 = vmatprep.subr.bf16.mxu1 %v13903_v5  ;;  %v13943_v5 = vld [vmem:[%s21584_s3 + $0xa88] ss:$16 sps:$4 sm:$0xff]  }
 0x418   :  { %7432 = vmatpush1.bf16.msra.mxu0 %v13898_v19  ;;  %v13951_v19 = vld [vmem:[%s21584_s3 + $0xaac] ss:$16 sps:$4 sm:$0xff]  }
 0x419   :  { %7578 = vmatpush1.bf16.msra.mxu1 %v13901_v43  ;;  %7433 = vmatprep.subr.bf16.mxu0 %v13906_v16  ;;  %v13946_v43 = vld [vmem:[%s21584_s3 + $0xaa0] ss:$16 sps:$4 sm:$0xff]   ;;  %v13949_v16 = vld [vmem:[%s21584_s3 + $0xaa8] ss:$16 sps:$4 sm:$0xff]  }
 0x41a   :  { %7405 = vmatmul.mubr.bf16.gmra.mrb[56].mxu0 %v22542_v47  ;;  %7579 = vmatprep.subr.bf16.mxu1 %v13909_v21  ;;  %v13952_v21 = vld [vmem:[%s21584_s3 + $0xac4] ss:$16 sps:$4 sm:$0x3f]  }
 0x41b   :  { %7551 = vmatmul.mubr.bf16.gmra.mrb[56].mxu1 %v22542_v47  ;;  %7414 = vmatprep.mubr.bf16.mxu0 %v18910_v6 }
 0x41c   :  { %7434 = vmatpush1.bf16.msra.mxu0 %v13904_v20  ;;  %7560 = vmatprep.mubr.bf16.mxu1 %v18910_v6  ;;  %v13916_v6 = vld [vmem:[%s21584_s3 + $0xa00] ss:$16 sps:$4 sm:$0xff]  }
 0x41d   :  { %7580 = vmatpush1.bf16.msra.mxu1 %v13907_v23  ;;  %7435 = vmatprep.subr.bf16.mxu0 %v13912_v25  ;;  %v13956_v20 = vld [vmem:[%s21584_s3 + $0xac0] ss:$16 sps:$4 sm:$0x3f]   ;;  %v13954_v23 = vld [vmem:[%s21584_s3 + $0xacc] ss:$16 sps:$4 sm:$0x3f]  }
 0x41e   :  { %7581 = vmatprep.subr.bf16.mxu1 %v13915_v3  ;;  %v13957_v25 = vld [vmem:[%s21584_s3 + $0xac8] ss:$16 sps:$4 sm:$0x3f]   ;;  %v7341_v47 = vsel %vm22544_vm6, %v13956_v20, 0  ;;  %v13960_v3 = vld [vmem:[%s21584_s3 + $0xae4] ss:$16 sps:$4 sm:$0xff]  }
 0x41f   :  { %v14008_v20 = vld [vmem:[%s21584_s3 + $0xbe4] ss:$16 sps:$4 sm:$0xff]  }
 0x420   :  { %7436 = vmatpush1.bf16.msra.mxu0 %v13910_v8  ;;  %v7347_v8 = vsel %vm22546_vm7, %v13957_v25, 0  ;;  %v14009_v25 = vld [vmem:[%s21584_s3 + $0xbe8] ss:$16 sps:$4 sm:$0xff]   ;;  %vm22580_vm7 = vcmask 1043459  }
 0x421   :  { %7582 = vmatpush1.bf16.msra.mxu1 %v13913_v30  ;;  %7437 = vmatprep.subr.bf16.mxu0 %v13918_v33  ;;  %v13963_v30 = vld [vmem:[%s21584_s3 + $0xaec] ss:$16 sps:$4 sm:$0xff]   ;;  %v13958_v33 = vld [vmem:[%s21584_s3 + $0xae0] ss:$16 sps:$4 sm:$0xff]  }
 0x422   :  { %7415 = vmatmul.mubr.bf16.gmra.mrb[60].mxu0 %v18912_v59  ;;  %7583 = vmatprep.subr.bf16.mxu1 %v13921_v51  ;;  %v13961_v51 = vld [vmem:[%s21584_s3 + $0xae8] ss:$16 sps:$4 sm:$0xff]  }
 0x423   :  { %7561 = vmatmul.mubr.bf16.gmra.mrb[60].mxu1 %v18912_v59  ;;  %12079 = vmatprep.mubr.msk.bf16.mxu0 %vm5175_vm3, %v18922_v63  ;;  %v13930_v59 = vld [vmem:[%s21584_s3 + $0xa44] ss:$16 sps:$4 sm:$0xff]  }
 0x424   :  { %7438 = vmatpush1.bf16.msra.mxu0 %v13916_v6  ;;  %12084 = vmatprep.mubr.msk.bf16.mxu1 %vm5175_vm3, %v18922_v63  ;;  %v13928_v63 = vld [vmem:[%s21584_s3 + $0xa40] ss:$16 sps:$4 sm:$0xff]   ;;  %v13966_v6 = vld [vmem:[%s21584_s3 + $0xb04] ss:$16 sps:$4 sm:$0xff]  }
 0x425   :  { %7584 = vmatpush1.bf16.msra.mxu1 %v13919_v44  ;;  %7439 = vmatprep.subr.bf16.mxu0 %v13924_v54  ;;  %v13969_v44 = vld [vmem:[%s21584_s3 + $0xb0c] ss:$16 sps:$4 sm:$0xff]   ;;  %v13964_v54 = vld [vmem:[%s21584_s3 + $0xb00] ss:$16 sps:$4 sm:$0xff]  }
 0x426   :  { %7585 = vmatprep.subr.bf16.mxu1 %v13927_v2  ;;  %v13967_v2 = vld [vmem:[%s21584_s3 + $0xb08] ss:$16 sps:$4 sm:$0xff]  }
 0x428   :  { %7440 = vmatpush1.bf16.msra.mxu0 %v13922_v17  ;;  %v13970_v17 = vld [vmem:[%s21584_s3 + $0xb20] ss:$16 sps:$4 sm:$0xff]  }
 0x429   :  { %7586 = vmatpush1.bf16.msra.mxu1 %v13925_v10  ;;  %7441 = vmatprep.subr.bf16.mxu0 %v13930_v59  ;;  %v13973_v10 = vld [vmem:[%s21584_s3 + $0xb28] ss:$16 sps:$4 sm:$0xff]   ;;  %v13978_v59 = vld [vmem:[%s21584_s3 + $0xb44] ss:$16 sps:$4 sm:$0xff]  }
 0x42a   :  { %7587 = vmatprep.subr.bf16.mxu1 %v13933_v55  ;;  %v13981_v55 = vld [vmem:[%s21584_s3 + $0xb4c] ss:$16 sps:$4 sm:$0xff]  }
 0x42c   :  { %7442 = vmatpush1.bf16.msra.mxu0 %v13928_v63  ;;  %v13976_v63 = vld [vmem:[%s21584_s3 + $0xb40] ss:$16 sps:$4 sm:$0xff]  }
 0x42d   :  { %7588 = vmatpush1.bf16.msra.mxu1 %v13931_v26  ;;  %7443 = vmatprep.subr.bf16.mxu0 %v13936_v35  ;;  %v13979_v26 = vld [vmem:[%s21584_s3 + $0xb48] ss:$16 sps:$4 sm:$0xff]   ;;  %v13982_v35 = vld [vmem:[%s21584_s3 + $0xb60] ss:$16 sps:$4 sm:$0xff]  }
 0x42e   :  { %7589 = vmatprep.subr.bf16.mxu1 %v13939_v18  ;;  %v13985_v18 = vld [vmem:[%s21584_s3 + $0xb68] ss:$16 sps:$4 sm:$0xff]  }
 0x430   :  { %7444 = vmatpush1.bf16.msra.mxu0 %v13934_v11  ;;  %v13990_v11 = vld [vmem:[%s21584_s3 + $0xb84] ss:$16 sps:$4 sm:$0xff]  }
 0x431   :  { %7590 = vmatpush1.bf16.msra.mxu1 %v13937_v48  ;;  %7445 = vmatprep.subr.bf16.mxu0 %v13942_v36  ;;  %v13993_v48 = vld [vmem:[%s21584_s3 + $0xb8c] ss:$16 sps:$4 sm:$0xff]   ;;  %v13988_v36 = vld [vmem:[%s21584_s3 + $0xb80] ss:$16 sps:$4 sm:$0xff]  }
 0x432   :  { %7591 = vmatprep.subr.bf16.mxu1 %v13945_v29  ;;  %v13991_v29 = vld [vmem:[%s21584_s3 + $0xb88] ss:$16 sps:$4 sm:$0xff]  }
 0x434   :  { %7446 = vmatpush1.bf16.msra.mxu0 %v13940_v58  ;;  %v13994_v58 = vld [vmem:[%s21584_s3 + $0xba0] ss:$16 sps:$4 sm:$0xff]  }
 0x435   :  { %7592 = vmatpush1.bf16.msra.mxu1 %v13943_v5  ;;  %7447 = vmatprep.subr.bf16.mxu0 %v13948_v38  ;;  %v13997_v5 = vld [vmem:[%s21584_s3 + $0xba8] ss:$16 sps:$4 sm:$0xff]   ;;  %v14002_v38 = vld [vmem:[%s21584_s3 + $0xbc4] ss:$16 sps:$4 sm:$0xff]  }
 0x436   :  { %7593 = vmatprep.subr.bf16.mxu1 %v13951_v19  ;;  %v14005_v19 = vld [vmem:[%s21584_s3 + $0xbcc] ss:$16 sps:$4 sm:$0xff]  }
 0x438   :  { %7448 = vmatpush1.bf16.msra.mxu0 %v13946_v43  ;;  %v22547_v43 = vld [vmem:[#allocation41_spill] sm:$0xff] }
 0x439   :  { %7594 = vmatpush1.bf16.msra.mxu1 %v13949_v16  ;;  %12078 = vmatprep.subr.msk.bf16.mxu0 %vm22543_vm8, %v13952_v21  ;;  %v14000_v16 = vld [vmem:[%s21584_s3 + $0xbc0] ss:$16 sps:$4 sm:$0xff]   ;;  %v14003_v21 = vld [vmem:[%s21584_s3 + $0xbc8] ss:$16 sps:$4 sm:$0xff]  }
 0x43a   :  { %12083 = vmatprep.subr.msk.bf16.mxu1 %vm22545_vm13, %v13954_v23  ;;  %v14006_v23 = vld [vmem:[%s21584_s3 + $0xbe0] ss:$16 sps:$4 sm:$0xff]   ;;  %vm22576_vm13 = vmmov %vm22564_vm5 }
 0x43c   :  { %7450 = vmatpush1.bf16.msra.mxu0 %v7341_v47  ;;  %v14014_v47 = vld [vmem:[%s21584_s3 + $0xc04] ss:$16 sps:$4 sm:$0xff]  }
 0x43d   :  { %7596 = vmatpush1.bf16.msra.mxu1 %v7347_v8  ;;  %8759 = vmatprep.subr.bf16.mxu0 %v13960_v3  ;;  %v14017_v3 = vld [vmem:[%s21584_s3 + $0xc0c] ss:$16 sps:$4 sm:$0xff]   ;;  %v14012_v8 = vld [vmem:[%s21584_s3 + $0xc00] ss:$16 sps:$4 sm:$0xff]  }
 0x43e   :  { %8905 = vmatprep.subr.bf16.mxu1 %v13963_v30  ;;  %v14015_v30 = vld [vmem:[%s21584_s3 + $0xc08] ss:$16 sps:$4 sm:$0xff]  }
 0x43f   :  { %7458 = vmatmul.mubr.bf16.vlgmr.msra.gmra.mrb[48].mxu0 %v18920_v45 }
 0x440   :  { %7604 = vmatmul.mubr.bf16.vlgmr.msra.gmra.mrb[48].mxu1 %v18920_v45  ;;  %12080 = vmatprep.mubr.msk.bf16.mxu0 %vm5175_vm3, %v18980_v28  ;;  %v13972_v45 = vld [vmem:[%s21584_s3 + $0xb24] ss:$16 sps:$4 sm:$0xff]  }
 0x441   :  { %12085 = vmatprep.mubr.msk.bf16.mxu1 %vm5175_vm3, %v18980_v28  ;;  %8760 = vmatpush1.bf16.msra.mxu0 %v13958_v33  ;;  %v13975_v28 = vld [vmem:[%s21584_s3 + $0xb2c] ss:$16 sps:$4 sm:$0xff]   ;;  %v14020_v33 = vld [vmem:[%s21584_s3 + $0xc24] ss:$16 sps:$4 sm:$0xff]  }
 0x442   :  { %8906 = vmatpush1.bf16.msra.mxu1 %v13961_v51  ;;  %8761 = vmatprep.subr.bf16.mxu0 %v13966_v6  ;;  %v14023_v51 = vld [vmem:[%s21584_s3 + $0xc2c] ss:$16 sps:$4 sm:$0xff]   ;;  %v14018_v6 = vld [vmem:[%s21584_s3 + $0xc20] ss:$16 sps:$4 sm:$0xff]  }
 0x443   :  { %8907 = vmatprep.subr.bf16.mxu1 %v13969_v44  ;;  %v14021_v44 = vld [vmem:[%s21584_s3 + $0xc28] ss:$16 sps:$4 sm:$0xff]  }
 0x445   :  { %8762 = vmatpush1.bf16.msra.mxu0 %v13964_v54  ;;  %v14026_v54 = vld [vmem:[%s21584_s3 + $0xc44] ss:$16 sps:$4 sm:$0xff]  }
 0x446   :  { %8908 = vmatpush1.bf16.msra.mxu1 %v13967_v2  ;;  %8763 = vmatprep.subr.bf16.mxu0 %v13972_v45  ;;  %v14029_v2 = vld [vmem:[%s21584_s3 + $0xc4c] ss:$16 sps:$4 sm:$0xff]   ;;  %v14024_v45 = vld [vmem:[%s21584_s3 + $0xc40] ss:$16 sps:$4 sm:$0xff]  }
 0x447   :  { %7468 = vmatmul.mubr.bf16.gmra.mrb[52].mxu0 %v18982_v42  ;;  %8909 = vmatprep.subr.bf16.mxu1 %v13975_v28  ;;  %v14027_v28 = vld [vmem:[%s21584_s3 + $0xc48] ss:$16 sps:$4 sm:$0xff]  }
 0x448   :  { %7614 = vmatmul.mubr.bf16.gmra.mrb[52].mxu1 %v18982_v42  ;;  %12081 = vmatprep.mubr.msk.bf16.mxu0 %vm5175_vm3, %v19000_v9  ;;  %v13984_v42 = vld [vmem:[%s21584_s3 + $0xb64] ss:$16 sps:$4 sm:$0xff]  }
 0x449   :  { %12086 = vmatprep.mubr.msk.bf16.mxu1 %vm5175_vm3, %v19000_v9  ;;  %8764 = vmatpush1.bf16.msra.mxu0 %v13970_v17  ;;  %v13987_v9 = vld [vmem:[%s21584_s3 + $0xb6c] ss:$16 sps:$4 sm:$0xff]   ;;  %v14032_v17 = vld [vmem:[%s21584_s3 + $0xc64] ss:$16 sps:$4 sm:$0xff]  }
 0x44a   :  { %8910 = vmatpush1.bf16.msra.mxu1 %v13973_v10  ;;  %8765 = vmatprep.subr.bf16.mxu0 %v13978_v59  ;;  %v14035_v10 = vld [vmem:[%s21584_s3 + $0xc6c] ss:$16 sps:$4 sm:$0xff]   ;;  %v14030_v59 = vld [vmem:[%s21584_s3 + $0xc60] ss:$16 sps:$4 sm:$0xff]  }
 0x44b   :  { %8911 = vmatprep.subr.bf16.mxu1 %v13981_v55  ;;  %v14033_v55 = vld [vmem:[%s21584_s3 + $0xc68] ss:$16 sps:$4 sm:$0xff]  }
 0x44d   :  { %8766 = vmatpush1.bf16.msra.mxu0 %v13976_v63  ;;  %v14038_v63 = vld [vmem:[%s21584_s3 + $0xc84] ss:$16 sps:$4 sm:$0xff]  }
 0x44e   :  { %8912 = vmatpush1.bf16.msra.mxu1 %v13979_v26  ;;  %8767 = vmatprep.subr.bf16.mxu0 %v13984_v42  ;;  %v14041_v26 = vld [vmem:[%s21584_s3 + $0xc8c] ss:$16 sps:$4 sm:$0xff]   ;;  %v14036_v42 = vld [vmem:[%s21584_s3 + $0xc80] ss:$16 sps:$4 sm:$0xff]  }
 0x44f   :  { %7478 = vmatmul.mubr.bf16.gmra.mrb[56].mxu0 %v19002_v57  ;;  %8913 = vmatprep.subr.bf16.mxu1 %v13987_v9  ;;  %v14039_v9 = vld [vmem:[%s21584_s3 + $0xc88] ss:$16 sps:$4 sm:$0xff]  }
 0x450   :  { %7624 = vmatmul.mubr.bf16.gmra.mrb[56].mxu1 %v19002_v57  ;;  %12082 = vmatprep.mubr.msk.bf16.mxu0 %vm5175_vm3, %v19004_v39  ;;  %v13996_v57 = vld [vmem:[%s21584_s3 + $0xba4] ss:$16 sps:$4 sm:$0xff]  }
 0x451   :  { %12087 = vmatprep.mubr.msk.bf16.mxu1 %vm5175_vm3, %v19004_v39  ;;  %8768 = vmatpush1.bf16.msra.mxu0 %v13982_v35  ;;  %v13999_v39 = vld [vmem:[%s21584_s3 + $0xbac] ss:$16 sps:$4 sm:$0xff]   ;;  %v14044_v35 = vld [vmem:[%s21584_s3 + $0xca4] ss:$16 sps:$4 sm:$0xff]  }
 0x452   :  { %8914 = vmatpush1.bf16.msra.mxu1 %v13985_v18  ;;  %8769 = vmatprep.subr.bf16.mxu0 %v13990_v11  ;;  %v14047_v18 = vld [vmem:[%s21584_s3 + $0xcac] ss:$16 sps:$4 sm:$0xff]   ;;  %v14306_v11 = vld [vmem:[#allocation3 + $0xa0] sm:$0xee] }
 0x453   :  { %8915 = vmatprep.subr.bf16.mxu1 %v13993_v48  ;;  %v7875_v48 = vshrl.u32 %v14306_v11, 16 }
 0x455   :  { %8770 = vmatpush1.bf16.msra.mxu0 %v13988_v36  ;;  %v7878_v36 = vshll.u32 %v14306_v11, 16  ;;  %v14063_v11 = vld [vmem:[%s21584_s3 + $0xd08] ss:$16 sps:$4 sm:$0xff]  }
 0x456   :  { %8916 = vmatpush1.bf16.msra.mxu1 %v13991_v29  ;;  %8771 = vmatprep.subr.bf16.mxu0 %v13996_v57  ;;  %v14042_v29 = vld [vmem:[%s21584_s3 + $0xca0] ss:$16 sps:$4 sm:$0xff]  }
 0x457   :  { %7488 = vmatmul.mubr.bf16.gmra.mrb[60].mxu0 %v19008_v15  ;;  %8917 = vmatprep.subr.bf16.mxu1 %v13999_v39  ;;  %v14307_v57 = vld [vmem:[#allocation3 + $0x80] sm:$0xee] }
 0x458   :  { %7634 = vmatmul.mubr.bf16.gmra.mrb[60].mxu1 %v19008_v15  ;;  %8791 = vmatprep.mubr.bf16.mxu0 %v22547_v43  ;;  %v14011_v15 = vld [vmem:[%s21584_s3 + $0xbec] ss:$16 sps:$4 sm:$0xff]   ;;  %v7839_v39 = vshrl.u32 %v14307_v57, 16 }
 0x459   :  { %8772 = vmatpush1.bf16.msra.mxu0 %v13994_v58  ;;  %8937 = vmatprep.mubr.bf16.mxu1 %v22547_v43  ;;  %v7842_v58 = vshll.u32 %v14307_v57, 16  ;;  %v7877_v43 = vrot.slane %v7875_v48, 5  ;;  %v14068_v48 = vld [vmem:[%s21584_s3 + $0xd24] ss:$16 sps:$4 sm:$0xff]   ;;  %v14066_v57 = vld [vmem:[%s21584_s3 + $0xd20] ss:$16 sps:$4 sm:$0xff]  }
 0x45a   :  { %8918 = vmatpush1.bf16.msra.mxu1 %v13997_v5  ;;  %8773 = vmatprep.subr.bf16.mxu0 %v14002_v38  ;;  %v14045_v5 = vld [vmem:[%s21584_s3 + $0xca8] ss:$16 sps:$4 sm:$0xff]   ;;  %v14050_v38 = vld [vmem:[%s21584_s3 + $0xcc4] ss:$16 sps:$4 sm:$0xff]  }
 0x45b   :  { %8919 = vmatprep.subr.bf16.mxu1 %v14005_v19  ;;  %v14053_v19 = vld [vmem:[%s21584_s3 + $0xccc] ss:$16 sps:$4 sm:$0xff]  }
 0x45d   :  { %8774 = vmatpush1.bf16.msra.mxu0 %v14000_v16  ;;  %v7880_v16 = vrot.slane %v7878_v36, 6 }
 0x45e   :  { %8920 = vmatpush1.bf16.msra.mxu1 %v14003_v21  ;;  %8775 = vmatprep.subr.bf16.mxu0 %v14008_v20  ;;  %v14048_v21 = vld [vmem:[%s21584_s3 + $0xcc0] ss:$16 sps:$4 sm:$0xff]   ;;  %v7841_v20 = vrot.slane %v7839_v39, 5 }
 0x45f   :  { %8921 = vmatprep.subr.bf16.mxu1 %v14011_v15  ;;  %v7844_v15 = vrot.slane %v7842_v58, 6  ;;  %v14069_v58 = vld [vmem:[%s21584_s3 + $0xd28] ss:$16 sps:$4 sm:$0xff]  }
 0x461   :  { %8776 = vmatpush1.bf16.msra.mxu0 %v14006_v23  ;;  %v14051_v23 = vld [vmem:[%s21584_s3 + $0xcc8] ss:$16 sps:$4 sm:$0xff]  }
 0x462   :  { %8922 = vmatpush1.bf16.msra.mxu1 %v14009_v25  ;;  %8777 = vmatprep.subr.bf16.mxu0 %v14014_v47  ;;  %v14056_v25 = vld [vmem:[%s21584_s3 + $0xce4] ss:$16 sps:$4 sm:$0xff]  }
 0x463   :  { %8923 = vmatprep.subr.bf16.mxu1 %v14017_v3  ;;  %v14308_v47 = vld [vmem:[#allocation3 + $0xb0] sm:$0x33] }
 0x464   :  { %v7884_v3 = vshrl.u32 %v14308_v47, 16 }
 0x465   :  { %8778 = vmatpush1.bf16.msra.mxu0 %v14012_v8  ;;  %v7887_v8 = vshll.u32 %v14308_v47, 16  ;;  %v14084_v47 = vld [vmem:[%s21584_s3 + $0xd80] ss:$16 sps:$4 sm:$0xff]  }
 0x466   :  { %8924 = vmatpush1.bf16.msra.mxu1 %v14015_v30  ;;  %8779 = vmatprep.subr.bf16.mxu0 %v14020_v33  ;;  %v14059_v30 = vld [vmem:[%s21584_s3 + $0xcec] ss:$16 sps:$4 sm:$0xff]   ;;  %v14309_v33 = vld [vmem:[#allocation3 + $0x90] sm:$0x33] }
 0x467   :  { %8925 = vmatprep.subr.bf16.mxu1 %v14023_v51  ;;  %v7848_v51 = vshrl.u32 %v14309_v33, 16 }
 0x469   :  { %8780 = vmatpush1.bf16.msra.mxu0 %v14018_v6  ;;  %v7851_v6 = vshll.u32 %v14309_v33, 16  ;;  %v14093_v33 = vld [vmem:[%s21584_s3 + $0xda8] ss:$16 sps:$4 sm:$0xff]  }
 0x46a   :  { %8926 = vmatpush1.bf16.msra.mxu1 %v14021_v44  ;;  %8781 = vmatprep.subr.bf16.mxu0 %v14026_v54  ;;  %v7881_v44 = vor.u32 %v7880_v16, %v7877_v43  ;;  %v14054_v54 = vld [vmem:[%s21584_s3 + $0xce0] ss:$16 sps:$4 sm:$0xff]   ;;  %v14075_v43 = vld [vmem:[%s21584_s3 + $0xd48] ss:$16 sps:$4 sm:$0xff]   ;;  %v14080_v16 = vld [vmem:[%s21584_s3 + $0xd64] ss:$16 sps:$4 sm:$0xff]  }
 0x46b   :  { %8927 = vmatprep.subr.bf16.mxu1 %v14029_v2  ;;  %v7845_v2 = vor.u32 %v7844_v15, %v7841_v20  ;;  %v14078_v20 = vld [vmem:[%s21584_s3 + $0xd60] ss:$16 sps:$4 sm:$0xff]   ;;  %v14081_v15 = vld [vmem:[%s21584_s3 + $0xd68] ss:$16 sps:$4 sm:$0xff]  }
 0x46d   :  { %8782 = vmatpush1.bf16.msra.mxu0 %v14024_v45  ;;  %v7886_v45 = vrot.slane %v7884_v3, 5  ;;  %v14087_v3 = vld [vmem:[%s21584_s3 + $0xd88] ss:$16 sps:$4 sm:$0xff]  }
 0x46e   :  { %8928 = vmatpush1.bf16.msra.mxu1 %v14027_v28  ;;  %8783 = vmatprep.subr.bf16.mxu0 %v14032_v17  ;;  %v7889_v28 = vrot.slane %v7887_v8, 6  ;;  %v14057_v17 = vld [vmem:[%s21584_s3 + $0xce8] ss:$16 sps:$4 sm:$0xff]   ;;  %v14092_v8 = vld [vmem:[%s21584_s3 + $0xda4] ss:$16 sps:$4 sm:$0xff]  }
 0x46f   :  { %8929 = vmatprep.subr.bf16.mxu1 %v14035_v10  ;;  %v14062_v10 = vld [vmem:[%s21584_s3 + $0xd04] ss:$16 sps:$4 sm:$0xff]  }
 0x471   :  { %8784 = vmatpush1.bf16.msra.mxu0 %v14030_v59  ;;  %v22548_v59 = vld [vmem:[#allocation39_spill] sm:$0xff] }
 0x472   :  { %8930 = vmatpush1.bf16.msra.mxu1 %v14033_v55  ;;  %8785 = vmatprep.subr.bf16.mxu0 %v14038_v63  ;;  %v14065_v55 = vld [vmem:[%s21584_s3 + $0xd0c] ss:$16 sps:$4 sm:$0xff]   ;;  %v7850_v63 = vrot.slane %v7848_v51, 5  ;;  %v14098_v51 = vld [vmem:[%s21584_s3 + $0xdc4] ss:$16 sps:$4 sm:$0xff]  }
 0x473   :  { %8931 = vmatprep.subr.bf16.mxu1 %v14041_v26  ;;  %v7853_v26 = vrot.slane %v7851_v6, 6  ;;  %v14101_v6 = vld [vmem:[%s21584_s3 + $0xdcc] ss:$16 sps:$4 sm:$0xff]  }
 0x475   :  { %8786 = vmatpush1.bf16.msra.mxu0 %v14036_v42  ;;  %v7882_v42 = vrot.slane %v7881_v44, 4  ;;  %v7854_v36 = vor.u32 %v7853_v26, %v7850_v63  ;;  %v14096_v44 = vld [vmem:[%s21584_s3 + $0xdc0] ss:$16 sps:$4 sm:$0xff]   ;;  %v14119_v63 = vld [vmem:[%s21584_s3 + $0xe2c] ss:$16 sps:$4 sm:$0xff]  }
 0x476   :  { %8932 = vmatpush1.bf16.msra.mxu1 %v14039_v9  ;;  %8787 = vmatprep.subr.bf16.mxu0 %v14044_v35  ;;  %v14060_v9 = vld [vmem:[%s21584_s3 + $0xd00] ss:$16 sps:$4 sm:$0xff]   ;;  %v7846_v35 = vrot.slane %v7845_v2, 4  ;;  %v14107_v2 = vld [vmem:[%s21584_s3 + $0xdec] ss:$16 sps:$4 sm:$0xff]  }
 0x477   :  { %8933 = vmatprep.subr.bf16.mxu1 %v14047_v18  ;;  %v7890_v18 = vor.u32 %v7889_v28, %v7886_v45  ;;  %v14105_v45 = vld [vmem:[%s21584_s3 + $0xde8] ss:$16 sps:$4 sm:$0xff]   ;;  %v14110_v28 = vld [vmem:[%s21584_s3 + $0xe04] ss:$16 sps:$4 sm:$0xff]   ;;  %v14114_v26 = vld [vmem:[%s21584_s3 + $0xe20] ss:$16 sps:$4 sm:$0xff]  }
 0x478   :  { %v7855_v39 = vsel %vm22522_vm1, %v7846_v35, %v7854_v36  ;;  %v14125_v35 = vld [vmem:[%s21584_s3 + $0xe4c] ss:$16 sps:$4 sm:$0xff]  }
 0x479   :  { %8788 = vmatpush1.bf16.msra.mxu0 %v14042_v29  ;;  %v7891_v29 = vsel %vm22522_vm1, %v7882_v42, %v7890_v18  ;;  %v14117_v42 = vld [vmem:[%s21584_s3 + $0xe28] ss:$16 sps:$4 sm:$0xff]   ;;  %v14120_v18 = vld [vmem:[%s21584_s3 + $0xe40] ss:$16 sps:$4 sm:$0xff]   ;;  %vm22552_vm1 = vmmov %vm22534_vm0 }
 0x47a   :  { %8934 = vmatpush1.bf16.msra.mxu1 %v14045_v5  ;;  %8789 = vmatprep.subr.bf16.mxu0 %v14050_v38  ;;  %v12213_v5 = vcombine.high %v7855_v39, %v7891_v29  ;;  %v14074_v38 = vld [vmem:[%s21584_s3 + $0xd44] ss:$16 sps:$4 sm:$0xff]   ;;  %v14128_v36 = vld [vmem:[%s21584_s3 + $0xe6c] ss:$16 sps:$4 sm:$0x3f]  }
 0x47b   :  { %8935 = vmatprep.subr.bf16.mxu1 %v14053_v19  ;;  %v14077_v19 = vld [vmem:[%s21584_s3 + $0xd4c] ss:$16 sps:$4 sm:$0xff]  }
 0x47d   :  { %8790 = vmatpush1.bf16.msra.mxu0 %v14048_v21  ;;  %v12212_v21 = vcombine.low %v7855_v39, %v7891_v29  ;;  %v14131_v29 = vld [vmem:[%s21584_s3 + $0xe68] ss:$16 sps:$4 sm:$0x3f]   ;;  %v14134_v39 = vld [vmem:[%s21584_s3 + $0xe84] ss:$16 sps:$4 sm:$0xff]  }
 0x47e   :  { %8936 = vmatpush1.bf16.msra.mxu1 %v14051_v23  ;;  %8832 = vmatprep.subr.bf16.mxu0 %v14056_v25  ;;  %v14086_v23 = vld [vmem:[%s21584_s3 + $0xd84] ss:$16 sps:$4 sm:$0xff]   ;;  %v14089_v25 = vld [vmem:[%s21584_s3 + $0xd8c] ss:$16 sps:$4 sm:$0xff]  }
 0x47f   :  { %8978 = vmatprep.subr.bf16.mxu1 %v14059_v30  ;;  %v14095_v30 = vld [vmem:[%s21584_s3 + $0xdac] ss:$16 sps:$4 sm:$0xff]  }
 0x480   :  { %8792 = vmatmul.mubr.bf16.vlgmr.msra.gmra.mrb[48].mxu0 %v22548_v59 }
 0x481   :  { %8938 = vmatmul.mubr.bf16.vlgmr.msra.gmra.mrb[48].mxu1 %v22548_v59  ;;  %8801 = vmatprep.mubr.bf16.mxu0 %v18992_v37  ;;  %v14111_v59 = vld [vmem:[%s21584_s3 + $0xe08] ss:$16 sps:$4 sm:$0xff]  }
 0x482   :  { %8833 = vmatpush1.bf16.msra.mxu0 %v14054_v54  ;;  %8947 = vmatprep.mubr.bf16.mxu1 %v18992_v37  ;;  %v14071_v37 = vld [vmem:[%s21584_s3 + $0xd2c] ss:$16 sps:$4 sm:$0xff]   ;;  %v14099_v54 = vld [vmem:[%s21584_s3 + $0xdc8] ss:$16 sps:$4 sm:$0xff]  }
 0x483   :  { %8979 = vmatpush1.bf16.msra.mxu1 %v14057_v17  ;;  %8834 = vmatprep.subr.bf16.mxu0 %v14062_v10  ;;  %v14113_v17 = vld [vmem:[%s21584_s3 + $0xe0c] ss:$16 sps:$4 sm:$0xff]   ;;  %v14108_v10 = vld [vmem:[%s21584_s3 + $0xe00] ss:$16 sps:$4 sm:$0xff]  }
 0x484   :  { %8980 = vmatprep.subr.bf16.mxu1 %v14065_v55  ;;  %v14116_v55 = vld [vmem:[%s21584_s3 + $0xe24] ss:$16 sps:$4 sm:$0xff]  }
 0x486   :  { %8835 = vmatpush1.bf16.msra.mxu0 %v14060_v9  ;;  %v14122_v9 = vld [vmem:[%s21584_s3 + $0xe44] ss:$16 sps:$4 sm:$0xff]  }
 0x487   :  { %8981 = vmatpush1.bf16.msra.mxu1 %v14063_v11  ;;  %8836 = vmatprep.subr.bf16.mxu0 %v14068_v48  ;;  %v14123_v11 = vld [vmem:[%s21584_s3 + $0xe48] ss:$16 sps:$4 sm:$0xff]   ;;  %v14126_v48 = vld [vmem:[%s21584_s3 + $0xe64] ss:$16 sps:$4 sm:$0x3f]  }
 0x488   :  { %8802 = vmatmul.mubr.bf16.gmra.mrb[52].mxu0 %v19010_v41  ;;  %8982 = vmatprep.subr.bf16.mxu1 %v14071_v37  ;;  %v14130_v37 = vld [vmem:[%s21584_s3 + $0xe60] ss:$16 sps:$4 sm:$0x3f]  }
 0x489   :  { %8948 = vmatmul.mubr.bf16.gmra.mrb[52].mxu1 %v19010_v41  ;;  %8811 = vmatprep.mubr.bf16.mxu0 %v12213_v5  ;;  %v14083_v41 = vld [vmem:[%s21584_s3 + $0xd6c] ss:$16 sps:$4 sm:$0xff]  }
 0x48a   :  { %8837 = vmatpush1.bf16.msra.mxu0 %v14066_v57  ;;  %8957 = vmatprep.mubr.bf16.mxu1 %v12213_v5  ;;  %v8748_v57 = vsel %vm22550_vm12, %v14130_v37, 0  ;;  %v14137_v5 = vld [vmem:[%s21584_s3 + $0xe8c] ss:$16 sps:$4 sm:$0xff]   ;;  %v14180_v37 = vld [vmem:[%s21584_s3 + $0xf80] ss:$16 sps:$4 sm:$0xff]   ;;  %vm22584_vm12 = vmmov %vm22564_vm5 }
 0x48b   :  { %8983 = vmatpush1.bf16.msra.mxu1 %v14069_v58  ;;  %8838 = vmatprep.subr.bf16.mxu0 %v14074_v38  ;;  %v8754_v58 = vsel %vm22552_vm1, %v14131_v29, 0  ;;  %v14132_v38 = vld [vmem:[%s21584_s3 + $0xe80] ss:$16 sps:$4 sm:$0xff]   ;;  %v14188_v29 = vld [vmem:[%s21584_s3 + $0xfa4] ss:$16 sps:$4 sm:$0xff]   ;;  %vm22587_vm1 = vcmask 1045509  }
 0x48c   :  { %8984 = vmatprep.subr.bf16.mxu1 %v14077_v19  ;;  %v14135_v19 = vld [vmem:[%s21584_s3 + $0xe88] ss:$16 sps:$4 sm:$0xff]  }
 0x48e   :  { %8839 = vmatpush1.bf16.msra.mxu0 %v14072_v31  ;;  %v14140_v31 = vld [vmem:[%s21584_s3 + $0xea4] ss:$16 sps:$4 sm:$0xff]  }
 0x48f   :  { %8985 = vmatpush1.bf16.msra.mxu1 %v14075_v43  ;;  %8840 = vmatprep.subr.bf16.mxu0 %v14080_v16  ;;  %v14143_v43 = vld [vmem:[%s21584_s3 + $0xeac] ss:$16 sps:$4 sm:$0xff]   ;;  %v14138_v16 = vld [vmem:[%s21584_s3 + $0xea0] ss:$16 sps:$4 sm:$0xff]  }
 0x490   :  { %8812 = vmatmul.mubr.bf16.gmra.mrb[56].mxu0 %v12212_v21  ;;  %8986 = vmatprep.subr.bf16.mxu1 %v14083_v41  ;;  %v14141_v41 = vld [vmem:[%s21584_s3 + $0xea8] ss:$16 sps:$4 sm:$0xff]  }
 0x491   :  { %8958 = vmatmul.mubr.bf16.gmra.mrb[56].mxu1 %v12212_v21  ;;  %8821 = vmatprep.mubr.bf16.mxu0 %v19114_v12  ;;  %v14144_v21 = vld [vmem:[%s21584_s3 + $0xec0] ss:$16 sps:$4 sm:$0xff]  }
 0x492   :  { %8841 = vmatpush1.bf16.msra.mxu0 %v14078_v20  ;;  %8967 = vmatprep.mubr.bf16.mxu1 %v19114_v12  ;;  %v14090_v12 = vld [vmem:[%s21584_s3 + $0xda0] ss:$16 sps:$4 sm:$0xff]   ;;  %v14147_v20 = vld [vmem:[%s21584_s3 + $0xec8] ss:$16 sps:$4 sm:$0xff]  }
 0x493   :  { %8987 = vmatpush1.bf16.msra.mxu1 %v14081_v15  ;;  %8842 = vmatprep.subr.bf16.mxu0 %v14086_v23  ;;  %v14152_v15 = vld [vmem:[%s21584_s3 + $0xee4] ss:$16 sps:$4 sm:$0xff]   ;;  %v14155_v23 = vld [vmem:[%s21584_s3 + $0xeec] ss:$16 sps:$4 sm:$0xff]  }
 0x494   :  { %8988 = vmatprep.subr.bf16.mxu1 %v14089_v25  ;;  %v14150_v25 = vld [vmem:[%s21584_s3 + $0xee0] ss:$16 sps:$4 sm:$0xff]  }
 0x496   :  { %8843 = vmatpush1.bf16.msra.mxu0 %v14084_v47  ;;  %v14153_v47 = vld [vmem:[%s21584_s3 + $0xee8] ss:$16 sps:$4 sm:$0xff]  }
 0x497   :  { %8989 = vmatpush1.bf16.msra.mxu1 %v14087_v3  ;;  %8844 = vmatprep.subr.bf16.mxu0 %v14092_v8  ;;  %v9085_v3 = vld [vmem:[#allocation3 + $0x20] sm:$0xcc] }
 0x498   :  { %8822 = vmatmul.mubr.bf16.gmra.mrb[60].mxu0 %v19116_v62  ;;  %8990 = vmatprep.subr.bf16.mxu1 %v14095_v30  ;;  %v14156_v8 = vld [vmem:[%s21584_s3 + $0xf00] ss:$16 sps:$4 sm:$0xff]   ;;  %v14159_v30 = vld [vmem:[%s21584_s3 + $0xf08] ss:$16 sps:$4 sm:$0xff]  }
 0x499   :  { %8968 = vmatmul.mubr.bf16.gmra.mrb[60].mxu1 %v19116_v62  ;;  %12337 = vmatprep.mubr.msk.bf16.mxu0 %vm5175_vm3, %v19146_v32  ;;  %v14104_v62 = vld [vmem:[%s21584_s3 + $0xde4] ss:$16 sps:$4 sm:$0xff]  }
 0x49a   :  { %8845 = vmatpush1.bf16.msra.mxu0 %v14090_v12  ;;  %12342 = vmatprep.mubr.msk.bf16.mxu1 %vm5175_vm3, %v19146_v32  ;;  %v14102_v32 = vld [vmem:[%s21584_s3 + $0xde0] ss:$16 sps:$4 sm:$0xff]   ;;  %v14164_v12 = vld [vmem:[%s21584_s3 + $0xf24] ss:$16 sps:$4 sm:$0xff]  }
 0x49b   :  { %8991 = vmatpush1.bf16.msra.mxu1 %v14093_v33  ;;  %8846 = vmatprep.subr.bf16.mxu0 %v14098_v51  ;;  %v9083_v33 = vld [vmem:[#allocation3] sm:$0xcc]  ;;  %v22553_v51 = vld [vmem:[#allocation66_spill] sm:$0xff] }
 0x49c   :  { %8992 = vmatprep.subr.bf16.mxu1 %v14101_v6  ;;  %v14167_v6 = vld [vmem:[%s21584_s3 + $0xf2c] ss:$16 sps:$4 sm:$0xff]  }
 0x49e   :  { %8847 = vmatpush1.bf16.msra.mxu0 %v14096_v44  ;;  %v12348_v44 = vrot.slane %v9085_v3, 10  ;;  %v14221_v3 = vld [vmem:[%s21584_s3 + $0x104c] ss:$16 sps:$4 sm:$0xff]  }
 0x49f   :  { %8993 = vmatpush1.bf16.msra.mxu1 %v14099_v54  ;;  %8848 = vmatprep.subr.bf16.mxu0 %v14104_v62  ;;  %v14310_v54 = vld [vmem:[#allocation3 + $0x30] sm:$0x33] }
 0x4a0   :  { %8994 = vmatprep.subr.bf16.mxu1 %v14107_v2  ;;  %v9144_v62 = vrot.slane %v14310_v54, 6  ;;  %v14162_v2 = vld [vmem:[%s21584_s3 + $0xf20] ss:$16 sps:$4 sm:$0xff]  }
 0x4a1   :  { %v14312_v54 = vld [vmem:[#allocation3 + $0x70] sm:$0x33] }
 0x4a2   :  { %8849 = vmatpush1.bf16.msra.mxu0 %v14102_v32  ;;  %v12346_v32 = vrot.slane %v9083_v33, 10  ;;  %v14224_v33 = vld [vmem:[%s21584_s3 + $0x1064] ss:$16 sps:$4 sm:$0xff]  }
 0x4a3   :  { %8995 = vmatpush1.bf16.msra.mxu1 %v14105_v45  ;;  %8850 = vmatprep.subr.bf16.mxu0 %v14110_v28  ;;  %v14311_v45 = vld [vmem:[#allocation3 + $0x10] sm:$0x33] }
 0x4a4   :  { %8996 = vmatprep.subr.bf16.mxu1 %v14113_v17  ;;  %v9136_v28 = vrot.slane %v14311_v45, 6  ;;  %v14165_v17 = vld [vmem:[%s21584_s3 + $0xf28] ss:$16 sps:$4 sm:$0xff]   ;;  %v14230_v45 = vld [vmem:[%s21584_s3 + $0x1084] ss:$16 sps:$4 sm:$0xff]  }
 0x4a6   :  { %8851 = vmatpush1.bf16.msra.mxu0 %v14108_v10  ;;  %v14170_v10 = vld [vmem:[%s21584_s3 + $0xf44] ss:$16 sps:$4 sm:$0xff]  }
 0x4a7   :  { %8997 = vmatpush1.bf16.msra.mxu1 %v14111_v59  ;;  %8852 = vmatprep.subr.bf16.mxu0 %v14116_v55  ;;  %v20346_v59 = vsel %vm19276_vm15, %v12348_v44, %v9144_v62  ;;  %v14168_v55 = vld [vmem:[%s21584_s3 + $0xf40] ss:$16 sps:$4 sm:$0xff]   ;;  %v9160_v62 = vrot.slane %v14312_v54, 6  ;;  %v14299_v54 = vld [vmem:[%s21584_s3 + $0x11ec] ss:$16 sps:$4 sm:$0xff]  }
 0x4a8   :  { %8998 = vmatprep.subr.bf16.mxu1 %v14119_v63  ;;  %v20353_v63 = vsel %vm19276_vm15, %v12346_v32, %v9136_v28  ;;  %v14225_v32 = vld [vmem:[%s21584_s3 + $0x1068] ss:$16 sps:$4 sm:$0xff]  }
 0x4aa   :  { %8853 = vmatpush1.bf16.msra.mxu0 %v14114_v26  ;;  %v14171_v26 = vld [vmem:[%s21584_s3 + $0xf48] ss:$16 sps:$4 sm:$0xff]  }
 0x4ab   :  { %8999 = vmatpush1.bf16.msra.mxu1 %v14117_v42  ;;  %8854 = vmatprep.subr.bf16.mxu0 %v14122_v9  ;;  %v12479_v42 = vcombine.high %v20353_v63, %v20346_v59  ;;  %v14176_v9 = vld [vmem:[%s21584_s3 + $0xf64] ss:$16 sps:$4 sm:$0xff]  }
 0x4ac   :  { %9000 = vmatprep.subr.bf16.mxu1 %v14125_v35  ;;  %v14179_v35 = vld [vmem:[%s21584_s3 + $0xf6c] ss:$16 sps:$4 sm:$0xff]  }
 0x4ae   :  { %8855 = vmatpush1.bf16.msra.mxu0 %v14120_v18  ;;  %v14174_v18 = vld [vmem:[%s21584_s3 + $0xf60] ss:$16 sps:$4 sm:$0xff]  }
 0x4af   :  { %9001 = vmatpush1.bf16.msra.mxu1 %v14123_v11  ;;  %12336 = vmatprep.subr.msk.bf16.mxu0 %vm22549_vm10, %v14126_v48  ;;  %v14177_v11 = vld [vmem:[%s21584_s3 + $0xf68] ss:$16 sps:$4 sm:$0xff]   ;;  %v14182_v48 = vld [vmem:[%s21584_s3 + $0xf84] ss:$16 sps:$4 sm:$0xff]   ;;  %vm22582_vm10 = vcmask 1044484  }
 0x4b0   :  { %12341 = vmatprep.subr.msk.bf16.mxu1 %vm22551_vm2, %v14128_v36  ;;  %v14183_v36 = vld [vmem:[%s21584_s3 + $0xf88] ss:$16 sps:$4 sm:$0xff]   ;;  %vm22586_vm2 = vmmov %vm22580_vm7 }
 0x4b2   :  { %8857 = vmatpush1.bf16.msra.mxu0 %v8748_v57  ;;  %v14191_v57 = vld [vmem:[%s21584_s3 + $0xfac] ss:$16 sps:$4 sm:$0xff]  }
 0x4b3   :  { %9003 = vmatpush1.bf16.msra.mxu1 %v8754_v58  ;;  %9975 = vmatprep.subr.bf16.mxu0 %v14134_v39  ;;  %v14186_v39 = vld [vmem:[%s21584_s3 + $0xfa0] ss:$16 sps:$4 sm:$0xff]   ;;  %v14189_v58 = vld [vmem:[%s21584_s3 + $0xfa8] ss:$16 sps:$4 sm:$0xff]  }
 0x4b4   :  { %10121 = vmatprep.subr.bf16.mxu1 %v14137_v5  ;;  %v14194_v5 = vld [vmem:[%s21584_s3 + $0xfc4] ss:$16 sps:$4 sm:$0xff]  }
 0x4b5   :  { %8865 = vmatmul.mubr.bf16.vlgmr.msra.gmra.mrb[48].mxu0 %v19144_v1 }
 0x4b6   :  { %9011 = vmatmul.mubr.bf16.vlgmr.msra.gmra.mrb[48].mxu1 %v19144_v1  ;;  %12338 = vmatprep.mubr.msk.bf16.mxu0 %vm5175_vm3, %v19194_v4  ;;  %v14146_v1 = vld [vmem:[%s21584_s3 + $0xec4] ss:$16 sps:$4 sm:$0xff]  }
 0x4b7   :  { %12343 = vmatprep.mubr.msk.bf16.mxu1 %vm5175_vm3, %v19194_v4  ;;  %9976 = vmatpush1.bf16.msra.mxu0 %v14132_v38  ;;  %v14149_v4 = vld [vmem:[%s21584_s3 + $0xecc] ss:$16 sps:$4 sm:$0xff]  }
 0x4b8   :  { %10122 = vmatpush1.bf16.msra.mxu1 %v14135_v19  ;;  %9977 = vmatprep.subr.bf16.mxu0 %v14140_v31  ;;  %v14197_v38 = vld [vmem:[%s21584_s3 + $0xfcc] ss:$16 sps:$4 sm:$0xff]   ;;  %v14192_v19 = vld [vmem:[%s21584_s3 + $0xfc0] ss:$16 sps:$4 sm:$0xff]   ;;  %v14195_v31 = vld [vmem:[%s21584_s3 + $0xfc8] ss:$16 sps:$4 sm:$0xff]  }
 0x4b9   :  { %10123 = vmatprep.subr.bf16.mxu1 %v14143_v43  ;;  %v14200_v43 = vld [vmem:[%s21584_s3 + $0xfe4] ss:$16 sps:$4 sm:$0xff]  }
 0x4bb   :  { %9978 = vmatpush1.bf16.msra.mxu0 %v14138_v16  ;;  %v14203_v16 = vld [vmem:[%s21584_s3 + $0xfec] ss:$16 sps:$4 sm:$0xff]  }
 0x4bc   :  { %10124 = vmatpush1.bf16.msra.mxu1 %v14141_v41  ;;  %9979 = vmatprep.subr.bf16.mxu0 %v14146_v1  ;;  %v14198_v41 = vld [vmem:[%s21584_s3 + $0xfe0] ss:$16 sps:$4 sm:$0xff]   ;;  %v14201_v1 = vld [vmem:[%s21584_s3 + $0xfe8] ss:$16 sps:$4 sm:$0xff]  }
 0x4bd   :  { %8875 = vmatmul.mubr.bf16.gmra.mrb[52].mxu0 %v19196_v52  ;;  %10125 = vmatprep.subr.bf16.mxu1 %v14149_v4  ;;  %v14206_v4 = vld [vmem:[%s21584_s3 + $0x1004] ss:$16 sps:$4 sm:$0xff]  }
 0x4be   :  { %9021 = vmatmul.mubr.bf16.gmra.mrb[52].mxu1 %v19196_v52  ;;  %12339 = vmatprep.mubr.msk.bf16.mxu0 %vm5175_vm3, %v19235_v22  ;;  %v14158_v52 = vld [vmem:[%s21584_s3 + $0xf04] ss:$16 sps:$4 sm:$0xff]  }
 0x4bf   :  { %12344 = vmatprep.mubr.msk.bf16.mxu1 %vm5175_vm3, %v19235_v22  ;;  %9980 = vmatpush1.bf16.msra.mxu0 %v14144_v21  ;;  %v14161_v22 = vld [vmem:[%s21584_s3 + $0xf0c] ss:$16 sps:$4 sm:$0xff]  }
 0x4c0   :  { %10126 = vmatpush1.bf16.msra.mxu1 %v14147_v20  ;;  %9981 = vmatprep.subr.bf16.mxu0 %v14152_v15  ;;  %v14209_v21 = vld [vmem:[%s21584_s3 + $0x100c] ss:$16 sps:$4 sm:$0xff]   ;;  %v14204_v20 = vld [vmem:[%s21584_s3 + $0x1000] ss:$16 sps:$4 sm:$0xff]   ;;  %v14207_v15 = vld [vmem:[%s21584_s3 + $0x1008] ss:$16 sps:$4 sm:$0xff]  }
 0x4c1   :  { %10127 = vmatprep.subr.bf16.mxu1 %v14155_v23  ;;  %v14212_v23 = vld [vmem:[%s21584_s3 + $0x1024] ss:$16 sps:$4 sm:$0xff]  }
 0x4c3   :  { %9982 = vmatpush1.bf16.msra.mxu0 %v14150_v25  ;;  %v14215_v25 = vld [vmem:[%s21584_s3 + $0x102c] ss:$16 sps:$4 sm:$0xff]  }
 0x4c4   :  { %10128 = vmatpush1.bf16.msra.mxu1 %v14153_v47  ;;  %9983 = vmatprep.subr.bf16.mxu0 %v14158_v52  ;;  %v14210_v47 = vld [vmem:[%s21584_s3 + $0x1020] ss:$16 sps:$4 sm:$0xff]   ;;  %v14213_v52 = vld [vmem:[%s21584_s3 + $0x1028] ss:$16 sps:$4 sm:$0xff]  }
 0x4c5   :  { %8885 = vmatmul.mubr.bf16.gmra.mrb[56].mxu0 %v22553_v51  ;;  %10129 = vmatprep.subr.bf16.mxu1 %v14161_v22  ;;  %v14218_v22 = vld [vmem:[%s21584_s3 + $0x1044] ss:$16 sps:$4 sm:$0xff]  }
 0x4c6   :  { %9031 = vmatmul.mubr.bf16.gmra.mrb[56].mxu1 %v22553_v51  ;;  %12340 = vmatprep.mubr.msk.bf16.mxu0 %vm5175_vm3, %v19270_v27  ;;  %v14227_v51 = vld [vmem:[%s21584_s3 + $0x106c] ss:$16 sps:$4 sm:$0xff]  }
 0x4c7   :  { %12345 = vmatprep.mubr.msk.bf16.mxu1 %vm5175_vm3, %v19270_v27  ;;  %9984 = vmatpush1.bf16.msra.mxu0 %v14156_v8  ;;  %v14173_v27 = vld [vmem:[%s21584_s3 + $0xf4c] ss:$16 sps:$4 sm:$0xff]   ;;  %v14216_v8 = vld [vmem:[%s21584_s3 + $0x1040] ss:$16 sps:$4 sm:$0xff]  }
 0x4c8   :  { %10130 = vmatpush1.bf16.msra.mxu1 %v14159_v30  ;;  %9985 = vmatprep.subr.bf16.mxu0 %v14164_v12  ;;  %v9089_v30 = vld [vmem:[#allocation3 + $0x60] sm:$0xcc]  ;;  %v14219_v12 = vld [vmem:[%s21584_s3 + $0x1048] ss:$16 sps:$4 sm:$0xff]  }
 0x4c9   :  { %10131 = vmatprep.subr.bf16.mxu1 %v14167_v6  ;;  %v9087_v6 = vld [vmem:[#allocation3 + $0x40] sm:$0xcc]  ;;  %v12352_v44 = vrot.slane %v9089_v30, 10  ;;  %v14285_v30 = vld [vmem:[%s21584_s3 + $0x11a8] ss:$16 sps:$4 sm:$0xff]  }
 0x4ca   :  { %v12350_v28 = vrot.slane %v9087_v6, 10  ;;  %v14291_v6 = vld [vmem:[%s21584_s3 + $0x11c8] ss:$16 sps:$4 sm:$0xff]  }
 0x4cb   :  { %9986 = vmatpush1.bf16.msra.mxu0 %v14162_v2  ;;  %v14222_v2 = vld [vmem:[%s21584_s3 + $0x1060] ss:$16 sps:$4 sm:$0xff]  }
 0x4cc   :  { %10132 = vmatpush1.bf16.msra.mxu1 %v14165_v17  ;;  %9987 = vmatprep.subr.bf16.mxu0 %v14170_v10  ;;  %v14313_v17 = vld [vmem:[#allocation3 + $0x50] sm:$0x33] }
 0x4cd   :  { %8895 = vmatmul.mubr.bf16.gmra.mrb[60].mxu0 %v19272_v56  ;;  %10133 = vmatprep.subr.bf16.mxu1 %v14173_v27  ;;  %v9152_v10 = vrot.slane %v14313_v17, 6  ;;  %v14233_v27 = vld [vmem:[%s21584_s3 + $0x108c] ss:$16 sps:$4 sm:$0xff]   ;;  %v14305_v17 = vld [vmem:[%s21584_s3 + $0x1208] ss:$16 sps:$4 sm:$0x3f]  }
 0x4ce   :  { %9041 = vmatmul.mubr.bf16.gmra.mrb[60].mxu1 %v19272_v56  ;;  %10007 = vmatprep.mubr.bf16.mxu0 %v12479_v42  ;;  %v14185_v56 = vld [vmem:[%s21584_s3 + $0xf8c] ss:$16 sps:$4 sm:$0xff]  }
 0x4cf   :  { %9988 = vmatpush1.bf16.msra.mxu0 %v14168_v55  ;;  %10153 = vmatprep.mubr.bf16.mxu1 %v12479_v42  ;;  %v9161_v55 = vsel %vm19276_vm15, %v12352_v44, %v9160_v62  ;;  %v14228_v42 = vld [vmem:[%s21584_s3 + $0x1080] ss:$16 sps:$4 sm:$0xff]   ;;  %v14296_v44 = vld [vmem:[%s21584_s3 + $0x11e4] ss:$16 sps:$4 sm:$0xff]  }
 0x4d0   :  { %10134 = vmatpush1.bf16.msra.mxu1 %v14171_v26  ;;  %9989 = vmatprep.subr.bf16.mxu0 %v14176_v9  ;;  %v12478_v26 = vcombine.low %v20353_v63, %v20346_v59  ;;  %v9153_v9 = vsel %vm19276_vm15, %v12350_v28, %v9152_v10  ;;  %v14239_v59 = vld [vmem:[%s21584_s3 + $0x10ac] ss:$16 sps:$4 sm:$0xff]   ;;  %v14237_v63 = vld [vmem:[%s21584_s3 + $0x10a8] ss:$16 sps:$4 sm:$0xff]   ;;  %v14294_v62 = vld [vmem:[%s21584_s3 + $0x11e0] ss:$16 sps:$4 sm:$0xff]  }
 0x4d1   :  { %10135 = vmatprep.subr.bf16.mxu1 %v14179_v35  ;;  %v14231_v35 = vld [vmem:[%s21584_s3 + $0x1088] ss:$16 sps:$4 sm:$0xff]   ;;  %v14302_v28 = vld [vmem:[%s21584_s3 + $0x120c] ss:$16 sps:$4 sm:$0x3f]   ;;  %vm22556_vm15 = vmmov %vm22534_vm0  ;;  %vm22563_vm0 = vcmask 1041409  }
 0x4d2   :  { %vm22565_vm11 = vmmov %vm22563_vm0 }
 0x4d3   :  { %9990 = vmatpush1.bf16.msra.mxu0 %v14174_v18  ;;  %v12483_v18 = vcombine.high %v9153_v9, %v9161_v55  ;;  %vm22566_vm8 = vmmov %vm22563_vm0 }
 0x4d4   :  { %10136 = vmatpush1.bf16.msra.mxu1 %v14177_v11  ;;  %9991 = vmatprep.subr.bf16.mxu0 %v14182_v48  ;;  %v14236_v11 = vld [vmem:[%s21584_s3 + $0x10a4] ss:$16 sps:$4 sm:$0xff]   ;;  %vm22567_vm6 = vmmov %vm22563_vm0 }
 0x4d5   :  { %10137 = vmatprep.subr.bf16.mxu1 %v14185_v56  ;;  %v14242_v48 = vld [vmem:[%s21584_s3 + $0x10c4] ss:$16 sps:$4 sm:$0xff]   ;;  %v14245_v56 = vld [vmem:[%s21584_s3 + $0x10cc] ss:$16 sps:$4 sm:$0xff]  }
 0x4d7   :  { %9992 = vmatpush1.bf16.msra.mxu0 %v14180_v37  ;;  %v12482_v37 = vcombine.low %v9153_v9, %v9161_v55 }
 0x4d8   :  { %10138 = vmatpush1.bf16.msra.mxu1 %v14183_v36  ;;  %9993 = vmatprep.subr.bf16.mxu0 %v14188_v29  ;;  %v14240_v36 = vld [vmem:[%s21584_s3 + $0x10c0] ss:$16 sps:$4 sm:$0xff]   ;;  %v14243_v29 = vld [vmem:[%s21584_s3 + $0x10c8] ss:$16 sps:$4 sm:$0xff]  }
 0x4d9   :  { %10139 = vmatprep.subr.bf16.mxu1 %v14191_v57  ;;  %v14248_v57 = vld [vmem:[%s21584_s3 + $0x10e4] ss:$16 sps:$4 sm:$0xff]  }
 0x4db   :  { %9994 = vmatpush1.bf16.msra.mxu0 %v14186_v39  ;;  %v14251_v39 = vld [vmem:[%s21584_s3 + $0x10ec] ss:$16 sps:$4 sm:$0xff]  }
 0x4dc   :  { %10140 = vmatpush1.bf16.msra.mxu1 %v14189_v58  ;;  %9995 = vmatprep.subr.bf16.mxu0 %v14194_v5  ;;  %v14246_v58 = vld [vmem:[%s21584_s3 + $0x10e0] ss:$16 sps:$4 sm:$0xff]   ;;  %v14249_v5 = vld [vmem:[%s21584_s3 + $0x10e8] ss:$16 sps:$4 sm:$0xff]  }
 0x4dd   :  { %10141 = vmatprep.subr.bf16.mxu1 %v14197_v38  ;;  %v14254_v38 = vld [vmem:[%s21584_s3 + $0x1104] ss:$16 sps:$4 sm:$0xff]  }
 0x4df   :  { %9996 = vmatpush1.bf16.msra.mxu0 %v14192_v19  ;;  %v14257_v19 = vld [vmem:[%s21584_s3 + $0x110c] ss:$16 sps:$4 sm:$0xff]  }
 0x4e0   :  { %10142 = vmatpush1.bf16.msra.mxu1 %v14195_v31  ;;  %9997 = vmatprep.subr.bf16.mxu0 %v14200_v43  ;;  %v14255_v31 = vld [vmem:[%s21584_s3 + $0x1108] ss:$16 sps:$4 sm:$0xff]   ;;  %v14260_v43 = vld [vmem:[%s21584_s3 + $0x1124] ss:$16 sps:$4 sm:$0xff]  }
 0x4e1   :  { %10143 = vmatprep.subr.bf16.mxu1 %v14203_v16  ;;  %v14263_v16 = vld [vmem:[%s21584_s3 + $0x112c] ss:$16 sps:$4 sm:$0xff]  }
 0x4e3   :  { %9998 = vmatpush1.bf16.msra.mxu0 %v14198_v41  ;;  %v14258_v41 = vld [vmem:[%s21584_s3 + $0x1120] ss:$16 sps:$4 sm:$0xff]  }
 0x4e4   :  { %10144 = vmatpush1.bf16.msra.mxu1 %v14201_v1  ;;  %9999 = vmatprep.subr.bf16.mxu0 %v14206_v4  ;;  %v14261_v1 = vld [vmem:[%s21584_s3 + $0x1128] ss:$16 sps:$4 sm:$0xff]   ;;  %v14266_v4 = vld [vmem:[%s21584_s3 + $0x1144] ss:$16 sps:$4 sm:$0xff]  }
 0x4e5   :  { %10145 = vmatprep.subr.bf16.mxu1 %v14209_v21  ;;  %v14267_v21 = vld [vmem:[%s21584_s3 + $0x1148] ss:$16 sps:$4 sm:$0xff]  }
 0x4e7   :  { %10000 = vmatpush1.bf16.msra.mxu0 %v14204_v20  ;;  %v14272_v20 = vld [vmem:[%s21584_s3 + $0x1164] ss:$16 sps:$4 sm:$0xff]  }
 0x4e8   :  { %10146 = vmatpush1.bf16.msra.mxu1 %v14207_v15  ;;  %10001 = vmatprep.subr.bf16.mxu0 %v14212_v23  ;;  %v14275_v15 = vld [vmem:[%s21584_s3 + $0x116c] ss:$16 sps:$4 sm:$0xff]   ;;  %v14270_v23 = vld [vmem:[%s21584_s3 + $0x1160] ss:$16 sps:$4 sm:$0xff]  }
 0x4e9   :  { %10147 = vmatprep.subr.bf16.mxu1 %v14215_v25  ;;  %v14273_v25 = vld [vmem:[%s21584_s3 + $0x1168] ss:$16 sps:$4 sm:$0xff]  }
 0x4eb   :  { %10002 = vmatpush1.bf16.msra.mxu0 %v14210_v47  ;;  %v14281_v47 = vld [vmem:[%s21584_s3 + $0x118c] ss:$16 sps:$4 sm:$0xff]  }
 0x4ec   :  { %10148 = vmatpush1.bf16.msra.mxu1 %v14213_v52  ;;  %10003 = vmatprep.subr.bf16.mxu0 %v14218_v22  ;;  %v14279_v52 = vld [vmem:[%s21584_s3 + $0x1188] ss:$16 sps:$4 sm:$0xff]   ;;  %v14284_v22 = vld [vmem:[%s21584_s3 + $0x11a4] ss:$16 sps:$4 sm:$0xff]  }
 0x4ed   :  { %10149 = vmatprep.subr.bf16.mxu1 %v14221_v3  ;;  %v14287_v3 = vld [vmem:[%s21584_s3 + $0x11ac] ss:$16 sps:$4 sm:$0xff]  }
 0x4ef   :  { %10004 = vmatpush1.bf16.msra.mxu0 %v14216_v8  ;;  %v14282_v8 = vld [vmem:[%s21584_s3 + $0x11a0] ss:$16 sps:$4 sm:$0xff]  }
 0x4f0   :  { %10150 = vmatpush1.bf16.msra.mxu1 %v14219_v12  ;;  %10005 = vmatprep.subr.bf16.mxu0 %v14224_v33  ;;  %v14290_v12 = vld [vmem:[%s21584_s3 + $0x11c4] ss:$16 sps:$4 sm:$0xff]   ;;  %v14293_v33 = vld [vmem:[%s21584_s3 + $0x11cc] ss:$16 sps:$4 sm:$0xff]  }
 0x4f1   :  { %10151 = vmatprep.subr.bf16.mxu1 %v14227_v51  ;;  %v14288_v51 = vld [vmem:[%s21584_s3 + $0x11c0] ss:$16 sps:$4 sm:$0xff]  }
 0x4f3   :  { %10006 = vmatpush1.bf16.msra.mxu0 %v14222_v2  ;;  %v14297_v2 = vld [vmem:[%s21584_s3 + $0x11e8] ss:$16 sps:$4 sm:$0xff]  }
 0x4f4   :  { %10152 = vmatpush1.bf16.msra.mxu1 %v14225_v32  ;;  %10048 = vmatprep.subr.bf16.mxu0 %v14230_v45  ;;  %v14300_v32 = vld [vmem:[%s21584_s3 + $0x1204] ss:$16 sps:$4 sm:$0x3f]   ;;  %v14304_v45 = vld [vmem:[%s21584_s3 + $0x1200] ss:$16 sps:$4 sm:$0x3f]  }
 0x4f5   :  { %10194 = vmatprep.subr.bf16.mxu1 %v14233_v27  ;;  %v9964_v10 = vsel %vm22555_vm9, %v14304_v45, 0  ;;  %v9970_v27 = vsel %vm22557_vm4, %v14305_v17, 0  ;;  %vm22589_vm9 = vmmov %vm22582_vm10 }
 0x4f6   :  { %10008 = vmatmul.mubr.bf16.vlgmr.msra.gmra.mrb[48].mxu0 %v12478_v26  ;;  %vm22591_vm4 = vmmov %vm22587_vm1 }
 0x4f7   :  { %10154 = vmatmul.mubr.bf16.vlgmr.msra.gmra.mrb[48].mxu1 %v12478_v26  ;;  %10017 = vmatprep.mubr.bf16.mxu0 %v12483_v18 }
 0x4f8   :  { %10049 = vmatpush1.bf16.msra.mxu0 %v14228_v42  ;;  %10163 = vmatprep.mubr.bf16.mxu1 %v12483_v18 }
 0x4f9   :  { %10195 = vmatpush1.bf16.msra.mxu1 %v14231_v35  ;;  %10050 = vmatprep.subr.bf16.mxu0 %v14236_v11 }
 0x4fa   :  { %10196 = vmatprep.subr.bf16.mxu1 %v14239_v59 }
 0x4fc   :  { %10051 = vmatpush1.bf16.msra.mxu0 %v14234_v46 }
 0x4fd   :  { %10197 = vmatpush1.bf16.msra.mxu1 %v14237_v63  ;;  %10052 = vmatprep.subr.bf16.mxu0 %v14242_v48 }
 0x4fe   :  { %10018 = vmatmul.mubr.bf16.gmra.mrb[52].mxu0 %v12482_v37  ;;  %10198 = vmatprep.subr.bf16.mxu1 %v14245_v56 }
 0x4ff   :  { %10164 = vmatmul.mubr.bf16.gmra.mrb[52].mxu1 %v12482_v37  ;;  %10027 = vmatprep.mubr.bf16.mxu0 %v19294_v34 }
 0x500   :  { %10053 = vmatpush1.bf16.msra.mxu0 %v14240_v36  ;;  %10173 = vmatprep.mubr.bf16.mxu1 %v19294_v34  ;;  %v14252_v34 = vld [vmem:[%s21584_s3 + $0x1100] ss:$16 sps:$4 sm:$0xff]  }
 0x501   :  { %10199 = vmatpush1.bf16.msra.mxu1 %v14243_v29  ;;  %10054 = vmatprep.subr.bf16.mxu0 %v14248_v57 }
 0x502   :  { %10200 = vmatprep.subr.bf16.mxu1 %v14251_v39 }
 0x504   :  { %10055 = vmatpush1.bf16.msra.mxu0 %v14246_v58 }
 0x505   :  { %10201 = vmatpush1.bf16.msra.mxu1 %v14249_v5  ;;  %10056 = vmatprep.subr.bf16.mxu0 %v14254_v38 }
 0x506   :  { %10028 = vmatmul.mubr.bf16.gmra.mrb[56].mxu0 %v19296_v53  ;;  %10202 = vmatprep.subr.bf16.mxu1 %v14257_v19 }
 0x507   :  { %10174 = vmatmul.mubr.bf16.gmra.mrb[56].mxu1 %v19296_v53  ;;  %10037 = vmatprep.mubr.bf16.mxu0 %v19338_v61  ;;  %v14269_v53 = vld [vmem:[%s21584_s3 + $0x114c] ss:$16 sps:$4 sm:$0xff]  }
 0x508   :  { %10057 = vmatpush1.bf16.msra.mxu0 %v14252_v34  ;;  %10183 = vmatprep.mubr.bf16.mxu1 %v19338_v61  ;;  %v14264_v61 = vld [vmem:[%s21584_s3 + $0x1140] ss:$16 sps:$4 sm:$0xff]  }
 0x509   :  { %10203 = vmatpush1.bf16.msra.mxu1 %v14255_v31  ;;  %10058 = vmatprep.subr.bf16.mxu0 %v14260_v43 }
 0x50a   :  { %10204 = vmatprep.subr.bf16.mxu1 %v14263_v16 }
 0x50c   :  { %10059 = vmatpush1.bf16.msra.mxu0 %v14258_v41 }
 0x50d   :  { %10205 = vmatpush1.bf16.msra.mxu1 %v14261_v1  ;;  %10060 = vmatprep.subr.bf16.mxu0 %v14266_v4 }
 0x50e   :  { %10038 = vmatmul.mubr.bf16.gmra.mrb[60].mxu0 %v19340_v7  ;;  %10206 = vmatprep.subr.bf16.mxu1 %v14269_v53 }
 0x50f   :  { %10184 = vmatmul.mubr.bf16.gmra.mrb[60].mxu1 %v19340_v7  ;;  %12611 = vmatprep.mubr.msk.bf16.mxu0 %vm5175_vm3, %v19380_v0  ;;  %v14278_v7 = vld [vmem:[%s21584_s3 + $0x1184] ss:$16 sps:$4 sm:$0xff]  }
 0x510   :  { %10061 = vmatpush1.bf16.msra.mxu0 %v14264_v61  ;;  %12616 = vmatprep.mubr.msk.bf16.mxu1 %vm5175_vm3, %v19380_v0  ;;  %v14276_v0 = vld [vmem:[%s21584_s3 + $0x1180] ss:$16 sps:$4 sm:$0xff]  }
 0x511   :  { %10207 = vmatpush1.bf16.msra.mxu1 %v14267_v21  ;;  %10062 = vmatprep.subr.bf16.mxu0 %v14272_v20 }
 0x512   :  { %10208 = vmatprep.subr.bf16.mxu1 %v14275_v15 }
 0x514   :  { %10063 = vmatpush1.bf16.msra.mxu0 %v14270_v23 }
 0x515   :  { %10209 = vmatpush1.bf16.msra.mxu1 %v14273_v25  ;;  %10064 = vmatprep.subr.bf16.mxu0 %v14278_v7 }
 0x516   :  { %10210 = vmatprep.subr.bf16.mxu1 %v14281_v47 }
 0x518   :  { %10065 = vmatpush1.bf16.msra.mxu0 %v14276_v0 }
 0x519   :  { %10211 = vmatpush1.bf16.msra.mxu1 %v14279_v52  ;;  %10066 = vmatprep.subr.bf16.mxu0 %v14284_v22 }
 0x51a   :  { %10212 = vmatprep.subr.bf16.mxu1 %v14287_v3 }
 0x51c   :  { %10067 = vmatpush1.bf16.msra.mxu0 %v14282_v8 }
 0x51d   :  { %10213 = vmatpush1.bf16.msra.mxu1 %v14285_v30  ;;  %10068 = vmatprep.subr.bf16.mxu0 %v14290_v12 }
 0x51e   :  { %10214 = vmatprep.subr.bf16.mxu1 %v14293_v33 }
 0x520   :  { %10069 = vmatpush1.bf16.msra.mxu0 %v14288_v51 }
 0x521   :  { %10215 = vmatpush1.bf16.msra.mxu1 %v14291_v6  ;;  %10070 = vmatprep.subr.bf16.mxu0 %v14296_v44 }
 0x522   :  { %10216 = vmatprep.subr.bf16.mxu1 %v14299_v54 }
 0x524   :  { %10071 = vmatpush1.bf16.msra.mxu0 %v14294_v62 }
 0x525   :  { %10217 = vmatpush1.bf16.msra.mxu1 %v14297_v2  ;;  %12610 = vmatprep.subr.msk.bf16.mxu0 %vm22554_vm14, %v14300_v32  ;;  %vm22588_vm14 = vcmask 1046534  }
 0x526   :  { %12615 = vmatprep.subr.msk.bf16.mxu1 %vm22556_vm15, %v14302_v28  ;;  %vm22590_vm15 = vcmask 1047559  }
 0x528   :  { %10073 = vmatpush1.bf16.msra.mxu0 %v9964_v10 }
 0x529   :  { %10219 = vmatpush1.bf16.msra.mxu1 %v9970_v27 }
 0x52b   :  { %10081 = vmatmul.mubr.bf16.vlgmr.msra.gmra.mrb[48].mxu0 %v19378_v60 }
 0x52c   :  { %10227 = vmatmul.mubr.bf16.vlgmr.msra.gmra.mrb[48].mxu1 %v19378_v60  ;;  %12612 = vmatprep.mubr.msk.bf16.mxu0 %vm5175_vm3, %v19403_v13  ;;  %v10299_v60 = vld [vmem:[%s21585_s4] sm:$0xf]  ;;  %s14320_s4 = smov 78  }
 0x52d   :  { %12617 = vmatprep.mubr.msk.bf16.mxu1 %vm5175_vm3, %v19403_v13  ;;  %v22558_v13 = vld [vmem:[#allocation4_spill] sm:$0xff] }
 0x52e   :  { %v22561_v56 = vsub.s32 3, %v22558_v13  ;;  %v22562_v57 = vsub.s32 2, %v22558_v13 }
 0x530   :  { %v20692_v37 = vrot.slane %v10299_v60, %v22561_v56  ;;  %v20701_v39 = vrot.slane %v10299_v60, %v22562_v57 }
 0x533   :  { %10091 = vmatmul.mubr.bf16.gmra.mrb[52].mxu0 %v19405_v24 }
 0x534   :  { %10237 = vmatmul.mubr.bf16.gmra.mrb[52].mxu1 %v19405_v24  ;;  %12613 = vmatprep.mubr.msk.bf16.mxu0 %vm5175_vm3, %v19437_v49  ;;  %v22559_v24 = vsub.s32 0, %v22558_v13 }
 0x535   :  { %12618 = vmatprep.mubr.msk.bf16.mxu1 %vm5175_vm3, %v19437_v49 }
 0x536   :  { %v20673_v49 = vrot.slane %v10299_v60, %v22559_v24 }
 0x53b   :  { %10101 = vmatmul.mubr.bf16.gmra.mrb[56].mxu0 %v19439_v40 }
 0x53c   :  { %10247 = vmatmul.mubr.bf16.gmra.mrb[56].mxu1 %v19439_v40  ;;  %12614 = vmatprep.mubr.msk.bf16.mxu0 %vm5175_vm3, %v19466_v14  ;;  %v22560_v40 = vsub.s32 1, %v22558_v13 }
 0x53d   :  { %12619 = vmatprep.mubr.msk.bf16.mxu1 %vm5175_vm3, %v19466_v14  ;;  %vm10481_vm3 = vcmask 637952  }
 0x53e   :  { %v20677_v55 = vrot.slane %v10299_v60, %v22560_v40 }
 0x543   :  { %10111 = vmatmul.mubr.bf16.gmra.mrb[60].mxu0 %v19468_v50 }
 0x544   :  { %10257 = vmatmul.mubr.bf16.gmra.mrb[60].mxu1 %v19468_v50 }
 0x5fe   :  { %v10082_v26 = vpop.f32.mrb[48].mxu0 }
 0x5ff   :  { %v20680_v42 = vadd.f32 %v20673_v49, %v10082_v26  ;;  %v10228_v14 = vpop.f32.mrb[48].mxu1  ;;  %v10084_v9 = vpop.f32.mrb[49].mxu0 }
 0x600   :  { %v20683_v50 = vadd.f32 %v20677_v55, %v10084_v9  ;;  %v10230_v35 = vpop.f32.mrb[49].mxu1  ;;  %v10086_v18 = vpop.f32.mrb[50].mxu0  ;;  %v20735_v0 = vadd.f32 %v20701_v39, %v10228_v14 }
 0x601   :  { %v10353_v11 = vmax.f32 %v20680_v42, 0.0  ;;  %v20687_v59 = vadd.f32 %v20673_v49, %v10086_v18  ;;  %v10232_v46 = vpop.f32.mrb[50].mxu1  ;;  %v10088_v63 = vpop.f32.mrb[51].mxu0  ;;  %v10324_v34 = vadd.f32 %v20692_v37, %v10230_v35 }
 0x602   :  { %v10354_v48 = vmax.f32 %v20683_v50, 0.0  ;;  %v20695_v36 = vadd.f32 %v20677_v55, %v10088_v63  ;;  %v20697_v29 = vpop.f32.mrb[51].mxu1  ;;  %v20710_v19 = vadd.f32 %v20701_v39, %v10232_v46  ;;  %v10355_v62 = vmax.f32 %v20735_v0, 0.0 }
 0x603   :  { %v10357_v58 = vmax.f32 %v20687_v59, 0.0  ;;  %v10356_v52 = vmax.f32 %v10324_v34, 0.0 }
 0x604   :  { %v13356_v5 = vpack.i.bf16 %v10354_v48, %v10353_v11  ;;  %v10358_v38 = vmax.f32 %v20695_v36, 0.0  ;;  %v10359_v20 = vmax.f32 %v20710_v19, 0.0 }
 0x606   :  { %v13361_v31 = vpack.i.bf16 %v10358_v38, %v10357_v58  ;;  %13357 = vrot.lane.b32.xlu1 %v13356_v5, %s14320_s4  ;;  %v10092_v43 = vpop.f32.mrb[52].mxu0 }
 0x607   :  { %v10238_v16 = vpop.f32.mrb[52].mxu1  ;;  %v20719_v41 = vadd.f32 %v20673_v49, %v10092_v43  ;;  %v10094_v1 = vpop.f32.mrb[53].mxu0  ;;  %v10328_v43 = vadd.f32 %v20692_v37, %v20697_v29 }
 0x608   :  { %v20722_v4 = vadd.f32 %v20701_v39, %v10238_v16  ;;  %v20725_v53 = vadd.f32 %v20677_v55, %v10094_v1  ;;  %v10240_v61 = vpop.f32.mrb[53].mxu1  ;;  %13362 = vrot.lane.b32.xlu0 %v13361_v31, %s14320_s4  ;;  %v10096_v21 = vpop.f32.mrb[54].mxu0 }
 0x609   :  { %v10361_v15 = vmax.f32 %v20719_v41, 0.0  ;;  %v10332_v23 = vadd.f32 %v20692_v37, %v10240_v61  ;;  %v10242_v25 = vpop.f32.mrb[54].mxu1  ;;  %v20732_v7 = vadd.f32 %v20673_v49, %v10096_v21  ;;  %v10098_v47 = vpop.f32.mrb[55].mxu0 }
 0x60a   :  { %v10363_v22 = vmax.f32 %v20722_v4, 0.0  ;;  %v10362_v3 = vmax.f32 %v20725_v53, 0.0  ;;  %v10244_v8 = vpop.f32.mrb[55].mxu1  ;;  %v20744_v33 = vadd.f32 %v20701_v39, %v10242_v25  ;;  %v20747_v51 = vadd.f32 %v20677_v55, %v10098_v47 }
 0x60b   :  { %v13366_v30 = vpack.i.bf16 %v10361_v15, %v10359_v20  ;;  %v10364_v12 = vmax.f32 %v10332_v23, 0.0  ;;  %v10365_v44 = vmax.f32 %v20732_v7, 0.0 }
 0x60c   :  { %v13371_v6 = vpack.i.bf16 %v10363_v22, %v10362_v3  ;;  %v21820_v32 = vmax.f32 %v20744_v33, 0.0  ;;  %v10366_v45 = vmax.f32 %v20747_v51, 0.0 }
 0x60d   :  { %v13376_v54 = vpack.i.bf16 %v10364_v12, %v10356_v52  ;;  %13367 = vrot.lane.b32.xlu1 %v13366_v30, %s14320_s4  ;;  %v13381_v27 = vpack.i.bf16 %v10365_v44, %v10355_v62 }
 0x60e   :  { %13372 = vrot.lane.b32.xlu0 %v13371_v6, %s14320_s4  ;;  %v10102_v2 = vpop.f32.mrb[56].mxu0  ;;  %v13386_v5 = vpack.i.bf16 %v21820_v32, %v10366_v45 }
 0x60f   :  { %v10248_v28 = vpop.f32.mrb[56].mxu1  ;;  %v20760_v17 = vadd.f32 %v20673_v49, %v10102_v2  ;;  %v10104_v10 = vpop.f32.mrb[57].mxu0 }
 0x610   :  { %v20767_v60 = vadd.f32 %v20677_v55, %v10104_v10  ;;  %v10250_v13 = vpop.f32.mrb[57].mxu1  ;;  %v10106_v24 = vpop.f32.mrb[58].mxu0  ;;  %v20770_v40 = vadd.f32 %v20701_v39, %v10248_v28 }
 0x611   :  { %v10369_v26 = vmax.f32 %v20760_v17, 0.0  ;;  %v10340_v14 = vadd.f32 %v20692_v37, %v10250_v13  ;;  %v20775_v9 = vadd.f32 %v20673_v49, %v10106_v24  ;;  %v10252_v35 = vpop.f32.mrb[58].mxu1  ;;  %13377 = vrot.lane.b32.xlu1 %v13376_v54, %s14320_s4  ;;  %v10108_v18 = vpop.f32.mrb[59].mxu0  ;;  %v10360_v54 = vmax.f32 %v10328_v43, 0.0 }
 0x612   :  { %v10370_v46 = vmax.f32 %v20767_v60, 0.0  ;;  %v20780_v63 = vadd.f32 %v20701_v39, %v10252_v35  ;;  %v10254_v56 = vpop.f32.mrb[59].mxu1  ;;  %v20783_v57 = vadd.f32 %v20677_v55, %v10108_v18  ;;  %13382 = vrot.lane.b32.xlu0 %v13381_v27, %s14320_s4  ;;  %v21814_v21 = vmax.f32 %v20770_v40, 0.0 }
 0x613   :  { %v10373_v34 = vmax.f32 %v20775_v9, 0.0  ;;  %v10344_v31 = vadd.f32 %v20692_v37, %v10254_v56  ;;  %v10372_v23 = vmax.f32 %v10340_v14, 0.0  ;;  %v10336_v24 = vadd.f32 %v20692_v37, %v10244_v8 }
 0x614   :  { %v13391_v16 = vpack.i.bf16 %v10370_v46, %v10369_v26  ;;  %v21815_v1 = vmax.f32 %v20780_v63, 0.0  ;;  %v10374_v61 = vmax.f32 %v20783_v57, 0.0 }
 0x615   :  { %v10376_v25 = vmax.f32 %v10344_v31, 0.0  ;;  %13387 = vrot.lane.b32.xlu1 %v13386_v5, %s14320_s4  ;;  %v13396_v29 = vpack.i.bf16 %v10373_v34, %v21814_v21 }
 0x616   :  { %13392 = vrot.lane.b32.xlu0 %v13391_v16, %s14320_s4  ;;  %v10112_v47 = vpop.f32.mrb[60].mxu0  ;;  %v13401_v2 = vpack.i.bf16 %v21815_v1, %v10374_v61 }
 0x617   :  { %v13426_v52 = vpack.i.bf16 %v10376_v25, %v10372_v23  ;;  %v10258_v30 = vpop.f32.mrb[60].mxu1  ;;  %v20808_v12 = vadd.f32 %v20673_v49, %v10112_v47  ;;  %v10114_v6 = vpop.f32.mrb[61].mxu0 }
 0x618   :  { %v20815_v28 = vadd.f32 %v20701_v39, %v10258_v30  ;;  %v20818_v10 = vadd.f32 %v20677_v55, %v10114_v6  ;;  %v10260_v27 = vpop.f32.mrb[61].mxu1  ;;  %v10116_v13 = vpop.f32.mrb[62].mxu0 }
 0x619   :  { %v10377_v14 = vmax.f32 %v20808_v12, 0.0  ;;  %v10348_v35 = vadd.f32 %v20692_v37, %v10260_v27  ;;  %v20824_v18 = vadd.f32 %v20673_v49, %v10116_v13  ;;  %v10262_v56 = vpop.f32.mrb[62].mxu1  ;;  %13397 = vrot.lane.b32.xlu1 %v13396_v29, %s14320_s4  ;;  %v10118_v5 = vpop.f32.mrb[63].mxu0 }
 0x61a   :  { %v21817_v31 = vmax.f32 %v20815_v28, 0.0  ;;  %v10378_v43 = vmax.f32 %v20818_v10, 0.0  ;;  %v20830_v16 = vadd.f32 %v20701_v39, %v10262_v56  ;;  %v10264_v23 = vpop.f32.mrb[63].mxu1  ;;  %v20833_v8 = vadd.f32 %v20677_v55, %v10118_v5  ;;  %13402 = vrot.lane.b32.xlu0 %v13401_v2, %s14320_s4 }
 0x61b   :  { %v13406_v49 = vpack.i.bf16 %v10377_v14, %v10360_v54  ;;  %v10352_v25 = vadd.f32 %v20692_v37, %v10264_v23  ;;  %v21818_v29 = vmax.f32 %v20824_v18, 0.0  ;;  %v10368_v55 = vmax.f32 %v10336_v24, 0.0 }
 0x61c   :  { %v13411_v47 = vpack.i.bf16 %v21817_v31, %v10378_v43  ;;  %v21816_v39 = vmax.f32 %v20830_v16, 0.0  ;;  %v21819_v30 = vmax.f32 %v20833_v8, 0.0  ;;  %v10380_v6 = vmax.f32 %v10348_v35, 0.0 }
 0x61d   :  { %v10384_v27 = vmax.f32 %v10352_v25, 0.0  ;;  %13407 = vrot.lane.b32.xlu1 %v13406_v49, %s14320_s4 }
 0x61e   :  { %13412 = vrot.lane.b32.xlu0 %v13411_v47, %s14320_s4  ;;  %v13416_v37 = vpack.i.bf16 %v10368_v55, %v21816_v39  ;;  %v13421_v2 = vpack.i.bf16 %v21819_v30, %v21818_v29 }
 0x61f   :  { %v13431_v54 = vpack.i.bf16 %v10384_v27, %v10380_v6 }
 0x621   :  { %13417 = vrot.lane.b32.xlu1 %v13416_v37, %s14320_s4 }
 0x622   :  { %13422 = vrot.lane.b32.xlu0 %v13421_v2, %s14320_s4 }
 0x625   :  { %13432 = vrot.lane.b32.xlu1 %v13431_v54, %s14320_s4 }
 0x626   :  { %13427 = vrot.lane.b32.xlu0 %v13426_v52, %s14320_s4 }
 0x678   :  { %v20858_v13 = vpop.permute.xlu1 %13357 }
 0x679   :  { %v13360_v24 = vunpack.i.h.bf16 %v20858_v13  ;;  %v13359_v35 = vunpack.i.l.bf16 %v20858_v13 }
 0x67a   :  { %v13363_v56 = vpop.permute.xlu0 %13362 }
 0x67b   :  { %v10482_v5 = vsel %vm10481_vm3, %v13359_v35, %v13360_v24  ;;  %v13365_v23 = vunpack.i.h.bf16 %v13363_v56  ;;  %v13364_v49 = vunpack.i.l.bf16 %v13363_v56 }
 0x67c   :  { %v10530_v25 = vmax.f32 %v10353_v11, %v10482_v5 }
 0x67d   :  { %v10485_v47 = vsel %vm10481_vm3, %v13364_v49, %v13365_v23 }
 0x67e   :  { %v10578_v52 = vrot.slane %v10530_v25, 1  ;;  %v10533_v55 = vmax.f32 %v10357_v58, %v10485_v47 }
 0x67f   :  { %v20870_v6 = vpop.permute.xlu1 %13367 }
 0x680   :  { %v20872_v27 = vmax.f32 %v10530_v25, %v10578_v52  ;;  %v10581_v37 = vrot.slane %v10533_v55, 1  ;;  %v13370_v54 = vunpack.i.h.bf16 %v20870_v6  ;;  %v13369_v2 = vunpack.i.l.bf16 %v20870_v6  ;;  %v13373_v35 = vpop.permute.xlu0 %13372 }
 0x681   :  { %v13375_v56 = vunpack.i.h.bf16 %v13373_v35  ;;  %v13374_v21 = vunpack.i.l.bf16 %v13373_v35 }
 0x682   :  { %v12700_v42 = vpack.c.bf16 %v20872_v27, %v20872_v27  ;;  %v10629_v11 = vmax.f32 %v10533_v55, %v10581_v37  ;;  %v10486_v59 = vsel %vm10481_vm3, %v13365_v23, %v13369_v2 }
 0x683   :  { %v10534_v58 = vmax.f32 %v10358_v38, %v10486_v59  ;;  %v10488_v5 = vsel %vm10481_vm3, %v13370_v54, %v13374_v21  ;;  %v10489_v49 = vsel %vm10481_vm3, %v13374_v21, %v13375_v56  ;;  %v13378_v25 = vpop.permute.xlu1 %13377 }
 0x684   :  { %v20885_v47 = vunpack.c.l.b16 %v12700_v42  ;;  %v12701_v52 = vpack.c.bf16 %v10629_v11, %v10629_v11  ;;  %v10536_v35 = vmax.f32 %v10361_v15, %v10488_v5  ;;  %v10537_v55 = vmax.f32 %v10362_v3, %v10489_v49  ;;  %v20891_v37 = vpop.permute.xlu0 %13382 }
 0x685   :  { %v10582_v23 = vrot.slane %v10534_v58, 1  ;;  %v13380_v1 = vunpack.i.h.bf16 %v13378_v25  ;;  %v13379_v36 = vunpack.i.l.bf16 %v13378_v25  ;;  %v13385_v38 = vunpack.i.h.bf16 %v20891_v37 }
 0x686   :  { %v20897_v59 = vunpack.c.l.b16 %v12701_v52  ;;  %v10584_v15 = vrot.slane %v10536_v35, 1  ;;  %v10585_v5 = vrot.slane %v10537_v55, 1 }
 0x687   :  { %v10630_v41 = vmax.f32 %v10534_v58, %v10582_v23  ;;  %v10490_v53 = vsel %vm10481_vm3, %v13375_v56, %v13380_v1  ;;  %v20900_v3 = vpop.permute.xlu1 %13387  ;;  %v13384_v56 = vunpack.i.l.bf16 %v20891_v37 }
 0x688   :  { %v10690_v49 = vrot.slane %v20897_v59, 7  ;;  %v10632_v42 = vmax.f32 %v10536_v35, %v10584_v15  ;;  %v10633_v52 = vmax.f32 %v10537_v55, %v10585_v5  ;;  %v10538_v1 = vmax.f32 %v10363_v22, %v10490_v53 }
 0x689   :  { %v12709_v21 = vpack.c.bf16 %v10630_v41, %v10629_v11  ;;  %v12717_v31 = vpack.c.bf16 %v10630_v41, %v10630_v41  ;;  %v21822_v23 = vunpack.i.h.bf16 %v20900_v3  ;;  %v10483_v15 = vsel %vm10481_vm3, %v13360_v24, %v13384_v56 }
 0x68a   :  { %v10692_v58 = vsel %vm22563_vm0, %v10690_v49, %v20885_v47  ;;  %v12702_v11 = vpack.c.bf16 %v10632_v42, %v10632_v42  ;;  %v12710_v41 = vpack.c.bf16 %v10633_v52, %v10632_v42  ;;  %v12718_v35 = vpack.c.bf16 %v10633_v52, %v10633_v52  ;;  %vm22593_vm0 = vmmov %vm22564_vm5 }
 0x68b   :  { %v20912_v29 = vunpack.c.l.b16 %v12709_v21  ;;  %v20914_v25 = vunpack.c.h.b16 %v12709_v21  ;;  %v20916_v39 = vunpack.c.l.b16 %v12717_v31  ;;  %v10586_v55 = vrot.slane %v10538_v1, 1  ;;  %v20962_v49 = vpop.permute.xlu1 %13397 }
 0x68c   :  { %v20933_v30 = vunpack.c.l.b16 %v12702_v11  ;;  %v20935_v32 = vunpack.c.l.b16 %v12710_v41  ;;  %v20937_v53 = vunpack.c.h.b16 %v12710_v41  ;;  %v20939_v21 = vunpack.c.l.b16 %v12718_v35  ;;  %v13393_v41 = vpop.permute.xlu0 %13392 }
 0x68d   :  { %v10763_v4 = vrot.slane %v20912_v29, 7  ;;  %v10777_v22 = vrot.slane %v20914_v25, 7  ;;  %v10816_v5 = vrot.slane %v20916_v39, 7  ;;  %v10634_v31 = vmax.f32 %v10538_v1, %v10586_v55 }
 0x68e   :  { %v10484_v42 = vsel %vm10481_vm3, %v13384_v56, %v13379_v36  ;;  %v10531_v13 = vmax.f32 %v10354_v48, %v10483_v15  ;;  %v13389_v24 = vunpack.i.l.bf16 %v20900_v3  ;;  %v10693_v52 = vrot.slane %v20933_v30, 6 }
 0x68f   :  { %v12726_v54 = vpack.c.bf16 %v10634_v31, %v10634_v31  ;;  %v10532_v35 = vmax.f32 %v10355_v62, %v10484_v42  ;;  %v13395_v55 = vunpack.i.h.bf16 %v13393_v41  ;;  %v13394_v56 = vunpack.i.l.bf16 %v13393_v41 }
 0x690   :  { %v20954_v48 = vsel %vm22564_vm5, %v10693_v52, %v10692_v58  ;;  %v10579_v1 = vrot.slane %v10531_v13, 1  ;;  %v10491_v58 = vsel %vm10481_vm3, %v13385_v38, %v13389_v24  ;;  %v10492_v52 = vsel %vm10481_vm3, %v13389_v24, %v21822_v23  ;;  %v20979_v50 = vpop.permute.xlu0 %13402  ;;  %vm22594_vm5 = vmmov %vm22588_vm14 }
 0x691   :  { %v20970_v15 = vunpack.c.l.b16 %v12726_v54  ;;  %v10580_v11 = vrot.slane %v10532_v35, 1  ;;  %v10539_v0 = vmax.f32 %v10365_v44, %v10491_v58  ;;  %v10540_v62 = vmax.f32 %v10366_v45, %v10492_v52 }
 0x692   :  { %v10627_v31 = vmax.f32 %v10531_v13, %v10579_v1  ;;  %v10494_v37 = vsel %vm10481_vm3, %v13394_v56, %v13395_v55  ;;  %v13400_v38 = vunpack.i.h.bf16 %v20962_v49  ;;  %v21821_v42 = vunpack.i.l.bf16 %v20962_v49 }
 0x693   :  { %v10628_v41 = vmax.f32 %v10532_v35, %v10580_v11  ;;  %v10587_v51 = vrot.slane %v10539_v0, 1  ;;  %v10588_v45 = vrot.slane %v10540_v62, 1  ;;  %v10542_v56 = vmax.f32 %v10369_v26, %v10494_v37 }
 0x694   :  { %v12708_v7 = vpack.c.bf16 %v10627_v31, %v20872_v27  ;;  %v12716_v44 = vpack.c.bf16 %v10627_v31, %v10627_v31  ;;  %v10495_v58 = vsel %vm10481_vm3, %v13395_v55, %v21821_v42  ;;  %v21823_v52 = vunpack.i.h.bf16 %v20979_v50  ;;  %v21052_v23 = vpop.permute.xlu0 %13412 }
 0x695   :  { %v12724_v1 = vpack.c.bf16 %v10628_v41, %v10628_v41  ;;  %v10635_v27 = vmax.f32 %v10539_v0, %v10587_v51  ;;  %v10636_v31 = vmax.f32 %v10540_v62, %v10588_v45  ;;  %v10590_v41 = vrot.slane %v10542_v56, 1 }
 0x696   :  { %v20991_v36 = vunpack.c.l.b16 %v12708_v7  ;;  %v20993_v54 = vunpack.c.h.b16 %v12708_v7  ;;  %v20995_v11 = vunpack.c.l.b16 %v12716_v44  ;;  %v10543_v17 = vmax.f32 %v10370_v46, %v10495_v58 }
 0x697   :  { %v20997_v35 = vunpack.c.l.b16 %v12724_v1  ;;  %v12703_v13 = vpack.c.bf16 %v10635_v27, %v10635_v27  ;;  %v12711_v62 = vpack.c.bf16 %v10636_v31, %v10635_v27  ;;  %v10638_v24 = vmax.f32 %v10542_v56, %v10590_v41 }
 0x698   :  { %v21005_v26 = vsel %vm22565_vm11, %v10763_v4, %v20991_v36  ;;  %v21011_v55 = vsel %vm22566_vm8, %v10777_v22, %v20993_v54  ;;  %v21017_v0 = vsel %vm22567_vm6, %v10816_v5, %v20995_v11  ;;  %v13408_v5 = vpop.permute.xlu1 %13407  ;;  %v12719_v4 = vpack.c.bf16 %v10636_v31, %v10636_v31  ;;  %vm22596_vm11 = vmmov %vm22586_vm2 }
 0x699   :  { %v10591_v37 = vrot.slane %v10543_v17, 1  ;;  %v21031_v46 = vunpack.c.l.b16 %v12703_v13  ;;  %v13404_v22 = vunpack.i.l.bf16 %v20979_v50  ;;  %v13410_v7 = vunpack.i.h.bf16 %v13408_v5  ;;  %vm22597_vm8 = vmmov %vm22590_vm15 }
 0x69a   :  { %v13409_v44 = vunpack.i.l.bf16 %v13408_v5  ;;  %v21034_v60 = vunpack.c.l.b16 %v12711_v62  ;;  %v21036_v51 = vunpack.c.h.b16 %v12711_v62  ;;  %v21038_v45 = vunpack.c.l.b16 %v12719_v4  ;;  %vm22598_vm6 = vmmov %vm22589_vm9 }
 0x69b   :  { %v12704_v1 = vpack.c.bf16 %v10638_v24, %v10638_v24  ;;  %v10639_v62 = vmax.f32 %v10543_v17, %v10591_v37  ;;  %v10497_v42 = vsel %vm10481_vm3, %v13400_v38, %v13404_v22  ;;  %v10498_v27 = vsel %vm10481_vm3, %v13404_v22, %v21823_v52 }
 0x69c   :  { %v13418_v58 = vpop.permute.xlu1 %13417  ;;  %v10545_v13 = vmax.f32 %v10373_v34, %v10497_v42  ;;  %v10546_v41 = vmax.f32 %v10374_v61, %v10498_v27  ;;  %v13415_v17 = vunpack.i.h.bf16 %v21052_v23  ;;  %v13414_v9 = vunpack.i.l.bf16 %v21052_v23 }
 0x69d   :  { %v21058_v5 = vunpack.c.l.b16 %v12704_v1  ;;  %v10487_v1 = vsel %vm10481_vm3, %v13369_v2, %v13409_v44  ;;  %v12712_v38 = vpack.c.bf16 %v10639_v62, %v10638_v24  ;;  %v12720_v31 = vpack.c.bf16 %v10639_v62, %v10639_v62 }
 0x69e   :  { %v10535_v22 = vmax.f32 %v10359_v20, %v10487_v1  ;;  %v10593_v56 = vrot.slane %v10545_v13, 1  ;;  %v10594_v4 = vrot.slane %v10546_v41, 1  ;;  %v13420_v34 = vunpack.i.h.bf16 %v13418_v58 }
 0x69f   :  { %v21078_v57 = vunpack.c.l.b16 %v12712_v38  ;;  %v21080_v61 = vunpack.c.h.b16 %v12712_v38  ;;  %v21082_v6 = vunpack.c.l.b16 %v12720_v31  ;;  %v10500_v24 = vsel %vm10481_vm3, %v13410_v7, %v13414_v9 }
 0x6a0   :  { %v10583_v2 = vrot.slane %v10535_v22, 1  ;;  %v10641_v42 = vmax.f32 %v10545_v13, %v10593_v56  ;;  %v10642_v44 = vmax.f32 %v10546_v41, %v10594_v4  ;;  %v10501_v19 = vsel %vm10481_vm3, %v13414_v9, %v13415_v17  ;;  %v13433_v12 = vpop.permute.xlu1 %13432 }
 0x6a1   :  { %v10548_v27 = vmax.f32 %v10377_v14, %v10500_v24  ;;  %v10549_v62 = vmax.f32 %v10378_v43, %v10501_v19  ;;  %v22568_v1 = vunpack.i.h.bf16 %v20900_v3  ;;  %v22569_v7 = vmax.f32 %v20744_v33, 0.0 }
 0x6a2   :  { %v10631_v20 = vmax.f32 %v10535_v22, %v10583_v2  ;;  %v12705_v38 = vpack.c.bf16 %v10641_v42, %v10641_v42  ;;  %v12713_v56 = vpack.c.bf16 %v10642_v44, %v10641_v42  ;;  %v12721_v13 = vpack.c.bf16 %v10642_v44, %v10642_v44  ;;  %v13423_v2 = vpop.permute.xlu0 %13422 }
 0x6a3   :  { %v10493_v31 = vsel %vm10481_vm3, %v22568_v1, %v13420_v34  ;;  %v10596_v37 = vrot.slane %v10548_v27, 1  ;;  %v10597_v9 = vrot.slane %v10549_v62, 1  ;;  %v13419_v22 = vunpack.i.l.bf16 %v13418_v58 }
 0x6a4   :  { %v10541_v41 = vmax.f32 %v22569_v7, %v10493_v31  ;;  %v12725_v4 = vpack.c.bf16 %v10631_v20, %v10631_v20  ;;  %v21097_v14 = vunpack.c.l.b16 %v12705_v38  ;;  %v21099_v10 = vunpack.c.l.b16 %v12713_v56 }
 0x6a5   :  { %v21101_v43 = vunpack.c.h.b16 %v12713_v56  ;;  %v21103_v3 = vunpack.c.l.b16 %v12721_v13  ;;  %v10644_v42 = vmax.f32 %v10548_v27, %v10596_v37  ;;  %v10645_v44 = vmax.f32 %v10549_v62, %v10597_v9 }
 0x6a6   :  { %v21105_v34 = vunpack.c.l.b16 %v12725_v4  ;;  %v10589_v33 = vrot.slane %v10541_v41, 1  ;;  %v13425_v19 = vunpack.i.h.bf16 %v13423_v2  ;;  %v13424_v20 = vunpack.i.l.bf16 %v13423_v2  ;;  %v13428_v2 = vpop.permute.xlu0 %13427 }
 0x6a7   :  { %v13435_v58 = vunpack.i.h.bf16 %v13433_v12  ;;  %v12706_v13 = vpack.c.bf16 %v10644_v42, %v10644_v42  ;;  %v12714_v7 = vpack.c.bf16 %v10645_v44, %v10644_v42  ;;  %v12722_v4 = vpack.c.bf16 %v10645_v44, %v10645_v44 }
 0x6a8   :  { %v10637_v52 = vmax.f32 %v10541_v41, %v10589_v33  ;;  %v10504_v37 = vsel %vm10481_vm3, %v13425_v19, %v13419_v22  ;;  %v10503_v27 = vsel %vm10481_vm3, %v13424_v20, %v13425_v19  ;;  %v13434_v62 = vunpack.i.l.bf16 %v13433_v12 }
 0x6a9   :  { %v10505_v9 = vsel %vm10481_vm3, %v13419_v22, %v13435_v58  ;;  %v21115_v24 = vunpack.c.l.b16 %v12706_v13  ;;  %v21117_v1 = vunpack.c.l.b16 %v12714_v7  ;;  %v21119_v31 = vunpack.c.h.b16 %v12714_v7 }
 0x6aa   :  { %v21121_v38 = vunpack.c.l.b16 %v12722_v4  ;;  %v12727_v56 = vpack.c.bf16 %v10637_v52, %v10637_v52  ;;  %v22570_v42 = vmax.f32 %v20833_v8, 0.0  ;;  %v22571_v44 = vmax.f32 %v20824_v18, 0.0 }
 0x6ab   :  { %v10502_v22 = vsel %vm10481_vm3, %v13415_v17, %v13434_v62  ;;  %v22572_v19 = vmax.f32 %v20815_v28, 0.0  ;;  %v22573_v58 = vmax.f32 %v20830_v16, 0.0  ;;  %v13430_v7 = vunpack.i.h.bf16 %v13428_v2 }
 0x6ac   :  { %v10552_v41 = vmax.f32 %v22570_v42, %v10504_v37  ;;  %v10551_v33 = vmax.f32 %v22571_v44, %v10503_v27  ;;  %v21135_v52 = vunpack.c.l.b16 %v12727_v56  ;;  %v13429_v37 = vunpack.i.l.bf16 %v13428_v2 }
 0x6ad   :  { %v10550_v20 = vmax.f32 %v22572_v19, %v10502_v22  ;;  %v10553_v13 = vmax.f32 %v22573_v58, %v10505_v9  ;;  %v22574_v23 = vunpack.i.h.bf16 %v20979_v50  ;;  %v22575_v62 = vrot.slane %v20939_v21, 6 }
 0x6ae   :  { %v10600_v8 = vrot.slane %v10552_v41, 1  ;;  %v10599_v4 = vrot.slane %v10551_v33, 1  ;;  %v10885_v16 = vrot.slane %v21135_v52, 5  ;;  %v22577_v50 = vmax.f32 %v20780_v63, 0.0 }
 0x6af   :  { %v10598_v18 = vrot.slane %v10550_v20, 1  ;;  %v10601_v27 = vrot.slane %v10553_v13, 1  ;;  %v10499_v17 = vsel %vm10481_vm3, %v22574_v23, %v13430_v7  ;;  %v10819_v28 = vsel %vm22576_vm13, %v22575_v62, %v21017_v0  ;;  %vm22599_vm13 = vmmov %vm22587_vm1 }
 0x6b0   :  { %v10648_v2 = vmax.f32 %v10552_v41, %v10600_v8  ;;  %v10647_v44 = vmax.f32 %v10551_v33, %v10599_v4  ;;  %v10547_v58 = vmax.f32 %v22577_v50, %v10499_v17  ;;  %v22578_v7 = vunpack.i.l.bf16 %v20962_v49 }
 0x6b1   :  { %v10646_v22 = vmax.f32 %v10550_v20, %v10598_v18  ;;  %v10649_v19 = vmax.f32 %v10553_v13, %v10601_v27  ;;  %v22579_v0 = vrot.slane %v21038_v45, 5  ;;  %v10822_v12 = vrot.slane %v21082_v6, 4 }
 0x6b2   :  { %v10496_v23 = vsel %vm10481_vm3, %v22578_v7, %v13429_v37  ;;  %v12723_v56 = vpack.c.bf16 %v10648_v2, %v10648_v2  ;;  %v12707_v9 = vpack.c.bf16 %v10647_v44, %v10647_v44  ;;  %v12715_v42 = vpack.c.bf16 %v10648_v2, %v10647_v44 }
 0x6b3   :  { %v10821_v62 = vsel %vm22580_vm7, %v22579_v0, %v10819_v28  ;;  %v12730_v41 = vpack.c.bf16 %v10646_v22, %v10646_v22  ;;  %v12731_v33 = vpack.c.bf16 %v10649_v19, %v10649_v19  ;;  %v10595_v20 = vrot.slane %v10547_v58, 1 }
 0x6b4   :  { %v22581_v13 = vmax.f32 %v20770_v40, 0.0  ;;  %v10823_v8 = vsel %vm22582_vm10, %v10822_v12, %v10821_v62  ;;  %v21160_v49 = vunpack.c.l.b16 %v12723_v56  ;;  %v21162_v4 = vunpack.c.l.b16 %v12707_v9  ;;  %vm22603_vm10 = vmmov %vm22594_vm5 }
 0x6b5   :  { %v21164_v37 = vunpack.c.l.b16 %v12715_v42  ;;  %v21166_v18 = vunpack.c.h.b16 %v12715_v42  ;;  %v21168_v27 = vunpack.c.l.b16 %v12730_v41  ;;  %v21170_v17 = vunpack.c.l.b16 %v12731_v33 }
 0x6b6   :  { %v10544_v63 = vmax.f32 %v22581_v13, %v10496_v23  ;;  %v10643_v28 = vmax.f32 %v10547_v58, %v10595_v20  ;;  %v10824_v44 = vrot.slane %v21103_v3, 3  ;;  %v10826_v40 = vrot.slane %v21121_v38, 2 }
 0x6b7   :  { %v10828_v12 = vrot.slane %v21160_v49, 1  ;;  %v22583_v9 = vrot.slane %v20935_v32, 6  ;;  %v22585_v19 = vrot.slane %v21034_v60, 5  ;;  %v10769_v58 = vrot.slane %v21078_v57, 4 }
 0x6b8   :  { %v10592_v2 = vrot.slane %v10544_v63, 1  ;;  %v12729_v22 = vpack.c.bf16 %v10643_v28, %v10643_v28  ;;  %v10825_v7 = vsel %vm22587_vm1, %v10824_v44, %v10823_v8  ;;  %v10771_v23 = vrot.slane %v21099_v10, 3  ;;  %vm22607_vm1 = vmmov %vm22596_vm11 }
 0x6b9   :  { %v10766_v56 = vsel %vm22584_vm12, %v22583_v9, %v21005_v26  ;;  %v10773_v0 = vrot.slane %v21117_v1, 2  ;;  %v10775_v62 = vrot.slane %v21164_v37, 1  ;;  %v10827_v26 = vsel %vm22588_vm14, %v10826_v40, %v10825_v7  ;;  %vm22604_vm12 = vmmov %vm22593_vm0 }
 0x6ba   :  { %v10640_v42 = vmax.f32 %v10544_v63, %v10592_v2  ;;  %v10768_v50 = vsel %vm22586_vm2, %v22585_v19, %v10766_v56  ;;  %v21187_v41 = vunpack.c.l.b16 %v12729_v22  ;;  %v10829_v13 = vsel %vm22590_vm15, %v10828_v12, %v10827_v26  ;;  %vm22605_vm2 = vmmov %vm22597_vm8 }
 0x6bb   :  { %v10770_v20 = vsel %vm22589_vm9, %v10769_v58, %v10768_v50  ;;  %v22592_v8 = vrot.slane %v20937_v53, 6  ;;  %v10783_v2 = vrot.slane %v21080_v61, 4  ;;  %v10830_v9 = vpack.c.b16 %v10829_v13, %v10829_v13  ;;  %vm22611_vm9 = vmmov %vm22598_vm6 }
 0x6bc   :  { %v12728_v33 = vpack.c.bf16 %v10640_v42, %v10640_v42  ;;  %v10772_v63 = vsel %vm22591_vm4, %v10771_v23, %v10770_v20  ;;  %v22595_v40 = vrot.slane %v21036_v51, 5  ;;  %v10785_v19 = vrot.slane %v21101_v43, 3  ;;  %vm22612_vm15 = vmmov %vm22593_vm0 }
 0x6bd   :  { %v10780_v28 = vsel %vm22593_vm0, %v22592_v8, %v21011_v55  ;;  %v10774_v56 = vsel %vm22594_vm5, %v10773_v0, %v10772_v63  ;;  %v10787_v50 = vrot.slane %v21119_v31, 2  ;;  %10831 = vrot.lane.b32.xlu1 %v10830_v9, %s14315_s10  ;;  %v10789_v23 = vrot.slane %v21166_v18, 1  ;;  %vm22614_vm0 = vmmov %vm22607_vm1  ;;  %s14321_s10 = smov 22  }
 0x6be   :  { %v21198_v44 = vunpack.c.l.b16 %v12728_v33  ;;  %v10782_v22 = vsel %vm22596_vm11, %v22595_v40, %v10780_v28  ;;  %v10776_v12 = vsel %vm22597_vm8, %v10775_v62, %v10774_v56  ;;  %v22600_v62 = vrot.slane %v20991_v36, 2  ;;  %vm22615_vm11 = vmmov %vm22598_vm6 }
 0x6bf   :  { %v10784_v42 = vsel %vm22598_vm6, %v10783_v2, %v10782_v22  ;;  %v22601_v33 = vrot.slane %v20912_v29, 1  ;;  %vm22602_vm7 = vcmask 1041409   ;;  %v10927_v20 = vrot.slane %v21078_v57, 6  ;;  %vm22618_vm6 = vmmov %vm22605_vm2 }
 0x6c0   :  { %v10887_v55 = vrot.slane %v21198_v44, 4  ;;  %v10986_v58 = vrot.slane %v21198_v44, 6  ;;  %v11196_v7 = vrot.slane %v21198_v44, 2  ;;  %v10786_v0 = vsel %vm22599_vm13, %v10785_v19, %v10784_v42  ;;  %vm22610_vm14 = vmmov %vm22602_vm7 }
 0x6c1   :  { %v10923_v26 = vsel %vm22602_vm7, %v22601_v33, %v22600_v62  ;;  %v10929_v13 = vrot.slane %v21099_v10, 5  ;;  %v10788_v63 = vsel %vm22603_vm10, %v10787_v50, %v10786_v0  ;;  %v10931_v28 = vrot.slane %v21117_v1, 4  ;;  %vm22617_vm8 = vmmov %vm22602_vm7 }
 0x6c2   :  { %v10924_v8 = vsel %vm22604_vm12, %v20935_v32, %v10923_v26  ;;  %v10933_v2 = vrot.slane %v21164_v37, 3  ;;  %v10790_v9 = vsel %vm22605_vm2, %v10789_v23, %v10788_v63  ;;  %v22606_v56 = vrot.slane %v21034_v60, 7  ;;  %vm22619_vm13 = vmmov %vm22591_vm4 }
 0x6c3   :  { %v22608_v22 = vrot.slane %v20993_v54, 2  ;;  %v22609_v42 = vrot.slane %v20914_v25, 1  ;;  %v10941_v50 = vrot.slane %v21080_v61, 6  ;;  %v10791_v0 = vpack.c.b16 %v10790_v9, %v10776_v12  ;;  %vm22621_vm7 = vmmov %vm22604_vm12 }
 0x6c4   :  { %v10926_v40 = vsel %vm22607_vm1, %v22606_v56, %v10924_v8  ;;  %v10943_v23 = vrot.slane %v21101_v43, 5  ;;  %v22613_v63 = vrot.slane %v21036_v51, 7  ;;  %v10945_v56 = vrot.slane %v21119_v31, 4  ;;  %vm22622_vm10 = vmmov %vm22594_vm5 }
 0x6c5   :  { %v10937_v19 = vsel %vm22610_vm14, %v22609_v42, %v22608_v22  ;;  %v10928_v62 = vsel %vm22611_vm9, %v10927_v20, %v10926_v40  ;;  %v10947_v22 = vrot.slane %v21166_v18, 3  ;;  %10792 = vrot.lane.b32.xlu0 %v10791_v0, %s14320_s4  ;;  %v22616_v9 = vrot.slane %v21105_v34, 7  ;;  %vm22623_vm12 = vmmov %vm22614_vm0 }
 0x6c6   :  { %v10938_v33 = vsel %vm22612_vm15, %v20937_v53, %v10937_v19  ;;  %v10930_v26 = vsel %vm22591_vm4, %v10929_v13, %v10928_v62  ;;  %v10889_v13 = vrot.slane %v21187_v41, 3  ;;  %v22620_v62 = vrot.slane %v20970_v15, 6  ;;  %vm22626_vm2 = vmmov %vm22617_vm8 }
 0x6c7   :  { %v10940_v8 = vsel %vm22614_vm0, %v22613_v63, %v10938_v33  ;;  %v10932_v12 = vsel %vm22594_vm5, %v10931_v28, %v10930_v26  ;;  %v10882_v40 = vsel %vm22617_vm8, %v22616_v9, %v20997_v35  ;;  %v10891_v0 = vrot.slane %v21168_v27, 2  ;;  %vm22627_vm1 = vmmov %vm22618_vm6 }
 0x6c8   :  { %v10942_v20 = vsel %vm22615_vm11, %v10941_v50, %v10940_v8  ;;  %v10934_v42 = vsel %vm22618_vm6, %v10933_v2, %v10932_v12  ;;  %v10884_v33 = vsel %vm22621_vm7, %v22620_v62, %v10882_v40  ;;  %v10893_v26 = vrot.slane %v21170_v17, 1  ;;  %vm22628_vm14 = vmmov %vm22611_vm9 }
 0x6c9   :  { %v10944_v19 = vsel %vm22619_vm13, %v10943_v23, %v10942_v20  ;;  %v10886_v50 = vsel %vm22623_vm12, %v10885_v16, %v10884_v33  ;;  %v22624_v63 = vrot.slane %v20885_v47, 2  ;;  %v22625_v2 = vrot.slane %v20897_v59, 1  ;;  %vm22629_vm9 = vmmov %vm22621_vm7 }
 0x6ca   :  { %v10946_v28 = vsel %vm22622_vm10, %v10945_v56, %v10944_v19  ;;  %v10888_v12 = vsel %vm22628_vm14, %v10887_v55, %v10886_v50  ;;  %v10907_v56 = vrot.slane %v21058_v5, 6  ;;  %vm22630_vm15 = vmmov %vm22591_vm4  ;;  %v22631_v40 = vrot.slane %v21031_v46, 7 }
 0x6cb   :  { %v10903_v23 = vsel %vm22626_vm2, %v22625_v2, %v22624_v63  ;;  %v10948_v8 = vsel %vm22627_vm1, %v10947_v22, %v10946_v28  ;;  %v10890_v16 = vsel %vm22630_vm15, %v10889_v13, %v10888_v12  ;;  %vm22632_vm4 = vmmov %vm22614_vm0  ;;  %v10909_v62 = vrot.slane %v21097_v14, 5 }
 0x6cc   :  { %v10904_v20 = vsel %vm22629_vm9, %v20933_v30, %v10903_v23  ;;  %v10949_v9 = vpack.c.b16 %v10948_v8, %v10934_v42  ;;  %vm22633_vm0 = vmmov %vm22594_vm5  ;;  %v10911_v55 = vrot.slane %v21115_v24, 4  ;;  %v10913_v28 = vrot.slane %v21162_v4, 3 }
 0x6cd   :  { %v10906_v19 = vsel %vm22632_vm4, %v22631_v40, %v10904_v20  ;;  %v10892_v33 = vsel %vm22633_vm0, %v10891_v0, %v10890_v16  ;;  %vm22634_vm5 = vmmov %vm22615_vm11  ;;  %v22637_v50 = vrot.slane %v20997_v35, 2  ;;  %v22638_v63 = vrot.slane %v21105_v34, 1 }
 0x6ce   :  { %v10908_v22 = vsel %vm22634_vm5, %v10907_v56, %v10906_v19  ;;  %10950 = vrot.lane.b32.xlu0 %v10949_v9, %s14321_s10  ;;  %vm22635_vm11 = vmmov %vm22627_vm1  ;;  %v10988_v0 = vrot.slane %v21187_v41, 5  ;;  %v10990_v20 = vrot.slane %v21168_v27, 4  ;;  %v22642_v56 = vrot.slane %v21135_v52, 7 }
 0x6cf   :  { %v10894_v42 = vsel %vm22635_vm11, %v10893_v26, %v10892_v33  ;;  %vm22636_vm8 = vmmov %vm22619_vm13  ;;  %v10992_v16 = vrot.slane %v21170_v17, 3  ;;  %v22644_v40 = vrot.slane %v20995_v11, 2  ;;  %v22645_v19 = vrot.slane %v20916_v39, 1 }
 0x6d0   :  { %v10910_v13 = vsel %vm22636_vm8, %v10909_v62, %v10908_v22  ;;  %vm22639_vm6 = vmmov %vm22626_vm2  ;;  %v10895_v23 = vpack.c.b16 %v10894_v42, %v10894_v42 }
 0x6d1   :  { %v10982_v2 = vsel %vm22639_vm6, %v22638_v63, %v22637_v50  ;;  %vm22640_vm13 = vmmov %vm22633_vm0  ;;  %v10962_v62 = vsel %vm22626_vm2, %v22645_v19, %v22644_v40  ;;  %v10968_v63 = vrot.slane %v21103_v3, 5  ;;  %v22657_v40 = vrot.slane %v20935_v32, 2 }
 0x6d2   :  { %v10912_v8 = vsel %vm22640_vm13, %v10911_v55, %v10910_v13  ;;  %v10983_v12 = vsel %vm22621_vm7, %v20970_v15, %v10982_v2  ;;  %vm22641_vm10 = vmmov %vm22627_vm1  ;;  %10896 = vrot.lane.b32.xlu1 %v10895_v23, %s14322_s16  ;;  %v22649_v13 = vrot.slane %v21038_v45, 7  ;;  %v10970_v2 = vrot.slane %v21121_v38, 4 }
 0x6d3   :  { %v10914_v26 = vsel %vm22641_vm10, %v10913_v28, %v10912_v8  ;;  %vm22643_vm12 = vmmov %vm22632_vm4  ;;  %v10966_v28 = vrot.slane %v21082_v6, 6  ;;  %v10972_v8 = vrot.slane %v21160_v49, 3 }
 0x6d4   :  { %v10985_v9 = vsel %vm22643_vm12, %v22642_v56, %v10983_v12  ;;  %v10915_v33 = vpack.c.b16 %v10914_v26, %v10914_v26  ;;  %vm22646_vm1 = vmmov %vm22634_vm5  ;;  %v22653_v12 = vrot.slane %v20991_v36, 4 }
 0x6d5   :  { %v10987_v22 = vsel %vm22646_vm1, %v10986_v58, %v10985_v9  ;;  %vm22647_vm14 = vmmov %vm22621_vm7 }
 0x6d6   :  { %v10963_v55 = vsel %vm22647_vm14, %v20939_v21, %v10962_v62  ;;  %vm22648_vm9 = vmmov %vm22636_vm8  ;;  %10916 = vrot.lane.b32.xlu0 %v10915_v33, %s14323_s17 }
 0x6d7   :  { %v10989_v42 = vsel %vm22648_vm9, %v10988_v0, %v10987_v22  ;;  %vm22650_vm15 = vmmov %vm22632_vm4  ;;  %v22654_v0 = vrot.slane %v20912_v29, 3  ;;  %v22660_v22 = vrot.slane %v21034_v60, 1 }
 0x6d8   :  { %v10965_v50 = vsel %vm22650_vm15, %v22649_v13, %v10963_v55  ;;  %vm22651_vm4 = vmmov %vm22633_vm0  ;;  %v11037_v13 = vrot.slane %v21164_v37, 5 }
 0x6d9   :  { %v10991_v23 = vsel %vm22651_vm4, %v10990_v20, %v10989_v42  ;;  %vm22652_vm0 = vmmov %vm22646_vm1  ;;  %v11033_v20 = vrot.slane %v21099_v10, 7 }
 0x6da   :  { %v10967_v58 = vsel %vm22652_vm0, %v10966_v28, %v10965_v50  ;;  %vm22655_vm5 = vmmov %vm22626_vm2  ;;  %v11035_v28 = vrot.slane %v21117_v1, 6  ;;  %v22663_v50 = vrot.slane %v20993_v54, 4 }
 0x6db   :  { %v11027_v26 = vsel %vm22655_vm5, %v22654_v0, %v22653_v12  ;;  %vm22656_vm11 = vmmov %vm22641_vm10  ;;  %v10969_v9 = vsel %vm22636_vm8, %v10968_v63, %v10967_v58  ;;  %v22664_v63 = vrot.slane %v20914_v25, 3  ;;  %v22666_v12 = vrot.slane %v20937_v53, 2 }
 0x6dc   :  { %v10993_v56 = vsel %vm22656_vm11, %v10992_v16, %v10991_v23  ;;  %vm22658_vm6 = vmmov %vm22621_vm7  ;;  %v11047_v0 = vrot.slane %v21101_v43, 7 }
 0x6dd   :  { %v11029_v19 = vsel %vm22658_vm6, %v22657_v40, %v11027_v26  ;;  %v10994_v62 = vpack.c.b16 %v10993_v56, %v10993_v56  ;;  %vm22659_vm13 = vmmov %vm22651_vm4  ;;  %v11041_v23 = vsel %vm22626_vm2, %v22664_v63, %v22663_v50  ;;  %v22669_v56 = vrot.slane %v21036_v51, 1 }
 0x6de   :  { %v10971_v33 = vsel %vm22659_vm13, %v10970_v2, %v10969_v9  ;;  %vm22661_vm7 = vmmov %vm22643_vm12  ;;  %v11049_v40 = vrot.slane %v21119_v31, 6  ;;  %v11072_v63 = vrot.slane %v21121_v38, 6 }
 0x6df   :  { %v11031_v55 = vsel %vm22661_vm7, %v22660_v22, %v11029_v19  ;;  %v10973_v42 = vsel %vm22641_vm10, %v10972_v8, %v10971_v33  ;;  %vm22662_vm12 = vmmov %vm22652_vm0  ;;  %10995 = vrot.lane.b32.xlu1 %v10994_v62, %s14324_s18  ;;  %v11051_v19 = vrot.slane %v21166_v18, 5  ;;  %v22672_v33 = vrot.slane %v20995_v11, 4 }
 0x6e0   :  { %v11032_v16 = vsel %vm22662_vm12, %v21078_v57, %v11031_v55  ;;  %v10974_v2 = vpack.c.b16 %v10973_v42, %v10973_v42  ;;  %vm22665_vm1 = vmmov %vm22636_vm8  ;;  %v22673_v22 = vrot.slane %v20916_v39, 3 }
 0x6e1   :  { %v11034_v58 = vsel %vm22665_vm1, %v11033_v20, %v11032_v16  ;;  %vm22667_vm14 = vmmov %vm22658_vm6  ;;  %v22676_v16 = vrot.slane %v20939_v21, 2 }
 0x6e2   :  { %v11043_v8 = vsel %vm22667_vm14, %v22666_v12, %v11041_v23  ;;  %vm22668_vm9 = vmmov %vm22651_vm4  ;;  %10975 = vrot.lane.b32.xlu0 %v10974_v2, %s14325_s19  ;;  %v22679_v2 = vrot.slane %v21038_v45, 1  ;;  %v22681_v12 = vrot.slane %v20885_v47, 4 }
 0x6e3   :  { %v11036_v26 = vsel %vm22668_vm9, %v11035_v28, %v11034_v58  ;;  %vm22670_vm15 = vmmov %vm22661_vm7  ;;  %v11070_v28 = vrot.slane %v21103_v3, 7 }
 0x6e4   :  { %v11045_v9 = vsel %vm22670_vm15, %v22669_v56, %v11043_v8  ;;  %vm22671_vm4 = vmmov %vm22641_vm10  ;;  %v22682_v8 = vrot.slane %v20897_v59, 3 }
 0x6e5   :  { %v11038_v20 = vsel %vm22671_vm4, %v11037_v13, %v11036_v26  ;;  %v11046_v62 = vsel %vm22652_vm0, %v21080_v61, %v11045_v9  ;;  %vm22674_vm5 = vmmov %vm22626_vm2  ;;  %v11074_v13 = vrot.slane %v21160_v49, 5  ;;  %v11013_v26 = vrot.slane %v21097_v14, 7 }
 0x6e6   :  { %v11064_v55 = vsel %vm22674_vm5, %v22673_v22, %v22672_v33  ;;  %vm22675_vm11 = vmmov %vm22665_vm1  ;;  %v11015_v33 = vrot.slane %v21115_v24, 6 }
 0x6e7   :  { %v11048_v42 = vsel %vm22675_vm11, %v11047_v0, %v11046_v62  ;;  %vm22677_vm8 = vmmov %vm22658_vm6  ;;  %v22686_v62 = vrot.slane %v20933_v30, 2 }
 0x6e8   :  { %v11066_v50 = vsel %vm22677_vm8, %v22676_v16, %v11064_v55  ;;  %vm22678_vm6 = vmmov %vm22668_vm9 }
 0x6e9   :  { %v11050_v23 = vsel %vm22678_vm6, %v11049_v40, %v11048_v42  ;;  %vm22680_vm13 = vmmov %vm22661_vm7  ;;  %v22688_v42 = vrot.slane %v21031_v46, 1 }
 0x6ea   :  { %v11068_v58 = vsel %vm22680_vm13, %v22679_v2, %v11066_v50  ;;  %vm22683_vm7 = vmmov %vm22626_vm2  ;;  %v11017_v50 = vrot.slane %v21162_v4, 5  ;;  %v22692_v2 = vrot.slane %v20885_v47, 6 }
 0x6eb   :  { %v11007_v0 = vsel %vm22683_vm7, %v22682_v8, %v22681_v12  ;;  %vm22684_vm10 = vmmov %vm22671_vm4 }
 0x6ec   :  { %v11052_v56 = vsel %vm22684_vm10, %v11051_v19, %v11050_v23  ;;  %vm22685_vm12 = vmmov %vm22652_vm0 }
 0x6ed   :  { %v11069_v9 = vsel %vm22685_vm12, %v21082_v6, %v11068_v58  ;;  %vm22687_vm2 = vmmov %vm22677_vm8  ;;  %v11053_v22 = vpack.c.b16 %v11052_v56, %v11038_v20  ;;  %v22693_v58 = vrot.slane %v20897_v59, 5  ;;  %v11114_v20 = vrot.slane %v21058_v5, 2 }
 0x6ee   :  { %v11009_v40 = vsel %vm22687_vm2, %v22686_v62, %v11007_v0  ;;  %v11071_v55 = vsel %vm22665_vm1, %v11070_v28, %v11069_v9  ;;  %vm22689_vm14 = vmmov %vm22680_vm13  ;;  %v22697_v0 = vrot.slane %v20933_v30, 4  ;;  %v11116_v56 = vrot.slane %v21097_v14, 1 }
 0x6ef   :  { %v11011_v16 = vsel %vm22689_vm14, %v22688_v42, %v11009_v40  ;;  %vm22690_vm9 = vmmov %vm22678_vm6  ;;  %11054 = vrot.lane.b32.xlu1 %v11053_v22, %s14326_s20  ;;  %v22700_v59 = vrot.slane %v21031_v46, 3  ;;  %v11119_v40 = vrot.slane %v21162_v4, 7  ;;  %v22705_v30 = vrot.slane %v20912_v29, 5 }
 0x6f0   :  { %v11073_v19 = vsel %vm22690_vm9, %v11072_v63, %v11071_v55  ;;  %vm22691_vm15 = vmmov %vm22652_vm0  ;;  %v11139_v42 = vrot.slane %v21078_v57, 2  ;;  %v22710_v29 = vrot.slane %v21034_v60, 3  ;;  %v11144_v57 = vrot.slane %v21164_v37, 7 }
 0x6f1   :  { %v11012_v23 = vsel %vm22691_vm15, %v21058_v5, %v11011_v16  ;;  %vm22694_vm4 = vmmov %vm22674_vm5 }
 0x6f2   :  { %v11109_v12 = vsel %vm22694_vm4, %v22693_v58, %v22692_v2  ;;  %vm22695_vm0 = vmmov %vm22684_vm10  ;;  %v22712_v58 = vrot.slane %v20993_v54, 6  ;;  %v22719_v54 = vrot.slane %v21036_v51, 3 }
 0x6f3   :  { %v11075_v28 = vsel %vm22695_vm0, %v11074_v13, %v11073_v19  ;;  %vm22696_vm5 = vmmov %vm22665_vm1  ;;  %v22708_v19 = vrot.slane %v20935_v32, 4 }
 0x6f4   :  { %v11014_v8 = vsel %vm22696_vm5, %v11013_v26, %v11012_v23  ;;  %vm22698_vm11 = vmmov %vm22687_vm2  ;;  %v11076_v9 = vpack.c.b16 %v11075_v28, %v11075_v28  ;;  %v22704_v26 = vrot.slane %v20991_v36, 6  ;;  %v22717_v28 = vrot.slane %v20937_v53, 4 }
 0x6f5   :  { %v11111_v63 = vsel %vm22698_vm11, %v22697_v0, %v11109_v12  ;;  %vm22699_vm8 = vmmov %vm22678_vm6  ;;  %v22713_v12 = vrot.slane %v20914_v25, 5  ;;  %v11158_v53 = vrot.slane %v21166_v18, 7 }
 0x6f6   :  { %v11016_v47 = vsel %vm22699_vm8, %v11015_v33, %v11014_v8  ;;  %vm22701_vm6 = vmmov %vm22680_vm13  ;;  %11077 = vrot.lane.b32.xlu0 %v11076_v9, %s14327_s23  ;;  %v11153_v8 = vrot.slane %v21080_v61, 2  ;;  %v22724_v61 = vrot.slane %v21105_v34, 3 }
 0x6f7   :  { %v11113_v62 = vsel %vm22701_vm6, %v22700_v59, %v11111_v63  ;;  %vm22702_vm13 = vmmov %vm22695_vm0  ;;  %v11155_v63 = vrot.slane %v21101_v43, 1  ;;  %v22728_v43 = vrot.slane %v20970_v15, 2 }
 0x6f8   :  { %v11018_v22 = vsel %vm22702_vm13, %v11017_v50, %v11016_v47  ;;  %vm22703_vm7 = vmmov %vm22685_vm12  ;;  %v11141_v50 = vrot.slane %v21099_v10, 1  ;;  %v22723_v47 = vrot.slane %v20997_v35, 4 }
 0x6f9   :  { %v11115_v13 = vsel %vm22703_vm7, %v11114_v20, %v11113_v62  ;;  %vm22706_vm10 = vmmov %vm22694_vm4  ;;  %v11019_v33 = vpack.c.b16 %v11018_v22, %v11018_v22  ;;  %v22731_v22 = vrot.slane %v21135_v52, 1 }
 0x6fa   :  { %v11134_v55 = vsel %vm22706_vm10, %v22705_v30, %v22704_v26  ;;  %vm22707_vm12 = vmmov %vm22665_vm1  ;;  %v11097_v26 = vrot.slane %v21168_v27, 6  ;;  %v11099_v30 = vrot.slane %v21170_v17, 5 }
 0x6fb   :  { %v11117_v16 = vsel %vm22707_vm12, %v11116_v56, %v11115_v13  ;;  %v11136_v23 = vsel %vm22687_vm2, %v22708_v19, %v11134_v55  ;;  %vm22709_vm1 = vmmov %vm22699_vm8  ;;  %11020 = vrot.lane.b32.xlu1 %v11019_v33, %s14328_s24  ;;  %v22735_v33 = vrot.slane %v20997_v35, 6 }
 0x6fc   :  { %v11118_v36 = vsel %vm22709_vm1, %v21115_v24, %v11117_v16  ;;  %vm22711_vm14 = vmmov %vm22701_vm6  ;;  %v22736_v16 = vrot.slane %v21105_v34, 5  ;;  %v22743_v34 = vrot.slane %v20995_v11, 6  ;;  %v11178_v11 = vrot.slane %v21103_v3, 1 }
 0x6fd   :  { %v11138_v2 = vsel %vm22711_vm14, %v22710_v29, %v11136_v23  ;;  %vm22714_vm9 = vmmov %vm22694_vm4 }
 0x6fe   :  { %v11148_v20 = vsel %vm22714_vm9, %v22713_v12, %v22712_v58  ;;  %vm22715_vm15 = vmmov %vm22695_vm0  ;;  %v22741_v58 = vrot.slane %v21135_v52, 3  ;;  %v22744_v12 = vrot.slane %v20916_v39, 5  ;;  %v22748_v52 = vrot.slane %v20939_v21, 4 }
 0x6ff   :  { %v11120_v32 = vsel %vm22715_vm15, %v11119_v40, %v11118_v36  ;;  %vm22716_vm4 = vmmov %vm22703_vm7  ;;  %v11095_v40 = vrot.slane %v21187_v41, 7  ;;  %v22739_v36 = vrot.slane %v20970_v15, 4  ;;  %v22754_v21 = vrot.slane %v21031_v46, 5 }
 0x700   :  { %v11140_v10 = vsel %vm22716_vm4, %v11139_v42, %v11138_v2  ;;  %vm22718_vm0 = vmmov %vm22687_vm2  ;;  %v11121_v0 = vpack.c.b16 %v11120_v32, %v11120_v32  ;;  %v11201_v2 = vrot.slane %v21170_v17, 7 }
 0x701   :  { %v11150_v60 = vsel %vm22718_vm0, %v22717_v28, %v11148_v20  ;;  %v11142_v37 = vsel %vm22696_vm5, %v11141_v50, %v11140_v10  ;;  %vm22720_vm11 = vmmov %vm22701_vm6  ;;  %v11176_v20 = vrot.slane %v21082_v6, 2  ;;  %v22751_v28 = vrot.slane %v21038_v45, 3 }
 0x702   :  { %v11152_v25 = vsel %vm22720_vm11, %v22719_v54, %v11150_v60  ;;  %vm22721_vm8 = vmmov %vm22709_vm1  ;;  %11122 = vrot.lane.b32.xlu0 %v11121_v0, %s14329_s25  ;;  %v11181_v60 = vrot.slane %v21160_v49, 7  ;;  %v22758_v0 = vrot.slane %v21058_v5, 4  ;;  %v22761_v54 = vrot.slane %v21097_v14, 3 }
 0x703   :  { %v11143_v56 = vsel %vm22721_vm8, %v21117_v1, %v11142_v37  ;;  %vm22722_vm6 = vmmov %vm22716_vm4 }
 0x704   :  { %v11154_v9 = vsel %vm22722_vm6, %v11153_v8, %v11152_v25  ;;  %vm22725_vm13 = vmmov %vm22714_vm9 }
 0x705   :  { %v11089_v59 = vsel %vm22725_vm13, %v22724_v61, %v22723_v47  ;;  %vm22726_vm7 = vmmov %vm22715_vm15 }
 0x706   :  { %v11145_v51 = vsel %vm22726_vm7, %v11144_v57, %v11143_v56  ;;  %vm22727_vm10 = vmmov %vm22696_vm5 }
 0x707   :  { %v11156_v62 = vsel %vm22727_vm10, %v11155_v63, %v11154_v9  ;;  %vm22729_vm12 = vmmov %vm22718_vm0  ;;  %v22764_v63 = vrot.slane %v21115_v24, 2 }
 0x708   :  { %v11091_v1 = vsel %vm22729_vm12, %v22728_v43, %v11089_v59  ;;  %vm22730_vm2 = vmmov %vm22709_vm1 }
 0x709   :  { %v11157_v18 = vsel %vm22730_vm2, %v21119_v31, %v11156_v62  ;;  %vm22732_vm1 = vmmov %vm22720_vm11  ;;  %v11198_v31 = vrot.slane %v21187_v41, 1 }
 0x70a   :  { %v11093_v13 = vsel %vm22732_vm1, %v22731_v22, %v11091_v1  ;;  %vm22733_vm14 = vmmov %vm22726_vm7 }
 0x70b   :  { %v11159_v55 = vsel %vm22733_vm14, %v11158_v53, %v11157_v18  ;;  %vm22734_vm9 = vmmov %vm22716_vm4 }
 0x70c   :  { %v11094_v42 = vsel %vm22734_vm9, %v21198_v44, %v11093_v13  ;;  %vm22737_vm15 = vmmov %vm22725_vm13  ;;  %v11160_v23 = vpack.c.b16 %v11159_v55, %v11145_v51 }
 0x70d   :  { %v11191_v19 = vsel %vm22737_vm15, %v22736_v16, %v22735_v33  ;;  %vm22738_vm4 = vmmov %vm22696_vm5 }
 0x70e   :  { %v11096_v50 = vsel %vm22738_vm4, %v11095_v40, %v11094_v42  ;;  %v11193_v29 = vsel %vm22718_vm0, %v22739_v36, %v11191_v19  ;;  %vm22740_vm5 = vmmov %vm22730_vm2  ;;  %11161 = vrot.lane.b32.xlu1 %v11160_v23, %s14330_s26 }
 0x70f   :  { %v11098_v57 = vsel %vm22740_vm5, %v11097_v26, %v11096_v50  ;;  %vm22742_vm11 = vmmov %vm22732_vm1 }
 0x710   :  { %v11195_v35 = vsel %vm22742_vm11, %v22741_v58, %v11193_v29  ;;  %vm22745_vm8 = vmmov %vm22725_vm13 }
 0x711   :  { %v11171_v41 = vsel %vm22745_vm8, %v22744_v12, %v22743_v34  ;;  %vm22746_vm6 = vmmov %vm22726_vm7 }
 0x712   :  { %v11100_v15 = vsel %vm22746_vm6, %v11099_v30, %v11098_v57  ;;  %vm22747_vm13 = vmmov %vm22734_vm9 }
 0x713   :  { %v11197_v17 = vsel %vm22747_vm13, %v11196_v7, %v11195_v35  ;;  %vm22749_vm7 = vmmov %vm22718_vm0  ;;  %v11101_v10 = vpack.c.b16 %v11100_v15, %v11100_v15 }
 0x714   :  { %v11173_v32 = vsel %vm22749_vm7, %v22748_v52, %v11171_v41  ;;  %vm22750_vm10 = vmmov %vm22738_vm4  ;;  %vm10837_vm7 = vcmask 1044256  }
 0x715   :  { %v11199_v39 = vsel %vm22750_vm10, %v11198_v31, %v11197_v17  ;;  %vm22752_vm12 = vmmov %vm22732_vm1  ;;  %11102 = vrot.lane.b32.xlu0 %v11101_v10, %s14331_s2 }
 0x716   :  { %v11175_v6 = vsel %vm22752_vm12, %v22751_v28, %v11173_v32  ;;  %v11200_v44 = vsel %vm22730_vm2, %v21168_v27, %v11199_v39  ;;  %vm22753_vm1 = vmmov %vm22734_vm9  ;;  %vm10798_vm12 = vcmask 814480  }
 0x717   :  { %v11177_v7 = vsel %vm22753_vm1, %v11176_v20, %v11175_v6  ;;  %vm22755_vm14 = vmmov %vm22742_vm11 }
 0x718   :  { %v10698_v8 = vsel %vm22755_vm14, %v22754_v21, %v20954_v48  ;;  %vm22756_vm9 = vmmov %vm22746_vm6  ;;  %v10708_v48 = vrot.slane %v21162_v4, 1  ;;  %vm10899_vm14 = vcmask 584880  }
 0x719   :  { %v11202_v3 = vsel %vm22756_vm9, %v11201_v2, %v11200_v44  ;;  %vm22757_vm15 = vmmov %vm22738_vm4 }
 0x71a   :  { %v11179_v45 = vsel %vm22757_vm15, %v11178_v11, %v11177_v7  ;;  %vm22759_vm4 = vmmov %vm22753_vm1  ;;  %v11203_v37 = vpack.c.b16 %v11202_v3, %v11202_v3  ;;  %vm10957_vm15 = vcmask 359428  }
 0x71b   :  { %v10701_v49 = vsel %vm22759_vm4, %v22758_v0, %v10698_v8  ;;  %vm22760_vm0 = vmmov %vm22730_vm2  ;;  %vm22767_vm2 = vcmask 228352   ;;  %vm10953_vm4 = vcmask 179200  }
 0x71c   :  { %v11180_v27 = vsel %vm22760_vm0, %v21121_v38, %v11179_v45  ;;  %vm22762_vm5 = vmmov %vm22750_vm10  ;;  %11204 = vrot.lane.b32.xlu1 %v11203_v37, %s14332_s27  ;;  %vm10838_vm10 = vcmask 179204  }
 0x71d   :  { %v10704_v46 = vsel %vm22762_vm5, %v22761_v54, %v10701_v49  ;;  %vm22763_vm11 = vmmov %vm22746_vm6  ;;  %vm10713_vm6 = vcmask 404480   ;;  %vm11001_vm5 = vcmask 1044208  }
 0x71e   :  { %v11182_v25 = vsel %vm22763_vm11, %v11181_v60, %v11180_v27  ;;  %vm22765_vm8 = vmmov %vm22760_vm0  ;;  %vm10919_vm0 = vcmask 994880   ;;  %vm11002_vm11 = vcmask 130052  }
 0x71f   :  { %v10707_v56 = vsel %vm22765_vm8, %v22764_v63, %v10704_v46  ;;  %v11183_v5 = vpack.c.b16 %v11182_v25, %v11182_v25  ;;  %vm22766_vm13 = vmmov %vm22756_vm9  ;;  %vm10956_vm9 = vcmask 1044432   ;;  %vm10998_vm8 = vcmask 408576  }
 0x720   :  { %v10710_v9 = vsel %vm22766_vm13, %v10708_v48, %v10707_v56  ;;  %vm10839_vm1 = vmor %vm10838_vm10, %vm10837_vm7  ;;  %vm11083_vm7 = vcmask 1044384   ;;  %vm11084_vm10 = vcmask 310276  }
 0x721   :  { %v10711_v53 = vpack.c.b16 %v10710_v9, %v10710_v9  ;;  %11184 = vrot.lane.b32.xlu0 %v11183_v5, %s14333_s28  ;;  %vm11003_vm13 = vmor %vm11002_vm11, %vm11001_vm5  ;;  %vm11105_vm5 = vcmask 716080  }
 0x723   :  { %10714 = vst.msk [vmem:[%s21586_s5] sm:$0xf] %vm10713_vm6, %v10711_v53  ;;  %vm10978_vm6 = vcmask 765280  }
 0x72f   :  { %v10832_v14 = vpop.permute.xlu1 %10831 }
 0x730   :  { %v10833_v38 = vrot.slane %v10832_v14, 4 }
 0x732   :  { %v10835_v47 = vsel %vm22767_vm2, %v10833_v38, %v10832_v14  ;;  %vm11023_vm2 = vcmask 535680  }
 0x737   :  { %v10793_v24 = vpop.permute.xlu0 %10792 }
 0x738   :  { %v10794_v4 = vrot.slane %v10793_v24, 4 }
 0x73a   :  { %v10796_v61 = vsel %vm10481_vm3, %v10793_v24, %v10794_v4  ;;  %vm10958_vm3 = vmor %vm10957_vm15, %vm10956_vm9  ;;  %vm11128_vm15 = vcmask 1044160  }
 0x73b   :  { %10799 = vst.msk [vmem:[%s21586_s5] sm:$0xf] %vm10798_vm12, %v10796_v61  ;;  %vm11057_vm12 = vcmask 769024   ;;  %vm11085_vm9 = vmor %vm11084_vm10, %vm11083_vm7  ;;  %vm11207_vm7 = vcmask 539648   ;;  %vm11187_vm10 = vcmask 896480  }
 0x73c   :  { %10840 = vst.msk [vmem:[%s21586_s5] sm:$0xff] %vm10839_vm1, %v10835_v47  ;;  %vm11080_vm1 = vcmask 359424  }
 0x740   :  { %v10951_v59 = vpop.permute.xlu0 %10950 }
 0x741   :  { %v10952_v51 = vrot.slane %v10951_v59, 4 }
 0x743   :  { %v10954_v1 = vsel %vm10953_vm4, %v10952_v51, %v10951_v59  ;;  %vm11129_vm4 = vcmask 80900  }
 0x744   :  { %v10897_v62 = vpop.permute.xlu1 %10896  ;;  %vm11130_vm11 = vmor %vm11129_vm4, %vm11128_vm15 }
 0x745   :  { %10900 = vst.msk [vmem:[%s21586_s5 + $0x4] sm:$0xf] %vm10899_vm14, %v10897_v62  ;;  %vm11060_vm14 = vcmask 945680  }
 0x748   :  { %v10917_v43 = vpop.permute.xlu0 %10916 }
 0x749   :  { %10920 = vst.msk [vmem:[%s21586_s5 + $0x4] sm:$0xf] %vm10919_vm0, %v10917_v43  ;;  %vm11164_vm0 = vcmask 310272  }
 0x74a   :  { %10959 = vst.msk [vmem:[%s21586_s5 + $0x4] sm:$0xff] %vm10958_vm3, %v10954_v1  ;;  %vm11125_vm3 = vcmask 719872  }
 0x751   :  { %v10996_v40 = vpop.permute.xlu1 %10995 }
 0x752   :  { %v10997_v18 = vrot.slane %v10996_v40, 4 }
 0x754   :  { %v10976_v22 = vpop.permute.xlu0 %10975  ;;  %v10999_v13 = vsel %vm10998_vm8, %v10997_v18, %v10996_v40  ;;  %vm11167_vm8 = vcmask 486480  }
 0x755   :  { %10979 = vst.msk [vmem:[%s21586_s5 + $0x8] sm:$0xf] %vm10978_vm6, %v10976_v22  ;;  %vm11210_vm6 = vcmask 1044336  }
 0x756   :  { %11004 = vst.msk [vmem:[%s21586_s5 + $0x8] sm:$0xff] %vm11003_vm13, %v10999_v13  ;;  %vm11211_vm13 = vcmask 261124  }
 0x761   :  { %v11055_v26 = vpop.permute.xlu1 %11054 }
 0x762   :  { %v11056_v30 = vrot.slane %v11055_v26, 4 }
 0x764   :  { %v11058_v16 = vsel %vm11057_vm12, %v11055_v26, %v11056_v30  ;;  %vm11212_vm12 = vmor %vm11211_vm13, %vm11210_vm6 }
 0x768   :  { %v11078_v55 = vpop.permute.xlu0 %11077 }
 0x769   :  { %v11079_v42 = vrot.slane %v11078_v55, 4 }
 0x76b   :  { %v11081_v19 = vsel %vm11080_vm1, %v11079_v42, %v11078_v55 }
 0x76d   :  { %v11021_v33 = vpop.permute.xlu1 %11020 }
 0x76e   :  { %11024 = vst.msk [vmem:[%s21586_s5 + $0xc] sm:$0xf] %vm11023_vm2, %v11021_v33 }
 0x76f   :  { %11061 = vst.msk [vmem:[%s21586_s5 + $0xc] sm:$0xf] %vm11060_vm14, %v11058_v16 }
 0x770   :  { %11086 = vst.msk [vmem:[%s21586_s5 + $0xc] sm:$0xff] %vm11085_vm9, %v11081_v19 }
 0x774   :  { %v11123_v31 = vpop.permute.xlu0 %11122 }
 0x775   :  { %v11124_v23 = vrot.slane %v11123_v31, 4 }
 0x777   :  { %v11126_v57 = vsel %vm11125_vm3, %v11124_v23, %v11123_v31 }
 0x780   :  { %v11162_v50 = vpop.permute.xlu1 %11161 }
 0x781   :  { %v11163_v36 = vrot.slane %v11162_v50, 4 }
 0x783   :  { %v11165_v29 = vsel %vm11164_vm0, %v11162_v50, %v11163_v36 }
 0x787   :  { %v11103_v2 = vpop.permute.xlu0 %11102 }
 0x788   :  { %11106 = vst.msk [vmem:[%s21586_s5 + $0x10] sm:$0xf] %vm11105_vm5, %v11103_v2 }
 0x789   :  { %11131 = vst.msk [vmem:[%s21586_s5 + $0x10] sm:$0xff] %vm11130_vm11, %v11126_v57 }
 0x78a   :  { %11168 = vst.msk [vmem:[%s21586_s5 + $0x14] sm:$0xf] %vm11167_vm8, %v11165_v29 }
 0x78e   :  { %v11205_v58 = vpop.permute.xlu1 %11204 }
 0x78f   :  { %v11206_v35 = vrot.slane %v11205_v58, 4 }
 0x791   :  { %v11208_v12 = vsel %vm11207_vm7, %v11206_v35, %v11205_v58 }
 0x793   :  { %v11185_v34 = vpop.permute.xlu0 %11184 }
 0x794   :  { %11188 = vst.msk [vmem:[%s21586_s5 + $0x14] sm:$0xf] %vm11187_vm10, %v11185_v34 }
 0x795   :  { %11213 = vst.msk [vmem:[%s21586_s5 + $0x14] sm:$0xff] %vm11212_vm12, %v11208_v12 }

</bundles_post_ra>
